<compile_context>
chip_gen: v5e
topology: v5e:2x2
jax: 0.10.0
libtpu: 0.0.40
codegen_flags: <defaults>
</compile_context>

<pallas_src>
import jax
import jax.numpy as jnp
from jax.experimental import pallas as pl
from jax.experimental.pallas import tpu as pltpu


# --------------------------------------------------------------------------
# Fused Pallas kernel (3 GRU layers, wavefront schedule + FC head)
# --------------------------------------------------------------------------
def make_fused_kernel(L, T, Bp, H):
    """Build the fused kernel for fixed (num layers L, time T, padded batch Bp, H)."""

    H2 = 2 * H

    def kernel(*refs):
        # refs = [x_flat,
        #         (wih_t, whh_rz, whh_n, bias_gi, b_hn) * L,
        #         w1, b1, w2, b2,
        #         out, gi0_scratch, r0_scratch]
        x_ref = refs[0]
        lw = refs[1:1 + 5 * L]
        w1_ref, b1_ref, w2_ref, b2_ref = refs[1 + 5 * L:5 + 5 * L]
        out_ref = refs[5 + 5 * L]
        gi0_ref = refs[6 + 5 * L]          # (T*Bp, 3H) hoisted layer-0 projection
        r0_ref = refs[7 + 5 * L]           # (T, H) batch-row-0 output of last layer

        def layer_w(l):
            return lw[5 * l], lw[5 * l + 1], lw[5 * l + 2], lw[5 * l + 3], lw[5 * l + 4]

        # ---- hoisted layer-0 input projection (one matmul covers all T steps) ----
        wih0, _, _, bias0, _ = layer_w(0)
        gi0_ref[...] = (
            jnp.dot(x_ref[...], wih0[...], preferred_element_type=jnp.float32)
            + bias0[...]
        )

        def gru_cell(gi, h_prev, whh_rz_ref, whh_n_ref, bhn_ref, first_step):
            # gi already contains b_ih (all gates) + b_hh (r,z gates).
            i_r = gi[:, 0:H]
            i_z = gi[:, H:H2]
            i_n = gi[:, H2:]
            bhn = bhn_ref[...]
            if first_step:
                # h_prev == 0: both recurrent matmuls vanish.
                r = jax.nn.sigmoid(i_r)
                z = jax.nn.sigmoid(i_z)
                n = jnp.tanh(i_n + r * bhn)
                return (1.0 - z) * n
            # Gate-split recurrent matmul: rz chunk first so the EUP sigmoids
            # overlap the n-chunk matmul.  RHS streams straight from VMEM refs.
            gh_rz = jnp.dot(h_prev, whh_rz_ref[...], preferred_element_type=jnp.float32)
            gh_n = jnp.dot(h_prev, whh_n_ref[...], preferred_element_type=jnp.float32)
            r = jax.nn.sigmoid(i_r + gh_rz[:, 0:H])
            z = jax.nn.sigmoid(i_z + gh_rz[:, H:H2])
            n = jnp.tanh(i_n + r * (gh_n + bhn))
            return (1.0 - z) * n + z * h_prev

        # ---- wavefront recurrence: T+L-1 statically-unrolled steps ----
        h = [jnp.zeros((Bp, H), jnp.float32) for _ in range(L)]   # h0 = None -> zeros
        for s in range(T + L - 1):
            h_new = list(h)
            for l in range(L):
                t = s - l
                if t < 0 or t >= T:
                    continue
                wih, whh_rz, whh_n, bias_gi, bhn = layer_w(l)
                if l == 0:
                    gi = gi0_ref[t * Bp:(t + 1) * Bp, :]
                else:
                    # Input to layer l at time t is h_{l-1}(t), computed at the
                    # previous wavefront step; project it now (independent of
                    # this step's other matmuls -> pipelines on the MXU).
                    gi = (
                        jnp.dot(h[l - 1], wih[...], preferred_element_type=jnp.float32)
                        + bias_gi[...]
                    )
                h_new[l] = gru_cell(gi, h[l], whh_rz, whh_n, bhn, first_step=(t == 0))
                if l == L - 1:
                    # Only batch row 0 of the top layer feeds the FC head.
                    r0_ref[t:t + 1, :] = h_new[l][0:1, :]
            h = h_new

        # ---- FC head on batch row 0 only (PyTorch returns out[0, :, :]) ----
        hfc = jnp.tanh(
            jnp.dot(r0_ref[...], w1_ref[...], preferred_element_type=jnp.float32)
            + b1_ref[...]
        )
        out_ref[...] = (
            jnp.dot(hfc, w2_ref[...], preferred_element_type=jnp.float32) + b2_ref[...]
        )

    return kernel


# --------------------------------------------------------------------------
# Wrappers
# --------------------------------------------------------------------------
def _round_up(x, m):
    return ((x + m - 1) // m) * m


def prepare_params(params):
    """Pre-transpose / pre-split / bias-fold the weights (done once, outside the kernel)."""
    H = params["gru"][0][1].shape[1]           # w_hh: (3H, H)
    gru = []
    for li, (w_ih, w_hh, b_ih, b_hh) in enumerate(params["gru"]):
        d_in = w_ih.shape[1]
        wih_t = jnp.transpose(w_ih)            # (d_in, 3H)
        if li == 0:
            Dp = _round_up(d_in, 128)          # lane-pad the layer-0 input dim
            wih_t = jnp.pad(wih_t, ((0, Dp - d_in), (0, 0)))
        whh_t = jnp.transpose(w_hh)            # (H, 3H)
        whh_rz = whh_t[:, :2 * H]              # (H, 2H)
        whh_n = whh_t[:, 2 * H:]               # (H, H)
        # Fold b_ih (all gates) + b_hh (r,z gates only) into one combined bias;
        # b_hn must stay separate (it sits inside r * (W_hn h + b_hn)).
        bias_gi = (
            b_ih + jnp.concatenate([b_hh[:2 * H], jnp.zeros((H,), b_hh.dtype)])
        ).reshape(1, 3 * H)
        b_hn = b_hh[2 * H:].reshape(1, H)
        gru.append((wih_t, whh_rz, whh_n, bias_gi, b_hn))

    w1, b1, w2, b2 = params["fc"]
    O = w2.shape[0]
    Op = _round_up(O, 128)                                   # lane-dense output
    w2p = jnp.pad(jnp.transpose(w2), ((0, 0), (0, Op - O)))  # (H, Op)
    b2p = jnp.pad(b2, (0, Op - O)).reshape(1, Op)
    fc = (jnp.transpose(w1), b1.reshape(1, H), w2p, b2p)
    return {
        "gru": tuple(gru), "fc": fc, "out_dim": O, "out_pad": Op,
        "hidden": H, "in_pad": _round_up(params["gru"][0][0].shape[1], 128),
    }


def grunet_forward(x, pp):
    """x: (B, T, input_dim) f32 -> (T, output_dim)  (== PyTorch out[0, :, :])."""
    B, T, D = x.shape
    H = pp["hidden"]
    Op = pp["out_pad"]
    Dp = pp["in_pad"]
    L = len(pp["gru"])

    Bp = max(8, _round_up(B, 8))                       # fill a full sublane group
    # Pre-flatten to (T*Bp, Dp) in the wrapper (no in-kernel reshape of a
    # non-lane-aligned array): pad batch 2->8 and lanes 20->128, then time-major.
    x_p = jnp.pad(x, ((0, Bp - B), (0, 0), (0, Dp - D)))
    x_flat = jnp.transpose(x_p, (1, 0, 2)).reshape(T * Bp, Dp)

    flat_w = []
    for tup in pp["gru"]:
        flat_w.extend(tup)
    flat_w.extend(pp["fc"])

    vmem = pl.BlockSpec(memory_space=pltpu.MemorySpace.VMEM)
    out = pl.pallas_call(
        make_fused_kernel(L, T, Bp, H),
        out_shape=jax.ShapeDtypeStruct((T, Op), jnp.float32),
        in_specs=[vmem] * (1 + len(flat_w)),
        out_specs=vmem,
        scratch_shapes=[
            pltpu.VMEM((T * Bp, 3 * H), jnp.float32),  # hoisted layer-0 projection
            pltpu.VMEM((T, H), jnp.float32),           # batch-0 hidden of last layer
        ],
    )(x_flat, *flat_w)
    return out[:, : pp["out_dim"]]


# --------------------------------------------------------------------------
# Deterministic parameter init (PyTorch-style uniform(-1/sqrt(fan), 1/sqrt(fan)))
# --------------------------------------------------------------------------
def init_params(key, input_dim, hidden_dim, output_dim, layer_dim):
    params = {"gru": [], "fc": None}
    k_gru = 1.0 / jnp.sqrt(hidden_dim)
    for l in range(layer_dim):
        d_in = input_dim if l == 0 else hidden_dim
        key, k1, k2, k3, k4 = jax.random.split(key, 5)
        w_ih = jax.random.uniform(k1, (3 * hidden_dim, d_in), jnp.float32, -k_gru, k_gru)
        w_hh = jax.random.uniform(k2, (3 * hidden_dim, hidden_dim), jnp.float32, -k_gru, k_gru)
        b_ih = jax.random.uniform(k3, (3 * hidden_dim,), jnp.float32, -k_gru, k_gru)
        b_hh = jax.random.uniform(k4, (3 * hidden_dim,), jnp.float32, -k_gru, k_gru)
        params["gru"].append((w_ih, w_hh, b_ih, b_hh))
    key, k1, k2, k3, k4 = jax.random.split(key, 5)
    k_fc = 1.0 / jnp.sqrt(hidden_dim)
    w1 = jax.random.uniform(k1, (hidden_dim, hidden_dim), jnp.float32, -k_fc, k_fc)
    b1 = jax.random.uniform(k2, (hidden_dim,), jnp.float32, -k_fc, k_fc)
    w2 = jax.random.uniform(k3, (output_dim, hidden_dim), jnp.float32, -k_fc, k_fc)
    b2 = jax.random.uniform(k4, (output_dim,), jnp.float32, -k_fc, k_fc)
    params["fc"] = (w1, b1, w2, b2)
    return params


# --------------------------------------------------------------------------
# Pure-JAX reference (silent correctness check)
# --------------------------------------------------------------------------
def grunet_ref(x, params):
    B = x.shape[0]
    h_seq = x
    for (w_ih, w_hh, b_ih, b_hh) in params["gru"]:
        H = w_hh.shape[1]

        def step(h, xt, w_ih=w_ih, w_hh=w_hh, b_ih=b_ih, b_hh=b_hh):
            gi = xt @ w_ih.T + b_ih
            gh = h @ w_hh.T + b_hh
            i_r, i_z, i_n = jnp.split(gi, 3, axis=-1)
            h_r, h_z, h_n = jnp.split(gh, 3, axis=-1)
            r = jax.nn.sigmoid(i_r + h_r)
            z = jax.nn.sigmoid(i_z + h_z)
            n = jnp.tanh(i_n + r * h_n)
            hn = (1.0 - z) * n + z * h
            return hn, hn

        h0 = jnp.zeros((B, H), jnp.float32)
        _, outs = jax.lax.scan(step, h0, jnp.transpose(h_seq, (1, 0, 2)))
        h_seq = jnp.transpose(outs, (1, 0, 2))
    w1, b1, w2, b2 = params["fc"]
    out = jnp.tanh(h_seq @ w1.T + b1) @ w2.T + b2
    return out[0, :, :]


# --------------------------------------------------------------------------
if __name__ == "__main__":
    INPUT_DIM, OUTPUT_DIM, HIDDEN_DIM, LAYER_DIM = 20, 100, 128, 3
    B, T = 2, 8

    key = jax.random.PRNGKey(0)
    key, kx, kp = jax.random.split(key, 3)
    x = jax.random.normal(kx, (B, T, INPUT_DIM), jnp.float32)
    params = init_params(kp, INPUT_DIM, HIDDEN_DIM, OUTPUT_DIM, LAYER_DIM)
    pp = prepare_params(params)

    out = jax.block_until_ready(grunet_forward(x, pp))
    assert out.shape == (T, OUTPUT_DIM), out.shape

    ref = jax.block_until_ready(grunet_ref(x, params))
    assert jnp.allclose(out, ref, rtol=2e-3, atol=2e-3), float(jnp.max(jnp.abs(out - ref)))

    print("KERNEL_OK")
</pallas_src>

<mosaic_0001>
module attributes {stable_mosaic.version = 11 : i64} {
  func.func @kernel(%arg0: memref<64x128xf32, #tpu.memory_space<vmem>>, %arg1: memref<128x384xf32, #tpu.memory_space<vmem>>, %arg2: memref<128x256xf32, #tpu.memory_space<vmem>>, %arg3: memref<128x128xf32, #tpu.memory_space<vmem>>, %arg4: memref<1x384xf32, #tpu.memory_space<vmem>>, %arg5: memref<1x128xf32, #tpu.memory_space<vmem>>, %arg6: memref<128x384xf32, #tpu.memory_space<vmem>>, %arg7: memref<128x256xf32, #tpu.memory_space<vmem>>, %arg8: memref<128x128xf32, #tpu.memory_space<vmem>>, %arg9: memref<1x384xf32, #tpu.memory_space<vmem>>, %arg10: memref<1x128xf32, #tpu.memory_space<vmem>>, %arg11: memref<128x384xf32, #tpu.memory_space<vmem>>, %arg12: memref<128x256xf32, #tpu.memory_space<vmem>>, %arg13: memref<128x128xf32, #tpu.memory_space<vmem>>, %arg14: memref<1x384xf32, #tpu.memory_space<vmem>>, %arg15: memref<1x128xf32, #tpu.memory_space<vmem>>, %arg16: memref<128x128xf32, #tpu.memory_space<vmem>>, %arg17: memref<1x128xf32, #tpu.memory_space<vmem>>, %arg18: memref<128x128xf32, #tpu.memory_space<vmem>>, %arg19: memref<1x128xf32, #tpu.memory_space<vmem>>, %arg20: memref<8x128xf32, #tpu.memory_space<vmem>>, %arg21: memref<64x384xf32, #tpu.memory_space<vmem>>, %arg22: memref<8x128xf32, #tpu.memory_space<vmem>>) attributes {dimension_semantics = [], scalar_prefetch = 0 : i64, scratch_operands = 2 : i64, tpu.core_type = #tpu.core_type<tc>} {
    %c0 = arith.constant 0 : index
    %c0_0 = arith.constant 0 : index
    %0 = vector.load %arg0[%c0, %c0_0] : memref<64x128xf32, #tpu.memory_space<vmem>>, vector<64x128xf32>
    %c0_1 = arith.constant 0 : index
    %c0_2 = arith.constant 0 : index
    %1 = vector.load %arg1[%c0_1, %c0_2] : memref<128x384xf32, #tpu.memory_space<vmem>>, vector<128x384xf32>
    %cst = arith.constant dense<0.000000e+00> : vector<64x384xf32>
    %2 = tpu.matmul %0, %1, %cst {dimension_numbers = #tpu.dot_dimension_numbers<[1], [0], [0], [1], [0, 0, 1, 1], [], []>} : vector<64x128xf32>, vector<128x384xf32>, vector<64x384xf32> -> vector<64x384xf32>
    %c0_3 = arith.constant 0 : index
    %c0_4 = arith.constant 0 : index
    %3 = vector.load %arg4[%c0_3, %c0_4] : memref<1x384xf32, #tpu.memory_space<vmem>>, vector<1x384xf32>
    %4 = vector.broadcast %3 : vector<1x384xf32> to vector<64x384xf32>
    %5 = arith.addf %2, %4 : vector<64x384xf32>
    %c0_5 = arith.constant 0 : index
    %c0_6 = arith.constant 0 : index
    %6 = vector.load %arg21[%c0_5, %c0_6] : memref<64x384xf32, #tpu.memory_space<vmem>>, vector<64x384xf32>
    tpu.vector_store %arg21[%c0_5, %c0_6], %5 {strides = array<i32>} : memref<64x384xf32, #tpu.memory_space<vmem>>, vector<64x384xf32>,
    %c0_7 = arith.constant 0 : index
    %c0_8 = arith.constant 0 : index
    %7 = vector.load %arg21[%c0_7, %c0_8] : memref<64x384xf32, #tpu.memory_space<vmem>>, vector<8x384xf32>
    %8 = vector.extract_strided_slice %7 {offsets = [0, 0], sizes = [8, 128], strides = [1, 1]} : vector<8x384xf32> to vector<8x128xf32>
    %9 = vector.extract_strided_slice %7 {offsets = [0, 128], sizes = [8, 128], strides = [1, 1]} : vector<8x384xf32> to vector<8x128xf32>
    %10 = vector.extract_strided_slice %7 {offsets = [0, 256], sizes = [8, 128], strides = [1, 1]} : vector<8x384xf32> to vector<8x128xf32>
    %c0_9 = arith.constant 0 : index
    %c0_10 = arith.constant 0 : index
    %11 = vector.load %arg5[%c0_9, %c0_10] : memref<1x128xf32, #tpu.memory_space<vmem>>, vector<1x128xf32>
    %12 = arith.negf %8 : vector<8x128xf32>
    %13 = math.exp %12 : vector<8x128xf32>
    %cst_11 = arith.constant 1.000000e+00 : f32
    %14 = vector.broadcast %cst_11 : f32 to vector<8x128xf32>
    %15 = arith.addf %14, %13 : vector<8x128xf32>
    %16 = arith.divf %14, %15 : vector<8x128xf32>
    %17 = arith.negf %9 : vector<8x128xf32>
    %18 = math.exp %17 : vector<8x128xf32>
    %cst_12 = arith.constant 1.000000e+00 : f32
    %19 = vector.broadcast %cst_12 : f32 to vector<8x128xf32>
    %20 = arith.addf %19, %18 : vector<8x128xf32>
    %21 = arith.divf %19, %20 : vector<8x128xf32>
    %22 = vector.broadcast %11 : vector<1x128xf32> to vector<8x128xf32>
    %23 = arith.mulf %16, %22 : vector<8x128xf32>
    %24 = arith.addf %10, %23 : vector<8x128xf32>
    %25 = math.tanh %24 : vector<8x128xf32>
    %cst_13 = arith.constant 1.000000e+00 : f32
    %26 = vector.broadcast %cst_13 : f32 to vector<8x128xf32>
    %27 = arith.subf %26, %21 : vector<8x128xf32>
    %28 = arith.mulf %27, %25 : vector<8x128xf32>
    %c8 = arith.constant 8 : index
    %c0_14 = arith.constant 0 : index
    %29 = vector.load %arg21[%c8, %c0_14] : memref<64x384xf32, #tpu.memory_space<vmem>>, vector<8x384xf32>
    %30 = vector.extract_strided_slice %29 {offsets = [0, 0], sizes = [8, 128], strides = [1, 1]} : vector<8x384xf32> to vector<8x128xf32>
    %31 = vector.extract_strided_slice %29 {offsets = [0, 128], sizes = [8, 128], strides = [1, 1]} : vector<8x384xf32> to vector<8x128xf32>
    %32 = vector.extract_strided_slice %29 {offsets = [0, 256], sizes = [8, 128], strides = [1, 1]} : vector<8x384xf32> to vector<8x128xf32>
    %c0_15 = arith.constant 0 : index
    %c0_16 = arith.constant 0 : index
    %33 = vector.load %arg5[%c0_15, %c0_16] : memref<1x128xf32, #tpu.memory_space<vmem>>, vector<1x128xf32>
    %c0_17 = arith.constant 0 : index
    %c0_18 = arith.constant 0 : index
    %34 = vector.load %arg2[%c0_17, %c0_18] : memref<128x256xf32, #tpu.memory_space<vmem>>, vector<128x256xf32>
    %cst_19 = arith.constant dense<0.000000e+00> : vector<8x256xf32>
    %35 = tpu.matmul %28, %34, %cst_19 {dimension_numbers = #tpu.dot_dimension_numbers<[1], [0], [0], [1], [0, 0, 1, 1], [], []>} : vector<8x128xf32>, vector<128x256xf32>, vector<8x256xf32> -> vector<8x256xf32>
    %c0_20 = arith.constant 0 : index
    %c0_21 = arith.constant 0 : index
    %36 = vector.load %arg3[%c0_20, %c0_21] : memref<128x128xf32, #tpu.memory_space<vmem>>, vector<128x128xf32>
    %cst_22 = arith.constant dense<0.000000e+00> : vector<8x128xf32>
    %37 = tpu.matmul %28, %36, %cst_22 {dimension_numbers = #tpu.dot_dimension_numbers<[1], [0], [0], [1], [0, 0, 1, 1], [], []>} : vector<8x128xf32>, vector<128x128xf32>, vector<8x128xf32> -> vector<8x128xf32>
    %38 = vector.extract_strided_slice %35 {offsets = [0, 0], sizes = [8, 128], strides = [1, 1]} : vector<8x256xf32> to vector<8x128xf32>
    %39 = arith.addf %30, %38 : vector<8x128xf32>
    %40 = arith.negf %39 : vector<8x128xf32>
    %41 = math.exp %40 : vector<8x128xf32>
    %cst_23 = arith.constant 1.000000e+00 : f32
    %42 = vector.broadcast %cst_23 : f32 to vector<8x128xf32>
    %43 = arith.addf %42, %41 : vector<8x128xf32>
    %44 = arith.divf %42, %43 : vector<8x128xf32>
    %45 = vector.extract_strided_slice %35 {offsets = [0, 128], sizes = [8, 128], strides = [1, 1]} : vector<8x256xf32> to vector<8x128xf32>
    %46 = arith.addf %31, %45 : vector<8x128xf32>
    %47 = arith.negf %46 : vector<8x128xf32>
    %48 = math.exp %47 : vector<8x128xf32>
    %cst_24 = arith.constant 1.000000e+00 : f32
    %49 = vector.broadcast %cst_24 : f32 to vector<8x128xf32>
    %50 = arith.addf %49, %48 : vector<8x128xf32>
    %51 = arith.divf %49, %50 : vector<8x128xf32>
    %52 = vector.broadcast %33 : vector<1x128xf32> to vector<8x128xf32>
    %53 = arith.addf %37, %52 : vector<8x128xf32>
    %54 = arith.mulf %44, %53 : vector<8x128xf32>
    %55 = arith.addf %32, %54 : vector<8x128xf32>
    %56 = math.tanh %55 : vector<8x128xf32>
    %cst_25 = arith.constant 1.000000e+00 : f32
    %57 = vector.broadcast %cst_25 : f32 to vector<8x128xf32>
    %58 = arith.subf %57, %51 : vector<8x128xf32>
    %59 = arith.mulf %58, %56 : vector<8x128xf32>
    %60 = arith.mulf %51, %28 : vector<8x128xf32>
    %61 = arith.addf %59, %60 : vector<8x128xf32>
    %c0_26 = arith.constant 0 : index
    %c0_27 = arith.constant 0 : index
    %62 = vector.load %arg6[%c0_26, %c0_27] : memref<128x384xf32, #tpu.memory_space<vmem>>, vector<128x384xf32>
    %cst_28 = arith.constant dense<0.000000e+00> : vector<8x384xf32>
    %63 = tpu.matmul %28, %62, %cst_28 {dimension_numbers = #tpu.dot_dimension_numbers<[1], [0], [0], [1], [0, 0, 1, 1], [], []>} : vector<8x128xf32>, vector<128x384xf32>, vector<8x384xf32> -> vector<8x384xf32>
    %c0_29 = arith.constant 0 : index
    %c0_30 = arith.constant 0 : index
    %64 = vector.load %arg9[%c0_29, %c0_30] : memref<1x384xf32, #tpu.memory_space<vmem>>, vector<1x384xf32>
    %65 = vector.broadcast %64 : vector<1x384xf32> to vector<8x384xf32>
    %66 = arith.addf %63, %65 : vector<8x384xf32>
    %67 = vector.extract_strided_slice %66 {offsets = [0, 0], sizes = [8, 128], strides = [1, 1]} : vector<8x384xf32> to vector<8x128xf32>
    %68 = vector.extract_strided_slice %66 {offsets = [0, 128], sizes = [8, 128], strides = [1, 1]} : vector<8x384xf32> to vector<8x128xf32>
    %69 = vector.extract_strided_slice %66 {offsets = [0, 256], sizes = [8, 128], strides = [1, 1]} : vector<8x384xf32> to vector<8x128xf32>
    %c0_31 = arith.constant 0 : index
    %c0_32 = arith.constant 0 : index
    %70 = vector.load %arg10[%c0_31, %c0_32] : memref<1x128xf32, #tpu.memory_space<vmem>>, vector<1x128xf32>
    %71 = arith.negf %67 : vector<8x128xf32>
    %72 = math.exp %71 : vector<8x128xf32>
    %cst_33 = arith.constant 1.000000e+00 : f32
    %73 = vector.broadcast %cst_33 : f32 to vector<8x128xf32>
    %74 = arith.addf %73, %72 : vector<8x128xf32>
    %75 = arith.divf %73, %74 : vector<8x128xf32>
    %76 = arith.negf %68 : vector<8x128xf32>
    %77 = math.exp %76 : vector<8x128xf32>
    %cst_34 = arith.constant 1.000000e+00 : f32
    %78 = vector.broadcast %cst_34 : f32 to vector<8x128xf32>
    %79 = arith.addf %78, %77 : vector<8x128xf32>
    %80 = arith.divf %78, %79 : vector<8x128xf32>
    %81 = vector.broadcast %70 : vector<1x128xf32> to vector<8x128xf32>
    %82 = arith.mulf %75, %81 : vector<8x128xf32>
    %83 = arith.addf %69, %82 : vector<8x128xf32>
    %84 = math.tanh %83 : vector<8x128xf32>
    %cst_35 = arith.constant 1.000000e+00 : f32
    %85 = vector.broadcast %cst_35 : f32 to vector<8x128xf32>
    %86 = arith.subf %85, %80 : vector<8x128xf32>
    %87 = arith.mulf %86, %84 : vector<8x128xf32>
    %c16 = arith.constant 16 : index
    %c0_36 = arith.constant 0 : index
    %88 = vector.load %arg21[%c16, %c0_36] : memref<64x384xf32, #tpu.memory_space<vmem>>, vector<8x384xf32>
    %89 = vector.extract_strided_slice %88 {offsets = [0, 0], sizes = [8, 128], strides = [1, 1]} : vector<8x384xf32> to vector<8x128xf32>
    %90 = vector.extract_strided_slice %88 {offsets = [0, 128], sizes = [8, 128], strides = [1, 1]} : vector<8x384xf32> to vector<8x128xf32>
    %91 = vector.extract_strided_slice %88 {offsets = [0, 256], sizes = [8, 128], strides = [1, 1]} : vector<8x384xf32> to vector<8x128xf32>
    %c0_37 = arith.constant 0 : index
    %c0_38 = arith.constant 0 : index
    %92 = vector.load %arg5[%c0_37, %c0_38] : memref<1x128xf32, #tpu.memory_space<vmem>>, vector<1x128xf32>
    %c0_39 = arith.constant 0 : index
    %c0_40 = arith.constant 0 : index
    %93 = vector.load %arg2[%c0_39, %c0_40] : memref<128x256xf32, #tpu.memory_space<vmem>>, vector<128x256xf32>
    %cst_41 = arith.constant dense<0.000000e+00> : vector<8x256xf32>
    %94 = tpu.matmul %61, %93, %cst_41 {dimension_numbers = #tpu.dot_dimension_numbers<[1], [0], [0], [1], [0, 0, 1, 1], [], []>} : vector<8x128xf32>, vector<128x256xf32>, vector<8x256xf32> -> vector<8x256xf32>
    %c0_42 = arith.constant 0 : index
    %c0_43 = arith.constant 0 : index
    %95 = vector.load %arg3[%c0_42, %c0_43] : memref<128x128xf32, #tpu.memory_space<vmem>>, vector<128x128xf32>
    %cst_44 = arith.constant dense<0.000000e+00> : vector<8x128xf32>
    %96 = tpu.matmul %61, %95, %cst_44 {dimension_numbers = #tpu.dot_dimension_numbers<[1], [0], [0], [1], [0, 0, 1, 1], [], []>} : vector<8x128xf32>, vector<128x128xf32>, vector<8x128xf32> -> vector<8x128xf32>
    %97 = vector.extract_strided_slice %94 {offsets = [0, 0], sizes = [8, 128], strides = [1, 1]} : vector<8x256xf32> to vector<8x128xf32>
    %98 = arith.addf %89, %97 : vector<8x128xf32>
    %99 = arith.negf %98 : vector<8x128xf32>
    %100 = math.exp %99 : vector<8x128xf32>
    %cst_45 = arith.constant 1.000000e+00 : f32
    %101 = vector.broadcast %cst_45 : f32 to vector<8x128xf32>
    %102 = arith.addf %101, %100 : vector<8x128xf32>
    %103 = arith.divf %101, %102 : vector<8x128xf32>
    %104 = vector.extract_strided_slice %94 {offsets = [0, 128], sizes = [8, 128], strides = [1, 1]} : vector<8x256xf32> to vector<8x128xf32>
    %105 = arith.addf %90, %104 : vector<8x128xf32>
    %106 = arith.negf %105 : vector<8x128xf32>
    %107 = math.exp %106 : vector<8x128xf32>
    %cst_46 = arith.constant 1.000000e+00 : f32
    %108 = vector.broadcast %cst_46 : f32 to vector<8x128xf32>
    %109 = arith.addf %108, %107 : vector<8x128xf32>
    %110 = arith.divf %108, %109 : vector<8x128xf32>
    %111 = vector.broadcast %92 : vector<1x128xf32> to vector<8x128xf32>
    %112 = arith.addf %96, %111 : vector<8x128xf32>
    %113 = arith.mulf %103, %112 : vector<8x128xf32>
    %114 = arith.addf %91, %113 : vector<8x128xf32>
    %115 = math.tanh %114 : vector<8x128xf32>
    %cst_47 = arith.constant 1.000000e+00 : f32
    %116 = vector.broadcast %cst_47 : f32 to vector<8x128xf32>
    %117 = arith.subf %116, %110 : vector<8x128xf32>
    %118 = arith.mulf %117, %115 : vector<8x128xf32>
    %119 = arith.mulf %110, %61 : vector<8x128xf32>
    %120 = arith.addf %118, %119 : vector<8x128xf32>
    %c0_48 = arith.constant 0 : index
    %c0_49 = arith.constant 0 : index
    %121 = vector.load %arg6[%c0_48, %c0_49] : memref<128x384xf32, #tpu.memory_space<vmem>>, vector<128x384xf32>
    %cst_50 = arith.constant dense<0.000000e+00> : vector<8x384xf32>
    %122 = tpu.matmul %61, %121, %cst_50 {dimension_numbers = #tpu.dot_dimension_numbers<[1], [0], [0], [1], [0, 0, 1, 1], [], []>} : vector<8x128xf32>, vector<128x384xf32>, vector<8x384xf32> -> vector<8x384xf32>
    %c0_51 = arith.constant 0 : index
    %c0_52 = arith.constant 0 : index
    %123 = vector.load %arg9[%c0_51, %c0_52] : memref<1x384xf32, #tpu.memory_space<vmem>>, vector<1x384xf32>
    %124 = vector.broadcast %123 : vector<1x384xf32> to vector<8x384xf32>
    %125 = arith.addf %122, %124 : vector<8x384xf32>
    %126 = vector.extract_strided_slice %125 {offsets = [0, 0], sizes = [8, 128], strides = [1, 1]} : vector<8x384xf32> to vector<8x128xf32>
    %127 = vector.extract_strided_slice %125 {offsets = [0, 128], sizes = [8, 128], strides = [1, 1]} : vector<8x384xf32> to vector<8x128xf32>
    %128 = vector.extract_strided_slice %125 {offsets = [0, 256], sizes = [8, 128], strides = [1, 1]} : vector<8x384xf32> to vector<8x128xf32>
    %c0_53 = arith.constant 0 : index
    %c0_54 = arith.constant 0 : index
    %129 = vector.load %arg10[%c0_53, %c0_54] : memref<1x128xf32, #tpu.memory_space<vmem>>, vector<1x128xf32>
    %c0_55 = arith.constant 0 : index
    %c0_56 = arith.constant 0 : index
    %130 = vector.load %arg7[%c0_55, %c0_56] : memref<128x256xf32, #tpu.memory_space<vmem>>, vector<128x256xf32>
    %cst_57 = arith.constant dense<0.000000e+00> : vector<8x256xf32>
    %131 = tpu.matmul %87, %130, %cst_57 {dimension_numbers = #tpu.dot_dimension_numbers<[1], [0], [0], [1], [0, 0, 1, 1], [], []>} : vector<8x128xf32>, vector<128x256xf32>, vector<8x256xf32> -> vector<8x256xf32>
    %c0_58 = arith.constant 0 : index
    %c0_59 = arith.constant 0 : index
    %132 = vector.load %arg8[%c0_58, %c0_59] : memref<128x128xf32, #tpu.memory_space<vmem>>, vector<128x128xf32>
    %cst_60 = arith.constant dense<0.000000e+00> : vector<8x128xf32>
    %133 = tpu.matmul %87, %132, %cst_60 {dimension_numbers = #tpu.dot_dimension_numbers<[1], [0], [0], [1], [0, 0, 1, 1], [], []>} : vector<8x128xf32>, vector<128x128xf32>, vector<8x128xf32> -> vector<8x128xf32>
    %134 = vector.extract_strided_slice %131 {offsets = [0, 0], sizes = [8, 128], strides = [1, 1]} : vector<8x256xf32> to vector<8x128xf32>
    %135 = arith.addf %126, %134 : vector<8x128xf32>
    %136 = arith.negf %135 : vector<8x128xf32>
    %137 = math.exp %136 : vector<8x128xf32>
    %cst_61 = arith.constant 1.000000e+00 : f32
    %138 = vector.broadcast %cst_61 : f32 to vector<8x128xf32>
    %139 = arith.addf %138, %137 : vector<8x128xf32>
    %140 = arith.divf %138, %139 : vector<8x128xf32>
    %141 = vector.extract_strided_slice %131 {offsets = [0, 128], sizes = [8, 128], strides = [1, 1]} : vector<8x256xf32> to vector<8x128xf32>
    %142 = arith.addf %127, %141 : vector<8x128xf32>
    %143 = arith.negf %142 : vector<8x128xf32>
    %144 = math.exp %143 : vector<8x128xf32>
    %cst_62 = arith.constant 1.000000e+00 : f32
    %145 = vector.broadcast %cst_62 : f32 to vector<8x128xf32>
    %146 = arith.addf %145, %144 : vector<8x128xf32>
    %147 = arith.divf %145, %146 : vector<8x128xf32>
    %148 = vector.broadcast %129 : vector<1x128xf32> to vector<8x128xf32>
    %149 = arith.addf %133, %148 : vector<8x128xf32>
    %150 = arith.mulf %140, %149 : vector<8x128xf32>
    %151 = arith.addf %128, %150 : vector<8x128xf32>
    %152 = math.tanh %151 : vector<8x128xf32>
    %cst_63 = arith.constant 1.000000e+00 : f32
    %153 = vector.broadcast %cst_63 : f32 to vector<8x128xf32>
    %154 = arith.subf %153, %147 : vector<8x128xf32>
    %155 = arith.mulf %154, %152 : vector<8x128xf32>
    %156 = arith.mulf %147, %87 : vector<8x128xf32>
    %157 = arith.addf %155, %156 : vector<8x128xf32>
    %c0_64 = arith.constant 0 : index
    %c0_65 = arith.constant 0 : index
    %158 = vector.load %arg11[%c0_64, %c0_65] : memref<128x384xf32, #tpu.memory_space<vmem>>, vector<128x384xf32>
    %cst_66 = arith.constant dense<0.000000e+00> : vector<8x384xf32>
    %159 = tpu.matmul %87, %158, %cst_66 {dimension_numbers = #tpu.dot_dimension_numbers<[1], [0], [0], [1], [0, 0, 1, 1], [], []>} : vector<8x128xf32>, vector<128x384xf32>, vector<8x384xf32> -> vector<8x384xf32>
    %c0_67 = arith.constant 0 : index
    %c0_68 = arith.constant 0 : index
    %160 = vector.load %arg14[%c0_67, %c0_68] : memref<1x384xf32, #tpu.memory_space<vmem>>, vector<1x384xf32>
    %161 = vector.broadcast %160 : vector<1x384xf32> to vector<8x384xf32>
    %162 = arith.addf %159, %161 : vector<8x384xf32>
    %163 = vector.extract_strided_slice %162 {offsets = [0, 0], sizes = [8, 128], strides = [1, 1]} : vector<8x384xf32> to vector<8x128xf32>
    %164 = vector.extract_strided_slice %162 {offsets = [0, 128], sizes = [8, 128], strides = [1, 1]} : vector<8x384xf32> to vector<8x128xf32>
    %165 = vector.extract_strided_slice %162 {offsets = [0, 256], sizes = [8, 128], strides = [1, 1]} : vector<8x384xf32> to vector<8x128xf32>
    %c0_69 = arith.constant 0 : index
    %c0_70 = arith.constant 0 : index
    %166 = vector.load %arg15[%c0_69, %c0_70] : memref<1x128xf32, #tpu.memory_space<vmem>>, vector<1x128xf32>
    %167 = arith.negf %163 : vector<8x128xf32>
    %168 = math.exp %167 : vector<8x128xf32>
    %cst_71 = arith.constant 1.000000e+00 : f32
    %169 = vector.broadcast %cst_71 : f32 to vector<8x128xf32>
    %170 = arith.addf %169, %168 : vector<8x128xf32>
    %171 = arith.divf %169, %170 : vector<8x128xf32>
    %172 = arith.negf %164 : vector<8x128xf32>
    %173 = math.exp %172 : vector<8x128xf32>
    %cst_72 = arith.constant 1.000000e+00 : f32
    %174 = vector.broadcast %cst_72 : f32 to vector<8x128xf32>
    %175 = arith.addf %174, %173 : vector<8x128xf32>
    %176 = arith.divf %174, %175 : vector<8x128xf32>
    %177 = vector.broadcast %166 : vector<1x128xf32> to vector<8x128xf32>
    %178 = arith.mulf %171, %177 : vector<8x128xf32>
    %179 = arith.addf %165, %178 : vector<8x128xf32>
    %180 = math.tanh %179 : vector<8x128xf32>
    %cst_73 = arith.constant 1.000000e+00 : f32
    %181 = vector.broadcast %cst_73 : f32 to vector<8x128xf32>
    %182 = arith.subf %181, %176 : vector<8x128xf32>
    %183 = arith.mulf %182, %180 : vector<8x128xf32>
    %184 = vector.extract_strided_slice %183 {offsets = [0, 0], sizes = [1, 128], strides = [1, 1]} : vector<8x128xf32> to vector<1x128xf32>
    %c0_74 = arith.constant 0 : index
    %c0_75 = arith.constant 0 : index
    %185 = vector.load %arg22[%c0_74, %c0_75] : memref<8x128xf32, #tpu.memory_space<vmem>>, vector<1x128xf32>
    tpu.vector_store %arg22[%c0_74, %c0_75], %184 {strides = array<i32>} : memref<8x128xf32, #tpu.memory_space<vmem>>, vector<1x128xf32>,
    %c24 = arith.constant 24 : index
    %c0_76 = arith.constant 0 : index
    %186 = vector.load %arg21[%c24, %c0_76] : memref<64x384xf32, #tpu.memory_space<vmem>>, vector<8x384xf32>
    %187 = vector.extract_strided_slice %186 {offsets = [0, 0], sizes = [8, 128], strides = [1, 1]} : vector<8x384xf32> to vector<8x128xf32>
    %188 = vector.extract_strided_slice %186 {offsets = [0, 128], sizes = [8, 128], strides = [1, 1]} : vector<8x384xf32> to vector<8x128xf32>
    %189 = vector.extract_strided_slice %186 {offsets = [0, 256], sizes = [8, 128], strides = [1, 1]} : vector<8x384xf32> to vector<8x128xf32>
    %c0_77 = arith.constant 0 : index
    %c0_78 = arith.constant 0 : index
    %190 = vector.load %arg5[%c0_77, %c0_78] : memref<1x128xf32, #tpu.memory_space<vmem>>, vector<1x128xf32>
    %c0_79 = arith.constant 0 : index
    %c0_80 = arith.constant 0 : index
    %191 = vector.load %arg2[%c0_79, %c0_80] : memref<128x256xf32, #tpu.memory_space<vmem>>, vector<128x256xf32>
    %cst_81 = arith.constant dense<0.000000e+00> : vector<8x256xf32>
    %192 = tpu.matmul %120, %191, %cst_81 {dimension_numbers = #tpu.dot_dimension_numbers<[1], [0], [0], [1], [0, 0, 1, 1], [], []>} : vector<8x128xf32>, vector<128x256xf32>, vector<8x256xf32> -> vector<8x256xf32>
    %c0_82 = arith.constant 0 : index
    %c0_83 = arith.constant 0 : index
    %193 = vector.load %arg3[%c0_82, %c0_83] : memref<128x128xf32, #tpu.memory_space<vmem>>, vector<128x128xf32>
    %cst_84 = arith.constant dense<0.000000e+00> : vector<8x128xf32>
    %194 = tpu.matmul %120, %193, %cst_84 {dimension_numbers = #tpu.dot_dimension_numbers<[1], [0], [0], [1], [0, 0, 1, 1], [], []>} : vector<8x128xf32>, vector<128x128xf32>, vector<8x128xf32> -> vector<8x128xf32>
    %195 = vector.extract_strided_slice %192 {offsets = [0, 0], sizes = [8, 128], strides = [1, 1]} : vector<8x256xf32> to vector<8x128xf32>
    %196 = arith.addf %187, %195 : vector<8x128xf32>
    %197 = arith.negf %196 : vector<8x128xf32>
    %198 = math.exp %197 : vector<8x128xf32>
    %cst_85 = arith.constant 1.000000e+00 : f32
    %199 = vector.broadcast %cst_85 : f32 to vector<8x128xf32>
    %200 = arith.addf %199, %198 : vector<8x128xf32>
    %201 = arith.divf %199, %200 : vector<8x128xf32>
    %202 = vector.extract_strided_slice %192 {offsets = [0, 128], sizes = [8, 128], strides = [1, 1]} : vector<8x256xf32> to vector<8x128xf32>
    %203 = arith.addf %188, %202 : vector<8x128xf32>
    %204 = arith.negf %203 : vector<8x128xf32>
    %205 = math.exp %204 : vector<8x128xf32>
    %cst_86 = arith.constant 1.000000e+00 : f32
    %206 = vector.broadcast %cst_86 : f32 to vector<8x128xf32>
    %207 = arith.addf %206, %205 : vector<8x128xf32>
    %208 = arith.divf %206, %207 : vector<8x128xf32>
    %209 = vector.broadcast %190 : vector<1x128xf32> to vector<8x128xf32>
    %210 = arith.addf %194, %209 : vector<8x128xf32>
    %211 = arith.mulf %201, %210 : vector<8x128xf32>
    %212 = arith.addf %189, %211 : vector<8x128xf32>
    %213 = math.tanh %212 : vector<8x128xf32>
    %cst_87 = arith.constant 1.000000e+00 : f32
    %214 = vector.broadcast %cst_87 : f32 to vector<8x128xf32>
    %215 = arith.subf %214, %208 : vector<8x128xf32>
    %216 = arith.mulf %215, %213 : vector<8x128xf32>
    %217 = arith.mulf %208, %120 : vector<8x128xf32>
    %218 = arith.addf %216, %217 : vector<8x128xf32>
    %c0_88 = arith.constant 0 : index
    %c0_89 = arith.constant 0 : index
    %219 = vector.load %arg6[%c0_88, %c0_89] : memref<128x384xf32, #tpu.memory_space<vmem>>, vector<128x384xf32>
    %cst_90 = arith.constant dense<0.000000e+00> : vector<8x384xf32>
    %220 = tpu.matmul %120, %219, %cst_90 {dimension_numbers = #tpu.dot_dimension_numbers<[1], [0], [0], [1], [0, 0, 1, 1], [], []>} : vector<8x128xf32>, vector<128x384xf32>, vector<8x384xf32> -> vector<8x384xf32>
    %c0_91 = arith.constant 0 : index
    %c0_92 = arith.constant 0 : index
    %221 = vector.load %arg9[%c0_91, %c0_92] : memref<1x384xf32, #tpu.memory_space<vmem>>, vector<1x384xf32>
    %222 = vector.broadcast %221 : vector<1x384xf32> to vector<8x384xf32>
    %223 = arith.addf %220, %222 : vector<8x384xf32>
    %224 = vector.extract_strided_slice %223 {offsets = [0, 0], sizes = [8, 128], strides = [1, 1]} : vector<8x384xf32> to vector<8x128xf32>
    %225 = vector.extract_strided_slice %223 {offsets = [0, 128], sizes = [8, 128], strides = [1, 1]} : vector<8x384xf32> to vector<8x128xf32>
    %226 = vector.extract_strided_slice %223 {offsets = [0, 256], sizes = [8, 128], strides = [1, 1]} : vector<8x384xf32> to vector<8x128xf32>
    %c0_93 = arith.constant 0 : index
    %c0_94 = arith.constant 0 : index
    %227 = vector.load %arg10[%c0_93, %c0_94] : memref<1x128xf32, #tpu.memory_space<vmem>>, vector<1x128xf32>
    %c0_95 = arith.constant 0 : index
    %c0_96 = arith.constant 0 : index
    %228 = vector.load %arg7[%c0_95, %c0_96] : memref<128x256xf32, #tpu.memory_space<vmem>>, vector<128x256xf32>
    %cst_97 = arith.constant dense<0.000000e+00> : vector<8x256xf32>
    %229 = tpu.matmul %157, %228, %cst_97 {dimension_numbers = #tpu.dot_dimension_numbers<[1], [0], [0], [1], [0, 0, 1, 1], [], []>} : vector<8x128xf32>, vector<128x256xf32>, vector<8x256xf32> -> vector<8x256xf32>
    %c0_98 = arith.constant 0 : index
    %c0_99 = arith.constant 0 : index
    %230 = vector.load %arg8[%c0_98, %c0_99] : memref<128x128xf32, #tpu.memory_space<vmem>>, vector<128x128xf32>
    %cst_100 = arith.constant dense<0.000000e+00> : vector<8x128xf32>
    %231 = tpu.matmul %157, %230, %cst_100 {dimension_numbers = #tpu.dot_dimension_numbers<[1], [0], [0], [1], [0, 0, 1, 1], [], []>} : vector<8x128xf32>, vector<128x128xf32>, vector<8x128xf32> -> vector<8x128xf32>
    %232 = vector.extract_strided_slice %229 {offsets = [0, 0], sizes = [8, 128], strides = [1, 1]} : vector<8x256xf32> to vector<8x128xf32>
    %233 = arith.addf %224, %232 : vector<8x128xf32>
    %234 = arith.negf %233 : vector<8x128xf32>
    %235 = math.exp %234 : vector<8x128xf32>
    %cst_101 = arith.constant 1.000000e+00 : f32
    %236 = vector.broadcast %cst_101 : f32 to vector<8x128xf32>
    %237 = arith.addf %236, %235 : vector<8x128xf32>
    %238 = arith.divf %236, %237 : vector<8x128xf32>
    %239 = vector.extract_strided_slice %229 {offsets = [0, 128], sizes = [8, 128], strides = [1, 1]} : vector<8x256xf32> to vector<8x128xf32>
    %240 = arith.addf %225, %239 : vector<8x128xf32>
    %241 = arith.negf %240 : vector<8x128xf32>
    %242 = math.exp %241 : vector<8x128xf32>
    %cst_102 = arith.constant 1.000000e+00 : f32
    %243 = vector.broadcast %cst_102 : f32 to vector<8x128xf32>
    %244 = arith.addf %243, %242 : vector<8x128xf32>
    %245 = arith.divf %243, %244 : vector<8x128xf32>
    %246 = vector.broadcast %227 : vector<1x128xf32> to vector<8x128xf32>
    %247 = arith.addf %231, %246 : vector<8x128xf32>
    %248 = arith.mulf %238, %247 : vector<8x128xf32>
    %249 = arith.addf %226, %248 : vector<8x128xf32>
    %250 = math.tanh %249 : vector<8x128xf32>
    %cst_103 = arith.constant 1.000000e+00 : f32
    %251 = vector.broadcast %cst_103 : f32 to vector<8x128xf32>
    %252 = arith.subf %251, %245 : vector<8x128xf32>
    %253 = arith.mulf %252, %250 : vector<8x128xf32>
    %254 = arith.mulf %245, %157 : vector<8x128xf32>
    %255 = arith.addf %253, %254 : vector<8x128xf32>
    %c0_104 = arith.constant 0 : index
    %c0_105 = arith.constant 0 : index
    %256 = vector.load %arg11[%c0_104, %c0_105] : memref<128x384xf32, #tpu.memory_space<vmem>>, vector<128x384xf32>
    %cst_106 = arith.constant dense<0.000000e+00> : vector<8x384xf32>
    %257 = tpu.matmul %157, %256, %cst_106 {dimension_numbers = #tpu.dot_dimension_numbers<[1], [0], [0], [1], [0, 0, 1, 1], [], []>} : vector<8x128xf32>, vector<128x384xf32>, vector<8x384xf32> -> vector<8x384xf32>
    %c0_107 = arith.constant 0 : index
    %c0_108 = arith.constant 0 : index
    %258 = vector.load %arg14[%c0_107, %c0_108] : memref<1x384xf32, #tpu.memory_space<vmem>>, vector<1x384xf32>
    %259 = vector.broadcast %258 : vector<1x384xf32> to vector<8x384xf32>
    %260 = arith.addf %257, %259 : vector<8x384xf32>
    %261 = vector.extract_strided_slice %260 {offsets = [0, 0], sizes = [8, 128], strides = [1, 1]} : vector<8x384xf32> to vector<8x128xf32>
    %262 = vector.extract_strided_slice %260 {offsets = [0, 128], sizes = [8, 128], strides = [1, 1]} : vector<8x384xf32> to vector<8x128xf32>
    %263 = vector.extract_strided_slice %260 {offsets = [0, 256], sizes = [8, 128], strides = [1, 1]} : vector<8x384xf32> to vector<8x128xf32>
    %c0_109 = arith.constant 0 : index
    %c0_110 = arith.constant 0 : index
    %264 = vector.load %arg15[%c0_109, %c0_110] : memref<1x128xf32, #tpu.memory_space<vmem>>, vector<1x128xf32>
    %c0_111 = arith.constant 0 : index
    %c0_112 = arith.constant 0 : index
    %265 = vector.load %arg12[%c0_111, %c0_112] : memref<128x256xf32, #tpu.memory_space<vmem>>, vector<128x256xf32>
    %cst_113 = arith.constant dense<0.000000e+00> : vector<8x256xf32>
    %266 = tpu.matmul %183, %265, %cst_113 {dimension_numbers = #tpu.dot_dimension_numbers<[1], [0], [0], [1], [0, 0, 1, 1], [], []>} : vector<8x128xf32>, vector<128x256xf32>, vector<8x256xf32> -> vector<8x256xf32>
    %c0_114 = arith.constant 0 : index
    %c0_115 = arith.constant 0 : index
    %267 = vector.load %arg13[%c0_114, %c0_115] : memref<128x128xf32, #tpu.memory_space<vmem>>, vector<128x128xf32>
    %cst_116 = arith.constant dense<0.000000e+00> : vector<8x128xf32>
    %268 = tpu.matmul %183, %267, %cst_116 {dimension_numbers = #tpu.dot_dimension_numbers<[1], [0], [0], [1], [0, 0, 1, 1], [], []>} : vector<8x128xf32>, vector<128x128xf32>, vector<8x128xf32> -> vector<8x128xf32>
    %269 = vector.extract_strided_slice %266 {offsets = [0, 0], sizes = [8, 128], strides = [1, 1]} : vector<8x256xf32> to vector<8x128xf32>
    %270 = arith.addf %261, %269 : vector<8x128xf32>
    %271 = arith.negf %270 : vector<8x128xf32>
    %272 = math.exp %271 : vector<8x128xf32>
    %cst_117 = arith.constant 1.000000e+00 : f32
    %273 = vector.broadcast %cst_117 : f32 to vector<8x128xf32>
    %274 = arith.addf %273, %272 : vector<8x128xf32>
    %275 = arith.divf %273, %274 : vector<8x128xf32>
    %276 = vector.extract_strided_slice %266 {offsets = [0, 128], sizes = [8, 128], strides = [1, 1]} : vector<8x256xf32> to vector<8x128xf32>
    %277 = arith.addf %262, %276 : vector<8x128xf32>
    %278 = arith.negf %277 : vector<8x128xf32>
    %279 = math.exp %278 : vector<8x128xf32>
    %cst_118 = arith.constant 1.000000e+00 : f32
    %280 = vector.broadcast %cst_118 : f32 to vector<8x128xf32>
    %281 = arith.addf %280, %279 : vector<8x128xf32>
    %282 = arith.divf %280, %281 : vector<8x128xf32>
    %283 = vector.broadcast %264 : vector<1x128xf32> to vector<8x128xf32>
    %284 = arith.addf %268, %283 : vector<8x128xf32>
    %285 = arith.mulf %275, %284 : vector<8x128xf32>
    %286 = arith.addf %263, %285 : vector<8x128xf32>
    %287 = math.tanh %286 : vector<8x128xf32>
    %cst_119 = arith.constant 1.000000e+00 : f32
    %288 = vector.broadcast %cst_119 : f32 to vector<8x128xf32>
    %289 = arith.subf %288, %282 : vector<8x128xf32>
    %290 = arith.mulf %289, %287 : vector<8x128xf32>
    %291 = arith.mulf %282, %183 : vector<8x128xf32>
    %292 = arith.addf %290, %291 : vector<8x128xf32>
    %293 = vector.extract_strided_slice %292 {offsets = [0, 0], sizes = [1, 128], strides = [1, 1]} : vector<8x128xf32> to vector<1x128xf32>
    %c1 = arith.constant 1 : index
    %c0_120 = arith.constant 0 : index
    %294 = vector.load %arg22[%c1, %c0_120] : memref<8x128xf32, #tpu.memory_space<vmem>>, vector<1x128xf32>
    tpu.vector_store %arg22[%c1, %c0_120], %293 {strides = array<i32>} : memref<8x128xf32, #tpu.memory_space<vmem>>, vector<1x128xf32>,
    %c32 = arith.constant 32 : index
    %c0_121 = arith.constant 0 : index
    %295 = vector.load %arg21[%c32, %c0_121] : memref<64x384xf32, #tpu.memory_space<vmem>>, vector<8x384xf32>
    %296 = vector.extract_strided_slice %295 {offsets = [0, 0], sizes = [8, 128], strides = [1, 1]} : vector<8x384xf32> to vector<8x128xf32>
    %297 = vector.extract_strided_slice %295 {offsets = [0, 128], sizes = [8, 128], strides = [1, 1]} : vector<8x384xf32> to vector<8x128xf32>
    %298 = vector.extract_strided_slice %295 {offsets = [0, 256], sizes = [8, 128], strides = [1, 1]} : vector<8x384xf32> to vector<8x128xf32>
    %c0_122 = arith.constant 0 : index
    %c0_123 = arith.constant 0 : index
    %299 = vector.load %arg5[%c0_122, %c0_123] : memref<1x128xf32, #tpu.memory_space<vmem>>, vector<1x128xf32>
    %c0_124 = arith.constant 0 : index
    %c0_125 = arith.constant 0 : index
    %300 = vector.load %arg2[%c0_124, %c0_125] : memref<128x256xf32, #tpu.memory_space<vmem>>, vector<128x256xf32>
    %cst_126 = arith.constant dense<0.000000e+00> : vector<8x256xf32>
    %301 = tpu.matmul %218, %300, %cst_126 {dimension_numbers = #tpu.dot_dimension_numbers<[1], [0], [0], [1], [0, 0, 1, 1], [], []>} : vector<8x128xf32>, vector<128x256xf32>, vector<8x256xf32> -> vector<8x256xf32>
    %c0_127 = arith.constant 0 : index
    %c0_128 = arith.constant 0 : index
    %302 = vector.load %arg3[%c0_127, %c0_128] : memref<128x128xf32, #tpu.memory_space<vmem>>, vector<128x128xf32>
    %cst_129 = arith.constant dense<0.000000e+00> : vector<8x128xf32>
    %303 = tpu.matmul %218, %302, %cst_129 {dimension_numbers = #tpu.dot_dimension_numbers<[1], [0], [0], [1], [0, 0, 1, 1], [], []>} : vector<8x128xf32>, vector<128x128xf32>, vector<8x128xf32> -> vector<8x128xf32>
    %304 = vector.extract_strided_slice %301 {offsets = [0, 0], sizes = [8, 128], strides = [1, 1]} : vector<8x256xf32> to vector<8x128xf32>
    %305 = arith.addf %296, %304 : vector<8x128xf32>
    %306 = arith.negf %305 : vector<8x128xf32>
    %307 = math.exp %306 : vector<8x128xf32>
    %cst_130 = arith.constant 1.000000e+00 : f32
    %308 = vector.broadcast %cst_130 : f32 to vector<8x128xf32>
    %309 = arith.addf %308, %307 : vector<8x128xf32>
    %310 = arith.divf %308, %309 : vector<8x128xf32>
    %311 = vector.extract_strided_slice %301 {offsets = [0, 128], sizes = [8, 128], strides = [1, 1]} : vector<8x256xf32> to vector<8x128xf32>
    %312 = arith.addf %297, %311 : vector<8x128xf32>
    %313 = arith.negf %312 : vector<8x128xf32>
    %314 = math.exp %313 : vector<8x128xf32>
    %cst_131 = arith.constant 1.000000e+00 : f32
    %315 = vector.broadcast %cst_131 : f32 to vector<8x128xf32>
    %316 = arith.addf %315, %314 : vector<8x128xf32>
    %317 = arith.divf %315, %316 : vector<8x128xf32>
    %318 = vector.broadcast %299 : vector<1x128xf32> to vector<8x128xf32>
    %319 = arith.addf %303, %318 : vector<8x128xf32>
    %320 = arith.mulf %310, %319 : vector<8x128xf32>
    %321 = arith.addf %298, %320 : vector<8x128xf32>
    %322 = math.tanh %321 : vector<8x128xf32>
    %cst_132 = arith.constant 1.000000e+00 : f32
    %323 = vector.broadcast %cst_132 : f32 to vector<8x128xf32>
    %324 = arith.subf %323, %317 : vector<8x128xf32>
    %325 = arith.mulf %324, %322 : vector<8x128xf32>
    %326 = arith.mulf %317, %218 : vector<8x128xf32>
    %327 = arith.addf %325, %326 : vector<8x128xf32>
    %c0_133 = arith.constant 0 : index
    %c0_134 = arith.constant 0 : index
    %328 = vector.load %arg6[%c0_133, %c0_134] : memref<128x384xf32, #tpu.memory_space<vmem>>, vector<128x384xf32>
    %cst_135 = arith.constant dense<0.000000e+00> : vector<8x384xf32>
    %329 = tpu.matmul %218, %328, %cst_135 {dimension_numbers = #tpu.dot_dimension_numbers<[1], [0], [0], [1], [0, 0, 1, 1], [], []>} : vector<8x128xf32>, vector<128x384xf32>, vector<8x384xf32> -> vector<8x384xf32>
    %c0_136 = arith.constant 0 : index
    %c0_137 = arith.constant 0 : index
    %330 = vector.load %arg9[%c0_136, %c0_137] : memref<1x384xf32, #tpu.memory_space<vmem>>, vector<1x384xf32>
    %331 = vector.broadcast %330 : vector<1x384xf32> to vector<8x384xf32>
    %332 = arith.addf %329, %331 : vector<8x384xf32>
    %333 = vector.extract_strided_slice %332 {offsets = [0, 0], sizes = [8, 128], strides = [1, 1]} : vector<8x384xf32> to vector<8x128xf32>
    %334 = vector.extract_strided_slice %332 {offsets = [0, 128], sizes = [8, 128], strides = [1, 1]} : vector<8x384xf32> to vector<8x128xf32>
    %335 = vector.extract_strided_slice %332 {offsets = [0, 256], sizes = [8, 128], strides = [1, 1]} : vector<8x384xf32> to vector<8x128xf32>
    %c0_138 = arith.constant 0 : index
    %c0_139 = arith.constant 0 : index
    %336 = vector.load %arg10[%c0_138, %c0_139] : memref<1x128xf32, #tpu.memory_space<vmem>>, vector<1x128xf32>
    %c0_140 = arith.constant 0 : index
    %c0_141 = arith.constant 0 : index
    %337 = vector.load %arg7[%c0_140, %c0_141] : memref<128x256xf32, #tpu.memory_space<vmem>>, vector<128x256xf32>
    %cst_142 = arith.constant dense<0.000000e+00> : vector<8x256xf32>
    %338 = tpu.matmul %255, %337, %cst_142 {dimension_numbers = #tpu.dot_dimension_numbers<[1], [0], [0], [1], [0, 0, 1, 1], [], []>} : vector<8x128xf32>, vector<128x256xf32>, vector<8x256xf32> -> vector<8x256xf32>
    %c0_143 = arith.constant 0 : index
    %c0_144 = arith.constant 0 : index
    %339 = vector.load %arg8[%c0_143, %c0_144] : memref<128x128xf32, #tpu.memory_space<vmem>>, vector<128x128xf32>
    %cst_145 = arith.constant dense<0.000000e+00> : vector<8x128xf32>
    %340 = tpu.matmul %255, %339, %cst_145 {dimension_numbers = #tpu.dot_dimension_numbers<[1], [0], [0], [1], [0, 0, 1, 1], [], []>} : vector<8x128xf32>, vector<128x128xf32>, vector<8x128xf32> -> vector<8x128xf32>
    %341 = vector.extract_strided_slice %338 {offsets = [0, 0], sizes = [8, 128], strides = [1, 1]} : vector<8x256xf32> to vector<8x128xf32>
    %342 = arith.addf %333, %341 : vector<8x128xf32>
    %343 = arith.negf %342 : vector<8x128xf32>
    %344 = math.exp %343 : vector<8x128xf32>
    %cst_146 = arith.constant 1.000000e+00 : f32
    %345 = vector.broadcast %cst_146 : f32 to vector<8x128xf32>
    %346 = arith.addf %345, %344 : vector<8x128xf32>
    %347 = arith.divf %345, %346 : vector<8x128xf32>
    %348 = vector.extract_strided_slice %338 {offsets = [0, 128], sizes = [8, 128], strides = [1, 1]} : vector<8x256xf32> to vector<8x128xf32>
    %349 = arith.addf %334, %348 : vector<8x128xf32>
    %350 = arith.negf %349 : vector<8x128xf32>
    %351 = math.exp %350 : vector<8x128xf32>
    %cst_147 = arith.constant 1.000000e+00 : f32
    %352 = vector.broadcast %cst_147 : f32 to vector<8x128xf32>
    %353 = arith.addf %352, %351 : vector<8x128xf32>
    %354 = arith.divf %352, %353 : vector<8x128xf32>
    %355 = vector.broadcast %336 : vector<1x128xf32> to vector<8x128xf32>
    %356 = arith.addf %340, %355 : vector<8x128xf32>
    %357 = arith.mulf %347, %356 : vector<8x128xf32>
    %358 = arith.addf %335, %357 : vector<8x128xf32>
    %359 = math.tanh %358 : vector<8x128xf32>
    %cst_148 = arith.constant 1.000000e+00 : f32
    %360 = vector.broadcast %cst_148 : f32 to vector<8x128xf32>
    %361 = arith.subf %360, %354 : vector<8x128xf32>
    %362 = arith.mulf %361, %359 : vector<8x128xf32>
    %363 = arith.mulf %354, %255 : vector<8x128xf32>
    %364 = arith.addf %362, %363 : vector<8x128xf32>
    %c0_149 = arith.constant 0 : index
    %c0_150 = arith.constant 0 : index
    %365 = vector.load %arg11[%c0_149, %c0_150] : memref<128x384xf32, #tpu.memory_space<vmem>>, vector<128x384xf32>
    %cst_151 = arith.constant dense<0.000000e+00> : vector<8x384xf32>
    %366 = tpu.matmul %255, %365, %cst_151 {dimension_numbers = #tpu.dot_dimension_numbers<[1], [0], [0], [1], [0, 0, 1, 1], [], []>} : vector<8x128xf32>, vector<128x384xf32>, vector<8x384xf32> -> vector<8x384xf32>
    %c0_152 = arith.constant 0 : index
    %c0_153 = arith.constant 0 : index
    %367 = vector.load %arg14[%c0_152, %c0_153] : memref<1x384xf32, #tpu.memory_space<vmem>>, vector<1x384xf32>
    %368 = vector.broadcast %367 : vector<1x384xf32> to vector<8x384xf32>
    %369 = arith.addf %366, %368 : vector<8x384xf32>
    %370 = vector.extract_strided_slice %369 {offsets = [0, 0], sizes = [8, 128], strides = [1, 1]} : vector<8x384xf32> to vector<8x128xf32>
    %371 = vector.extract_strided_slice %369 {offsets = [0, 128], sizes = [8, 128], strides = [1, 1]} : vector<8x384xf32> to vector<8x128xf32>
    %372 = vector.extract_strided_slice %369 {offsets = [0, 256], sizes = [8, 128], strides = [1, 1]} : vector<8x384xf32> to vector<8x128xf32>
    %c0_154 = arith.constant 0 : index
    %c0_155 = arith.constant 0 : index
    %373 = vector.load %arg15[%c0_154, %c0_155] : memref<1x128xf32, #tpu.memory_space<vmem>>, vector<1x128xf32>
    %c0_156 = arith.constant 0 : index
    %c0_157 = arith.constant 0 : index
    %374 = vector.load %arg12[%c0_156, %c0_157] : memref<128x256xf32, #tpu.memory_space<vmem>>, vector<128x256xf32>
    %cst_158 = arith.constant dense<0.000000e+00> : vector<8x256xf32>
    %375 = tpu.matmul %292, %374, %cst_158 {dimension_numbers = #tpu.dot_dimension_numbers<[1], [0], [0], [1], [0, 0, 1, 1], [], []>} : vector<8x128xf32>, vector<128x256xf32>, vector<8x256xf32> -> vector<8x256xf32>
    %c0_159 = arith.constant 0 : index
    %c0_160 = arith.constant 0 : index
    %376 = vector.load %arg13[%c0_159, %c0_160] : memref<128x128xf32, #tpu.memory_space<vmem>>, vector<128x128xf32>
    %cst_161 = arith.constant dense<0.000000e+00> : vector<8x128xf32>
    %377 = tpu.matmul %292, %376, %cst_161 {dimension_numbers = #tpu.dot_dimension_numbers<[1], [0], [0], [1], [0, 0, 1, 1], [], []>} : vector<8x128xf32>, vector<128x128xf32>, vector<8x128xf32> -> vector<8x128xf32>
    %378 = vector.extract_strided_slice %375 {offsets = [0, 0], sizes = [8, 128], strides = [1, 1]} : vector<8x256xf32> to vector<8x128xf32>
    %379 = arith.addf %370, %378 : vector<8x128xf32>
    %380 = arith.negf %379 : vector<8x128xf32>
    %381 = math.exp %380 : vector<8x128xf32>
    %cst_162 = arith.constant 1.000000e+00 : f32
    %382 = vector.broadcast %cst_162 : f32 to vector<8x128xf32>
    %383 = arith.addf %382, %381 : vector<8x128xf32>
    %384 = arith.divf %382, %383 : vector<8x128xf32>
    %385 = vector.extract_strided_slice %375 {offsets = [0, 128], sizes = [8, 128], strides = [1, 1]} : vector<8x256xf32> to vector<8x128xf32>
    %386 = arith.addf %371, %385 : vector<8x128xf32>
    %387 = arith.negf %386 : vector<8x128xf32>
    %388 = math.exp %387 : vector<8x128xf32>
    %cst_163 = arith.constant 1.000000e+00 : f32
    %389 = vector.broadcast %cst_163 : f32 to vector<8x128xf32>
    %390 = arith.addf %389, %388 : vector<8x128xf32>
    %391 = arith.divf %389, %390 : vector<8x128xf32>
    %392 = vector.broadcast %373 : vector<1x128xf32> to vector<8x128xf32>
    %393 = arith.addf %377, %392 : vector<8x128xf32>
    %394 = arith.mulf %384, %393 : vector<8x128xf32>
    %395 = arith.addf %372, %394 : vector<8x128xf32>
    %396 = math.tanh %395 : vector<8x128xf32>
    %cst_164 = arith.constant 1.000000e+00 : f32
    %397 = vector.broadcast %cst_164 : f32 to vector<8x128xf32>
    %398 = arith.subf %397, %391 : vector<8x128xf32>
    %399 = arith.mulf %398, %396 : vector<8x128xf32>
    %400 = arith.mulf %391, %292 : vector<8x128xf32>
    %401 = arith.addf %399, %400 : vector<8x128xf32>
    %402 = vector.extract_strided_slice %401 {offsets = [0, 0], sizes = [1, 128], strides = [1, 1]} : vector<8x128xf32> to vector<1x128xf32>
    %c2 = arith.constant 2 : index
    %c0_165 = arith.constant 0 : index
    %403 = vector.load %arg22[%c2, %c0_165] : memref<8x128xf32, #tpu.memory_space<vmem>>, vector<1x128xf32>
    tpu.vector_store %arg22[%c2, %c0_165], %402 {strides = array<i32>} : memref<8x128xf32, #tpu.memory_space<vmem>>, vector<1x128xf32>,
    %c40 = arith.constant 40 : index
    %c0_166 = arith.constant 0 : index
    %404 = vector.load %arg21[%c40, %c0_166] : memref<64x384xf32, #tpu.memory_space<vmem>>, vector<8x384xf32>
    %405 = vector.extract_strided_slice %404 {offsets = [0, 0], sizes = [8, 128], strides = [1, 1]} : vector<8x384xf32> to vector<8x128xf32>
    %406 = vector.extract_strided_slice %404 {offsets = [0, 128], sizes = [8, 128], strides = [1, 1]} : vector<8x384xf32> to vector<8x128xf32>
    %407 = vector.extract_strided_slice %404 {offsets = [0, 256], sizes = [8, 128], strides = [1, 1]} : vector<8x384xf32> to vector<8x128xf32>
    %c0_167 = arith.constant 0 : index
    %c0_168 = arith.constant 0 : index
    %408 = vector.load %arg5[%c0_167, %c0_168] : memref<1x128xf32, #tpu.memory_space<vmem>>, vector<1x128xf32>
    %c0_169 = arith.constant 0 : index
    %c0_170 = arith.constant 0 : index
    %409 = vector.load %arg2[%c0_169, %c0_170] : memref<128x256xf32, #tpu.memory_space<vmem>>, vector<128x256xf32>
    %cst_171 = arith.constant dense<0.000000e+00> : vector<8x256xf32>
    %410 = tpu.matmul %327, %409, %cst_171 {dimension_numbers = #tpu.dot_dimension_numbers<[1], [0], [0], [1], [0, 0, 1, 1], [], []>} : vector<8x128xf32>, vector<128x256xf32>, vector<8x256xf32> -> vector<8x256xf32>
    %c0_172 = arith.constant 0 : index
    %c0_173 = arith.constant 0 : index
    %411 = vector.load %arg3[%c0_172, %c0_173] : memref<128x128xf32, #tpu.memory_space<vmem>>, vector<128x128xf32>
    %cst_174 = arith.constant dense<0.000000e+00> : vector<8x128xf32>
    %412 = tpu.matmul %327, %411, %cst_174 {dimension_numbers = #tpu.dot_dimension_numbers<[1], [0], [0], [1], [0, 0, 1, 1], [], []>} : vector<8x128xf32>, vector<128x128xf32>, vector<8x128xf32> -> vector<8x128xf32>
    %413 = vector.extract_strided_slice %410 {offsets = [0, 0], sizes = [8, 128], strides = [1, 1]} : vector<8x256xf32> to vector<8x128xf32>
    %414 = arith.addf %405, %413 : vector<8x128xf32>
    %415 = arith.negf %414 : vector<8x128xf32>
    %416 = math.exp %415 : vector<8x128xf32>
    %cst_175 = arith.constant 1.000000e+00 : f32
    %417 = vector.broadcast %cst_175 : f32 to vector<8x128xf32>
    %418 = arith.addf %417, %416 : vector<8x128xf32>
    %419 = arith.divf %417, %418 : vector<8x128xf32>
    %420 = vector.extract_strided_slice %410 {offsets = [0, 128], sizes = [8, 128], strides = [1, 1]} : vector<8x256xf32> to vector<8x128xf32>
    %421 = arith.addf %406, %420 : vector<8x128xf32>
    %422 = arith.negf %421 : vector<8x128xf32>
    %423 = math.exp %422 : vector<8x128xf32>
    %cst_176 = arith.constant 1.000000e+00 : f32
    %424 = vector.broadcast %cst_176 : f32 to vector<8x128xf32>
    %425 = arith.addf %424, %423 : vector<8x128xf32>
    %426 = arith.divf %424, %425 : vector<8x128xf32>
    %427 = vector.broadcast %408 : vector<1x128xf32> to vector<8x128xf32>
    %428 = arith.addf %412, %427 : vector<8x128xf32>
    %429 = arith.mulf %419, %428 : vector<8x128xf32>
    %430 = arith.addf %407, %429 : vector<8x128xf32>
    %431 = math.tanh %430 : vector<8x128xf32>
    %cst_177 = arith.constant 1.000000e+00 : f32
    %432 = vector.broadcast %cst_177 : f32 to vector<8x128xf32>
    %433 = arith.subf %432, %426 : vector<8x128xf32>
    %434 = arith.mulf %433, %431 : vector<8x128xf32>
    %435 = arith.mulf %426, %327 : vector<8x128xf32>
    %436 = arith.addf %434, %435 : vector<8x128xf32>
    %c0_178 = arith.constant 0 : index
    %c0_179 = arith.constant 0 : index
    %437 = vector.load %arg6[%c0_178, %c0_179] : memref<128x384xf32, #tpu.memory_space<vmem>>, vector<128x384xf32>
    %cst_180 = arith.constant dense<0.000000e+00> : vector<8x384xf32>
    %438 = tpu.matmul %327, %437, %cst_180 {dimension_numbers = #tpu.dot_dimension_numbers<[1], [0], [0], [1], [0, 0, 1, 1], [], []>} : vector<8x128xf32>, vector<128x384xf32>, vector<8x384xf32> -> vector<8x384xf32>
    %c0_181 = arith.constant 0 : index
    %c0_182 = arith.constant 0 : index
    %439 = vector.load %arg9[%c0_181, %c0_182] : memref<1x384xf32, #tpu.memory_space<vmem>>, vector<1x384xf32>
    %440 = vector.broadcast %439 : vector<1x384xf32> to vector<8x384xf32>
    %441 = arith.addf %438, %440 : vector<8x384xf32>
    %442 = vector.extract_strided_slice %441 {offsets = [0, 0], sizes = [8, 128], strides = [1, 1]} : vector<8x384xf32> to vector<8x128xf32>
    %443 = vector.extract_strided_slice %441 {offsets = [0, 128], sizes = [8, 128], strides = [1, 1]} : vector<8x384xf32> to vector<8x128xf32>
    %444 = vector.extract_strided_slice %441 {offsets = [0, 256], sizes = [8, 128], strides = [1, 1]} : vector<8x384xf32> to vector<8x128xf32>
    %c0_183 = arith.constant 0 : index
    %c0_184 = arith.constant 0 : index
    %445 = vector.load %arg10[%c0_183, %c0_184] : memref<1x128xf32, #tpu.memory_space<vmem>>, vector<1x128xf32>
    %c0_185 = arith.constant 0 : index
    %c0_186 = arith.constant 0 : index
    %446 = vector.load %arg7[%c0_185, %c0_186] : memref<128x256xf32, #tpu.memory_space<vmem>>, vector<128x256xf32>
    %cst_187 = arith.constant dense<0.000000e+00> : vector<8x256xf32>
    %447 = tpu.matmul %364, %446, %cst_187 {dimension_numbers = #tpu.dot_dimension_numbers<[1], [0], [0], [1], [0, 0, 1, 1], [], []>} : vector<8x128xf32>, vector<128x256xf32>, vector<8x256xf32> -> vector<8x256xf32>
    %c0_188 = arith.constant 0 : index
    %c0_189 = arith.constant 0 : index
    %448 = vector.load %arg8[%c0_188, %c0_189] : memref<128x128xf32, #tpu.memory_space<vmem>>, vector<128x128xf32>
    %cst_190 = arith.constant dense<0.000000e+00> : vector<8x128xf32>
    %449 = tpu.matmul %364, %448, %cst_190 {dimension_numbers = #tpu.dot_dimension_numbers<[1], [0], [0], [1], [0, 0, 1, 1], [], []>} : vector<8x128xf32>, vector<128x128xf32>, vector<8x128xf32> -> vector<8x128xf32>
    %450 = vector.extract_strided_slice %447 {offsets = [0, 0], sizes = [8, 128], strides = [1, 1]} : vector<8x256xf32> to vector<8x128xf32>
    %451 = arith.addf %442, %450 : vector<8x128xf32>
    %452 = arith.negf %451 : vector<8x128xf32>
    %453 = math.exp %452 : vector<8x128xf32>
    %cst_191 = arith.constant 1.000000e+00 : f32
    %454 = vector.broadcast %cst_191 : f32 to vector<8x128xf32>
    %455 = arith.addf %454, %453 : vector<8x128xf32>
    %456 = arith.divf %454, %455 : vector<8x128xf32>
    %457 = vector.extract_strided_slice %447 {offsets = [0, 128], sizes = [8, 128], strides = [1, 1]} : vector<8x256xf32> to vector<8x128xf32>
    %458 = arith.addf %443, %457 : vector<8x128xf32>
    %459 = arith.negf %458 : vector<8x128xf32>
    %460 = math.exp %459 : vector<8x128xf32>
    %cst_192 = arith.constant 1.000000e+00 : f32
    %461 = vector.broadcast %cst_192 : f32 to vector<8x128xf32>
    %462 = arith.addf %461, %460 : vector<8x128xf32>
    %463 = arith.divf %461, %462 : vector<8x128xf32>
    %464 = vector.broadcast %445 : vector<1x128xf32> to vector<8x128xf32>
    %465 = arith.addf %449, %464 : vector<8x128xf32>
    %466 = arith.mulf %456, %465 : vector<8x128xf32>
    %467 = arith.addf %444, %466 : vector<8x128xf32>
    %468 = math.tanh %467 : vector<8x128xf32>
    %cst_193 = arith.constant 1.000000e+00 : f32
    %469 = vector.broadcast %cst_193 : f32 to vector<8x128xf32>
    %470 = arith.subf %469, %463 : vector<8x128xf32>
    %471 = arith.mulf %470, %468 : vector<8x128xf32>
    %472 = arith.mulf %463, %364 : vector<8x128xf32>
    %473 = arith.addf %471, %472 : vector<8x128xf32>
    %c0_194 = arith.constant 0 : index
    %c0_195 = arith.constant 0 : index
    %474 = vector.load %arg11[%c0_194, %c0_195] : memref<128x384xf32, #tpu.memory_space<vmem>>, vector<128x384xf32>
    %cst_196 = arith.constant dense<0.000000e+00> : vector<8x384xf32>
    %475 = tpu.matmul %364, %474, %cst_196 {dimension_numbers = #tpu.dot_dimension_numbers<[1], [0], [0], [1], [0, 0, 1, 1], [], []>} : vector<8x128xf32>, vector<128x384xf32>, vector<8x384xf32> -> vector<8x384xf32>
    %c0_197 = arith.constant 0 : index
    %c0_198 = arith.constant 0 : index
    %476 = vector.load %arg14[%c0_197, %c0_198] : memref<1x384xf32, #tpu.memory_space<vmem>>, vector<1x384xf32>
    %477 = vector.broadcast %476 : vector<1x384xf32> to vector<8x384xf32>
    %478 = arith.addf %475, %477 : vector<8x384xf32>
    %479 = vector.extract_strided_slice %478 {offsets = [0, 0], sizes = [8, 128], strides = [1, 1]} : vector<8x384xf32> to vector<8x128xf32>
    %480 = vector.extract_strided_slice %478 {offsets = [0, 128], sizes = [8, 128], strides = [1, 1]} : vector<8x384xf32> to vector<8x128xf32>
    %481 = vector.extract_strided_slice %478 {offsets = [0, 256], sizes = [8, 128], strides = [1, 1]} : vector<8x384xf32> to vector<8x128xf32>
    %c0_199 = arith.constant 0 : index
    %c0_200 = arith.constant 0 : index
    %482 = vector.load %arg15[%c0_199, %c0_200] : memref<1x128xf32, #tpu.memory_space<vmem>>, vector<1x128xf32>
    %c0_201 = arith.constant 0 : index
    %c0_202 = arith.constant 0 : index
    %483 = vector.load %arg12[%c0_201, %c0_202] : memref<128x256xf32, #tpu.memory_space<vmem>>, vector<128x256xf32>
    %cst_203 = arith.constant dense<0.000000e+00> : vector<8x256xf32>
    %484 = tpu.matmul %401, %483, %cst_203 {dimension_numbers = #tpu.dot_dimension_numbers<[1], [0], [0], [1], [0, 0, 1, 1], [], []>} : vector<8x128xf32>, vector<128x256xf32>, vector<8x256xf32> -> vector<8x256xf32>
    %c0_204 = arith.constant 0 : index
    %c0_205 = arith.constant 0 : index
    %485 = vector.load %arg13[%c0_204, %c0_205] : memref<128x128xf32, #tpu.memory_space<vmem>>, vector<128x128xf32>
    %cst_206 = arith.constant dense<0.000000e+00> : vector<8x128xf32>
    %486 = tpu.matmul %401, %485, %cst_206 {dimension_numbers = #tpu.dot_dimension_numbers<[1], [0], [0], [1], [0, 0, 1, 1], [], []>} : vector<8x128xf32>, vector<128x128xf32>, vector<8x128xf32> -> vector<8x128xf32>
    %487 = vector.extract_strided_slice %484 {offsets = [0, 0], sizes = [8, 128], strides = [1, 1]} : vector<8x256xf32> to vector<8x128xf32>
    %488 = arith.addf %479, %487 : vector<8x128xf32>
    %489 = arith.negf %488 : vector<8x128xf32>
    %490 = math.exp %489 : vector<8x128xf32>
    %cst_207 = arith.constant 1.000000e+00 : f32
    %491 = vector.broadcast %cst_207 : f32 to vector<8x128xf32>
    %492 = arith.addf %491, %490 : vector<8x128xf32>
    %493 = arith.divf %491, %492 : vector<8x128xf32>
    %494 = vector.extract_strided_slice %484 {offsets = [0, 128], sizes = [8, 128], strides = [1, 1]} : vector<8x256xf32> to vector<8x128xf32>
    %495 = arith.addf %480, %494 : vector<8x128xf32>
    %496 = arith.negf %495 : vector<8x128xf32>
    %497 = math.exp %496 : vector<8x128xf32>
    %cst_208 = arith.constant 1.000000e+00 : f32
    %498 = vector.broadcast %cst_208 : f32 to vector<8x128xf32>
    %499 = arith.addf %498, %497 : vector<8x128xf32>
    %500 = arith.divf %498, %499 : vector<8x128xf32>
    %501 = vector.broadcast %482 : vector<1x128xf32> to vector<8x128xf32>
    %502 = arith.addf %486, %501 : vector<8x128xf32>
    %503 = arith.mulf %493, %502 : vector<8x128xf32>
    %504 = arith.addf %481, %503 : vector<8x128xf32>
    %505 = math.tanh %504 : vector<8x128xf32>
    %cst_209 = arith.constant 1.000000e+00 : f32
    %506 = vector.broadcast %cst_209 : f32 to vector<8x128xf32>
    %507 = arith.subf %506, %500 : vector<8x128xf32>
    %508 = arith.mulf %507, %505 : vector<8x128xf32>
    %509 = arith.mulf %500, %401 : vector<8x128xf32>
    %510 = arith.addf %508, %509 : vector<8x128xf32>
    %511 = vector.extract_strided_slice %510 {offsets = [0, 0], sizes = [1, 128], strides = [1, 1]} : vector<8x128xf32> to vector<1x128xf32>
    %c3 = arith.constant 3 : index
    %c0_210 = arith.constant 0 : index
    %512 = vector.load %arg22[%c3, %c0_210] : memref<8x128xf32, #tpu.memory_space<vmem>>, vector<1x128xf32>
    tpu.vector_store %arg22[%c3, %c0_210], %511 {strides = array<i32>} : memref<8x128xf32, #tpu.memory_space<vmem>>, vector<1x128xf32>,
    %c48 = arith.constant 48 : index
    %c0_211 = arith.constant 0 : index
    %513 = vector.load %arg21[%c48, %c0_211] : memref<64x384xf32, #tpu.memory_space<vmem>>, vector<8x384xf32>
    %514 = vector.extract_strided_slice %513 {offsets = [0, 0], sizes = [8, 128], strides = [1, 1]} : vector<8x384xf32> to vector<8x128xf32>
    %515 = vector.extract_strided_slice %513 {offsets = [0, 128], sizes = [8, 128], strides = [1, 1]} : vector<8x384xf32> to vector<8x128xf32>
    %516 = vector.extract_strided_slice %513 {offsets = [0, 256], sizes = [8, 128], strides = [1, 1]} : vector<8x384xf32> to vector<8x128xf32>
    %c0_212 = arith.constant 0 : index
    %c0_213 = arith.constant 0 : index
    %517 = vector.load %arg5[%c0_212, %c0_213] : memref<1x128xf32, #tpu.memory_space<vmem>>, vector<1x128xf32>
    %c0_214 = arith.constant 0 : index
    %c0_215 = arith.constant 0 : index
    %518 = vector.load %arg2[%c0_214, %c0_215] : memref<128x256xf32, #tpu.memory_space<vmem>>, vector<128x256xf32>
    %cst_216 = arith.constant dense<0.000000e+00> : vector<8x256xf32>
    %519 = tpu.matmul %436, %518, %cst_216 {dimension_numbers = #tpu.dot_dimension_numbers<[1], [0], [0], [1], [0, 0, 1, 1], [], []>} : vector<8x128xf32>, vector<128x256xf32>, vector<8x256xf32> -> vector<8x256xf32>
    %c0_217 = arith.constant 0 : index
    %c0_218 = arith.constant 0 : index
    %520 = vector.load %arg3[%c0_217, %c0_218] : memref<128x128xf32, #tpu.memory_space<vmem>>, vector<128x128xf32>
    %cst_219 = arith.constant dense<0.000000e+00> : vector<8x128xf32>
    %521 = tpu.matmul %436, %520, %cst_219 {dimension_numbers = #tpu.dot_dimension_numbers<[1], [0], [0], [1], [0, 0, 1, 1], [], []>} : vector<8x128xf32>, vector<128x128xf32>, vector<8x128xf32> -> vector<8x128xf32>
    %522 = vector.extract_strided_slice %519 {offsets = [0, 0], sizes = [8, 128], strides = [1, 1]} : vector<8x256xf32> to vector<8x128xf32>
    %523 = arith.addf %514, %522 : vector<8x128xf32>
    %524 = arith.negf %523 : vector<8x128xf32>
    %525 = math.exp %524 : vector<8x128xf32>
    %cst_220 = arith.constant 1.000000e+00 : f32
    %526 = vector.broadcast %cst_220 : f32 to vector<8x128xf32>
    %527 = arith.addf %526, %525 : vector<8x128xf32>
    %528 = arith.divf %526, %527 : vector<8x128xf32>
    %529 = vector.extract_strided_slice %519 {offsets = [0, 128], sizes = [8, 128], strides = [1, 1]} : vector<8x256xf32> to vector<8x128xf32>
    %530 = arith.addf %515, %529 : vector<8x128xf32>
    %531 = arith.negf %530 : vector<8x128xf32>
    %532 = math.exp %531 : vector<8x128xf32>
    %cst_221 = arith.constant 1.000000e+00 : f32
    %533 = vector.broadcast %cst_221 : f32 to vector<8x128xf32>
    %534 = arith.addf %533, %532 : vector<8x128xf32>
    %535 = arith.divf %533, %534 : vector<8x128xf32>
    %536 = vector.broadcast %517 : vector<1x128xf32> to vector<8x128xf32>
    %537 = arith.addf %521, %536 : vector<8x128xf32>
    %538 = arith.mulf %528, %537 : vector<8x128xf32>
    %539 = arith.addf %516, %538 : vector<8x128xf32>
    %540 = math.tanh %539 : vector<8x128xf32>
    %cst_222 = arith.constant 1.000000e+00 : f32
    %541 = vector.broadcast %cst_222 : f32 to vector<8x128xf32>
    %542 = arith.subf %541, %535 : vector<8x128xf32>
    %543 = arith.mulf %542, %540 : vector<8x128xf32>
    %544 = arith.mulf %535, %436 : vector<8x128xf32>
    %545 = arith.addf %543, %544 : vector<8x128xf32>
    %c0_223 = arith.constant 0 : index
    %c0_224 = arith.constant 0 : index
    %546 = vector.load %arg6[%c0_223, %c0_224] : memref<128x384xf32, #tpu.memory_space<vmem>>, vector<128x384xf32>
    %cst_225 = arith.constant dense<0.000000e+00> : vector<8x384xf32>
    %547 = tpu.matmul %436, %546, %cst_225 {dimension_numbers = #tpu.dot_dimension_numbers<[1], [0], [0], [1], [0, 0, 1, 1], [], []>} : vector<8x128xf32>, vector<128x384xf32>, vector<8x384xf32> -> vector<8x384xf32>
    %c0_226 = arith.constant 0 : index
    %c0_227 = arith.constant 0 : index
    %548 = vector.load %arg9[%c0_226, %c0_227] : memref<1x384xf32, #tpu.memory_space<vmem>>, vector<1x384xf32>
    %549 = vector.broadcast %548 : vector<1x384xf32> to vector<8x384xf32>
    %550 = arith.addf %547, %549 : vector<8x384xf32>
    %551 = vector.extract_strided_slice %550 {offsets = [0, 0], sizes = [8, 128], strides = [1, 1]} : vector<8x384xf32> to vector<8x128xf32>
    %552 = vector.extract_strided_slice %550 {offsets = [0, 128], sizes = [8, 128], strides = [1, 1]} : vector<8x384xf32> to vector<8x128xf32>
    %553 = vector.extract_strided_slice %550 {offsets = [0, 256], sizes = [8, 128], strides = [1, 1]} : vector<8x384xf32> to vector<8x128xf32>
    %c0_228 = arith.constant 0 : index
    %c0_229 = arith.constant 0 : index
    %554 = vector.load %arg10[%c0_228, %c0_229] : memref<1x128xf32, #tpu.memory_space<vmem>>, vector<1x128xf32>
    %c0_230 = arith.constant 0 : index
    %c0_231 = arith.constant 0 : index
    %555 = vector.load %arg7[%c0_230, %c0_231] : memref<128x256xf32, #tpu.memory_space<vmem>>, vector<128x256xf32>
    %cst_232 = arith.constant dense<0.000000e+00> : vector<8x256xf32>
    %556 = tpu.matmul %473, %555, %cst_232 {dimension_numbers = #tpu.dot_dimension_numbers<[1], [0], [0], [1], [0, 0, 1, 1], [], []>} : vector<8x128xf32>, vector<128x256xf32>, vector<8x256xf32> -> vector<8x256xf32>
    %c0_233 = arith.constant 0 : index
    %c0_234 = arith.constant 0 : index
    %557 = vector.load %arg8[%c0_233, %c0_234] : memref<128x128xf32, #tpu.memory_space<vmem>>, vector<128x128xf32>
    %cst_235 = arith.constant dense<0.000000e+00> : vector<8x128xf32>
    %558 = tpu.matmul %473, %557, %cst_235 {dimension_numbers = #tpu.dot_dimension_numbers<[1], [0], [0], [1], [0, 0, 1, 1], [], []>} : vector<8x128xf32>, vector<128x128xf32>, vector<8x128xf32> -> vector<8x128xf32>
    %559 = vector.extract_strided_slice %556 {offsets = [0, 0], sizes = [8, 128], strides = [1, 1]} : vector<8x256xf32> to vector<8x128xf32>
    %560 = arith.addf %551, %559 : vector<8x128xf32>
    %561 = arith.negf %560 : vector<8x128xf32>
    %562 = math.exp %561 : vector<8x128xf32>
    %cst_236 = arith.constant 1.000000e+00 : f32
    %563 = vector.broadcast %cst_236 : f32 to vector<8x128xf32>
    %564 = arith.addf %563, %562 : vector<8x128xf32>
    %565 = arith.divf %563, %564 : vector<8x128xf32>
    %566 = vector.extract_strided_slice %556 {offsets = [0, 128], sizes = [8, 128], strides = [1, 1]} : vector<8x256xf32> to vector<8x128xf32>
    %567 = arith.addf %552, %566 : vector<8x128xf32>
    %568 = arith.negf %567 : vector<8x128xf32>
    %569 = math.exp %568 : vector<8x128xf32>
    %cst_237 = arith.constant 1.000000e+00 : f32
    %570 = vector.broadcast %cst_237 : f32 to vector<8x128xf32>
    %571 = arith.addf %570, %569 : vector<8x128xf32>
    %572 = arith.divf %570, %571 : vector<8x128xf32>
    %573 = vector.broadcast %554 : vector<1x128xf32> to vector<8x128xf32>
    %574 = arith.addf %558, %573 : vector<8x128xf32>
    %575 = arith.mulf %565, %574 : vector<8x128xf32>
    %576 = arith.addf %553, %575 : vector<8x128xf32>
    %577 = math.tanh %576 : vector<8x128xf32>
    %cst_238 = arith.constant 1.000000e+00 : f32
    %578 = vector.broadcast %cst_238 : f32 to vector<8x128xf32>
    %579 = arith.subf %578, %572 : vector<8x128xf32>
    %580 = arith.mulf %579, %577 : vector<8x128xf32>
    %581 = arith.mulf %572, %473 : vector<8x128xf32>
    %582 = arith.addf %580, %581 : vector<8x128xf32>
    %c0_239 = arith.constant 0 : index
    %c0_240 = arith.constant 0 : index
    %583 = vector.load %arg11[%c0_239, %c0_240] : memref<128x384xf32, #tpu.memory_space<vmem>>, vector<128x384xf32>
    %cst_241 = arith.constant dense<0.000000e+00> : vector<8x384xf32>
    %584 = tpu.matmul %473, %583, %cst_241 {dimension_numbers = #tpu.dot_dimension_numbers<[1], [0], [0], [1], [0, 0, 1, 1], [], []>} : vector<8x128xf32>, vector<128x384xf32>, vector<8x384xf32> -> vector<8x384xf32>
    %c0_242 = arith.constant 0 : index
    %c0_243 = arith.constant 0 : index
    %585 = vector.load %arg14[%c0_242, %c0_243] : memref<1x384xf32, #tpu.memory_space<vmem>>, vector<1x384xf32>
    %586 = vector.broadcast %585 : vector<1x384xf32> to vector<8x384xf32>
    %587 = arith.addf %584, %586 : vector<8x384xf32>
    %588 = vector.extract_strided_slice %587 {offsets = [0, 0], sizes = [8, 128], strides = [1, 1]} : vector<8x384xf32> to vector<8x128xf32>
    %589 = vector.extract_strided_slice %587 {offsets = [0, 128], sizes = [8, 128], strides = [1, 1]} : vector<8x384xf32> to vector<8x128xf32>
    %590 = vector.extract_strided_slice %587 {offsets = [0, 256], sizes = [8, 128], strides = [1, 1]} : vector<8x384xf32> to vector<8x128xf32>
    %c0_244 = arith.constant 0 : index
    %c0_245 = arith.constant 0 : index
    %591 = vector.load %arg15[%c0_244, %c0_245] : memref<1x128xf32, #tpu.memory_space<vmem>>, vector<1x128xf32>
    %c0_246 = arith.constant 0 : index
    %c0_247 = arith.constant 0 : index
    %592 = vector.load %arg12[%c0_246, %c0_247] : memref<128x256xf32, #tpu.memory_space<vmem>>, vector<128x256xf32>
    %cst_248 = arith.constant dense<0.000000e+00> : vector<8x256xf32>
    %593 = tpu.matmul %510, %592, %cst_248 {dimension_numbers = #tpu.dot_dimension_numbers<[1], [0], [0], [1], [0, 0, 1, 1], [], []>} : vector<8x128xf32>, vector<128x256xf32>, vector<8x256xf32> -> vector<8x256xf32>
    %c0_249 = arith.constant 0 : index
    %c0_250 = arith.constant 0 : index
    %594 = vector.load %arg13[%c0_249, %c0_250] : memref<128x128xf32, #tpu.memory_space<vmem>>, vector<128x128xf32>
    %cst_251 = arith.constant dense<0.000000e+00> : vector<8x128xf32>
    %595 = tpu.matmul %510, %594, %cst_251 {dimension_numbers = #tpu.dot_dimension_numbers<[1], [0], [0], [1], [0, 0, 1, 1], [], []>} : vector<8x128xf32>, vector<128x128xf32>, vector<8x128xf32> -> vector<8x128xf32>
    %596 = vector.extract_strided_slice %593 {offsets = [0, 0], sizes = [8, 128], strides = [1, 1]} : vector<8x256xf32> to vector<8x128xf32>
    %597 = arith.addf %588, %596 : vector<8x128xf32>
    %598 = arith.negf %597 : vector<8x128xf32>
    %599 = math.exp %598 : vector<8x128xf32>
    %cst_252 = arith.constant 1.000000e+00 : f32
    %600 = vector.broadcast %cst_252 : f32 to vector<8x128xf32>
    %601 = arith.addf %600, %599 : vector<8x128xf32>
    %602 = arith.divf %600, %601 : vector<8x128xf32>
    %603 = vector.extract_strided_slice %593 {offsets = [0, 128], sizes = [8, 128], strides = [1, 1]} : vector<8x256xf32> to vector<8x128xf32>
    %604 = arith.addf %589, %603 : vector<8x128xf32>
    %605 = arith.negf %604 : vector<8x128xf32>
    %606 = math.exp %605 : vector<8x128xf32>
    %cst_253 = arith.constant 1.000000e+00 : f32
    %607 = vector.broadcast %cst_253 : f32 to vector<8x128xf32>
    %608 = arith.addf %607, %606 : vector<8x128xf32>
    %609 = arith.divf %607, %608 : vector<8x128xf32>
    %610 = vector.broadcast %591 : vector<1x128xf32> to vector<8x128xf32>
    %611 = arith.addf %595, %610 : vector<8x128xf32>
    %612 = arith.mulf %602, %611 : vector<8x128xf32>
    %613 = arith.addf %590, %612 : vector<8x128xf32>
    %614 = math.tanh %613 : vector<8x128xf32>
    %cst_254 = arith.constant 1.000000e+00 : f32
    %615 = vector.broadcast %cst_254 : f32 to vector<8x128xf32>
    %616 = arith.subf %615, %609 : vector<8x128xf32>
    %617 = arith.mulf %616, %614 : vector<8x128xf32>
    %618 = arith.mulf %609, %510 : vector<8x128xf32>
    %619 = arith.addf %617, %618 : vector<8x128xf32>
    %620 = vector.extract_strided_slice %619 {offsets = [0, 0], sizes = [1, 128], strides = [1, 1]} : vector<8x128xf32> to vector<1x128xf32>
    %c4 = arith.constant 4 : index
    %c0_255 = arith.constant 0 : index
    %621 = vector.load %arg22[%c4, %c0_255] : memref<8x128xf32, #tpu.memory_space<vmem>>, vector<1x128xf32>
    tpu.vector_store %arg22[%c4, %c0_255], %620 {strides = array<i32>} : memref<8x128xf32, #tpu.memory_space<vmem>>, vector<1x128xf32>,
    %c56 = arith.constant 56 : index
    %c0_256 = arith.constant 0 : index
    %622 = vector.load %arg21[%c56, %c0_256] : memref<64x384xf32, #tpu.memory_space<vmem>>, vector<8x384xf32>
    %623 = vector.extract_strided_slice %622 {offsets = [0, 0], sizes = [8, 128], strides = [1, 1]} : vector<8x384xf32> to vector<8x128xf32>
    %624 = vector.extract_strided_slice %622 {offsets = [0, 128], sizes = [8, 128], strides = [1, 1]} : vector<8x384xf32> to vector<8x128xf32>
    %625 = vector.extract_strided_slice %622 {offsets = [0, 256], sizes = [8, 128], strides = [1, 1]} : vector<8x384xf32> to vector<8x128xf32>
    %c0_257 = arith.constant 0 : index
    %c0_258 = arith.constant 0 : index
    %626 = vector.load %arg5[%c0_257, %c0_258] : memref<1x128xf32, #tpu.memory_space<vmem>>, vector<1x128xf32>
    %c0_259 = arith.constant 0 : index
    %c0_260 = arith.constant 0 : index
    %627 = vector.load %arg2[%c0_259, %c0_260] : memref<128x256xf32, #tpu.memory_space<vmem>>, vector<128x256xf32>
    %cst_261 = arith.constant dense<0.000000e+00> : vector<8x256xf32>
    %628 = tpu.matmul %545, %627, %cst_261 {dimension_numbers = #tpu.dot_dimension_numbers<[1], [0], [0], [1], [0, 0, 1, 1], [], []>} : vector<8x128xf32>, vector<128x256xf32>, vector<8x256xf32> -> vector<8x256xf32>
    %c0_262 = arith.constant 0 : index
    %c0_263 = arith.constant 0 : index
    %629 = vector.load %arg3[%c0_262, %c0_263] : memref<128x128xf32, #tpu.memory_space<vmem>>, vector<128x128xf32>
    %cst_264 = arith.constant dense<0.000000e+00> : vector<8x128xf32>
    %630 = tpu.matmul %545, %629, %cst_264 {dimension_numbers = #tpu.dot_dimension_numbers<[1], [0], [0], [1], [0, 0, 1, 1], [], []>} : vector<8x128xf32>, vector<128x128xf32>, vector<8x128xf32> -> vector<8x128xf32>
    %631 = vector.extract_strided_slice %628 {offsets = [0, 0], sizes = [8, 128], strides = [1, 1]} : vector<8x256xf32> to vector<8x128xf32>
    %632 = arith.addf %623, %631 : vector<8x128xf32>
    %633 = arith.negf %632 : vector<8x128xf32>
    %634 = math.exp %633 : vector<8x128xf32>
    %cst_265 = arith.constant 1.000000e+00 : f32
    %635 = vector.broadcast %cst_265 : f32 to vector<8x128xf32>
    %636 = arith.addf %635, %634 : vector<8x128xf32>
    %637 = arith.divf %635, %636 : vector<8x128xf32>
    %638 = vector.extract_strided_slice %628 {offsets = [0, 128], sizes = [8, 128], strides = [1, 1]} : vector<8x256xf32> to vector<8x128xf32>
    %639 = arith.addf %624, %638 : vector<8x128xf32>
    %640 = arith.negf %639 : vector<8x128xf32>
    %641 = math.exp %640 : vector<8x128xf32>
    %cst_266 = arith.constant 1.000000e+00 : f32
    %642 = vector.broadcast %cst_266 : f32 to vector<8x128xf32>
    %643 = arith.addf %642, %641 : vector<8x128xf32>
    %644 = arith.divf %642, %643 : vector<8x128xf32>
    %645 = vector.broadcast %626 : vector<1x128xf32> to vector<8x128xf32>
    %646 = arith.addf %630, %645 : vector<8x128xf32>
    %647 = arith.mulf %637, %646 : vector<8x128xf32>
    %648 = arith.addf %625, %647 : vector<8x128xf32>
    %649 = math.tanh %648 : vector<8x128xf32>
    %cst_267 = arith.constant 1.000000e+00 : f32
    %650 = vector.broadcast %cst_267 : f32 to vector<8x128xf32>
    %651 = arith.subf %650, %644 : vector<8x128xf32>
    %652 = arith.mulf %651, %649 : vector<8x128xf32>
    %653 = arith.mulf %644, %545 : vector<8x128xf32>
    %654 = arith.addf %652, %653 : vector<8x128xf32>
    %c0_268 = arith.constant 0 : index
    %c0_269 = arith.constant 0 : index
    %655 = vector.load %arg6[%c0_268, %c0_269] : memref<128x384xf32, #tpu.memory_space<vmem>>, vector<128x384xf32>
    %cst_270 = arith.constant dense<0.000000e+00> : vector<8x384xf32>
    %656 = tpu.matmul %545, %655, %cst_270 {dimension_numbers = #tpu.dot_dimension_numbers<[1], [0], [0], [1], [0, 0, 1, 1], [], []>} : vector<8x128xf32>, vector<128x384xf32>, vector<8x384xf32> -> vector<8x384xf32>
    %c0_271 = arith.constant 0 : index
    %c0_272 = arith.constant 0 : index
    %657 = vector.load %arg9[%c0_271, %c0_272] : memref<1x384xf32, #tpu.memory_space<vmem>>, vector<1x384xf32>
    %658 = vector.broadcast %657 : vector<1x384xf32> to vector<8x384xf32>
    %659 = arith.addf %656, %658 : vector<8x384xf32>
    %660 = vector.extract_strided_slice %659 {offsets = [0, 0], sizes = [8, 128], strides = [1, 1]} : vector<8x384xf32> to vector<8x128xf32>
    %661 = vector.extract_strided_slice %659 {offsets = [0, 128], sizes = [8, 128], strides = [1, 1]} : vector<8x384xf32> to vector<8x128xf32>
    %662 = vector.extract_strided_slice %659 {offsets = [0, 256], sizes = [8, 128], strides = [1, 1]} : vector<8x384xf32> to vector<8x128xf32>
    %c0_273 = arith.constant 0 : index
    %c0_274 = arith.constant 0 : index
    %663 = vector.load %arg10[%c0_273, %c0_274] : memref<1x128xf32, #tpu.memory_space<vmem>>, vector<1x128xf32>
    %c0_275 = arith.constant 0 : index
    %c0_276 = arith.constant 0 : index
    %664 = vector.load %arg7[%c0_275, %c0_276] : memref<128x256xf32, #tpu.memory_space<vmem>>, vector<128x256xf32>
    %cst_277 = arith.constant dense<0.000000e+00> : vector<8x256xf32>
    %665 = tpu.matmul %582, %664, %cst_277 {dimension_numbers = #tpu.dot_dimension_numbers<[1], [0], [0], [1], [0, 0, 1, 1], [], []>} : vector<8x128xf32>, vector<128x256xf32>, vector<8x256xf32> -> vector<8x256xf32>
    %c0_278 = arith.constant 0 : index
    %c0_279 = arith.constant 0 : index
    %666 = vector.load %arg8[%c0_278, %c0_279] : memref<128x128xf32, #tpu.memory_space<vmem>>, vector<128x128xf32>
    %cst_280 = arith.constant dense<0.000000e+00> : vector<8x128xf32>
    %667 = tpu.matmul %582, %666, %cst_280 {dimension_numbers = #tpu.dot_dimension_numbers<[1], [0], [0], [1], [0, 0, 1, 1], [], []>} : vector<8x128xf32>, vector<128x128xf32>, vector<8x128xf32> -> vector<8x128xf32>
    %668 = vector.extract_strided_slice %665 {offsets = [0, 0], sizes = [8, 128], strides = [1, 1]} : vector<8x256xf32> to vector<8x128xf32>
    %669 = arith.addf %660, %668 : vector<8x128xf32>
    %670 = arith.negf %669 : vector<8x128xf32>
    %671 = math.exp %670 : vector<8x128xf32>
    %cst_281 = arith.constant 1.000000e+00 : f32
    %672 = vector.broadcast %cst_281 : f32 to vector<8x128xf32>
    %673 = arith.addf %672, %671 : vector<8x128xf32>
    %674 = arith.divf %672, %673 : vector<8x128xf32>
    %675 = vector.extract_strided_slice %665 {offsets = [0, 128], sizes = [8, 128], strides = [1, 1]} : vector<8x256xf32> to vector<8x128xf32>
    %676 = arith.addf %661, %675 : vector<8x128xf32>
    %677 = arith.negf %676 : vector<8x128xf32>
    %678 = math.exp %677 : vector<8x128xf32>
    %cst_282 = arith.constant 1.000000e+00 : f32
    %679 = vector.broadcast %cst_282 : f32 to vector<8x128xf32>
    %680 = arith.addf %679, %678 : vector<8x128xf32>
    %681 = arith.divf %679, %680 : vector<8x128xf32>
    %682 = vector.broadcast %663 : vector<1x128xf32> to vector<8x128xf32>
    %683 = arith.addf %667, %682 : vector<8x128xf32>
    %684 = arith.mulf %674, %683 : vector<8x128xf32>
    %685 = arith.addf %662, %684 : vector<8x128xf32>
    %686 = math.tanh %685 : vector<8x128xf32>
    %cst_283 = arith.constant 1.000000e+00 : f32
    %687 = vector.broadcast %cst_283 : f32 to vector<8x128xf32>
    %688 = arith.subf %687, %681 : vector<8x128xf32>
    %689 = arith.mulf %688, %686 : vector<8x128xf32>
    %690 = arith.mulf %681, %582 : vector<8x128xf32>
    %691 = arith.addf %689, %690 : vector<8x128xf32>
    %c0_284 = arith.constant 0 : index
    %c0_285 = arith.constant 0 : index
    %692 = vector.load %arg11[%c0_284, %c0_285] : memref<128x384xf32, #tpu.memory_space<vmem>>, vector<128x384xf32>
    %cst_286 = arith.constant dense<0.000000e+00> : vector<8x384xf32>
    %693 = tpu.matmul %582, %692, %cst_286 {dimension_numbers = #tpu.dot_dimension_numbers<[1], [0], [0], [1], [0, 0, 1, 1], [], []>} : vector<8x128xf32>, vector<128x384xf32>, vector<8x384xf32> -> vector<8x384xf32>
    %c0_287 = arith.constant 0 : index
    %c0_288 = arith.constant 0 : index
    %694 = vector.load %arg14[%c0_287, %c0_288] : memref<1x384xf32, #tpu.memory_space<vmem>>, vector<1x384xf32>
    %695 = vector.broadcast %694 : vector<1x384xf32> to vector<8x384xf32>
    %696 = arith.addf %693, %695 : vector<8x384xf32>
    %697 = vector.extract_strided_slice %696 {offsets = [0, 0], sizes = [8, 128], strides = [1, 1]} : vector<8x384xf32> to vector<8x128xf32>
    %698 = vector.extract_strided_slice %696 {offsets = [0, 128], sizes = [8, 128], strides = [1, 1]} : vector<8x384xf32> to vector<8x128xf32>
    %699 = vector.extract_strided_slice %696 {offsets = [0, 256], sizes = [8, 128], strides = [1, 1]} : vector<8x384xf32> to vector<8x128xf32>
    %c0_289 = arith.constant 0 : index
    %c0_290 = arith.constant 0 : index
    %700 = vector.load %arg15[%c0_289, %c0_290] : memref<1x128xf32, #tpu.memory_space<vmem>>, vector<1x128xf32>
    %c0_291 = arith.constant 0 : index
    %c0_292 = arith.constant 0 : index
    %701 = vector.load %arg12[%c0_291, %c0_292] : memref<128x256xf32, #tpu.memory_space<vmem>>, vector<128x256xf32>
    %cst_293 = arith.constant dense<0.000000e+00> : vector<8x256xf32>
    %702 = tpu.matmul %619, %701, %cst_293 {dimension_numbers = #tpu.dot_dimension_numbers<[1], [0], [0], [1], [0, 0, 1, 1], [], []>} : vector<8x128xf32>, vector<128x256xf32>, vector<8x256xf32> -> vector<8x256xf32>
    %c0_294 = arith.constant 0 : index
    %c0_295 = arith.constant 0 : index
    %703 = vector.load %arg13[%c0_294, %c0_295] : memref<128x128xf32, #tpu.memory_space<vmem>>, vector<128x128xf32>
    %cst_296 = arith.constant dense<0.000000e+00> : vector<8x128xf32>
    %704 = tpu.matmul %619, %703, %cst_296 {dimension_numbers = #tpu.dot_dimension_numbers<[1], [0], [0], [1], [0, 0, 1, 1], [], []>} : vector<8x128xf32>, vector<128x128xf32>, vector<8x128xf32> -> vector<8x128xf32>
    %705 = vector.extract_strided_slice %702 {offsets = [0, 0], sizes = [8, 128], strides = [1, 1]} : vector<8x256xf32> to vector<8x128xf32>
    %706 = arith.addf %697, %705 : vector<8x128xf32>
    %707 = arith.negf %706 : vector<8x128xf32>
    %708 = math.exp %707 : vector<8x128xf32>
    %cst_297 = arith.constant 1.000000e+00 : f32
    %709 = vector.broadcast %cst_297 : f32 to vector<8x128xf32>
    %710 = arith.addf %709, %708 : vector<8x128xf32>
    %711 = arith.divf %709, %710 : vector<8x128xf32>
    %712 = vector.extract_strided_slice %702 {offsets = [0, 128], sizes = [8, 128], strides = [1, 1]} : vector<8x256xf32> to vector<8x128xf32>
    %713 = arith.addf %698, %712 : vector<8x128xf32>
    %714 = arith.negf %713 : vector<8x128xf32>
    %715 = math.exp %714 : vector<8x128xf32>
    %cst_298 = arith.constant 1.000000e+00 : f32
    %716 = vector.broadcast %cst_298 : f32 to vector<8x128xf32>
    %717 = arith.addf %716, %715 : vector<8x128xf32>
    %718 = arith.divf %716, %717 : vector<8x128xf32>
    %719 = vector.broadcast %700 : vector<1x128xf32> to vector<8x128xf32>
    %720 = arith.addf %704, %719 : vector<8x128xf32>
    %721 = arith.mulf %711, %720 : vector<8x128xf32>
    %722 = arith.addf %699, %721 : vector<8x128xf32>
    %723 = math.tanh %722 : vector<8x128xf32>
    %cst_299 = arith.constant 1.000000e+00 : f32
    %724 = vector.broadcast %cst_299 : f32 to vector<8x128xf32>
    %725 = arith.subf %724, %718 : vector<8x128xf32>
    %726 = arith.mulf %725, %723 : vector<8x128xf32>
    %727 = arith.mulf %718, %619 : vector<8x128xf32>
    %728 = arith.addf %726, %727 : vector<8x128xf32>
    %729 = vector.extract_strided_slice %728 {offsets = [0, 0], sizes = [1, 128], strides = [1, 1]} : vector<8x128xf32> to vector<1x128xf32>
    %c5 = arith.constant 5 : index
    %c0_300 = arith.constant 0 : index
    %730 = vector.load %arg22[%c5, %c0_300] : memref<8x128xf32, #tpu.memory_space<vmem>>, vector<1x128xf32>
    tpu.vector_store %arg22[%c5, %c0_300], %729 {strides = array<i32>} : memref<8x128xf32, #tpu.memory_space<vmem>>, vector<1x128xf32>,
    %c0_301 = arith.constant 0 : index
    %c0_302 = arith.constant 0 : index
    %731 = vector.load %arg6[%c0_301, %c0_302] : memref<128x384xf32, #tpu.memory_space<vmem>>, vector<128x384xf32>
    %cst_303 = arith.constant dense<0.000000e+00> : vector<8x384xf32>
    %732 = tpu.matmul %654, %731, %cst_303 {dimension_numbers = #tpu.dot_dimension_numbers<[1], [0], [0], [1], [0, 0, 1, 1], [], []>} : vector<8x128xf32>, vector<128x384xf32>, vector<8x384xf32> -> vector<8x384xf32>
    %c0_304 = arith.constant 0 : index
    %c0_305 = arith.constant 0 : index
    %733 = vector.load %arg9[%c0_304, %c0_305] : memref<1x384xf32, #tpu.memory_space<vmem>>, vector<1x384xf32>
    %734 = vector.broadcast %733 : vector<1x384xf32> to vector<8x384xf32>
    %735 = arith.addf %732, %734 : vector<8x384xf32>
    %736 = vector.extract_strided_slice %735 {offsets = [0, 0], sizes = [8, 128], strides = [1, 1]} : vector<8x384xf32> to vector<8x128xf32>
    %737 = vector.extract_strided_slice %735 {offsets = [0, 128], sizes = [8, 128], strides = [1, 1]} : vector<8x384xf32> to vector<8x128xf32>
    %738 = vector.extract_strided_slice %735 {offsets = [0, 256], sizes = [8, 128], strides = [1, 1]} : vector<8x384xf32> to vector<8x128xf32>
    %c0_306 = arith.constant 0 : index
    %c0_307 = arith.constant 0 : index
    %739 = vector.load %arg10[%c0_306, %c0_307] : memref<1x128xf32, #tpu.memory_space<vmem>>, vector<1x128xf32>
    %c0_308 = arith.constant 0 : index
    %c0_309 = arith.constant 0 : index
    %740 = vector.load %arg7[%c0_308, %c0_309] : memref<128x256xf32, #tpu.memory_space<vmem>>, vector<128x256xf32>
    %cst_310 = arith.constant dense<0.000000e+00> : vector<8x256xf32>
    %741 = tpu.matmul %691, %740, %cst_310 {dimension_numbers = #tpu.dot_dimension_numbers<[1], [0], [0], [1], [0, 0, 1, 1], [], []>} : vector<8x128xf32>, vector<128x256xf32>, vector<8x256xf32> -> vector<8x256xf32>
    %c0_311 = arith.constant 0 : index
    %c0_312 = arith.constant 0 : index
    %742 = vector.load %arg8[%c0_311, %c0_312] : memref<128x128xf32, #tpu.memory_space<vmem>>, vector<128x128xf32>
    %cst_313 = arith.constant dense<0.000000e+00> : vector<8x128xf32>
    %743 = tpu.matmul %691, %742, %cst_313 {dimension_numbers = #tpu.dot_dimension_numbers<[1], [0], [0], [1], [0, 0, 1, 1], [], []>} : vector<8x128xf32>, vector<128x128xf32>, vector<8x128xf32> -> vector<8x128xf32>
    %744 = vector.extract_strided_slice %741 {offsets = [0, 0], sizes = [8, 128], strides = [1, 1]} : vector<8x256xf32> to vector<8x128xf32>
    %745 = arith.addf %736, %744 : vector<8x128xf32>
    %746 = arith.negf %745 : vector<8x128xf32>
    %747 = math.exp %746 : vector<8x128xf32>
    %cst_314 = arith.constant 1.000000e+00 : f32
    %748 = vector.broadcast %cst_314 : f32 to vector<8x128xf32>
    %749 = arith.addf %748, %747 : vector<8x128xf32>
    %750 = arith.divf %748, %749 : vector<8x128xf32>
    %751 = vector.extract_strided_slice %741 {offsets = [0, 128], sizes = [8, 128], strides = [1, 1]} : vector<8x256xf32> to vector<8x128xf32>
    %752 = arith.addf %737, %751 : vector<8x128xf32>
    %753 = arith.negf %752 : vector<8x128xf32>
    %754 = math.exp %753 : vector<8x128xf32>
    %cst_315 = arith.constant 1.000000e+00 : f32
    %755 = vector.broadcast %cst_315 : f32 to vector<8x128xf32>
    %756 = arith.addf %755, %754 : vector<8x128xf32>
    %757 = arith.divf %755, %756 : vector<8x128xf32>
    %758 = vector.broadcast %739 : vector<1x128xf32> to vector<8x128xf32>
    %759 = arith.addf %743, %758 : vector<8x128xf32>
    %760 = arith.mulf %750, %759 : vector<8x128xf32>
    %761 = arith.addf %738, %760 : vector<8x128xf32>
    %762 = math.tanh %761 : vector<8x128xf32>
    %cst_316 = arith.constant 1.000000e+00 : f32
    %763 = vector.broadcast %cst_316 : f32 to vector<8x128xf32>
    %764 = arith.subf %763, %757 : vector<8x128xf32>
    %765 = arith.mulf %764, %762 : vector<8x128xf32>
    %766 = arith.mulf %757, %691 : vector<8x128xf32>
    %767 = arith.addf %765, %766 : vector<8x128xf32>
    %c0_317 = arith.constant 0 : index
    %c0_318 = arith.constant 0 : index
    %768 = vector.load %arg11[%c0_317, %c0_318] : memref<128x384xf32, #tpu.memory_space<vmem>>, vector<128x384xf32>
    %cst_319 = arith.constant dense<0.000000e+00> : vector<8x384xf32>
    %769 = tpu.matmul %691, %768, %cst_319 {dimension_numbers = #tpu.dot_dimension_numbers<[1], [0], [0], [1], [0, 0, 1, 1], [], []>} : vector<8x128xf32>, vector<128x384xf32>, vector<8x384xf32> -> vector<8x384xf32>
    %c0_320 = arith.constant 0 : index
    %c0_321 = arith.constant 0 : index
    %770 = vector.load %arg14[%c0_320, %c0_321] : memref<1x384xf32, #tpu.memory_space<vmem>>, vector<1x384xf32>
    %771 = vector.broadcast %770 : vector<1x384xf32> to vector<8x384xf32>
    %772 = arith.addf %769, %771 : vector<8x384xf32>
    %773 = vector.extract_strided_slice %772 {offsets = [0, 0], sizes = [8, 128], strides = [1, 1]} : vector<8x384xf32> to vector<8x128xf32>
    %774 = vector.extract_strided_slice %772 {offsets = [0, 128], sizes = [8, 128], strides = [1, 1]} : vector<8x384xf32> to vector<8x128xf32>
    %775 = vector.extract_strided_slice %772 {offsets = [0, 256], sizes = [8, 128], strides = [1, 1]} : vector<8x384xf32> to vector<8x128xf32>
    %c0_322 = arith.constant 0 : index
    %c0_323 = arith.constant 0 : index
    %776 = vector.load %arg15[%c0_322, %c0_323] : memref<1x128xf32, #tpu.memory_space<vmem>>, vector<1x128xf32>
    %c0_324 = arith.constant 0 : index
    %c0_325 = arith.constant 0 : index
    %777 = vector.load %arg12[%c0_324, %c0_325] : memref<128x256xf32, #tpu.memory_space<vmem>>, vector<128x256xf32>
    %cst_326 = arith.constant dense<0.000000e+00> : vector<8x256xf32>
    %778 = tpu.matmul %728, %777, %cst_326 {dimension_numbers = #tpu.dot_dimension_numbers<[1], [0], [0], [1], [0, 0, 1, 1], [], []>} : vector<8x128xf32>, vector<128x256xf32>, vector<8x256xf32> -> vector<8x256xf32>
    %c0_327 = arith.constant 0 : index
    %c0_328 = arith.constant 0 : index
    %779 = vector.load %arg13[%c0_327, %c0_328] : memref<128x128xf32, #tpu.memory_space<vmem>>, vector<128x128xf32>
    %cst_329 = arith.constant dense<0.000000e+00> : vector<8x128xf32>
    %780 = tpu.matmul %728, %779, %cst_329 {dimension_numbers = #tpu.dot_dimension_numbers<[1], [0], [0], [1], [0, 0, 1, 1], [], []>} : vector<8x128xf32>, vector<128x128xf32>, vector<8x128xf32> -> vector<8x128xf32>
    %781 = vector.extract_strided_slice %778 {offsets = [0, 0], sizes = [8, 128], strides = [1, 1]} : vector<8x256xf32> to vector<8x128xf32>
    %782 = arith.addf %773, %781 : vector<8x128xf32>
    %783 = arith.negf %782 : vector<8x128xf32>
    %784 = math.exp %783 : vector<8x128xf32>
    %cst_330 = arith.constant 1.000000e+00 : f32
    %785 = vector.broadcast %cst_330 : f32 to vector<8x128xf32>
    %786 = arith.addf %785, %784 : vector<8x128xf32>
    %787 = arith.divf %785, %786 : vector<8x128xf32>
    %788 = vector.extract_strided_slice %778 {offsets = [0, 128], sizes = [8, 128], strides = [1, 1]} : vector<8x256xf32> to vector<8x128xf32>
    %789 = arith.addf %774, %788 : vector<8x128xf32>
    %790 = arith.negf %789 : vector<8x128xf32>
    %791 = math.exp %790 : vector<8x128xf32>
    %cst_331 = arith.constant 1.000000e+00 : f32
    %792 = vector.broadcast %cst_331 : f32 to vector<8x128xf32>
    %793 = arith.addf %792, %791 : vector<8x128xf32>
    %794 = arith.divf %792, %793 : vector<8x128xf32>
    %795 = vector.broadcast %776 : vector<1x128xf32> to vector<8x128xf32>
    %796 = arith.addf %780, %795 : vector<8x128xf32>
    %797 = arith.mulf %787, %796 : vector<8x128xf32>
    %798 = arith.addf %775, %797 : vector<8x128xf32>
    %799 = math.tanh %798 : vector<8x128xf32>
    %cst_332 = arith.constant 1.000000e+00 : f32
    %800 = vector.broadcast %cst_332 : f32 to vector<8x128xf32>
    %801 = arith.subf %800, %794 : vector<8x128xf32>
    %802 = arith.mulf %801, %799 : vector<8x128xf32>
    %803 = arith.mulf %794, %728 : vector<8x128xf32>
    %804 = arith.addf %802, %803 : vector<8x128xf32>
    %805 = vector.extract_strided_slice %804 {offsets = [0, 0], sizes = [1, 128], strides = [1, 1]} : vector<8x128xf32> to vector<1x128xf32>
    %c6 = arith.constant 6 : index
    %c0_333 = arith.constant 0 : index
    %806 = vector.load %arg22[%c6, %c0_333] : memref<8x128xf32, #tpu.memory_space<vmem>>, vector<1x128xf32>
    tpu.vector_store %arg22[%c6, %c0_333], %805 {strides = array<i32>} : memref<8x128xf32, #tpu.memory_space<vmem>>, vector<1x128xf32>,
    %c0_334 = arith.constant 0 : index
    %c0_335 = arith.constant 0 : index
    %807 = vector.load %arg11[%c0_334, %c0_335] : memref<128x384xf32, #tpu.memory_space<vmem>>, vector<128x384xf32>
    %cst_336 = arith.constant dense<0.000000e+00> : vector<8x384xf32>
    %808 = tpu.matmul %767, %807, %cst_336 {dimension_numbers = #tpu.dot_dimension_numbers<[1], [0], [0], [1], [0, 0, 1, 1], [], []>} : vector<8x128xf32>, vector<128x384xf32>, vector<8x384xf32> -> vector<8x384xf32>
    %c0_337 = arith.constant 0 : index
    %c0_338 = arith.constant 0 : index
    %809 = vector.load %arg14[%c0_337, %c0_338] : memref<1x384xf32, #tpu.memory_space<vmem>>, vector<1x384xf32>
    %810 = vector.broadcast %809 : vector<1x384xf32> to vector<8x384xf32>
    %811 = arith.addf %808, %810 : vector<8x384xf32>
    %812 = vector.extract_strided_slice %811 {offsets = [0, 0], sizes = [8, 128], strides = [1, 1]} : vector<8x384xf32> to vector<8x128xf32>
    %813 = vector.extract_strided_slice %811 {offsets = [0, 128], sizes = [8, 128], strides = [1, 1]} : vector<8x384xf32> to vector<8x128xf32>
    %814 = vector.extract_strided_slice %811 {offsets = [0, 256], sizes = [8, 128], strides = [1, 1]} : vector<8x384xf32> to vector<8x128xf32>
    %c0_339 = arith.constant 0 : index
    %c0_340 = arith.constant 0 : index
    %815 = vector.load %arg15[%c0_339, %c0_340] : memref<1x128xf32, #tpu.memory_space<vmem>>, vector<1x128xf32>
    %c0_341 = arith.constant 0 : index
    %c0_342 = arith.constant 0 : index
    %816 = vector.load %arg12[%c0_341, %c0_342] : memref<128x256xf32, #tpu.memory_space<vmem>>, vector<128x256xf32>
    %cst_343 = arith.constant dense<0.000000e+00> : vector<8x256xf32>
    %817 = tpu.matmul %804, %816, %cst_343 {dimension_numbers = #tpu.dot_dimension_numbers<[1], [0], [0], [1], [0, 0, 1, 1], [], []>} : vector<8x128xf32>, vector<128x256xf32>, vector<8x256xf32> -> vector<8x256xf32>
    %c0_344 = arith.constant 0 : index
    %c0_345 = arith.constant 0 : index
    %818 = vector.load %arg13[%c0_344, %c0_345] : memref<128x128xf32, #tpu.memory_space<vmem>>, vector<128x128xf32>
    %cst_346 = arith.constant dense<0.000000e+00> : vector<8x128xf32>
    %819 = tpu.matmul %804, %818, %cst_346 {dimension_numbers = #tpu.dot_dimension_numbers<[1], [0], [0], [1], [0, 0, 1, 1], [], []>} : vector<8x128xf32>, vector<128x128xf32>, vector<8x128xf32> -> vector<8x128xf32>
    %820 = vector.extract_strided_slice %817 {offsets = [0, 0], sizes = [8, 128], strides = [1, 1]} : vector<8x256xf32> to vector<8x128xf32>
    %821 = arith.addf %812, %820 : vector<8x128xf32>
    %822 = arith.negf %821 : vector<8x128xf32>
    %823 = math.exp %822 : vector<8x128xf32>
    %cst_347 = arith.constant 1.000000e+00 : f32
    %824 = vector.broadcast %cst_347 : f32 to vector<8x128xf32>
    %825 = arith.addf %824, %823 : vector<8x128xf32>
    %826 = arith.divf %824, %825 : vector<8x128xf32>
    %827 = vector.extract_strided_slice %817 {offsets = [0, 128], sizes = [8, 128], strides = [1, 1]} : vector<8x256xf32> to vector<8x128xf32>
    %828 = arith.addf %813, %827 : vector<8x128xf32>
    %829 = arith.negf %828 : vector<8x128xf32>
    %830 = math.exp %829 : vector<8x128xf32>
    %cst_348 = arith.constant 1.000000e+00 : f32
    %831 = vector.broadcast %cst_348 : f32 to vector<8x128xf32>
    %832 = arith.addf %831, %830 : vector<8x128xf32>
    %833 = arith.divf %831, %832 : vector<8x128xf32>
    %834 = vector.broadcast %815 : vector<1x128xf32> to vector<8x128xf32>
    %835 = arith.addf %819, %834 : vector<8x128xf32>
    %836 = arith.mulf %826, %835 : vector<8x128xf32>
    %837 = arith.addf %814, %836 : vector<8x128xf32>
    %838 = math.tanh %837 : vector<8x128xf32>
    %cst_349 = arith.constant 1.000000e+00 : f32
    %839 = vector.broadcast %cst_349 : f32 to vector<8x128xf32>
    %840 = arith.subf %839, %833 : vector<8x128xf32>
    %841 = arith.mulf %840, %838 : vector<8x128xf32>
    %842 = arith.mulf %833, %804 : vector<8x128xf32>
    %843 = arith.addf %841, %842 : vector<8x128xf32>
    %844 = vector.extract_strided_slice %843 {offsets = [0, 0], sizes = [1, 128], strides = [1, 1]} : vector<8x128xf32> to vector<1x128xf32>
    %c7 = arith.constant 7 : index
    %c0_350 = arith.constant 0 : index
    %845 = vector.load %arg22[%c7, %c0_350] : memref<8x128xf32, #tpu.memory_space<vmem>>, vector<1x128xf32>
    tpu.vector_store %arg22[%c7, %c0_350], %844 {strides = array<i32>} : memref<8x128xf32, #tpu.memory_space<vmem>>, vector<1x128xf32>,
    %c0_351 = arith.constant 0 : index
    %c0_352 = arith.constant 0 : index
    %846 = vector.load %arg22[%c0_351, %c0_352] : memref<8x128xf32, #tpu.memory_space<vmem>>, vector<8x128xf32>
    %c0_353 = arith.constant 0 : index
    %c0_354 = arith.constant 0 : index
    %847 = vector.load %arg16[%c0_353, %c0_354] : memref<128x128xf32, #tpu.memory_space<vmem>>, vector<128x128xf32>
    %cst_355 = arith.constant dense<0.000000e+00> : vector<8x128xf32>
    %848 = tpu.matmul %846, %847, %cst_355 {dimension_numbers = #tpu.dot_dimension_numbers<[1], [0], [0], [1], [0, 0, 1, 1], [], []>} : vector<8x128xf32>, vector<128x128xf32>, vector<8x128xf32> -> vector<8x128xf32>
    %c0_356 = arith.constant 0 : index
    %c0_357 = arith.constant 0 : index
    %849 = vector.load %arg17[%c0_356, %c0_357] : memref<1x128xf32, #tpu.memory_space<vmem>>, vector<1x128xf32>
    %850 = vector.broadcast %849 : vector<1x128xf32> to vector<8x128xf32>
    %851 = arith.addf %848, %850 : vector<8x128xf32>
    %852 = math.tanh %851 : vector<8x128xf32>
    %c0_358 = arith.constant 0 : index
    %c0_359 = arith.constant 0 : index
    %853 = vector.load %arg18[%c0_358, %c0_359] : memref<128x128xf32, #tpu.memory_space<vmem>>, vector<128x128xf32>
    %cst_360 = arith.constant dense<0.000000e+00> : vector<8x128xf32>
    %854 = tpu.matmul %852, %853, %cst_360 {dimension_numbers = #tpu.dot_dimension_numbers<[1], [0], [0], [1], [0, 0, 1, 1], [], []>} : vector<8x128xf32>, vector<128x128xf32>, vector<8x128xf32> -> vector<8x128xf32>
    %c0_361 = arith.constant 0 : index
    %c0_362 = arith.constant 0 : index
    %855 = vector.load %arg19[%c0_361, %c0_362] : memref<1x128xf32, #tpu.memory_space<vmem>>, vector<1x128xf32>
    %856 = vector.broadcast %855 : vector<1x128xf32> to vector<8x128xf32>
    %857 = arith.addf %854, %856 : vector<8x128xf32>
    %c0_363 = arith.constant 0 : index
    %c0_364 = arith.constant 0 : index
    %858 = vector.load %arg20[%c0_363, %c0_364] : memref<8x128xf32, #tpu.memory_space<vmem>>, vector<8x128xf32>
    tpu.vector_store %arg20[%c0_363, %c0_364], %857 {strides = array<i32>} : memref<8x128xf32, #tpu.memory_space<vmem>>, vector<8x128xf32>,
    return
  }
}

</mosaic_0001>

<bundles_post_ra>
// kernel: tpu_custom_call.1
= control target key start
LH: loop header
LB: loop body
LE: loop exit
PB: predicated region body
PF: predicated region fallthrough
CT: control target
= control target key end

     0   :  { %s8562_s0 = inlined_call_operand.hbm [shape: f32[64,128], index: 0, kind: input, shape index: {}]   ;;  %s8563_s1 = inlined_call_operand.hbm [shape: f32[128,384], index: 1, kind: input, shape index: {}]   ;;  %s8564_s2 = inlined_call_operand.hbm [shape: f32[128,256], index: 2, kind: input, shape index: {}]   ;;  %s8565_s3 = inlined_call_operand.hbm [shape: f32[128,128], index: 3, kind: input, shape index: {}]   ;;  %s8566_s4 = inlined_call_operand.vmem [shape: f32[1,384], index: 4, kind: input, shape index: {}]   ;;  %s8567_s5 = inlined_call_operand.hbm [shape: f32[1,128], index: 5, kind: input, shape index: {}]   ;;  %s8568_s6 = inlined_call_operand.hbm [shape: f32[128,384], index: 6, kind: input, shape index: {}]   ;;  %s8569_s7 = inlined_call_operand.hbm [shape: f32[128,256], index: 7, kind: input, shape index: {}]   ;;  %s8570_s8 = inlined_call_operand.hbm [shape: f32[128,128], index: 8, kind: input, shape index: {}]   ;;  %s8571_s9 = inlined_call_operand.vmem [shape: f32[1,384], index: 9, kind: input, shape index: {}]   ;;  %s8572_s10 = inlined_call_operand.hbm [shape: f32[1,128], index: 10, kind: input, shape index: {}]   ;;  %s8573_s11 = inlined_call_operand.hbm [shape: f32[128,384], index: 11, kind: input, shape index: {}]   ;;  %s8574_s12 = inlined_call_operand.hbm [shape: f32[128,256], index: 12, kind: input, shape index: {}]   ;;  %s8575_s13 = inlined_call_operand.hbm [shape: f32[128,128], index: 13, kind: input, shape index: {}]   ;;  %s8576_s14 = inlined_call_operand.vmem [shape: f32[1,384], index: 14, kind: input, shape index: {}]   ;;  %s8577_s15 = inlined_call_operand.vmem [shape: f32[1,128], index: 15, kind: input, shape index: {}]   ;;  %s8578_s16 = inlined_call_operand.hbm [shape: f32[128,128], index: 16, kind: input, shape index: {}]   ;;  %s8579_s17 = inlined_call_operand.vmem [shape: f32[1,128], index: 17, kind: input, shape index: {}]   ;;  %s8580_s18 = inlined_call_operand.hbm [shape: f32[128,128], index: 18, kind: input, shape index: {}]   ;;  %s8581_s19 = inlined_call_operand.vmem [shape: f32[1,128], index: 19, kind: input, shape index: {}]   ;;  %s8582_s20 = inlined_call_operand.hbm [shape: f32[8,128], index: 20, kind: output, shape index: {}]  }
   0x1   :  { %8644 = sst [smem:[#allocation67_spill]] %s8562_s0 }
   0x2   :  { %8645 = sst [smem:[#allocation68_spill]] %s8563_s1 }
   0x3   :  { %8646 = sst [smem:[#allocation69_spill]] %s8564_s2 }
   0x4   :  { %8647 = sst [smem:[#allocation70_spill]] %s8565_s3 }
   0x5   :  { %8648 = sst [smem:[#allocation71_spill]] %s8566_s4 }
   0x6   :  { %8649 = sst [smem:[#allocation72_spill]] %s8582_s20 }
   0x7   :  { %25 = vsyncpa [#allocation5], 0 }
   0x8   :  { %26 = vsyncpa [#allocation8], 0 }
   0x9   :  { %27 = vsyncpa [#allocation11], 0 }
   0xa   :  { %28 = vsyncpa [#allocation14], 0 }
   0xb   :  { %29 = vsyncpa [#allocation17], 0 }
   0xc   :  { %30 = vsyncpa [#allocation20], 0 }
   0xd   :  { %31 = vsyncpa [#allocation23], 0 }
   0xe   :  { %32 = vsyncpa [#allocation26], 0  ;;  %s8650_s23 = sld [smem:[#allocation68_spill]] }
  0x14   :  { %s51_s24 = sshll.u32 %s8650_s23, 4  ;;  %s52_s24 = int_to_ptr.hbm [resolvable:$true] %s51_s24 }
  0x15   :  { %33 = vsyncpa [#allocation6], 0  ;;  %s6571_s2 = smov [#allocation7]   ;;  %s6572_s3 = smov 384  }
  0x16   :  { %s53_s25 = sshll.u32 %s6571_s2, 4  ;;  %s6573_s26 = smov 24   ;;  %s54_s25 = int_to_ptr.vmem [resolvable:$true] %s53_s25 }
  0x17   :  { %59 = dma.hbm_to_vmem [thread:$0]  %s52_s24, 6144, %s54_s25, [#allocation8], %s6572_s3, %s6572_s3, %s6573_s26  }
  0x18   :  { %s8651_s4 = sld [smem:[#allocation70_spill]]  ;;  %s6574_s30 = smov [#allocation10]  }
  0x19   :  { %s79_s0 = sshll.u32 %s6574_s30, 4  ;;  %s103_s22 = sshll.u32 %s8568_s6, 4  ;;  %s80_s0 = int_to_ptr.vmem [resolvable:$true] %s79_s0  ;;  %s104_s22 = int_to_ptr.hbm [resolvable:$true] %s103_s22 }
  0x1a   :  { %s6575_s23 = smov 128   ;;  %s6576_s2 = smov 8  }
  0x1b   :  { %s129_s27 = sshll.u32 %s8570_s8, 4  ;;  %s6577_s28 = smov [#allocation13]   ;;  %s130_s27 = int_to_ptr.hbm [resolvable:$true] %s129_s27 }
  0x1c   :  { %s6578_s6 = smov [#allocation16]   ;;  %s155_s20 = sshll.u32 %s8573_s11, 4  ;;  %s156_s20 = int_to_ptr.hbm [resolvable:$true] %s155_s20 }
  0x1d   :  { %s131_s30 = sshll.u32 %s6578_s6, 4  ;;  %s6579_s24 = smov [#allocation19]   ;;  %s132_s30 = int_to_ptr.vmem [resolvable:$true] %s131_s30 }
  0x1e   :  { %s77_s29 = sshll.u32 %s8651_s4, 4  ;;  %s105_s4 = sshll.u32 %s6577_s28, 4  ;;  %s78_s29 = int_to_ptr.hbm [resolvable:$true] %s77_s29  ;;  %s106_s4 = int_to_ptr.vmem [resolvable:$true] %s105_s4 }
  0x1f   :  { %85 = dma.hbm_to_vmem [thread:$0]  %s78_s29, 2048, %s80_s0, [#allocation11], %s6575_s23, %s6575_s23, %s6576_s2  }
  0x20   :  { %111 = dma.hbm_to_vmem [thread:$0]  %s104_s22, 6144, %s106_s4, [#allocation14], %s6572_s3, %s6572_s3, %s6573_s26  }
  0x21   :  { %137 = dma.hbm_to_vmem [thread:$0]  %s130_s27, 2048, %s132_s30, [#allocation17], %s6575_s23, %s6575_s23, %s6576_s2  }
  0x22   :  { %s181_s0 = sshll.u32 %s8575_s13, 4  ;;  %s157_s25 = sshll.u32 %s6579_s24, 4  ;;  %s182_s0 = int_to_ptr.hbm [resolvable:$true] %s181_s0  ;;  %s158_s25 = int_to_ptr.vmem [resolvable:$true] %s157_s25 }
  0x23   :  { %163 = dma.hbm_to_vmem [thread:$0]  %s156_s20, 6144, %s158_s25, [#allocation20], %s6572_s3, %s6572_s3, %s6573_s26  }
  0x24   :  { %s6580_s22 = smov [#allocation22]   ;;  %s8652_s6 = sld [smem:[#allocation67_spill]] }
  0x25   :  { %s183_s11 = sshll.u32 %s6580_s22, 4  ;;  %s8653_s30 = sld [smem:[#allocation69_spill]]  ;;  %s184_s11 = int_to_ptr.vmem [resolvable:$true] %s183_s11 }
  0x26   :  { %189 = dma.hbm_to_vmem [thread:$0]  %s182_s0, 2048, %s184_s11, [#allocation23], %s6575_s23, %s6575_s23, %s6576_s2  }
  0x27   :  { %s6581_s8 = smov [#allocation4]   ;;  %s6582_s20 = smov [#allocation9]  }
  0x28   :  { %s40_s29 = sshll.u32 %s6581_s8, 4  ;;  %s66_s3 = sshll.u32 %s6582_s20, 4  ;;  %s41_s29 = int_to_ptr.vmem [resolvable:$true] %s40_s29  ;;  %s67_s3 = int_to_ptr.vmem [resolvable:$true] %s66_s3 }
  0x29   :  { %s6583_s26 = smov 256   ;;  %s6584_s24 = smov 16  }
  0x2a   :  { %s38_s21 = sshll.u32 %s8652_s6, 4  ;;  %s93_s22 = sshll.u32 %s8567_s5, 4  ;;  %s39_s21 = int_to_ptr.hbm [resolvable:$true] %s38_s21  ;;  %s94_s22 = int_to_ptr.hbm [resolvable:$true] %s93_s22 }
  0x2b   :  { %s64_s1 = sshll.u32 %s8653_s30, 4  ;;  %s6585_s11 = smov [#allocation12]   ;;  %s65_s1 = int_to_ptr.hbm [resolvable:$true] %s64_s1 }
  0x2c   :  { %46 = dma.hbm_to_vmem [thread:$0]  %s39_s21, 1024, %s41_s29, [#allocation5], %s6575_s23, %s6575_s23, %s6576_s2  }
  0x2d   :  { %72 = dma.hbm_to_vmem [thread:$0]  %s65_s1, 4096, %s67_s3, [#allocation8], %s6583_s26, %s6583_s26, %s6584_s24  }
  0x2e   :  { %s95_s28 = sshll.u32 %s6585_s11, 4  ;;  %s116_s21 = sshll.u32 %s8569_s7, 4  ;;  %s96_s28 = int_to_ptr.vmem [resolvable:$true] %s95_s28  ;;  %s117_s21 = int_to_ptr.hbm [resolvable:$true] %s116_s21 }
  0x2f   :  { %98 = dma.hbm_to_vmem [thread:$0]  %s94_s22, 16, %s96_s28, [#allocation11]  }
  0x30   :  { %s6586_s13 = smov [#allocation15]   ;;  %s145_s1 = sshll.u32 %s8572_s10, 4  ;;  %s146_s1 = int_to_ptr.hbm [resolvable:$true] %s145_s1 }
  0x31   :  { %s118_s27 = sshll.u32 %s6586_s13, 4  ;;  %s168_s20 = sshll.u32 %s8574_s12, 4  ;;  %s119_s27 = int_to_ptr.vmem [resolvable:$true] %s118_s27  ;;  %s169_s20 = int_to_ptr.hbm [resolvable:$true] %s168_s20 }
  0x32   :  { %124 = dma.hbm_to_vmem [thread:$0]  %s117_s21, 4096, %s119_s27, [#allocation14], %s6583_s26, %s6583_s26, %s6584_s24  }
  0x33   :  { %s6587_s3 = smov [#allocation18]   ;;  %s6588_s0 = smov [#allocation21]  }
  0x34   :  { %s147_s7 = sshll.u32 %s6587_s3, 4  ;;  %s170_s25 = sshll.u32 %s6588_s0, 4  ;;  %s148_s7 = int_to_ptr.vmem [resolvable:$true] %s147_s7  ;;  %s171_s25 = int_to_ptr.vmem [resolvable:$true] %s170_s25 }
  0x35   :  { %150 = dma.hbm_to_vmem [thread:$0]  %s146_s1, 16, %s148_s7, [#allocation17]  }
  0x36   :  { %s198_s10 = sshll.u32 %s8578_s16, 4  ;;  %s213_s12 = sshll.u32 %s8580_s18, 4  ;;  %s199_s10 = int_to_ptr.hbm [resolvable:$true] %s198_s10  ;;  %s214_s12 = int_to_ptr.hbm [resolvable:$true] %s213_s12 }
  0x37   :  { %176 = dma.hbm_to_vmem [thread:$0]  %s169_s20, 4096, %s171_s25, [#allocation20], %s6583_s26, %s6583_s26, %s6584_s24  }
  0x38   :  { %s6589_s6 = smov [#allocation24]   ;;  %s6590_s13 = smov [#allocation25]  }
  0x39   :  { %s200_s21 = sshll.u32 %s6589_s6, 4  ;;  %s215_s16 = sshll.u32 %s6590_s13, 4  ;;  %s201_s21 = int_to_ptr.vmem [resolvable:$true] %s200_s21  ;;  %s216_s16 = int_to_ptr.vmem [resolvable:$true] %s215_s16 }
  0x3a   :  { %206 = dma.hbm_to_vmem [thread:$0]  %s199_s10, 2048, %s201_s21, [#allocation23], %s6575_s23, %s6575_s23, %s6576_s2  }
  0x3b   :  { %221 = dma.hbm_to_vmem [thread:$0]  %s214_s12, 2048, %s216_s16, [#allocation26], %s6575_s23, %s6575_s23, %s6576_s2  }
  0x3c   :  { %6553 = dma.done.wait [#allocation5], 1024  }
  0x3d   :  { %6554 = vsyncadd [#allocation5], 4294966272 }
  0x3e   :  { %6555 = dma.done.wait [#allocation8], 10240  }
  0x3f   :  { %6556 = vsyncadd [#allocation8], 4294957056 }
  0x40   :  { %6557 = dma.done.wait [#allocation11], 2064  }
  0x41   :  { %6558 = vsyncadd [#allocation11], 4294965232 }
  0x42   :  { %6559 = dma.done.wait [#allocation14], 10240  }
  0x43   :  { %6560 = vsyncadd [#allocation14], 4294957056 }
  0x44   :  { %6561 = dma.done.wait [#allocation17], 2064  }
  0x45   :  { %6562 = vsyncadd [#allocation17], 4294965232 }
  0x46   :  { %6563 = dma.done.wait [#allocation20], 10240  }
  0x47   :  { %6564 = vsyncadd [#allocation20], 4294957056 }
  0x48   :  { %6565 = dma.done.wait [#allocation23], 4096  }
  0x49   :  { %6566 = vsyncadd [#allocation23], 4294963200 }
  0x4a   :  { %6567 = dma.done.wait [#allocation26], 2048  }
  0x4b   :  { %6568 = vsyncadd [#allocation26], 4294965248  ;;  %v333_v0 = vld [vmem:[#allocation7 + $0x168] sm:$0xff]  ;;  %v334_v1 = vld [vmem:[#allocation7 + $0x170] sm:$0xff]  ;;  %s8660_s2 = sld [smem:[#allocation71_spill]]  ;;  %s6591_s13 = smov [#allocation27]  }
  0x4c   :  { %v330_v2 = vld [vmem:[#allocation7 + $0x150] sm:$0xff]  ;;  %344 = vmatpush.msra.mxu0 %v333_v0  ;;  %385 = vmatpush.msra.mxu1 %v334_v1  ;;  %v331_v3 = vld [vmem:[#allocation7 + $0x158] sm:$0xff]  ;;  %v328_v5 = vld [vmem:[#allocation7 + $0x140] sm:$0xff]  ;;  %s5831_s16 = sshll.u32 %s6591_s13, 4  ;;  %s5832_s16 = int_to_ptr.vmem [resolvable:$true] %s5831_s16 }
  0x4d   :  { %v327_v4 = vld [vmem:[#allocation7 + $0x138] sm:$0xff]  ;;  %v324_v6 = vld [vmem:[#allocation7 + $0x120] sm:$0xff]  ;;  %v325_v7 = vld [vmem:[#allocation7 + $0x128] sm:$0xff] }
  0x4e   :  { %345 = vmatpush.msra.mxu0 %v330_v2  ;;  %386 = vmatpush.msra.mxu1 %v331_v3  ;;  %v321_v8 = vld [vmem:[#allocation7 + $0x108] sm:$0xff]  ;;  %v322_v9 = vld [vmem:[#allocation7 + $0x110] sm:$0xff]  ;;  %v319_v11 = vld [vmem:[#allocation7 + $0xf8] sm:$0xff] }
  0x4f   :  { %v318_v10 = vld [vmem:[#allocation7 + $0xf0] sm:$0xff]  ;;  %v335_v12 = vld [vmem:[#allocation7 + $0x178] sm:$0xff]  ;;  %v332_v13 = vld [vmem:[#allocation7 + $0x160] sm:$0xff] }
  0x50   :  { %346 = vmatpush.msra.mxu0 %v327_v4  ;;  %387 = vmatpush.msra.mxu1 %v328_v5  ;;  %v315_v14 = vld [vmem:[#allocation7 + $0xd8] sm:$0xff]  ;;  %v316_v15 = vld [vmem:[#allocation7 + $0xe0] sm:$0xff]  ;;  %v329_v16 = vld [vmem:[#allocation7 + $0x148] sm:$0xff] }
  0x51   :  { %426 = vmatpush.msra.mxu2 %v335_v12  ;;  %v312_v17 = vld [vmem:[#allocation7 + $0xc0] sm:$0xff]  ;;  %v313_v18 = vld [vmem:[#allocation7 + $0xc8] sm:$0xff]  ;;  %v326_v19 = vld [vmem:[#allocation7 + $0x130] sm:$0xff] }
  0x52   :  { %347 = vmatpush.msra.mxu0 %v324_v6  ;;  %388 = vmatpush.msra.mxu1 %v325_v7  ;;  %v309_v20 = vld [vmem:[#allocation7 + $0xa8] sm:$0xff]  ;;  %v310_v21 = vld [vmem:[#allocation7 + $0xb0] sm:$0xff]  ;;  %v307_v23 = vld [vmem:[#allocation7 + $0x98] sm:$0xff] }
  0x53   :  { %427 = vmatpush.msra.mxu2 %v332_v13  ;;  %v306_v22 = vld [vmem:[#allocation7 + $0x90] sm:$0xff]  ;;  %v323_v24 = vld [vmem:[#allocation7 + $0x118] sm:$0xff]  ;;  %v304_v26 = vld [vmem:[#allocation7 + $0x80] sm:$0xff] }
  0x54   :  { %348 = vmatpush.msra.mxu0 %v321_v8  ;;  %389 = vmatpush.msra.mxu1 %v322_v9  ;;  %v303_v25 = vld [vmem:[#allocation7 + $0x78] sm:$0xff]  ;;  %v6775_v27 = vld [vmem:[#allocation9 + $0xf0] sm:$0xff]  ;;  %v320_v28 = vld [vmem:[#allocation7 + $0x100] sm:$0xff] }
  0x55   :  { %428 = vmatpush.msra.mxu2 %v329_v16  ;;  %v6777_v29 = vld [vmem:[#allocation9 + $0xe0] sm:$0xff]  ;;  %v301_v31 = vld [vmem:[#allocation7 + $0x68] sm:$0xff]  ;;  %576 = vmatpush.msra.mxu3 %v6775_v27  ;;  %v314_v33 = vld [vmem:[#allocation7 + $0xd0] sm:$0xff] }
  0x56   :  { %349 = vmatpush.msra.mxu0 %v318_v10  ;;  %390 = vmatpush.msra.mxu1 %v319_v11  ;;  %v300_v30 = vld [vmem:[#allocation7 + $0x60] sm:$0xff]  ;;  %v317_v32 = vld [vmem:[#allocation7 + $0xe8] sm:$0xff]  ;;  %v6780_v34 = vld [vmem:[#allocation9 + $0xd0] sm:$0xff] }
  0x57   :  { %429 = vmatpush.msra.mxu2 %v326_v19  ;;  %v6782_v35 = vld [vmem:[#allocation9 + $0xc0] sm:$0xff]  ;;  %v297_v36 = vld [vmem:[#allocation7 + $0x48] sm:$0xff]  ;;  %v298_v37 = vld [vmem:[#allocation7 + $0x50] sm:$0xff]  ;;  %577 = vmatpush.msra.mxu3 %v6777_v29 }
  0x58   :  { %350 = vmatpush.msra.mxu0 %v315_v14  ;;  %391 = vmatpush.msra.mxu1 %v316_v15  ;;  %v311_v38 = vld [vmem:[#allocation7 + $0xb8] sm:$0xff]  ;;  %v6785_v39 = vld [vmem:[#allocation9 + $0xb0] sm:$0xff]  ;;  %v308_v42 = vld [vmem:[#allocation7 + $0xa0] sm:$0xff] }
  0x59   :  { %430 = vmatpush.msra.mxu2 %v323_v24  ;;  %v294_v40 = vld [vmem:[#allocation7 + $0x30] sm:$0xff]  ;;  %v295_v41 = vld [vmem:[#allocation7 + $0x38] sm:$0xff]  ;;  %578 = vmatpush.msra.mxu3 %v6780_v34  ;;  %v6788_v43 = vld [vmem:[#allocation9 + $0xa0] sm:$0xff] }
  0x5a   :  { %351 = vmatpush.msra.mxu0 %v312_v17  ;;  %392 = vmatpush.msra.mxu1 %v313_v18  ;;  %v291_v44 = vld [vmem:[#allocation7 + $0x18] sm:$0xff]  ;;  %v292_v45 = vld [vmem:[#allocation7 + $0x20] sm:$0xff]  ;;  %v305_v46 = vld [vmem:[#allocation7 + $0x88] sm:$0xff] }
  0x5b   :  { %431 = vmatpush.msra.mxu2 %v320_v28  ;;  %579 = vmatpush.msra.mxu3 %v6782_v35  ;;  %v6792_v47 = vld [vmem:[#allocation9 + $0x90] sm:$0xff]  ;;  %v288_v48 = vld [vmem:[#allocation7] sm:$0xff]  ;;  %v289_v49 = vld [vmem:[#allocation7 + $0x8] sm:$0xff] }
  0x5c   :  { %352 = vmatpush.msra.mxu0 %v309_v20  ;;  %393 = vmatpush.msra.mxu1 %v310_v21  ;;  %v280_v50 = vld [vmem:[#allocation4] sm:$0xff]  ;;  %v302_v51 = vld [vmem:[#allocation7 + $0x70] sm:$0xff]  ;;  %v299_v53 = vld [vmem:[#allocation7 + $0x58] sm:$0xff] }
  0x5d   :  { %432 = vmatpush.msra.mxu2 %v317_v32  ;;  %580 = vmatpush.msra.mxu3 %v6785_v39  ;;  %v6796_v52 = vld [vmem:[#allocation9 + $0x80] sm:$0xff]  ;;  %v6798_v54 = vld [vmem:[#allocation9 + $0x70] sm:$0xff]  ;;  %v293_v56 = vld [vmem:[#allocation7 + $0x28] sm:$0xff] }
  0x5e   :  { %353 = vmatpush.msra.mxu0 %v306_v22  ;;  %394 = vmatpush.msra.mxu1 %v307_v23  ;;  %v296_v55 = vld [vmem:[#allocation7 + $0x40] sm:$0xff]  ;;  %v281_v57 = vld [vmem:[#allocation4 + $0x8] sm:$0xff]  ;;  %v290_v58 = vld [vmem:[#allocation7 + $0x10] sm:$0xff] }
  0x5f   :  { %433 = vmatpush.msra.mxu2 %v314_v33  ;;  %581 = vmatpush.msra.mxu3 %v6788_v43  ;;  %v282_v59 = vld [vmem:[#allocation4 + $0x10] sm:$0xff]  ;;  %v6802_v60 = vld [vmem:[#allocation9 + $0x60] sm:$0xff]  ;;  %v283_v62 = vld [vmem:[#allocation4 + $0x18] sm:$0xff] }
  0x60   :  { %354 = vmatpush.msra.mxu0 %v303_v25  ;;  %395 = vmatpush.msra.mxu1 %v304_v26  ;;  %v6805_v61 = vld [vmem:[#allocation9 + $0x50] sm:$0xff]  ;;  %v6808_v63 = vld [vmem:[#allocation9 + $0x40] sm:$0xff]  ;;  %v6822_v5 = vld [vmem:[#allocation9 + $0xf8] sm:$0xff] }
  0x61   :  { %434 = vmatpush.msra.mxu2 %v311_v38  ;;  %582 = vmatpush.msra.mxu3 %v6792_v47  ;;  %v6811_v0 = vld [vmem:[#allocation9 + $0x30] sm:$0xff]  ;;  %v6814_v1 = vld [vmem:[#allocation9 + $0x20] sm:$0xff]  ;;  %v6824_v6 = vld [vmem:[#allocation10 + $0x78] sm:$0xff] }
  0x62   :  { %355 = vmatpush.msra.mxu0 %v300_v30  ;;  %396 = vmatpush.msra.mxu1 %v301_v31  ;;  %v6817_v2 = vld [vmem:[#allocation9 + $0x10] sm:$0xff]  ;;  %v284_v3 = vld [vmem:[#allocation4 + $0x20] sm:$0xff]  ;;  %v6833_v9 = vld [vmem:[#allocation9 + $0xe8] sm:$0xff] }
  0x63   :  { %435 = vmatpush.msra.mxu2 %v308_v42  ;;  %583 = vmatpush.msra.mxu3 %v6796_v52  ;;  %v6820_v4 = vld [vmem:[#allocation9] sm:$0xff]  ;;  %v6826_v7 = vld [vmem:[#allocation13 + $0x168] sm:$0xff]  ;;  %v6829_v8 = vld [vmem:[#allocation13 + $0x170] sm:$0xff] }
  0x64   :  { %356 = vmatpush.msra.mxu0 %v297_v36  ;;  %397 = vmatpush.msra.mxu1 %v298_v37  ;;  %8654 = vst [vmem:[#allocation37_spill] sm:$0xff] %v6826_v7  ;;  %v6835_v10 = vld [vmem:[#allocation10 + $0x70] sm:$0xff]  ;;  %v6841_v12 = vld [vmem:[#allocation13 + $0x158] sm:$0xff]  ;;  %v6847_v14 = vld [vmem:[#allocation10 + $0x68] sm:$0xff] }
  0x65   :  { %436 = vmatpush.msra.mxu2 %v305_v46  ;;  %584 = vmatpush.msra.mxu3 %v6798_v54  ;;  %v6837_v11 = vld [vmem:[#allocation13 + $0x150] sm:$0xff]  ;;  %v6849_v15 = vld [vmem:[#allocation13 + $0x138] sm:$0xff]  ;;  %v6853_v16 = vld [vmem:[#allocation13 + $0x140] sm:$0xff] }
  0x66   :  { %357 = vmatpush.msra.mxu0 %v294_v40  ;;  %398 = vmatpush.msra.mxu1 %v295_v41  ;;  %8655 = vst [vmem:[#allocation38_spill] sm:$0xff] %v6837_v11  ;;  %v6845_v13 = vld [vmem:[#allocation9 + $0xd8] sm:$0xff]  ;;  %v6857_v17 = vld [vmem:[#allocation9 + $0xc8] sm:$0xff]  ;;  %v6859_v18 = vld [vmem:[#allocation10 + $0x60] sm:$0xff] }
  0x67   :  { %437 = vmatpush.msra.mxu2 %v302_v51  ;;  %585 = vmatpush.msra.mxu3 %v6802_v60  ;;  %8656 = vst [vmem:[#allocation39_spill] sm:$0xff] %v6849_v15  ;;  %v6861_v19 = vld [vmem:[#allocation13 + $0x120] sm:$0xff]  ;;  %v6865_v20 = vld [vmem:[#allocation13 + $0x128] sm:$0xff]  ;;  %v6869_v22 = vld [vmem:[#allocation9 + $0xb8] sm:$0xff] }
  0x68   :  { %358 = vmatpush.msra.mxu0 %v291_v44  ;;  %399 = vmatpush.msra.mxu1 %v292_v45  ;;  %8657 = vst [vmem:[#allocation40_spill] sm:$0xff] %v6861_v19  ;;  %v285_v21 = vld [vmem:[#allocation4 + $0x28] sm:$0xff]  ;;  %v6873_v23 = vld [vmem:[#allocation10 + $0x58] sm:$0xff]  ;;  %v6882_v28 = vld [vmem:[#allocation10 + $0x50] sm:$0xff] }
  0x69   :  { %438 = vmatpush.msra.mxu2 %v299_v53  ;;  %586 = vmatpush.msra.mxu3 %v6805_v61  ;;  %v6875_v24 = vld [vmem:[#allocation13 + $0x108] sm:$0xff]  ;;  %v6877_v25 = vld [vmem:[#allocation13 + $0x110] sm:$0xff]  ;;  %v6888_v31 = vld [vmem:[#allocation13 + $0xf8] sm:$0xff] }
  0x6a   :  { %359 = vmatpush.msra.mxu0 %v288_v48  ;;  %400 = vmatpush.msra.mxu1 %v289_v49  ;;  %8658 = vst [vmem:[#allocation41_spill] sm:$0xff] %v6875_v24  ;;  %v6879_v26 = vld [vmem:[#allocation9 + $0xa8] sm:$0xff]  ;;  %v6884_v30 = vld [vmem:[#allocation13 + $0xf0] sm:$0xff]  ;;  %v6901_v37 = vld [vmem:[#allocation13 + $0xd8] sm:$0xff] }
  0x6b   :  { %360 = vmatmul.f32.vlgmr.msra.gmra.mxu0 %v280_v50  ;;  %401 = vmatmul.f32.vlgmr.msra.gmra.mxu1 %v280_v50  ;;  %8659 = vst [vmem:[#allocation42_spill] sm:$0xff] %v6884_v30  ;;  %v6890_v32 = vld [vmem:[#allocation9 + $0x98] sm:$0xff]  ;;  %v6899_v36 = vld [vmem:[#allocation10 + $0x48] sm:$0xff]  ;;  %v6911_v41 = vld [vmem:[#allocation10 + $0x40] sm:$0xff] }
  0x6c   :  { %439 = vmatpush.msra.mxu2 %v296_v55  ;;  %587 = vmatpush.msra.mxu3 %v6808_v63  ;;  %v6895_v33 = vld [vmem:[%s8660_s2] sm:$0x7]  ;;  %8661 = vst [vmem:[#allocation43_spill] sm:$0xff] %v6901_v37  ;;  %v6905_v38 = vld [vmem:[#allocation13 + $0xe0] sm:$0xff]  ;;  %v6923_v46 = vld [vmem:[#allocation13 + $0xc8] sm:$0xff]  ;;  %s8813_s2 = sld [smem:[#allocation72_spill]] }
  0x6d   :  { %672 = vmatpush.msrb.mxu0 %v6824_v6  ;;  %755 = vmatpush.msrb.mxu1 %v6826_v7  ;;  %v6907_v40 = vld [vmem:[#allocation9 + $0x88] sm:$0xff]  ;;  %v6916_v44 = vperm.slane %v6895_v33, 0  ;;  %v6919_v45 = vperm.slane %v6895_v33, 1  ;;  %8665 = vst [vmem:[#allocation47_spill] sm:$0xff] %v6923_v46  ;;  %v286_v48 = vld [vmem:[#allocation4 + $0x30] sm:$0xff]  ;;  %v6929_v49 = vld [vmem:[#allocation9 + $0x78] sm:$0xff] }
  0x6e   :  { %440 = vmatpush.msra.mxu2 %v293_v56  ;;  %588 = vmatpush.msra.mxu3 %v6811_v0  ;;  %v6913_v42 = vld [vmem:[#allocation13 + $0xc0] sm:$0xff]  ;;  %v6934_v55 = vld [vmem:[#allocation13 + $0xa8] sm:$0xff]  ;;  %v6936_v56 = vld [vmem:[#allocation13 + $0xb0] sm:$0xff] }
  0x6f   :  { %673 = vmatpush.msrb.mxu0 %v6835_v10  ;;  %756 = vmatpush.msrb.mxu1 %v6837_v11  ;;  %8662 = vst [vmem:[#allocation44_spill] sm:$0xff] %v6913_v42  ;;  %v6993_v11 = vld [vmem:[#allocation13 + $0x30] sm:$0xff] }
  0x70   :  { %441 = vmatpush.msra.mxu2 %v290_v58  ;;  %589 = vmatpush.msra.mxu3 %v6814_v1  ;;  %8663 = vst [vmem:[#allocation45_spill] sm:$0xff] %v6916_v44 }
  0x71   :  { %442 = vmatmul.f32.vlgmr.msra.gmra.mxu2 %v280_v50  ;;  %674 = vmatpush.msrb.mxu0 %v6847_v14  ;;  %8664 = vst [vmem:[#allocation46_spill] sm:$0xff] %v6919_v45  ;;  %v6931_v50 = vld [vmem:[#allocation10 + $0x38] sm:$0xff] }
  0x72   :  { %590 = vmatpush.msra.mxu3 %v6817_v2  ;;  %775 = vmatpush.msrb.mxu2 %v6829_v8  ;;  %8666 = vst [vmem:[#allocation48_spill] sm:$0xff] %v6934_v55  ;;  %s5833_s26 = sshll.u32 %s8813_s2, 4  ;;  %s5834_s26 = int_to_ptr.hbm [resolvable:$true] %s5833_s26 }
  0x73   :  { %363 = vmatmul.f32.gmra.mxu0 %v281_v57  ;;  %404 = vmatmul.f32.gmra.mxu1 %v281_v57  ;;  %8667 = vst [vmem:[#allocation49_spill] sm:$0xff] %v6936_v56 }
  0x74   :  { %591 = vmatpush.msra.mxu3 %v6820_v4  ;;  %776 = vmatpush.msrb.mxu2 %v6841_v12  ;;  %8676 = vst [vmem:[#allocation58_spill] sm:$0xff] %v6993_v11 }
  0x75   :  { %757 = vmatpush.msrb.mxu1 %v6849_v15  ;;  %675 = vmatpush.msrb.mxu0 %v6859_v18  ;;  %v6991_v15 = vld [vmem:[#allocation10 + $0x10] sm:$0xff] }
  0x76   :  { %596 = vmatpush.msrb.mxu3 %v6822_v5  ;;  %777 = vmatpush.msrb.mxu2 %v6853_v16 }
  0x77   :  { %758 = vmatpush.msrb.mxu1 %v6861_v19  ;;  %676 = vmatpush.msrb.mxu0 %v6873_v23 }
  0x78   :  { %597 = vmatpush.msrb.mxu3 %v6833_v9  ;;  %778 = vmatpush.msrb.mxu2 %v6865_v20 }
  0x79   :  { %445 = vmatmul.f32.gmra.mxu2 %v281_v57  ;;  %759 = vmatpush.msrb.mxu1 %v6875_v24  ;;  %v6988_v24 = vld [vmem:[#allocation9 + $0x28] sm:$0xff] }
  0x7a   :  { %598 = vmatpush.msrb.mxu3 %v6845_v13  ;;  %779 = vmatpush.msrb.mxu2 %v6877_v25 }
  0x7b   :  { %366 = vmatmul.f32.gmra.mxu0 %v282_v59  ;;  %407 = vmatmul.f32.gmra.mxu1 %v282_v59 }
  0x7c   :  { %599 = vmatpush.msrb.mxu3 %v6857_v17  ;;  %677 = vmatpush.msrb.mxu0 %v6882_v28 }
  0x7d   :  { %760 = vmatpush.msrb.mxu1 %v6884_v30  ;;  %780 = vmatpush.msrb.mxu2 %v6888_v31  ;;  %v6984_v30 = vld [vmem:[#allocation13 + $0x48] sm:$0xff] }
  0x7e   :  { %600 = vmatpush.msrb.mxu3 %v6869_v22  ;;  %678 = vmatpush.msrb.mxu0 %v6899_v36  ;;  %8674 = vst [vmem:[#allocation56_spill] sm:$0xff] %v6984_v30 }
  0x7f   :  { %761 = vmatpush.msrb.mxu1 %v6901_v37  ;;  %781 = vmatpush.msrb.mxu2 %v6905_v38 }
  0x80   :  { %601 = vmatpush.msrb.mxu3 %v6879_v26  ;;  %679 = vmatpush.msrb.mxu0 %v6911_v41 }
  0x81   :  { %448 = vmatmul.f32.gmra.mxu2 %v282_v59  ;;  %762 = vmatpush.msrb.mxu1 %v6913_v42  ;;  %v6940_v59 = vld [vmem:[#allocation9 + $0x68] sm:$0xff] }
  0x82   :  { %602 = vmatpush.msrb.mxu3 %v6890_v32  ;;  %782 = vmatpush.msrb.mxu2 %v6923_v46  ;;  %v7027_v46 = vld [vmem:[#allocation13 + $0x8] sm:$0xff] }
  0x83   :  { %369 = vmatmul.f32.gmra.mxu0 %v283_v62  ;;  %410 = vmatmul.f32.gmra.mxu1 %v283_v62  ;;  %8681 = vst [vmem:[#allocation63_spill] sm:$0xff] %v7027_v46 }
  0x84   :  { %603 = vmatpush.msrb.mxu3 %v6907_v40  ;;  %680 = vmatpush.msrb.mxu0 %v6931_v50 }
  0x85   :  { %763 = vmatpush.msrb.mxu1 %v6934_v55  ;;  %783 = vmatpush.msrb.mxu2 %v6936_v56  ;;  %v6972_v55 = vld [vmem:[#allocation13 + $0x68] sm:$0xff]  ;;  %v7009_v56 = vld [vmem:[#allocation13 + $0x18] sm:$0xff] }
  0x86   :  { %604 = vmatpush.msrb.mxu3 %v6929_v49  ;;  %8673 = vst [vmem:[#allocation55_spill] sm:$0xff] %v6972_v55 }
  0x87   :  { %8678 = vst [vmem:[#allocation60_spill] sm:$0xff] %v7009_v56 }
  0x88   :  { %605 = vmatpush.msrb.mxu3 %v6940_v59 }
  0x89   :  { %451 = vmatmul.f32.gmra.mxu2 %v283_v62  ;;  %v6942_v62 = vld [vmem:[#allocation10 + $0x30] sm:$0xff] }
  0x8a   :  { %681 = vmatpush.msrb.mxu0 %v6942_v62 }
  0x8b   :  { %372 = vmatmul.f32.gmra.mxu0 %v284_v3  ;;  %413 = vmatmul.f32.gmra.mxu1 %v284_v3 }
  0x91   :  { %454 = vmatmul.f32.gmra.mxu2 %v284_v3  ;;  %v6946_v3 = vld [vmem:[#allocation13 + $0x90] sm:$0xff] }
  0x92   :  { %8668 = vst [vmem:[#allocation50_spill] sm:$0xff] %v6946_v3  ;;  %764 = vmatpush.msrb.mxu1 %v6946_v3  ;;  %v6978_v3 = vld [vmem:[#allocation9 + $0x38] sm:$0xff] }
  0x93   :  { %375 = vmatmul.f32.gmra.mxu0 %v285_v21  ;;  %416 = vmatmul.f32.gmra.mxu1 %v285_v21 }
  0x99   :  { %457 = vmatmul.f32.gmra.mxu2 %v285_v21  ;;  %v6948_v21 = vld [vmem:[#allocation13 + $0x98] sm:$0xff] }
  0x9a   :  { %8669 = vst [vmem:[#allocation51_spill] sm:$0xff] %v6948_v21  ;;  %784 = vmatpush.msrb.mxu2 %v6948_v21 }
  0x9b   :  { %378 = vmatmul.f32.gmra.mxu0 %v286_v48  ;;  %419 = vmatmul.f32.gmra.mxu1 %v286_v48 }
  0xa1   :  { %460 = vmatmul.f32.gmra.mxu2 %v286_v48  ;;  %v6954_v48 = vld [vmem:[#allocation10 + $0x28] sm:$0xff] }
  0xa2   :  { %682 = vmatpush.msrb.mxu0 %v6954_v48 }
  0xe8   :  { %v361_v51 = vpop.f32.mrf.mxu0  ;;  %v402_v53 = vpop.f32.mrf.mxu1 }
  0xe9   :  { %v362_v57 = vadd.f32 %v361_v51, %v6916_v44  ;;  %v403_v58 = vadd.f32 %v402_v53, %v6919_v45  ;;  %v6952_v51 = vld [vmem:[#allocation9 + $0x58] sm:$0xff]  ;;  %v6960_v45 = vld [vmem:[#allocation13 + $0x80] sm:$0xff] }
  0xea   :  { %v6958_v53 = vld [vmem:[#allocation13 + $0x78] sm:$0xff]  ;;  %8671 = vst [vmem:[#allocation53_spill] sm:$0xff] %v6960_v45  ;;  %606 = vmatpush.msrb.mxu3 %v6952_v51  ;;  %v6970_v44 = vld [vmem:[#allocation13 + $0x60] sm:$0xff]  ;;  %785 = vmatpush.msrb.mxu2 %v6960_v45 }
  0xeb   :  { %v5850_v42 = vmul.f32 -1.442695, %v362_v57  ;;  %v5851_v37 = vmul.f32 -1.442695, %v403_v58  ;;  %8670 = vst [vmem:[#allocation52_spill] sm:$0xff] %v6958_v53  ;;  %v6964_v57 = vld [vmem:[#allocation9 + $0x48] sm:$0xff]  ;;  %765 = vmatpush.msrb.mxu1 %v6958_v53 }
  0xec   :  { %v6966_v58 = vld [vmem:[#allocation10 + $0x20] sm:$0xff]  ;;  %8672 = vst [vmem:[#allocation54_spill] sm:$0xff] %v6970_v44  ;;  %607 = vmatpush.msrb.mxu3 %v6964_v57  ;;  %786 = vmatpush.msrb.mxu2 %v6972_v55  ;;  %v6986_v53 = vld [vmem:[#allocation13 + $0x50] sm:$0xff] }
  0xed   :  { %5942 = vpow2.f32 %v5850_v42  ;;  %v287_v42 = vld [vmem:[#allocation4 + $0x38] sm:$0xff]  ;;  %683 = vmatpush.msrb.mxu0 %v6966_v58  ;;  %766 = vmatpush.msrb.mxu1 %v6970_v44  ;;  %8675 = vst [vmem:[#allocation57_spill] sm:$0xff] %v6986_v53 }
  0xee   :  { %5944 = vpow2.f32 %v5851_v37  ;;  %v6982_v37 = vld [vmem:[#allocation10 + $0x18] sm:$0xff]  ;;  %381 = vmatmul.f32.gmra.mxu0 %v287_v42  ;;  %422 = vmatmul.f32.gmra.mxu1 %v287_v42 }
  0xef   :  { %463 = vmatmul.f32.gmra.mxu2 %v287_v42  ;;  %608 = vmatpush.msrb.mxu3 %v6978_v3  ;;  %v6999_v55 = vld [vmem:[#allocation13 + $0x38] sm:$0xff]  ;;  %v7007_v42 = vld [vmem:[#allocation10 + $0x8] sm:$0xff] }
  0xf0   :  { %684 = vmatpush.msrb.mxu0 %v6982_v37  ;;  %767 = vmatpush.msrb.mxu1 %v6984_v30  ;;  %8677 = vst [vmem:[#allocation59_spill] sm:$0xff] %v6999_v55  ;;  %v7001_v45 = vld [vmem:[#allocation9 + $0x18] sm:$0xff]  ;;  %v7016_v30 = vld [vmem:[#allocation9 + $0x8] sm:$0xff] }
  0xf1   :  { %787 = vmatpush.msrb.mxu2 %v6986_v53  ;;  %609 = vmatpush.msrb.mxu3 %v6988_v24  ;;  %v7023_v53 = vld [vmem:[#allocation13] sm:$0xff] }
  0xf2   :  { %685 = vmatpush.msrb.mxu0 %v6991_v15  ;;  %768 = vmatpush.msrb.mxu1 %v6993_v11  ;;  %8680 = vst [vmem:[#allocation62_spill] sm:$0xff] %v7023_v53 }
  0xf3   :  { %v5943_v19 = vpop.eup %5942  ;;  %788 = vmatpush.msrb.mxu2 %v6999_v55  ;;  %610 = vmatpush.msrb.mxu3 %v7001_v45 }
  0xf4   :  { %v5945_v44 = vpop.eup %5944  ;;  %v6995_v7 = vadd.f32 1.0, %v5943_v19  ;;  %v7014_v19 = vld [vmem:[#allocation13 + $0x20] sm:$0xff]  ;;  %686 = vmatpush.msrb.mxu0 %v7007_v42  ;;  %769 = vmatpush.msrb.mxu1 %v7009_v56 }
  0xf5   :  { %v7003_v21 = vadd.f32 1.0, %v5945_v44  ;;  %8679 = vst [vmem:[#allocation61_spill] sm:$0xff] %v7014_v19  ;;  %v7021_v44 = vld [vmem:[#allocation10] sm:$0xff]  ;;  %789 = vmatpush.msrb.mxu2 %v7014_v19  ;;  %611 = vmatpush.msrb.mxu3 %v7016_v30 }
  0xf6   :  { %5946 = vrcp.f32 %v6995_v7  ;;  %687 = vmatpush.msrb.mxu0 %v7021_v44  ;;  %770 = vmatpush.msrb.mxu1 %v7023_v53  ;;  %vm504_vm1 = vweird.f32 %v6995_v7 }
  0xf7   :  { %5948 = vrcp.f32 %v7003_v21  ;;  %790 = vmatpush.msrb.mxu2 %v7027_v46  ;;  %v510_v46 = vand.u32 2147483648, %v6995_v7  ;;  %vm523_vm4 = vweird.f32 %v7003_v21 }
  0xf8   :  { %865 = vmatpush.msra.mxu0 %v6775_v27  ;;  %885 = vmatpush.msra.mxu1 %v6822_v5  ;;  %v7047_v5 = vperm.slane %v6895_v33, 2 }
  0xf9   :  { %945 = vmatpush.msra.mxu2 %v6824_v6  ;;  %v508_v6 = vand.u32 2147483647, %v6995_v7 }
  0xfa   :  { %866 = vmatpush.msra.mxu0 %v6777_v29  ;;  %886 = vmatpush.msra.mxu1 %v6833_v9 }
  0xfb   :  { %946 = vmatpush.msra.mxu2 %v6835_v10  ;;  %v443_v10 = vpop.f32.mrf.mxu2  ;;  %vm509_vm3 = vcmp.eq.f32.partialorder %v508_v6, 8.507059e+37 }
  0xfc   :  { %v5947_v11 = vpop.eup %5946  ;;  %867 = vmatpush.msra.mxu0 %v6780_v34  ;;  %887 = vmatpush.msra.mxu1 %v6845_v13  ;;  %v7054_v13 = vld [vmem:[#allocation12] ss:$0 sm:$0xff] }
  0xfd   :  { %v5949_v56 = vpop.eup %5948  ;;  %v500_v55 = vmul.f32 %v5947_v11, %v6995_v7  ;;  %947 = vmatpush.msra.mxu2 %v6847_v14  ;;  %vm505_vm0 = vweird.f32 %v5947_v11  ;;  %v511_v14 = vor.u32 1.1754944e-38, %v510_v46  ;;  %v8689_v46 = vld [vmem:[#allocation38_spill] sm:$0xff] }
  0xfe   :  { %v519_v19 = vmul.f32 %v5949_v56, %v7003_v21  ;;  %868 = vmatpush.msra.mxu0 %v6782_v35  ;;  %888 = vmatpush.msra.mxu1 %v6857_v17  ;;  %vm506_vm2 = vmor %vm504_vm1, %vm505_vm0  ;;  %v444_v35 = vadd.f32 %v443_v10, %v7047_v5  ;;  %vm524_vm5 = vweird.f32 %v5949_v56 }
  0xff   :  { %v501_v53 = vsub.f32 1.0, %v500_v55  ;;  %948 = vmatpush.msra.mxu2 %v6859_v18  ;;  %vm525_vm6 = vmor %vm523_vm4, %vm524_vm5  ;;  %v8692_v55 = vld [vmem:[#allocation61_spill] sm:$0xff] }
 0x100   :  { %v520_v27 = vsub.f32 1.0, %v519_v19  ;;  %869 = vmatpush.msra.mxu0 %v6785_v39  ;;  %889 = vmatpush.msra.mxu1 %v6869_v22  ;;  %v529_v39 = vand.u32 2147483648, %v7003_v21  ;;  %v8704_v19 = vld [vmem:[#allocation58_spill] sm:$0xff] }
 0x101   :  { %v502_v29 = vmul.f32 %v5947_v11, %v501_v53  ;;  %949 = vmatpush.msra.mxu2 %v6873_v23  ;;  %v8700_v53 = vld [vmem:[#allocation50_spill] sm:$0xff] }
 0x102   :  { %v521_v9 = vmul.f32 %v5949_v56, %v520_v27  ;;  %870 = vmatpush.msra.mxu0 %v6788_v43  ;;  %890 = vmatpush.msra.mxu1 %v6879_v26  ;;  %v530_v23 = vor.u32 1.1754944e-38, %v529_v39  ;;  %v8705_v27 = vld [vmem:[#allocation60_spill] sm:$0xff] }
 0x103   :  { %v503_v34 = vadd.f32 %v5947_v11, %v502_v29  ;;  %950 = vmatpush.msra.mxu2 %v6882_v28  ;;  %v734_v28 = vld [vmem:[#allocation13 + $0x118] sm:$0xff] }
 0x104   :  { %v522_v7 = vadd.f32 %v5949_v56, %v521_v9  ;;  %871 = vmatpush.msra.mxu0 %v6792_v47  ;;  %891 = vmatpush.msra.mxu1 %v6890_v32  ;;  %v8683_v32 = vld [vmem:[#allocation49_spill] sm:$0xff]  ;;  %v8706_v29 = vld [vmem:[#allocation62_spill] sm:$0xff] }
 0x105   :  { %v507_v33 = vsel %vm506_vm2, %v5947_v11, %v503_v34  ;;  %v527_v11 = vand.u32 2147483647, %v7003_v21  ;;  %951 = vmatpush.msra.mxu2 %v6899_v36  ;;  %v8684_v36 = vld [vmem:[#allocation51_spill] sm:$0xff] }
 0x106   :  { %v512_v17 = vsel %vm509_vm3, %v511_v14, %v507_v33  ;;  %872 = vmatpush.msra.mxu0 %v6796_v52  ;;  %v526_v22 = vsel %vm525_vm6, %v5949_v56, %v522_v7  ;;  %892 = vmatpush.msra.mxu1 %v6907_v40  ;;  %v8685_v40 = vld [vmem:[#allocation53_spill] sm:$0xff]  ;;  %v8693_v56 = vld [vmem:[#allocation40_spill] sm:$0xff]  ;;  %v8697_v21 = vld [vmem:[#allocation43_spill] sm:$0xff] }
 0x107   :  { %v536_v18 = vmul.f32 %v7054_v13, %v512_v17  ;;  %952 = vmatpush.msra.mxu2 %v6911_v41  ;;  %vm528_vm7 = vcmp.eq.f32.partialorder %v527_v11, 8.507059e+37  ;;  %v8687_v41 = vld [vmem:[#allocation37_spill] sm:$0xff] }
 0x108   :  { %873 = vmatpush.msra.mxu0 %v6798_v54  ;;  %893 = vmatpush.msra.mxu1 %v6929_v49  ;;  %v531_v47 = vsel %vm528_vm7, %v530_v23, %v526_v22  ;;  %v8690_v49 = vld [vmem:[#allocation59_spill] sm:$0xff] }
 0x109   :  { %v537_v43 = vadd.f32 %v536_v18, %v444_v35  ;;  %953 = vmatpush.msra.mxu2 %v6931_v50  ;;  %v539_v52 = vsub.f32 1.0, %v531_v47  ;;  %v8691_v50 = vld [vmem:[#allocation39_spill] sm:$0xff]  ;;  %v364_v35 = vpop.f32.mrf.mxu0  ;;  %v7169_v47 = vld [vmem:[#allocation15 + $0xf0] sm:$0xff] }
 0x10a   :  { %874 = vmatpush.msra.mxu0 %v6802_v60  ;;  %894 = vmatpush.msra.mxu1 %v6940_v59  ;;  %v746_v60 = vld [vmem:[#allocation13 + $0x178] sm:$0xff] }
 0x10b   :  { %5950 = vtanh.f32 %v537_v43  ;;  %954 = vmatpush.msra.mxu2 %v6942_v62  ;;  %v8694_v59 = vld [vmem:[#allocation63_spill] sm:$0xff]  ;;  %v8695_v62 = vld [vmem:[#allocation41_spill] sm:$0xff] }
 0x10c   :  { %875 = vmatpush.msra.mxu0 %v6805_v61  ;;  %895 = vmatpush.msra.mxu1 %v6952_v51  ;;  %v743_v61 = vld [vmem:[#allocation13 + $0x160] sm:$0xff] }
 0x10d   :  { %955 = vmatpush.msra.mxu2 %v6954_v48  ;;  %v8698_v51 = vld [vmem:[#allocation44_spill] sm:$0xff] }
 0x10e   :  { %876 = vmatpush.msra.mxu0 %v6808_v63  ;;  %896 = vmatpush.msra.mxu1 %v6964_v57  ;;  %v740_v63 = vld [vmem:[#allocation13 + $0x148] sm:$0xff] }
 0x10f   :  { %956 = vmatpush.msra.mxu2 %v6966_v58  ;;  %v8699_v48 = vld [vmem:[#allocation48_spill] sm:$0xff]  ;;  %v7132_v58 = vpop.f32.mrf.mxu1 }
 0x110   :  { %877 = vmatpush.msra.mxu0 %v6811_v0  ;;  %897 = vmatpush.msra.mxu1 %v6978_v3  ;;  %v737_v0 = vld [vmem:[#allocation13 + $0x130] sm:$0xff]  ;;  %v8701_v57 = vld [vmem:[#allocation52_spill] sm:$0xff] }
 0x111   :  { %v5951_v54 = vpop.eup %5950  ;;  %957 = vmatpush.msra.mxu2 %v6982_v37  ;;  %v8696_v3 = vld [vmem:[#allocation42_spill] sm:$0xff]  ;;  %v7155_v7 = vpop.f32.mrf.mxu0 }
 0x112   :  { %v7083_v26 = vmul.f32 %v5951_v54, %v539_v52  ;;  %878 = vmatpush.msra.mxu0 %v6814_v1  ;;  %898 = vmatpush.msra.mxu1 %v6988_v24  ;;  %v731_v1 = vld [vmem:[#allocation13 + $0x100] sm:$0xff]  ;;  %v8702_v37 = vld [vmem:[#allocation54_spill] sm:$0xff] }
 0x113   :  { %958 = vmatpush.msra.mxu2 %v6991_v15  ;;  %v725_v15 = vld [vmem:[#allocation13 + $0xd0] sm:$0xff]  ;;  %v719_v24 = vld [vmem:[#allocation13 + $0xa0] sm:$0xff]  ;;  %v7171_v52 = vld [vmem:[#allocation15 + $0xf8] sm:$0xff] }
 0x114   :  { %592 = vmatmul.f32.vlgmr.msra.gmra.mxu3 %v7083_v26  ;;  %688 = vmatmul.f32.vlgmr.msrb.gmra.mxu0 %v7083_v26  ;;  %v7175_v54 = vld [vmem:[#allocation15 + $0xe0] sm:$0xff] }
 0x115   :  { %771 = vmatmul.f32.vlgmr.msrb.gmra.mxu1 %v7083_v26  ;;  %791 = vmatmul.f32.vlgmr.msrb.gmra.mxu2 %v7083_v26 }
 0x116   :  { %795 = vmatpush.msra.mxu3 %v746_v60  ;;  %879 = vmatpush.msra.mxu0 %v6817_v2  ;;  %v728_v2 = vld [vmem:[#allocation13 + $0xe8] sm:$0xff] }
 0x117   :  { %899 = vmatpush.msra.mxu1 %v7001_v45  ;;  %959 = vmatpush.msra.mxu2 %v7007_v42  ;;  %v8688_v45 = vld [vmem:[#allocation57_spill] sm:$0xff]  ;;  %v8703_v42 = vld [vmem:[#allocation56_spill] sm:$0xff]  ;;  %v7141_v6 = vpop.f32.mrf.mxu1 }
 0x118   :  { %796 = vmatpush.msra.mxu3 %v743_v61  ;;  %880 = vmatpush.msra.mxu0 %v6820_v4  ;;  %v722_v4 = vld [vmem:[#allocation13 + $0xb8] sm:$0xff] }
 0x119   :  { %900 = vmatpush.msra.mxu1 %v7016_v30  ;;  %960 = vmatpush.msra.mxu2 %v7021_v44  ;;  %v8682_v30 = vld [vmem:[#allocation47_spill] sm:$0xff]  ;;  %v7137_v44 = vpop.f32.mrf.mxu2  ;;  %v7161_v11 = vpop.f32.mrf.mxu0 }
 0x11a   :  { %797 = vmatpush.msra.mxu3 %v740_v63  ;;  %992 = vmatpush.msrb.mxu0 %v6829_v8  ;;  %v716_v8 = vld [vmem:[#allocation13 + $0x88] sm:$0xff] }
 0x11b   :  { %1012 = vmatpush.msrb.mxu1 %v746_v60  ;;  %1064 = vmatpush.msrb.mxu2 %v7169_v47  ;;  %v7177_v60 = vld [vmem:[#allocation15 + $0xe8] sm:$0xff] }
 0x11c   :  { %798 = vmatpush.msra.mxu3 %v737_v0  ;;  %993 = vmatpush.msrb.mxu0 %v6841_v12  ;;  %v713_v12 = vld [vmem:[#allocation13 + $0x70] sm:$0xff] }
 0x11d   :  { %612 = vmatmul.f32.vlgmr.msrb.gmra.mxu3 %v7083_v26  ;;  %1013 = vmatpush.msrb.mxu1 %v743_v61  ;;  %v7182_v61 = vld [vmem:[%s8571_s9] sm:$0x7] }
 0x11e   :  { %799 = vmatpush.msra.mxu3 %v734_v28  ;;  %994 = vmatpush.msrb.mxu0 %v6853_v16  ;;  %v710_v16 = vld [vmem:[#allocation13 + $0x58] sm:$0xff] }
 0x11f   :  { %1014 = vmatpush.msrb.mxu1 %v740_v63  ;;  %v7145_v10 = vpop.f32.mrf.mxu1  ;;  %1065 = vmatpush.msrb.mxu2 %v7175_v54  ;;  %v7186_v63 = vld [vmem:[#allocation15 + $0xd0] sm:$0xff] }
 0x120   :  { %800 = vmatpush.msra.mxu3 %v731_v1  ;;  %995 = vmatpush.msrb.mxu0 %v6865_v20  ;;  %v707_v20 = vld [vmem:[#allocation13 + $0x40] sm:$0xff] }
 0x121   :  { %1015 = vmatpush.msrb.mxu1 %v737_v0  ;;  %v7143_v9 = vpop.f32.mrf.mxu2  ;;  %v7167_v23 = vpop.f32.mrf.mxu0  ;;  %v7188_v0 = vld [vmem:[#allocation15 + $0xd8] sm:$0xff]  ;;  %1066 = vmatpush.msrb.mxu2 %v7186_v63 }
 0x122   :  { %801 = vmatpush.msra.mxu3 %v728_v2  ;;  %996 = vmatpush.msrb.mxu0 %v6877_v25  ;;  %v704_v25 = vld [vmem:[#allocation13 + $0x28] sm:$0xff] }
 0x123   :  { %1016 = vmatpush.msrb.mxu1 %v734_v28 }
 0x124   :  { %802 = vmatpush.msra.mxu3 %v725_v15  ;;  %997 = vmatpush.msrb.mxu0 %v6888_v31  ;;  %v701_v31 = vld [vmem:[#allocation13 + $0x10] sm:$0xff] }
 0x125   :  { %1017 = vmatpush.msrb.mxu1 %v731_v1  ;;  %v8613_v1 = vperm.slane %v7182_v61, 0 }
 0x126   :  { %803 = vmatpush.msra.mxu3 %v722_v4  ;;  %998 = vmatpush.msrb.mxu0 %v6905_v38  ;;  %v8686_v38 = vld [vmem:[#allocation55_spill] sm:$0xff] }
 0x127   :  { %1018 = vmatpush.msrb.mxu1 %v728_v2  ;;  %v7149_v14 = vpop.f32.mrf.mxu1  ;;  %v7195_v2 = vld [vmem:[#allocation15 + $0xc0] sm:$0xff] }
 0x128   :  { %804 = vmatpush.msra.mxu3 %v719_v24  ;;  %999 = vmatpush.msrb.mxu0 %v8682_v30  ;;  %v7211_v30 = vld [vmem:[#allocation15 + $0xa0] sm:$0xff] }
 0x129   :  { %1019 = vmatpush.msrb.mxu1 %v725_v15  ;;  %v7147_v34 = vpop.f32.mrf.mxu2  ;;  %v7197_v15 = vld [vmem:[#allocation15 + $0xc8] sm:$0xff]  ;;  %1067 = vmatpush.msrb.mxu2 %v7195_v2 }
 0x12a   :  { %805 = vmatpush.msra.mxu3 %v716_v8  ;;  %1000 = vmatpush.msrb.mxu0 %v8683_v32 }
 0x12b   :  { %1020 = vmatpush.msrb.mxu1 %v722_v4  ;;  %v7201_v4 = vld [vmem:[#allocation15 + $0xb0] sm:$0xff] }
 0x12c   :  { %806 = vmatpush.msra.mxu3 %v713_v12  ;;  %1001 = vmatpush.msrb.mxu0 %v8684_v36  ;;  %v7218_v36 = vld [vmem:[#allocation15 + $0x90] sm:$0xff] }
 0x12d   :  { %1021 = vmatpush.msrb.mxu1 %v719_v24  ;;  %v7203_v24 = vld [vmem:[#allocation15 + $0xb8] sm:$0xff]  ;;  %1068 = vmatpush.msrb.mxu2 %v7201_v4 }
 0x12e   :  { %807 = vmatpush.msra.mxu3 %v710_v16  ;;  %1002 = vmatpush.msrb.mxu0 %v8685_v40  ;;  %v8711_v40 = vld [vmem:[#allocation45_spill] sm:$0xff] }
 0x12f   :  { %1022 = vmatpush.msrb.mxu1 %v716_v8  ;;  %v7153_v17 = vpop.f32.mrf.mxu1  ;;  %1069 = vmatpush.msrb.mxu2 %v7211_v30 }
 0x130   :  { %808 = vmatpush.msra.mxu3 %v707_v20  ;;  %1003 = vmatpush.msrb.mxu0 %v8686_v38  ;;  %v365_v38 = vadd.f32 %v364_v35, %v8711_v40  ;;  %v1041_v35 = vld [vmem:[#allocation15 + $0x48] sm:$0xff] }
 0x131   :  { %1023 = vmatpush.msrb.mxu1 %v713_v12  ;;  %v7151_v33 = vpop.f32.mrf.mxu2  ;;  %v7207_v12 = vpop.f32.mrf.mxu0  ;;  %1070 = vmatpush.msrb.mxu2 %v7218_v36 }
 0x132   :  { %809 = vmatpush.msra.mxu3 %v704_v25  ;;  %1004 = vmatpush.msrb.mxu0 %v8688_v45  ;;  %v7225_v45 = vld [vmem:[#allocation15 + $0x80] sm:$0xff] }
 0x133   :  { %1024 = vmatpush.msrb.mxu1 %v710_v16  ;;  %1071 = vmatpush.msrb.mxu2 %v7225_v45 }
 0x134   :  { %810 = vmatpush.msra.mxu3 %v701_v31  ;;  %1005 = vmatpush.msrb.mxu0 %v8690_v49 }
 0x135   :  { %811 = vmatmul.f32.vlgmr.msra.gmra.mxu3 %v7083_v26  ;;  %1025 = vmatpush.msrb.mxu1 %v707_v20  ;;  %v7213_v20 = vld [vmem:[#allocation15 + $0xa8] sm:$0xff] }
 0x136   :  { %972 = vmatpush.msrb.mxu3 %v8687_v41  ;;  %1006 = vmatpush.msrb.mxu0 %v8692_v55 }
 0x137   :  { %1026 = vmatpush.msrb.mxu1 %v704_v25  ;;  %v7159_v18 = vpop.f32.mrf.mxu1  ;;  %v8612_v25 = vperm.slane %v7182_v61, 1 }
 0x138   :  { %973 = vmatpush.msrb.mxu3 %v8689_v46  ;;  %1007 = vmatpush.msrb.mxu0 %v8694_v59  ;;  %8707 = vst [vmem:[#allocation47_spill] sm:$0xff] %v7159_v18  ;;  %v7227_v46 = vld [vmem:[#allocation15 + $0x88] sm:$0xff]  ;;  %v7235_v59 = vld [vmem:[#allocation15 + $0x78] sm:$0xff] }
 0x139   :  { %1027 = vmatpush.msrb.mxu1 %v701_v31  ;;  %v7157_v39 = vpop.f32.mrf.mxu2  ;;  %v7220_v31 = vld [vmem:[#allocation15 + $0x98] sm:$0xff] }
 0x13a   :  { %974 = vmatpush.msrb.mxu3 %v8691_v50 }
 0x13c   :  { %975 = vmatpush.msrb.mxu3 %v8693_v56  ;;  %v7233_v56 = vld [vmem:[#allocation15 + $0x70] sm:$0xff] }
 0x13d   :  { %1072 = vmatpush.msrb.mxu2 %v7233_v56 }
 0x13e   :  { %976 = vmatpush.msrb.mxu3 %v8695_v62 }
 0x140   :  { %977 = vmatpush.msrb.mxu3 %v8696_v3  ;;  %v7239_v3 = vld [vmem:[#allocation15 + $0x60] sm:$0xff] }
 0x141   :  { %v7163_v43 = vpop.f32.mrf.mxu2  ;;  %1073 = vmatpush.msrb.mxu2 %v7239_v3 }
 0x142   :  { %978 = vmatpush.msrb.mxu3 %v8697_v21  ;;  %8708 = vst [vmem:[#allocation49_spill] sm:$0xff] %v7163_v43  ;;  %v7241_v21 = vld [vmem:[#allocation15 + $0x68] sm:$0xff] }
 0x144   :  { %979 = vmatpush.msrb.mxu3 %v8698_v51 }
 0x146   :  { %980 = vmatpush.msrb.mxu3 %v8699_v48  ;;  %v7245_v48 = vpop.f32.mrf.mxu0 }
 0x147   :  { %8712 = vst [vmem:[#allocation55_spill] sm:$0xff] %v7245_v48 }
 0x148   :  { %981 = vmatpush.msrb.mxu3 %v8700_v53 }
 0x14a   :  { %982 = vmatpush.msrb.mxu3 %v8701_v57  ;;  %v7247_v57 = vld [vmem:[#allocation15 + $0x50] sm:$0xff] }
 0x14b   :  { %1074 = vmatpush.msrb.mxu2 %v7247_v57 }
 0x14c   :  { %983 = vmatpush.msrb.mxu3 %v8702_v37  ;;  %v7249_v37 = vld [vmem:[#allocation15 + $0x58] sm:$0xff] }
 0x14e   :  { %984 = vmatpush.msrb.mxu3 %v8703_v42 }
 0x150   :  { %985 = vmatpush.msrb.mxu3 %v8704_v19  ;;  %v8713_v19 = vld [vmem:[#allocation46_spill] sm:$0xff] }
 0x152   :  { %986 = vmatpush.msrb.mxu3 %v8705_v27  ;;  %v406_v27 = vadd.f32 %v7132_v58, %v8713_v19  ;;  %v1034_v58 = vld [vmem:[#allocation15 + $0x10] sm:$0xff] }
 0x154   :  { %987 = vmatpush.msrb.mxu3 %v8706_v29  ;;  %v1040_v29 = vld [vmem:[#allocation15 + $0x40] sm:$0xff] }
 0x155   :  { %1075 = vmatpush.msrb.mxu2 %v1040_v29  ;;  %v1032_v29 = vld [vmem:[#allocation15] sm:$0xff] }
 0x156   :  { %1084 = vmatpush.msra.mxu3 %v7171_v52 }
 0x158   :  { %1085 = vmatpush.msra.mxu3 %v7177_v60 }
 0x15a   :  { %1086 = vmatpush.msra.mxu3 %v7188_v0 }
 0x15c   :  { %1087 = vmatpush.msra.mxu3 %v7197_v15 }
 0x15e   :  { %1088 = vmatpush.msra.mxu3 %v7203_v24 }
 0x160   :  { %1089 = vmatpush.msra.mxu3 %v7213_v20 }
 0x162   :  { %1090 = vmatpush.msra.mxu3 %v7220_v31 }
 0x164   :  { %1091 = vmatpush.msra.mxu3 %v7227_v46 }
 0x166   :  { %1092 = vmatpush.msra.mxu3 %v7235_v59 }
 0x168   :  { %1093 = vmatpush.msra.mxu3 %v7241_v21 }
 0x16a   :  { %1094 = vmatpush.msra.mxu3 %v7249_v37 }
 0x16b   :  { %v7165_v22 = vpop.f32.mrf.mxu1 }
 0x16c   :  { %8709 = vst [vmem:[#allocation51_spill] sm:$0xff] %v7165_v22  ;;  %1095 = vmatpush.msra.mxu3 %v1041_v35  ;;  %v7258_v35 = vpop.f32.mrf.mxu0 }
 0x16d   :  { %8714 = vst [vmem:[#allocation37_spill] sm:$0xff] %v7258_v35 }
 0x172   :  { %v7190_v28 = vpop.f32.mrf.mxu2 }
 0x173   :  { %8710 = vst [vmem:[#allocation53_spill] sm:$0xff] %v7190_v28 }
 0x192   :  { %v772_v8 = vpop.f32.mrf.mxu1 }
 0x193   :  { %v773_v16 = vadd.f32 %v772_v8, %v8613_v1 }
 0x195   :  { %v5854_v32 = vmul.f32 -1.442695, %v773_v16 }
 0x197   :  { %5952 = vpow2.f32 %v5854_v32  ;;  %v593_v41 = vpop.f32.mrf.mxu3  ;;  %v1038_v32 = vld [vmem:[#allocation15 + $0x30] sm:$0xff] }
 0x198   :  { %v632_v49 = vadd.f32 %v593_v41, %v365_v38  ;;  %v792_v50 = vpop.f32.mrf.mxu2  ;;  %v1039_v38 = vld [vmem:[#allocation15 + $0x38] sm:$0xff]  ;;  %1076 = vmatpush.msrb.mxu2 %v1038_v32 }
 0x199   :  { %v793_v55 = vadd.f32 %v792_v50, %v8612_v25  ;;  %1096 = vmatpush.msra.mxu3 %v1039_v38 }
 0x19a   :  { %v5852_v62 = vmul.f32 -1.442695, %v632_v49 }
 0x19b   :  { %v5855_v53 = vmul.f32 -1.442695, %v793_v55  ;;  %v1036_v55 = vld [vmem:[#allocation15 + $0x20] sm:$0xff] }
 0x19c   :  { %5954 = vpow2.f32 %v5852_v62  ;;  %v1037_v62 = vld [vmem:[#allocation15 + $0x28] sm:$0xff]  ;;  %1077 = vmatpush.msrb.mxu2 %v1036_v55 }
 0x19d   :  { %v5953_v51 = vpop.eup %5952  ;;  %5956 = vpow2.f32 %v5855_v53  ;;  %1097 = vmatpush.msra.mxu3 %v1037_v62  ;;  %v1033_v53 = vld [vmem:[#allocation15 + $0x8] sm:$0xff] }
 0x19e   :  { %v7251_v42 = vadd.f32 1.0, %v5953_v51  ;;  %v1035_v51 = vld [vmem:[#allocation15 + $0x18] sm:$0xff]  ;;  %1078 = vmatpush.msrb.mxu2 %v1034_v58 }
 0x19f   :  { %1098 = vmatpush.msra.mxu3 %v1035_v51 }
 0x1a0   :  { %v613_v8 = vpop.f32.mrf.mxu3  ;;  %5958 = vrcp.f32 %v7251_v42  ;;  %1079 = vmatpush.msrb.mxu2 %v1032_v29  ;;  %vm825_vm13 = vweird.f32 %v7251_v42 }
 0x1a1   :  { %v652_v16 = vadd.f32 %v613_v8, %v406_v27  ;;  %1099 = vmatpush.msra.mxu3 %v1033_v53 }
 0x1a2   :  { %v5955_v41 = vpop.eup %5954 }
 0x1a3   :  { %v636_v49 = vadd.f32 1.0, %v5955_v41  ;;  %v5853_v50 = vmul.f32 -1.442695, %v652_v16  ;;  %v5957_v27 = vpop.eup %5956 }
 0x1a4   :  { %v7261_v38 = vadd.f32 1.0, %v5957_v27 }
 0x1a5   :  { %5960 = vrcp.f32 %v636_v49  ;;  %v648_v1 = vand.u32 2147483648, %v636_v49  ;;  %v646_v28 = vand.u32 2147483647, %v636_v49  ;;  %vm642_vm9 = vweird.f32 %v636_v49 }
 0x1a6   :  { %5962 = vpow2.f32 %v5853_v50  ;;  %v5959_v8 = vpop.eup %5958  ;;  %v689_v50 = vpop.f32.mrf.mxu0  ;;  %vm844_vm5 = vweird.f32 %v7261_v38 }
 0x1a7   :  { %v821_v16 = vmul.f32 %v5959_v8, %v7251_v42  ;;  %5964 = vrcp.f32 %v7261_v38  ;;  %v649_v53 = vor.u32 1.1754944e-38, %v648_v1  ;;  %v690_v27 = vadd.f32 %v7054_v13, %v689_v50 }
 0x1a8   :  { %vm647_vm11 = vcmp.eq.f32.partialorder %v646_v28, 8.507059e+37  ;;  %vm826_vm12 = vweird.f32 %v5959_v8  ;;  %v829_v28 = vand.u32 2147483647, %v7251_v42 }
 0x1a9   :  { %v822_v58 = vsub.f32 1.0, %v821_v16  ;;  %v447_v16 = vadd.f32 %v7137_v44, %v7047_v5  ;;  %vm827_vm14 = vmor %vm825_vm13, %vm826_vm12 }
 0x1aa   :  { %vm830_vm1 = vcmp.eq.f32.partialorder %v829_v28, 8.507059e+37 }
 0x1ab   :  { %v5961_v32 = vpop.eup %5960  ;;  %v823_v22 = vmul.f32 %v5959_v8, %v822_v58 }
 0x1ac   :  { %v638_v41 = vmul.f32 %v5961_v32, %v636_v49  ;;  %v5963_v55 = vpop.eup %5962  ;;  %vm643_vm8 = vweird.f32 %v5961_v32  ;;  %v831_v49 = vand.u32 2147483648, %v7251_v42 }
 0x1ad   :  { %v656_v25 = vadd.f32 1.0, %v5963_v55  ;;  %vm644_vm10 = vmor %vm642_vm9, %vm643_vm8  ;;  %v824_v48 = vadd.f32 %v5959_v8, %v823_v22 }
 0x1ae   :  { %v639_v62 = vsub.f32 1.0, %v638_v41  ;;  %v7265_v41 = vpop.eup %5964 }
 0x1af   :  { %5966 = vrcp.f32 %v656_v25  ;;  %v840_v1 = vmul.f32 %v7265_v41, %v7261_v38  ;;  %v666_v22 = vand.u32 2147483647, %v656_v25  ;;  %v828_v58 = vsel %vm827_vm14, %v5959_v8, %v824_v48 }
 0x1b0   :  { %v640_v51 = vmul.f32 %v5961_v32, %v639_v62  ;;  %vm662_vm0 = vweird.f32 %v656_v25  ;;  %vm845_vm4 = vweird.f32 %v7265_v41 }
 0x1b1   :  { %v841_v50 = vsub.f32 1.0, %v840_v1  ;;  %vm667_vm3 = vcmp.eq.f32.partialorder %v666_v22, 8.507059e+37  ;;  %v848_v22 = vand.u32 2147483647, %v7261_v38  ;;  %vm7289_vm6 = vmor %vm844_vm5, %vm845_vm4 }
 0x1b2   :  { %v641_v29 = vadd.f32 %v5961_v32, %v640_v51 }
 0x1b3   :  { %vm849_vm7 = vcmp.eq.f32.partialorder %v848_v22, 8.507059e+37 }
 0x1b4   :  { %v645_v35 = vsel %vm644_vm10, %v5961_v32, %v641_v29  ;;  %v751_v32 = vperm.slane %v7182_v61, 2 }
 0x1b5   :  { %v650_v55 = vsel %vm647_vm11, %v649_v53, %v645_v35  ;;  %v5967_v43 = vpop.eup %5966  ;;  %v668_v35 = vand.u32 2147483648, %v656_v25  ;;  %v832_v53 = vor.u32 1.1754944e-38, %v831_v49 }
 0x1b6   :  { %v692_v62 = vmul.f32 %v690_v27, %v650_v55  ;;  %v658_v18 = vmul.f32 %v5967_v43, %v656_v25  ;;  %vm663_vm15 = vweird.f32 %v5967_v43 }
 0x1b7   :  { %vm664_vm2 = vmor %vm662_vm0, %vm663_vm15  ;;  %v669_v55 = vor.u32 1.1754944e-38, %v668_v35  ;;  %v833_v42 = vsel %vm830_vm1, %v832_v53, %v828_v58  ;;  %v1119_v58 = vld [vmem:[#allocation16 + $0x78] sm:$0xff] }
 0x1b8   :  { %v693_v51 = vadd.f32 %v692_v62, %v447_v16  ;;  %v659_v13 = vsub.f32 1.0, %v658_v18  ;;  %v812_v29 = vpop.f32.mrf.mxu3  ;;  %v7275_v18 = vld [vmem:[#allocation18] ss:$0 sm:$0xff] }
 0x1b9   :  { %v813_v62 = vadd.f32 %v812_v29, %v751_v32  ;;  %v857_v1 = vmul.f32 %v7275_v18, %v833_v42  ;;  %v1234_v53 = vld [vmem:[#allocation19 + $0x178] sm:$0xff]  ;;  %v1221_v29 = vld [vmem:[#allocation19 + $0x110] sm:$0xff] }
 0x1ba   :  { %5968 = vtanh.f32 %v693_v51  ;;  %v660_v44 = vmul.f32 %v5967_v43, %v659_v13  ;;  %v842_v13 = vmul.f32 %v7265_v41, %v841_v50  ;;  %v1232_v50 = vld [vmem:[#allocation19 + $0x168] sm:$0xff] }
 0x1bb   :  { %v858_v28 = vadd.f32 %v857_v1, %v813_v62  ;;  %v1231_v62 = vld [vmem:[#allocation19 + $0x160] sm:$0xff] }
 0x1bc   :  { %v661_v27 = vadd.f32 %v5967_v43, %v660_v44  ;;  %v843_v44 = vadd.f32 %v7265_v41, %v842_v13  ;;  %v1226_v13 = vld [vmem:[#allocation19 + $0x138] sm:$0xff] }
 0x1bd   :  { %5970 = vtanh.f32 %v858_v28  ;;  %v1116_v1 = vld [vmem:[#allocation16 + $0x60] sm:$0xff]  ;;  %v1224_v28 = vld [vmem:[#allocation19 + $0x128] sm:$0xff] }
 0x1be   :  { %v665_v16 = vsel %vm664_vm2, %v5967_v43, %v661_v27  ;;  %v850_v43 = vand.u32 2147483648, %v7261_v38  ;;  %v847_v27 = vsel %vm7289_vm6, %v7265_v41, %v843_v44  ;;  %v1118_v38 = vld [vmem:[#allocation16 + $0x70] sm:$0xff]  ;;  %v1227_v41 = vld [vmem:[#allocation19 + $0x140] sm:$0xff] }
 0x1bf   :  { %v670_v48 = vsel %vm667_vm3, %v669_v55, %v665_v16  ;;  %v1229_v55 = vld [vmem:[#allocation19 + $0x150] sm:$0xff]  ;;  %v1230_v16 = vld [vmem:[#allocation19 + $0x158] sm:$0xff] }
 0x1c0   :  { %v5969_v51 = vpop.eup %5968  ;;  %v695_v8 = vsub.f32 1.0, %v670_v48  ;;  %v697_v25 = vmul.f32 %v670_v48, %v7083_v26  ;;  %v1233_v26 = vld [vmem:[#allocation19 + $0x170] sm:$0xff]  ;;  %v851_v42 = vor.u32 1.1754944e-38, %v850_v43 }
 0x1c1   :  { %v1225_v44 = vld [vmem:[#allocation19 + $0x130] sm:$0xff] }
 0x1c2   :  { %v696_v49 = vmul.f32 %v5969_v51, %v695_v8  ;;  %v1117_v51 = vld [vmem:[#allocation16 + $0x68] sm:$0xff]  ;;  %v852_v48 = vsel %vm849_vm7, %v851_v42, %v847_v27  ;;  %v1217_v27 = vld [vmem:[#allocation19 + $0xf0] sm:$0xff] }
 0x1c3   :  { %v1228_v8 = vld [vmem:[#allocation19 + $0x148] sm:$0xff]  ;;  %v860_v43 = vsub.f32 1.0, %v852_v48  ;;  %v1211_v48 = vld [vmem:[#allocation19 + $0xc0] sm:$0xff] }
 0x1c4   :  { %v7285_v35 = vadd.f32 %v697_v25, %v696_v49  ;;  %v1223_v49 = vld [vmem:[#allocation19 + $0x120] sm:$0xff]  ;;  %v5971_v25 = vpop.eup %5970 }
 0x1c5   :  { %v7300_v22 = vmul.f32 %v5971_v25, %v860_v43  ;;  %v1113_v42 = vld [vmem:[#allocation16 + $0x48] sm:$0xff]  ;;  %v1209_v25 = vld [vmem:[#allocation19 + $0xb0] sm:$0xff] }
 0x1c6   :  { %881 = vmatmul.f32.vlgmr.msra.gmra.mxu0 %v7285_v35  ;;  %901 = vmatmul.f32.vlgmr.msra.gmra.mxu1 %v7285_v35  ;;  %v1205_v43 = vld [vmem:[#allocation19 + $0x90] sm:$0xff] }
 0x1c7   :  { %961 = vmatmul.f32.vlgmr.msra.gmra.mxu2 %v7285_v35  ;;  %988 = vmatmul.f32.vlgmr.msrb.gmra.mxu3 %v7285_v35 }
 0x1c8   :  { %1160 = vmatpush.msra.mxu0 %v1119_v58  ;;  %1243 = vmatpush.msra.mxu1 %v1232_v50  ;;  %v1115_v58 = vld [vmem:[#allocation16 + $0x58] sm:$0xff]  ;;  %v1220_v50 = vld [vmem:[#allocation19 + $0x108] sm:$0xff] }
 0x1c9   :  { %1263 = vmatpush.msra.mxu2 %v1233_v26  ;;  %1283 = vmatpush.msrb.mxu3 %v1234_v53  ;;  %v1222_v26 = vld [vmem:[#allocation19 + $0x118] sm:$0xff]  ;;  %v1114_v53 = vld [vmem:[#allocation16 + $0x50] sm:$0xff] }
 0x1ca   :  { %1161 = vmatpush.msra.mxu0 %v1118_v38  ;;  %1244 = vmatpush.msra.mxu1 %v1229_v55  ;;  %v1218_v38 = vld [vmem:[#allocation19 + $0xf8] sm:$0xff]  ;;  %v1219_v55 = vld [vmem:[#allocation19 + $0x100] sm:$0xff] }
 0x1cb   :  { %1264 = vmatpush.msra.mxu2 %v1230_v16  ;;  %1284 = vmatpush.msrb.mxu3 %v1231_v62  ;;  %v1214_v16 = vld [vmem:[#allocation19 + $0xd8] sm:$0xff]  ;;  %v1215_v62 = vld [vmem:[#allocation19 + $0xe0] sm:$0xff] }
 0x1cc   :  { %1162 = vmatpush.msra.mxu0 %v1117_v51  ;;  %1245 = vmatpush.msra.mxu1 %v1226_v13  ;;  %v1216_v51 = vld [vmem:[#allocation19 + $0xe8] sm:$0xff]  ;;  %v1112_v13 = vld [vmem:[#allocation16 + $0x40] sm:$0xff] }
 0x1cd   :  { %1265 = vmatpush.msra.mxu2 %v1227_v41  ;;  %1285 = vmatpush.msrb.mxu3 %v1228_v8  ;;  %v1212_v41 = vld [vmem:[#allocation19 + $0xc8] sm:$0xff]  ;;  %v1213_v8 = vld [vmem:[#allocation19 + $0xd0] sm:$0xff] }
 0x1ce   :  { %1163 = vmatpush.msra.mxu0 %v1116_v1  ;;  %1246 = vmatpush.msra.mxu1 %v1223_v49  ;;  %v1111_v1 = vld [vmem:[#allocation16 + $0x38] sm:$0xff]  ;;  %v1208_v49 = vld [vmem:[#allocation19 + $0xa8] sm:$0xff] }
 0x1cf   :  { %1266 = vmatpush.msra.mxu2 %v1224_v28  ;;  %1286 = vmatpush.msrb.mxu3 %v1225_v44  ;;  %v1210_v28 = vld [vmem:[#allocation19 + $0xb8] sm:$0xff]  ;;  %v1110_v44 = vld [vmem:[#allocation16 + $0x30] sm:$0xff] }
 0x1d0   :  { %1008 = vmatmul.f32.vlgmr.msrb.gmra.mxu0 %v7285_v35  ;;  %1028 = vmatmul.f32.vlgmr.msrb.gmra.mxu1 %v7285_v35 }
 0x1d1   :  { %1080 = vmatmul.f32.vlgmr.msrb.gmra.mxu2 %v7300_v22  ;;  %1100 = vmatmul.f32.vlgmr.msra.gmra.mxu3 %v7300_v22 }
 0x1d2   :  { %1164 = vmatpush.msra.mxu0 %v1115_v58  ;;  %1247 = vmatpush.msra.mxu1 %v1220_v50  ;;  %v1206_v58 = vld [vmem:[#allocation19 + $0x98] sm:$0xff]  ;;  %v1207_v50 = vld [vmem:[#allocation19 + $0xa0] sm:$0xff] }
 0x1d3   :  { %1267 = vmatpush.msra.mxu2 %v1221_v29  ;;  %1287 = vmatpush.msrb.mxu3 %v1222_v26  ;;  %v1109_v29 = vld [vmem:[#allocation16 + $0x28] sm:$0xff]  ;;  %v1202_v26 = vld [vmem:[#allocation19 + $0x78] sm:$0xff] }
 0x1d4   :  { %1165 = vmatpush.msra.mxu0 %v1114_v53  ;;  %1248 = vmatpush.msra.mxu1 %v1217_v27  ;;  %v1203_v53 = vld [vmem:[#allocation19 + $0x80] sm:$0xff]  ;;  %v1204_v27 = vld [vmem:[#allocation19 + $0x88] sm:$0xff] }
 0x1d5   :  { %1268 = vmatpush.msra.mxu2 %v1218_v38  ;;  %1288 = vmatpush.msrb.mxu3 %v1219_v55  ;;  %v1108_v38 = vld [vmem:[#allocation16 + $0x20] sm:$0xff] }
 0x1d6   :  { %1166 = vmatpush.msra.mxu0 %v1113_v42  ;;  %1249 = vmatpush.msra.mxu1 %v1214_v16  ;;  %v1199_v55 = vld [vmem:[#allocation19 + $0x60] sm:$0xff]  ;;  %v1200_v42 = vld [vmem:[#allocation19 + $0x68] sm:$0xff]  ;;  %v1201_v16 = vld [vmem:[#allocation19 + $0x70] sm:$0xff] }
 0x1d7   :  { %1269 = vmatpush.msra.mxu2 %v1215_v62  ;;  %1289 = vmatpush.msrb.mxu3 %v1216_v51  ;;  %v1107_v62 = vld [vmem:[#allocation16 + $0x18] sm:$0xff]  ;;  %v1196_v51 = vld [vmem:[#allocation19 + $0x48] sm:$0xff] }
 0x1d8   :  { %1167 = vmatpush.msra.mxu0 %v1112_v13  ;;  %1250 = vmatpush.msra.mxu1 %v1211_v48  ;;  %v1197_v13 = vld [vmem:[#allocation19 + $0x50] sm:$0xff]  ;;  %v1198_v48 = vld [vmem:[#allocation19 + $0x58] sm:$0xff] }
 0x1d9   :  { %1270 = vmatpush.msra.mxu2 %v1212_v41  ;;  %1290 = vmatpush.msrb.mxu3 %v1213_v8  ;;  %v1106_v41 = vld [vmem:[#allocation16 + $0x10] sm:$0xff] }
 0x1da   :  { %1168 = vmatpush.msra.mxu0 %v1111_v1  ;;  %1251 = vmatpush.msra.mxu1 %v1208_v49  ;;  %v1193_v8 = vld [vmem:[#allocation19 + $0x30] sm:$0xff]  ;;  %v1194_v1 = vld [vmem:[#allocation19 + $0x38] sm:$0xff]  ;;  %v1195_v49 = vld [vmem:[#allocation19 + $0x40] sm:$0xff] }
 0x1db   :  { %1271 = vmatpush.msra.mxu2 %v1209_v25  ;;  %1291 = vmatpush.msrb.mxu3 %v1210_v28  ;;  %v1105_v25 = vld [vmem:[#allocation16 + $0x8] sm:$0xff]  ;;  %v1190_v28 = vld [vmem:[#allocation19 + $0x18] sm:$0xff] }
 0x1dc   :  { %1169 = vmatpush.msra.mxu0 %v1110_v44  ;;  %1252 = vmatpush.msra.mxu1 %v1205_v43  ;;  %v1191_v44 = vld [vmem:[#allocation19 + $0x20] sm:$0xff]  ;;  %v1192_v43 = vld [vmem:[#allocation19 + $0x28] sm:$0xff] }
 0x1dd   :  { %1272 = vmatpush.msra.mxu2 %v1206_v58  ;;  %1292 = vmatpush.msrb.mxu3 %v1207_v50  ;;  %v1104_v58 = vld [vmem:[#allocation16] sm:$0xff] }
 0x1de   :  { %1170 = vmatpush.msra.mxu0 %v1109_v29  ;;  %1253 = vmatpush.msra.mxu1 %v1202_v26  ;;  %v1187_v50 = vld [vmem:[#allocation19] sm:$0xff]  ;;  %v1188_v29 = vld [vmem:[#allocation19 + $0x8] sm:$0xff]  ;;  %v1189_v26 = vld [vmem:[#allocation19 + $0x10] sm:$0xff] }
 0x1df   :  { %1273 = vmatpush.msra.mxu2 %v1203_v53  ;;  %1293 = vmatpush.msrb.mxu3 %v1204_v27  ;;  %v1385_v53 = vld [vmem:[#allocation9 + $0xf0] sm:$0xff]  ;;  %v1386_v27 = vld [vmem:[#allocation9 + $0xf8] sm:$0xff] }
 0x1e0   :  { %1171 = vmatpush.msra.mxu0 %v1108_v38  ;;  %1254 = vmatpush.msra.mxu1 %v1199_v55  ;;  %v1442_v38 = vld [vmem:[#allocation10 + $0x78] sm:$0xff]  ;;  %v1558_v55 = vld [vmem:[#allocation13 + $0x168] sm:$0xff] }
 0x1e1   :  { %1274 = vmatpush.msra.mxu2 %v1200_v42  ;;  %1294 = vmatpush.msrb.mxu3 %v1201_v16  ;;  %v1383_v42 = vld [vmem:[#allocation9 + $0xe0] sm:$0xff]  ;;  %v1384_v16 = vld [vmem:[#allocation9 + $0xe8] sm:$0xff] }
 0x1e2   :  { %1172 = vmatpush.msra.mxu0 %v1107_v62  ;;  %1255 = vmatpush.msra.mxu1 %v1196_v51  ;;  %v1441_v62 = vld [vmem:[#allocation10 + $0x70] sm:$0xff] }
 0x1e3   :  { %1275 = vmatpush.msra.mxu2 %v1197_v13  ;;  %1295 = vmatpush.msrb.mxu3 %v1198_v48  ;;  %v1555_v51 = vld [vmem:[#allocation13 + $0x150] sm:$0xff] }
 0x1e4   :  { %1173 = vmatpush.msra.mxu0 %v1106_v41  ;;  %1256 = vmatpush.msra.mxu1 %v1193_v8  ;;  %v1381_v13 = vld [vmem:[#allocation9 + $0xd0] sm:$0xff]  ;;  %v1382_v48 = vld [vmem:[#allocation9 + $0xd8] sm:$0xff]  ;;  %v1440_v41 = vld [vmem:[#allocation10 + $0x68] sm:$0xff] }
 0x1e5   :  { %1276 = vmatpush.msra.mxu2 %v1194_v1  ;;  %1296 = vmatpush.msrb.mxu3 %v1195_v49  ;;  %v1552_v8 = vld [vmem:[#allocation13 + $0x138] sm:$0xff]  ;;  %v1380_v49 = vld [vmem:[#allocation9 + $0xc8] sm:$0xff] }
 0x1e6   :  { %1174 = vmatpush.msra.mxu0 %v1105_v25  ;;  %1257 = vmatpush.msra.mxu1 %v1190_v28  ;;  %v1379_v1 = vld [vmem:[#allocation9 + $0xc0] sm:$0xff] }
 0x1e7   :  { %1277 = vmatpush.msra.mxu2 %v1191_v44  ;;  %1297 = vmatpush.msrb.mxu3 %v1192_v43  ;;  %v1439_v25 = vld [vmem:[#allocation10 + $0x60] sm:$0xff]  ;;  %v1377_v44 = vld [vmem:[#allocation9 + $0xb0] sm:$0xff]  ;;  %v1378_v43 = vld [vmem:[#allocation9 + $0xb8] sm:$0xff] }
 0x1e8   :  { %1175 = vmatpush.msra.mxu0 %v1104_v58  ;;  %1258 = vmatpush.msra.mxu1 %v1187_v50  ;;  %v1549_v28 = vld [vmem:[#allocation13 + $0x120] sm:$0xff]  ;;  %v1438_v58 = vld [vmem:[#allocation10 + $0x58] sm:$0xff]  ;;  %v1546_v50 = vld [vmem:[#allocation13 + $0x108] sm:$0xff] }
 0x1e9   :  { %1278 = vmatpush.msra.mxu2 %v1188_v29  ;;  %1298 = vmatpush.msrb.mxu3 %v1189_v26  ;;  %v1375_v29 = vld [vmem:[#allocation9 + $0xa0] sm:$0xff]  ;;  %v1376_v26 = vld [vmem:[#allocation9 + $0xa8] sm:$0xff] }
 0x1ea   :  { %1176 = vmatmul.f32.vlgmr.msra.gmra.mxu0 %v7300_v22  ;;  %1259 = vmatmul.f32.vlgmr.msra.gmra.mxu1 %v7300_v22 }
 0x1eb   :  { %1279 = vmatmul.f32.vlgmr.msra.gmra.mxu2 %v7300_v22  ;;  %1299 = vmatmul.f32.vlgmr.msrb.gmra.mxu3 %v7300_v22 }
 0x1ec   :  { %1387 = vmatpush.msrb.mxu0 %v1385_v53  ;;  %1407 = vmatpush.msrb.mxu1 %v1386_v27  ;;  %v1437_v53 = vld [vmem:[#allocation10 + $0x50] sm:$0xff] }
 0x1ed   :  { %1486 = vmatpush.msrb.mxu2 %v1442_v38  ;;  %1569 = vmatpush.msra.mxu3 %v1558_v55  ;;  %v1543_v27 = vld [vmem:[#allocation13 + $0xf0] sm:$0xff] }
 0x1ee   :  { %1388 = vmatpush.msrb.mxu0 %v1383_v42  ;;  %1408 = vmatpush.msrb.mxu1 %v1384_v16  ;;  %v1373_v38 = vld [vmem:[#allocation9 + $0x90] sm:$0xff]  ;;  %v1374_v55 = vld [vmem:[#allocation9 + $0x98] sm:$0xff]  ;;  %v1436_v42 = vld [vmem:[#allocation10 + $0x48] sm:$0xff] }
 0x1ef   :  { %1487 = vmatpush.msrb.mxu2 %v1441_v62  ;;  %1570 = vmatpush.msra.mxu3 %v1555_v51  ;;  %v1540_v16 = vld [vmem:[#allocation13 + $0xd8] sm:$0xff]  ;;  %v1372_v51 = vld [vmem:[#allocation9 + $0x88] sm:$0xff] }
 0x1f0   :  { %1389 = vmatpush.msrb.mxu0 %v1381_v13  ;;  %1409 = vmatpush.msrb.mxu1 %v1382_v48  ;;  %v1371_v62 = vld [vmem:[#allocation9 + $0x80] sm:$0xff] }
 0x1f1   :  { %1488 = vmatpush.msrb.mxu2 %v1440_v41  ;;  %1571 = vmatpush.msra.mxu3 %v1552_v8  ;;  %v1435_v13 = vld [vmem:[#allocation10 + $0x40] sm:$0xff]  ;;  %v1369_v41 = vld [vmem:[#allocation9 + $0x70] sm:$0xff]  ;;  %v1370_v8 = vld [vmem:[#allocation9 + $0x78] sm:$0xff] }
 0x1f2   :  { %1390 = vmatpush.msrb.mxu0 %v1379_v1  ;;  %1410 = vmatpush.msrb.mxu1 %v1380_v49  ;;  %v1537_v48 = vld [vmem:[#allocation13 + $0xc0] sm:$0xff]  ;;  %v1434_v1 = vld [vmem:[#allocation10 + $0x38] sm:$0xff]  ;;  %v1534_v49 = vld [vmem:[#allocation13 + $0xa8] sm:$0xff] }
 0x1f3   :  { %1489 = vmatpush.msrb.mxu2 %v1439_v25  ;;  %1572 = vmatpush.msra.mxu3 %v1549_v28  ;;  %v1367_v25 = vld [vmem:[#allocation9 + $0x60] sm:$0xff]  ;;  %v1368_v28 = vld [vmem:[#allocation9 + $0x68] sm:$0xff] }
 0x1f4   :  { %1391 = vmatpush.msrb.mxu0 %v1377_v44  ;;  %1411 = vmatpush.msrb.mxu1 %v1378_v43  ;;  %v1433_v44 = vld [vmem:[#allocation10 + $0x30] sm:$0xff] }
 0x1f5   :  { %1490 = vmatpush.msrb.mxu2 %v1438_v58  ;;  %1573 = vmatpush.msra.mxu3 %v1546_v50  ;;  %v1531_v43 = vld [vmem:[#allocation13 + $0x90] sm:$0xff] }
 0x1f6   :  { %1392 = vmatpush.msrb.mxu0 %v1375_v29  ;;  %1412 = vmatpush.msrb.mxu1 %v1376_v26  ;;  %v1365_v58 = vld [vmem:[#allocation9 + $0x50] sm:$0xff]  ;;  %v1366_v50 = vld [vmem:[#allocation9 + $0x58] sm:$0xff]  ;;  %v1432_v29 = vld [vmem:[#allocation10 + $0x28] sm:$0xff] }
 0x1f7   :  { %1491 = vmatpush.msrb.mxu2 %v1437_v53  ;;  %1574 = vmatpush.msra.mxu3 %v1543_v27  ;;  %v1528_v26 = vld [vmem:[#allocation13 + $0x78] sm:$0xff]  ;;  %v1364_v27 = vld [vmem:[#allocation9 + $0x48] sm:$0xff] }
 0x1f8   :  { %1393 = vmatpush.msrb.mxu0 %v1373_v38  ;;  %1413 = vmatpush.msrb.mxu1 %v1374_v55  ;;  %v1363_v53 = vld [vmem:[#allocation9 + $0x40] sm:$0xff] }
 0x1f9   :  { %1492 = vmatpush.msrb.mxu2 %v1436_v42  ;;  %1575 = vmatpush.msra.mxu3 %v1540_v16  ;;  %v1431_v38 = vld [vmem:[#allocation10 + $0x20] sm:$0xff]  ;;  %v1361_v42 = vld [vmem:[#allocation9 + $0x30] sm:$0xff]  ;;  %v1362_v16 = vld [vmem:[#allocation9 + $0x38] sm:$0xff] }
 0x1fa   :  { %1394 = vmatpush.msrb.mxu0 %v1371_v62  ;;  %1414 = vmatpush.msrb.mxu1 %v1372_v51  ;;  %v1525_v55 = vld [vmem:[#allocation13 + $0x60] sm:$0xff]  ;;  %v1430_v62 = vld [vmem:[#allocation10 + $0x18] sm:$0xff]  ;;  %v1522_v51 = vld [vmem:[#allocation13 + $0x48] sm:$0xff] }
 0x1fb   :  { %1493 = vmatpush.msrb.mxu2 %v1435_v13  ;;  %1576 = vmatpush.msra.mxu3 %v1537_v48  ;;  %v1359_v13 = vld [vmem:[#allocation9 + $0x20] sm:$0xff]  ;;  %v1360_v48 = vld [vmem:[#allocation9 + $0x28] sm:$0xff] }
 0x1fc   :  { %1395 = vmatpush.msrb.mxu0 %v1369_v41  ;;  %1415 = vmatpush.msrb.mxu1 %v1370_v8  ;;  %v1429_v41 = vld [vmem:[#allocation10 + $0x10] sm:$0xff] }
 0x1fd   :  { %1494 = vmatpush.msrb.mxu2 %v1434_v1  ;;  %1577 = vmatpush.msra.mxu3 %v1534_v49  ;;  %v1519_v8 = vld [vmem:[#allocation13 + $0x30] sm:$0xff] }
 0x1fe   :  { %1396 = vmatpush.msrb.mxu0 %v1367_v25  ;;  %1416 = vmatpush.msrb.mxu1 %v1368_v28  ;;  %v1357_v1 = vld [vmem:[#allocation9 + $0x10] sm:$0xff]  ;;  %v1358_v49 = vld [vmem:[#allocation9 + $0x18] sm:$0xff]  ;;  %v1428_v25 = vld [vmem:[#allocation10 + $0x8] sm:$0xff] }
 0x1ff   :  { %1495 = vmatpush.msrb.mxu2 %v1433_v44  ;;  %1578 = vmatpush.msra.mxu3 %v1531_v43  ;;  %v1516_v28 = vld [vmem:[#allocation13 + $0x18] sm:$0xff]  ;;  %v1356_v43 = vld [vmem:[#allocation9 + $0x8] sm:$0xff] }
 0x200   :  { %1397 = vmatpush.msrb.mxu0 %v1365_v58  ;;  %1417 = vmatpush.msrb.mxu1 %v1366_v50  ;;  %v1355_v44 = vld [vmem:[#allocation9] sm:$0xff] }
 0x201   :  { %1496 = vmatpush.msrb.mxu2 %v1432_v29  ;;  %1579 = vmatpush.msra.mxu3 %v1528_v26  ;;  %v1427_v58 = vld [vmem:[#allocation10] sm:$0xff]  ;;  %v1559_v29 = vld [vmem:[#allocation13 + $0x170] sm:$0xff] }
 0x202   :  { %1398 = vmatpush.msrb.mxu0 %v1363_v53  ;;  %1418 = vmatpush.msrb.mxu1 %v1364_v27  ;;  %v1513_v50 = vld [vmem:[#allocation13] sm:$0xff]  ;;  %v1560_v26 = vld [vmem:[#allocation13 + $0x178] sm:$0xff] }
 0x203   :  { %1497 = vmatpush.msrb.mxu2 %v1431_v38  ;;  %1580 = vmatpush.msra.mxu3 %v1525_v55  ;;  %v1556_v53 = vld [vmem:[#allocation13 + $0x158] sm:$0xff]  ;;  %v1557_v27 = vld [vmem:[#allocation13 + $0x160] sm:$0xff]  ;;  %v1554_v55 = vld [vmem:[#allocation13 + $0x148] sm:$0xff] }
 0x204   :  { %1399 = vmatpush.msrb.mxu0 %v1361_v42  ;;  %1419 = vmatpush.msrb.mxu1 %v1362_v16  ;;  %v1553_v38 = vld [vmem:[#allocation13 + $0x140] sm:$0xff]  ;;  %v1550_v42 = vld [vmem:[#allocation13 + $0x128] sm:$0xff]  ;;  %v1551_v16 = vld [vmem:[#allocation13 + $0x130] sm:$0xff] }
 0x205   :  { %1498 = vmatpush.msrb.mxu2 %v1430_v62  ;;  %1581 = vmatpush.msra.mxu3 %v1522_v51  ;;  %v368_v62 = vadd.f32 %v7155_v7, %v8711_v40  ;;  %v1538_v7 = vld [vmem:[#allocation13 + $0xc8] sm:$0xff] }
 0x206   :  { %1400 = vmatpush.msrb.mxu0 %v1359_v13  ;;  %1420 = vmatpush.msrb.mxu1 %v1360_v48 }
 0x207   :  { %1499 = vmatpush.msrb.mxu2 %v1429_v41  ;;  %1582 = vmatpush.msra.mxu3 %v1519_v8  ;;  %v1536_v8 = vld [vmem:[#allocation13 + $0xb8] sm:$0xff] }
 0x208   :  { %1401 = vmatpush.msrb.mxu0 %v1357_v1  ;;  %1421 = vmatpush.msrb.mxu1 %v1358_v49 }
 0x209   :  { %1500 = vmatpush.msrb.mxu2 %v1428_v25  ;;  %1583 = vmatpush.msra.mxu3 %v1516_v28  ;;  %v1527_v25 = vld [vmem:[#allocation13 + $0x70] sm:$0xff] }
 0x20a   :  { %1402 = vmatpush.msrb.mxu0 %v1355_v44  ;;  %1422 = vmatpush.msrb.mxu1 %v1356_v43  ;;  %v1639_v44 = vld [vmem:[#allocation15 + $0x48] sm:$0xff] }
 0x20b   :  { %1501 = vmatpush.msrb.mxu2 %v1427_v58  ;;  %1584 = vmatpush.msra.mxu3 %v1513_v50  ;;  %v1524_v58 = vld [vmem:[#allocation13 + $0x58] sm:$0xff]  ;;  %v1636_v50 = vld [vmem:[#allocation15 + $0x30] sm:$0xff] }
 0x20c   :  { %1589 = vmatpush.msra.mxu0 %v1559_v29  ;;  %1609 = vmatpush.msra.mxu1 %v1560_v26  ;;  %v1521_v29 = vld [vmem:[#allocation13 + $0x40] sm:$0xff] }
 0x20d   :  { %1662 = vmatpush.msra.mxu2 %v7169_v47  ;;  %1682 = vmatpush.msrb.mxu3 %v7171_v52  ;;  %v1547_v47 = vld [vmem:[#allocation13 + $0x110] sm:$0xff]  ;;  %v1548_v52 = vld [vmem:[#allocation13 + $0x118] sm:$0xff]  ;;  %v1634_v26 = vld [vmem:[#allocation15 + $0x20] sm:$0xff] }
 0x20e   :  { %1590 = vmatpush.msra.mxu0 %v1556_v53  ;;  %1610 = vmatpush.msra.mxu1 %v1557_v27  ;;  %v8717_v53 = vperm.slane %v7182_v61, 0 }
 0x20f   :  { %1663 = vmatpush.msra.mxu2 %v7175_v54  ;;  %1683 = vmatpush.msrb.mxu3 %v7177_v60  ;;  %v1544_v54 = vld [vmem:[#allocation13 + $0xf8] sm:$0xff]  ;;  %v1545_v60 = vld [vmem:[#allocation13 + $0x100] sm:$0xff] }
 0x210   :  { %1591 = vmatpush.msra.mxu0 %v1553_v38  ;;  %1611 = vmatpush.msra.mxu1 %v1554_v55  ;;  %v8718_v38 = vperm.slane %v7182_v61, 1  ;;  %v1831_v61 = vld [vmem:[#allocation19 + $0x158] sm:$0xff] }
 0x211   :  { %1664 = vmatpush.msra.mxu2 %v7186_v63  ;;  %1684 = vmatpush.msrb.mxu3 %v7188_v0  ;;  %v409_v63 = vadd.f32 %v7141_v6, %v8713_v19  ;;  %v1539_v6 = vld [vmem:[#allocation13 + $0xd0] sm:$0xff] }
 0x212   :  { %1592 = vmatpush.msra.mxu0 %v1550_v42  ;;  %1612 = vmatpush.msra.mxu1 %v1551_v16  ;;  %v1635_v42 = vld [vmem:[#allocation15 + $0x28] sm:$0xff] }
 0x213   :  { %1665 = vmatpush.msra.mxu2 %v7195_v2  ;;  %1685 = vmatpush.msrb.mxu3 %v7197_v15  ;;  %v1541_v2 = vld [vmem:[#allocation13 + $0xe0] sm:$0xff]  ;;  %v1542_v15 = vld [vmem:[#allocation13 + $0xe8] sm:$0xff] }
 0x214   :  { %1593 = vmatpush.msra.mxu0 %v1547_v47  ;;  %1613 = vmatpush.msra.mxu1 %v1548_v52  ;;  %v1517_v52 = vld [vmem:[#allocation13 + $0x20] sm:$0xff] }
 0x215   :  { %1666 = vmatpush.msra.mxu2 %v7201_v4  ;;  %1686 = vmatpush.msrb.mxu3 %v7203_v24  ;;  %v1535_v24 = vld [vmem:[#allocation13 + $0xb0] sm:$0xff] }
 0x216   :  { %1594 = vmatpush.msra.mxu0 %v1544_v54  ;;  %1614 = vmatpush.msra.mxu1 %v1545_v60  ;;  %v1518_v54 = vld [vmem:[#allocation13 + $0x28] sm:$0xff]  ;;  %v1632_v60 = vld [vmem:[#allocation15 + $0x10] sm:$0xff] }
 0x217   :  { %1667 = vmatpush.msra.mxu2 %v7211_v30  ;;  %1687 = vmatpush.msrb.mxu3 %v7213_v20  ;;  %v1532_v30 = vld [vmem:[#allocation13 + $0x98] sm:$0xff]  ;;  %v1533_v20 = vld [vmem:[#allocation13 + $0xa0] sm:$0xff] }
 0x218   :  { %1595 = vmatpush.msra.mxu0 %v1541_v2  ;;  %1615 = vmatpush.msra.mxu1 %v1542_v15  ;;  %v1515_v2 = vld [vmem:[#allocation13 + $0x10] sm:$0xff]  ;;  %v1630_v15 = vld [vmem:[#allocation15] sm:$0xff] }
 0x219   :  { %1668 = vmatpush.msra.mxu2 %v7218_v36  ;;  %1688 = vmatpush.msrb.mxu3 %v7220_v31  ;;  %v1529_v36 = vld [vmem:[#allocation13 + $0x80] sm:$0xff]  ;;  %v1530_v31 = vld [vmem:[#allocation13 + $0x88] sm:$0xff] }
 0x21a   :  { %1596 = vmatpush.msra.mxu0 %v1538_v7  ;;  %1616 = vmatpush.msra.mxu1 %v1539_v6  ;;  %v1631_v6 = vld [vmem:[#allocation15 + $0x8] sm:$0xff] }
 0x21b   :  { %1669 = vmatpush.msra.mxu2 %v7225_v45  ;;  %1689 = vmatpush.msrb.mxu3 %v7227_v46  ;;  %v1526_v46 = vld [vmem:[#allocation13 + $0x68] sm:$0xff] }
 0x21c   :  { %1597 = vmatpush.msra.mxu0 %v1535_v24  ;;  %1617 = vmatpush.msra.mxu1 %v1536_v8 }
 0x21d   :  { %1670 = vmatpush.msra.mxu2 %v7233_v56  ;;  %1690 = vmatpush.msrb.mxu3 %v7235_v59  ;;  %v1638_v56 = vld [vmem:[#allocation15 + $0x40] sm:$0xff] }
 0x21e   :  { %1598 = vmatpush.msra.mxu0 %v1532_v30  ;;  %1618 = vmatpush.msra.mxu1 %v1533_v20 }
 0x21f   :  { %1671 = vmatpush.msra.mxu2 %v7239_v3  ;;  %1691 = vmatpush.msrb.mxu3 %v7241_v21  ;;  %v1523_v21 = vld [vmem:[#allocation13 + $0x50] sm:$0xff] }
 0x220   :  { %1599 = vmatpush.msra.mxu0 %v1529_v36  ;;  %1619 = vmatpush.msra.mxu1 %v1530_v31 }
 0x221   :  { %1672 = vmatpush.msra.mxu2 %v7247_v57  ;;  %1692 = vmatpush.msrb.mxu3 %v7249_v37  ;;  %v1637_v57 = vld [vmem:[#allocation15 + $0x38] sm:$0xff] }
 0x222   :  { %1600 = vmatpush.msra.mxu0 %v1526_v46  ;;  %1620 = vmatpush.msra.mxu1 %v1527_v25  ;;  %v1520_v37 = vld [vmem:[#allocation13 + $0x38] sm:$0xff] }
 0x223   :  { %1673 = vmatpush.msra.mxu2 %v1638_v56  ;;  %1693 = vmatpush.msrb.mxu3 %v1639_v44 }
 0x224   :  { %1601 = vmatpush.msra.mxu0 %v1523_v21  ;;  %1621 = vmatpush.msra.mxu1 %v1524_v58 }
 0x225   :  { %1674 = vmatpush.msra.mxu2 %v1636_v50  ;;  %1694 = vmatpush.msrb.mxu3 %v1637_v57 }
 0x226   :  { %1602 = vmatpush.msra.mxu0 %v1520_v37  ;;  %1622 = vmatpush.msra.mxu1 %v1521_v29  ;;  %v450_v29 = vadd.f32 %v7143_v9, %v7047_v5 }
 0x227   :  { %1675 = vmatpush.msra.mxu2 %v1634_v26  ;;  %1695 = vmatpush.msrb.mxu3 %v1635_v42 }
 0x228   :  { %1603 = vmatpush.msra.mxu0 %v1517_v52  ;;  %1623 = vmatpush.msra.mxu1 %v1518_v54 }
 0x229   :  { %1676 = vmatpush.msra.mxu2 %v1632_v60 }
 0x22a   :  { %1624 = vmatpush.msra.mxu1 %v1515_v2 }
 0x22b   :  { %1677 = vmatpush.msra.mxu2 %v1630_v15 }
 0x243   :  { %v882_v0 = vpop.f32.mrf.mxu0  ;;  %v902_v51 = vpop.f32.mrf.mxu1 }
 0x244   :  { %v905_v13 = vadd.f32 %v882_v0, %v368_v62  ;;  %v925_v48 = vadd.f32 %v902_v51, %v409_v63  ;;  %v1633_v0 = vld [vmem:[#allocation15 + $0x18] sm:$0xff]  ;;  %v1514_v51 = vld [vmem:[#allocation13 + $0x8] sm:$0xff] }
 0x245   :  { %1696 = vmatpush.msrb.mxu3 %v1633_v0  ;;  %1604 = vmatpush.msra.mxu0 %v1514_v51 }
 0x246   :  { %v5856_v41 = vmul.f32 -1.442695, %v905_v13  ;;  %v5857_v4 = vmul.f32 -1.442695, %v925_v48 }
 0x247   :  { %1697 = vmatpush.msrb.mxu3 %v1631_v6 }
 0x248   :  { %5972 = vpow2.f32 %v5856_v41 }
 0x249   :  { %5974 = vpow2.f32 %v5857_v4 }
 0x24a   :  { %v7330_v1 = vpop.f32.mrf.mxu2  ;;  %v989_v49 = vpop.f32.mrf.mxu3 }
 0x24b   :  { %v990_v27 = vadd.f32 %v989_v49, %v8717_v53 }
 0x24d   :  { %v1009_v3 = vpop.f32.mrf.mxu0  ;;  %v7353_v56 = vpop.f32.mrf.mxu1 }
 0x24e   :  { %v5973_v45 = vpop.eup %5972  ;;  %v1010_v55 = vadd.f32 %v1009_v3, %v8718_v38  ;;  %v6184_v3 = vld [vmem:[#allocation12] ss:$0 sm:$0xff] }
 0x24f   :  { %v5975_v28 = vpop.eup %5974  ;;  %v7338_v59 = vadd.f32 1.0, %v5973_v45  ;;  %v963_v21 = vadd.f32 %v6184_v3, %v7330_v1  ;;  %v1835_v3 = vld [vmem:[#allocation19 + $0x178] sm:$0xff] }
 0x250   :  { %v7340_v43 = vadd.f32 1.0, %v5975_v28 }
 0x251   :  { %5976 = vrcp.f32 %v7338_v59  ;;  %v921_v20 = vand.u32 2147483648, %v7338_v59  ;;  %v919_v36 = vand.u32 2147483647, %v7338_v59  ;;  %vm915_vm9 = vweird.f32 %v7338_v59 }
 0x252   :  { %5978 = vrcp.f32 %v7340_v43  ;;  %v941_v26 = vand.u32 2147483648, %v7340_v43  ;;  %vm935_vm13 = vweird.f32 %v7340_v43  ;;  %v939_v1 = vand.u32 2147483647, %v7340_v43 }
 0x253   :  { %v922_v25 = vor.u32 1.1754944e-38, %v921_v20  ;;  %vm920_vm11 = vcmp.eq.f32.partialorder %v919_v36, 8.507059e+37  ;;  %v1815_v36 = vld [vmem:[#allocation19 + $0xd8] sm:$0xff] }
 0x254   :  { %v1081_v16 = vpop.f32.mrf.mxu2  ;;  %v1101_v47 = vpop.f32.mrf.mxu3  ;;  %v942_v42 = vor.u32 1.1754944e-38, %v941_v26  ;;  %vm940_vm15 = vcmp.eq.f32.partialorder %v939_v1, 8.507059e+37 }
 0x255   :  { %v1120_v62 = vadd.f32 %v1081_v16, %v990_v27  ;;  %v1140_v63 = vadd.f32 %v1101_v47, %v1010_v55 }
 0x257   :  { %v5977_v13 = vpop.eup %5976  ;;  %v5858_v48 = vmul.f32 -1.442695, %v1120_v62  ;;  %v5859_v7 = vmul.f32 -1.442695, %v1140_v63 }
 0x258   :  { %v5979_v41 = vpop.eup %5978  ;;  %v911_v4 = vmul.f32 %v5977_v13, %v7338_v59  ;;  %vm916_vm8 = vweird.f32 %v5977_v13  ;;  %v7361_v59 = vld [vmem:[%s8576_s14] sm:$0x7] }
 0x259   :  { %v931_v24 = vmul.f32 %v5979_v41, %v7340_v43  ;;  %5980 = vpow2.f32 %v5858_v48  ;;  %vm917_vm10 = vmor %vm915_vm9, %vm916_vm8  ;;  %vm936_vm12 = vweird.f32 %v5979_v41  ;;  %v1237_v38 = vperm.slane %v7361_v59, 0 }
 0x25a   :  { %v912_v8 = vsub.f32 1.0, %v911_v4  ;;  %5982 = vpow2.f32 %v5859_v7  ;;  %vm937_vm14 = vmor %vm935_vm13, %vm936_vm12  ;;  %v1238_v51 = vperm.slane %v7361_v59, 1 }
 0x25b   :  { %v932_v30 = vsub.f32 1.0, %v931_v24 }
 0x25c   :  { %v913_v49 = vmul.f32 %v5977_v13, %v912_v8 }
 0x25d   :  { %v933_v31 = vmul.f32 %v5979_v41, %v932_v30 }
 0x25e   :  { %v914_v45 = vadd.f32 %v5977_v13, %v913_v49 }
 0x25f   :  { %v5981_v46 = vpop.eup %5980  ;;  %v934_v50 = vadd.f32 %v5979_v41, %v933_v31  ;;  %v1717_v31 = vld [vmem:[#allocation16 + $0x78] sm:$0xff] }
 0x260   :  { %v5983_v28 = vpop.eup %5982  ;;  %v918_v44 = vsel %vm917_vm10, %v5977_v13, %v914_v45  ;;  %v1124_v58 = vadd.f32 1.0, %v5981_v46  ;;  %v1833_v45 = vld [vmem:[#allocation19 + $0x168] sm:$0xff] }
 0x261   :  { %v923_v57 = vsel %vm920_vm11, %v922_v25, %v918_v44  ;;  %v7356_v37 = vadd.f32 1.0, %v5983_v28  ;;  %v938_v55 = vsel %vm937_vm14, %v5979_v41, %v934_v50  ;;  %v1834_v44 = vld [vmem:[#allocation19 + $0x170] sm:$0xff] }
 0x262   :  { %v965_v53 = vmul.f32 %v963_v21, %v923_v57  ;;  %5984 = vrcp.f32 %v1124_v58  ;;  %v943_v47 = vsel %vm940_vm15, %v942_v42, %v938_v55  ;;  %v1136_v48 = vand.u32 2147483648, %v1124_v58 }
 0x263   :  { %5986 = vrcp.f32 %v7356_v37  ;;  %v968_v63 = vsub.f32 1.0, %v943_v47  ;;  %v970_v15 = vmul.f32 %v943_v47, %v7285_v35  ;;  %v1134_v41 = vand.u32 2147483647, %v1124_v58  ;;  %v1714_v47 = vld [vmem:[#allocation16 + $0x60] sm:$0xff] }
 0x264   :  { %v966_v27 = vadd.f32 %v965_v53, %v450_v29  ;;  %vm1130_vm1 = vweird.f32 %v1124_v58  ;;  %v1137_v35 = vor.u32 1.1754944e-38, %v1136_v48  ;;  %v1830_v29 = vld [vmem:[#allocation19 + $0x150] sm:$0xff]  ;;  %v1156_v26 = vand.u32 2147483648, %v7356_v37 }
 0x265   :  { %vm1135_vm3 = vcmp.eq.f32.partialorder %v1134_v41, 8.507059e+37  ;;  %vm1150_vm5 = vweird.f32 %v7356_v37 }
 0x266   :  { %5988 = vtanh.f32 %v966_v27  ;;  %v1715_v27 = vld [vmem:[#allocation16 + $0x68] sm:$0xff] }
 0x267   :  { %v1260_v16 = vpop.f32.mrf.mxu1  ;;  %v1177_v24 = vpop.f32.mrf.mxu0 }
 0x268   :  { %v5985_v9 = vpop.eup %5984  ;;  %v1261_v52 = vadd.f32 %v1260_v16, %v1237_v38  ;;  %v1178_v25 = vadd.f32 %v7275_v18, %v1177_v24  ;;  %v1716_v18 = vld [vmem:[#allocation16 + $0x70] sm:$0xff]  ;;  %v1827_v38 = vld [vmem:[#allocation19 + $0x138] sm:$0xff]  ;;  %v1828_v16 = vld [vmem:[#allocation19 + $0x140] sm:$0xff] }
 0x269   :  { %v7370_v54 = vpop.eup %5986  ;;  %v1126_v60 = vmul.f32 %v5985_v9, %v1124_v58  ;;  %vm1131_vm0 = vweird.f32 %v5985_v9  ;;  %v1030_v58 = vadd.f32 %v7353_v56, %v751_v32  ;;  %v1832_v32 = vld [vmem:[#allocation19 + $0x160] sm:$0xff]  ;;  %v1154_v56 = vand.u32 2147483647, %v7356_v37  ;;  %v1819_v24 = vld [vmem:[#allocation19 + $0xf8] sm:$0xff] }
 0x26a   :  { %v1146_v43 = vmul.f32 %v7370_v54, %v7356_v37  ;;  %v5860_v62 = vmul.f32 -1.442695, %v1261_v52  ;;  %vm7379_vm2 = vmor %vm1130_vm1, %vm1131_vm0  ;;  %vm1151_vm4 = vweird.f32 %v7370_v54  ;;  %v1824_v52 = vld [vmem:[#allocation19 + $0x120] sm:$0xff] }
 0x26b   :  { %v1127_v0 = vsub.f32 1.0, %v1126_v60  ;;  %vm7402_vm6 = vmor %vm1150_vm5, %vm1151_vm4  ;;  %v1157_v60 = vor.u32 1.1754944e-38, %v1156_v26  ;;  %vm1155_vm7 = vcmp.eq.f32.partialorder %v1154_v56, 8.507059e+37 }
 0x26c   :  { %v5989_v2 = vpop.eup %5988  ;;  %v1147_v13 = vsub.f32 1.0, %v1146_v43  ;;  %5990 = vpow2.f32 %v5860_v62  ;;  %v1825_v43 = vld [vmem:[#allocation19 + $0x128] sm:$0xff]  ;;  %v1826_v62 = vld [vmem:[#allocation19 + $0x130] sm:$0xff] }
 0x26d   :  { %v969_v7 = vmul.f32 %v5989_v2, %v968_v63  ;;  %v1128_v6 = vmul.f32 %v5985_v9, %v1127_v0  ;;  %v1821_v2 = vld [vmem:[#allocation19 + $0x108] sm:$0xff] }
 0x26e   :  { %v1148_v4 = vmul.f32 %v7370_v54, %v1147_v13  ;;  %v1280_v8 = vpop.f32.mrf.mxu2  ;;  %v1823_v13 = vld [vmem:[#allocation19 + $0x118] sm:$0xff] }
 0x26f   :  { %v7377_v30 = vadd.f32 %v970_v15, %v969_v7  ;;  %v1129_v20 = vadd.f32 %v5985_v9, %v1128_v6  ;;  %v1281_v49 = vadd.f32 %v1280_v8, %v1238_v51  ;;  %v1713_v51 = vld [vmem:[#allocation16 + $0x58] sm:$0xff]  ;;  %v1712_v7 = vld [vmem:[#allocation16 + $0x50] sm:$0xff]  ;;  %v1820_v8 = vld [vmem:[#allocation19 + $0x100] sm:$0xff] }
 0x270   :  { %v1149_v50 = vadd.f32 %v7370_v54, %v1148_v4  ;;  %v1822_v15 = vld [vmem:[#allocation19 + $0x110] sm:$0xff] }
 0x271   :  { %v1133_v46 = vsel %vm7379_vm2, %v5985_v9, %v1129_v20  ;;  %v5861_v28 = vmul.f32 -1.442695, %v1281_v49  ;;  %1403 = vmatmul.f32.vlgmr.msrb.gmra.mxu0 %v7377_v30  ;;  %1423 = vmatmul.f32.vlgmr.msrb.gmra.mxu1 %v7377_v30  ;;  %v1829_v9 = vld [vmem:[#allocation19 + $0x148] sm:$0xff]  ;;  %v1818_v6 = vld [vmem:[#allocation19 + $0xf0] sm:$0xff] }
 0x272   :  { %v5991_v21 = vpop.eup %5990  ;;  %v1138_v57 = vsel %vm1135_vm3, %v1137_v35, %v1133_v46  ;;  %1502 = vmatmul.f32.vlgmr.msrb.gmra.mxu2 %v7377_v30  ;;  %1585 = vmatmul.f32.vlgmr.msra.gmra.mxu3 %v7377_v30  ;;  %v1153_v37 = vsel %vm7402_vm6, %v7370_v54, %v1149_v50  ;;  %v1711_v49 = vld [vmem:[#allocation16 + $0x48] sm:$0xff] }
 0x273   :  { %v1180_v53 = vmul.f32 %v1178_v25, %v1138_v57  ;;  %v7396_v1 = vadd.f32 1.0, %v5991_v21  ;;  %5992 = vpow2.f32 %v5861_v28  ;;  %1761 = vmatpush.msrb.mxu0 %v1717_v31  ;;  %1844 = vmatpush.msrb.mxu1 %v1833_v45  ;;  %v1158_v0 = vsel %vm1155_vm7, %v1157_v60, %v1153_v37  ;;  %v1816_v46 = vld [vmem:[#allocation19 + $0xe0] sm:$0xff]  ;;  %v1817_v25 = vld [vmem:[#allocation19 + $0xe8] sm:$0xff]  ;;  %v1814_v57 = vld [vmem:[#allocation19 + $0xd0] sm:$0xff] }
 0x274   :  { %1864 = vmatpush.msrb.mxu2 %v1834_v44  ;;  %1884 = vmatpush.msra.mxu3 %v1835_v3  ;;  %v1183_v41 = vsub.f32 1.0, %v1158_v0  ;;  %v1185_v31 = vmul.f32 %v1158_v0, %v7300_v22  ;;  %v1710_v22 = vld [vmem:[#allocation16 + $0x40] sm:$0xff]  ;;  %v1813_v50 = vld [vmem:[#allocation19 + $0xc8] sm:$0xff] }
 0x275   :  { %v1181_v42 = vadd.f32 %v1180_v53, %v1030_v58  ;;  %5994 = vrcp.f32 %v7396_v1  ;;  %1762 = vmatpush.msrb.mxu0 %v1716_v18  ;;  %1845 = vmatpush.msrb.mxu1 %v1830_v29  ;;  %v1319_v28 = vand.u32 2147483648, %v7396_v1  ;;  %v1317_v21 = vand.u32 2147483647, %v7396_v1  ;;  %v1812_v58 = vld [vmem:[#allocation19 + $0xc0] sm:$0xff]  ;;  %v5921_v53 = vld [vmem:[%s8577_s15] ss:$0 sm:$0xff] }
 0x276   :  { %1865 = vmatpush.msrb.mxu2 %v1831_v61  ;;  %1885 = vmatpush.msra.mxu3 %v1832_v32  ;;  %v1239_v29 = vperm.slane %v7361_v59, 2  ;;  %vm1313_vm9 = vweird.f32 %v7396_v1  ;;  %v1709_v61 = vld [vmem:[#allocation16 + $0x38] sm:$0xff]  ;;  %v1809_v32 = vld [vmem:[#allocation19 + $0xa8] sm:$0xff] }
 0x277   :  { %5996 = vtanh.f32 %v1181_v42  ;;  %1763 = vmatpush.msrb.mxu0 %v1715_v27  ;;  %1846 = vmatpush.msrb.mxu1 %v1827_v38  ;;  %v1300_v27 = vpop.f32.mrf.mxu3  ;;  %v1320_v59 = vor.u32 1.1754944e-38, %v1319_v28  ;;  %v1811_v38 = vld [vmem:[#allocation19 + $0xb8] sm:$0xff]  ;;  %vm1318_vm11 = vcmp.eq.f32.partialorder %v1317_v21, 8.507059e+37  ;;  %v1708_v42 = vld [vmem:[#allocation16 + $0x30] sm:$0xff]  ;;  %v1796_v28 = vld [vmem:[#allocation19 + $0x40] sm:$0xff] }
 0x278   :  { %1866 = vmatpush.msrb.mxu2 %v1828_v16  ;;  %1886 = vmatpush.msra.mxu3 %v1829_v9  ;;  %v1806_v16 = vld [vmem:[#allocation19 + $0x90] sm:$0xff]  ;;  %v1803_v0 = vld [vmem:[#allocation19 + $0x78] sm:$0xff] }
 0x279   :  { %v5993_v63 = vpop.eup %5992  ;;  %1764 = vmatpush.msrb.mxu0 %v1714_v47  ;;  %1847 = vmatpush.msrb.mxu1 %v1824_v52  ;;  %v1807_v47 = vld [vmem:[#allocation19 + $0x98] sm:$0xff]  ;;  %v1808_v52 = vld [vmem:[#allocation19 + $0xa0] sm:$0xff] }
 0x27a   :  { %v7410_v54 = vadd.f32 1.0, %v5993_v63  ;;  %1867 = vmatpush.msrb.mxu2 %v1825_v43  ;;  %1887 = vmatpush.msra.mxu3 %v1826_v62  ;;  %v1301_v43 = vadd.f32 %v1300_v27, %v1239_v29  ;;  %v1707_v63 = vld [vmem:[#allocation16 + $0x28] sm:$0xff]  ;;  %v1791_v21 = vld [vmem:[#allocation19 + $0x18] sm:$0xff] }
 0x27b   :  { %v7412_v48 = vpop.eup %5994  ;;  %1605 = vmatmul.f32.vlgmr.msra.gmra.mxu0 %v7377_v30  ;;  %1625 = vmatmul.f32.vlgmr.msra.gmra.mxu1 %v7377_v30  ;;  %v1788_v29 = vld [vmem:[#allocation19] sm:$0xff]  ;;  %v1992_v27 = vld [vmem:[#allocation22 + $0x78] sm:$0xff] }
 0x27c   :  { %5998 = vrcp.f32 %v7410_v54  ;;  %v1309_v4 = vmul.f32 %v7412_v48, %v7396_v1  ;;  %1765 = vmatpush.msrb.mxu0 %v1713_v51  ;;  %1848 = vmatpush.msrb.mxu1 %v1821_v2  ;;  %vm1314_vm8 = vweird.f32 %v7412_v48  ;;  %v1810_v1 = vld [vmem:[#allocation19 + $0xb0] sm:$0xff]  ;;  %v1338_v60 = vand.u32 2147483648, %v7410_v54 }
 0x27d   :  { %v5997_v20 = vpop.eup %5996  ;;  %1868 = vmatpush.msrb.mxu2 %v1822_v15  ;;  %1888 = vmatpush.msra.mxu3 %v1823_v13  ;;  %vm1315_vm10 = vmor %vm1313_vm9, %vm1314_vm8  ;;  %v1336_v2 = vand.u32 2147483647, %v7410_v54  ;;  %v1804_v15 = vld [vmem:[#allocation19 + $0x80] sm:$0xff]  ;;  %v1805_v13 = vld [vmem:[#allocation19 + $0x88] sm:$0xff]  ;;  %vm1332_vm13 = vweird.f32 %v7410_v54 }
 0x27e   :  { %v1184_v35 = vmul.f32 %v5997_v20, %v1183_v41  ;;  %v1310_v45 = vsub.f32 1.0, %v1309_v4  ;;  %1766 = vmatpush.msrb.mxu0 %v1712_v7  ;;  %1849 = vmatpush.msrb.mxu1 %v1818_v6  ;;  %v1706_v7 = vld [vmem:[#allocation16 + $0x20] sm:$0xff]  ;;  %v1801_v4 = vld [vmem:[#allocation19 + $0x68] sm:$0xff]  ;;  %v1705_v20 = vld [vmem:[#allocation16 + $0x18] sm:$0xff] }
 0x27f   :  { %1869 = vmatpush.msrb.mxu2 %v1819_v24  ;;  %1889 = vmatpush.msra.mxu3 %v1820_v8  ;;  %v1800_v6 = vld [vmem:[#allocation19 + $0x60] sm:$0xff]  ;;  %v1802_v24 = vld [vmem:[#allocation19 + $0x70] sm:$0xff]  ;;  %v1339_v8 = vor.u32 1.1754944e-38, %v1338_v60  ;;  %vm1337_vm15 = vcmp.eq.f32.partialorder %v1336_v2, 8.507059e+37 }
 0x280   :  { %v7421_v44 = vadd.f32 %v1185_v31, %v1184_v35  ;;  %v1311_v3 = vmul.f32 %v7412_v48, %v1310_v45  ;;  %1767 = vmatpush.msrb.mxu0 %v1711_v49  ;;  %1850 = vmatpush.msrb.mxu1 %v1815_v36  ;;  %v1797_v49 = vld [vmem:[#allocation19 + $0x48] sm:$0xff]  ;;  %v1799_v35 = vld [vmem:[#allocation19 + $0x58] sm:$0xff]  ;;  %v1989_v60 = vld [vmem:[#allocation22 + $0x60] sm:$0xff] }
 0x281   :  { %1870 = vmatpush.msrb.mxu2 %v1816_v46  ;;  %1890 = vmatpush.msra.mxu3 %v1817_v25  ;;  %v1704_v45 = vld [vmem:[#allocation16 + $0x10] sm:$0xff]  ;;  %v1795_v25 = vld [vmem:[#allocation19 + $0x38] sm:$0xff]  ;;  %v1925_v2 = vld [vmem:[#allocation21 + $0xa0] sm:$0xff] }
 0x282   :  { %v7426_v18 = vpop.eup %5998  ;;  %v1312_v26 = vadd.f32 %v7412_v48, %v1311_v3  ;;  %1678 = vmatmul.f32.vlgmr.msra.gmra.mxu2 %v7421_v44  ;;  %1698 = vmatmul.f32.vlgmr.msrb.gmra.mxu3 %v7421_v44  ;;  %v1794_v46 = vld [vmem:[#allocation19 + $0x30] sm:$0xff]  ;;  %v1703_v3 = vld [vmem:[#allocation16 + $0x8] sm:$0xff] }
 0x283   :  { %v1328_v56 = vmul.f32 %v7426_v18, %v7410_v54  ;;  %1768 = vmatpush.msrb.mxu0 %v1710_v22  ;;  %1851 = vmatpush.msrb.mxu1 %v1812_v58  ;;  %vm1333_vm12 = vweird.f32 %v7426_v18  ;;  %v1798_v54 = vld [vmem:[#allocation19 + $0x50] sm:$0xff]  ;;  %v1792_v58 = vld [vmem:[#allocation19 + $0x20] sm:$0xff] }
 0x284   :  { %v1316_v55 = vsel %vm1315_vm10, %v7412_v48, %v1312_v26  ;;  %1871 = vmatpush.msrb.mxu2 %v1813_v50  ;;  %1891 = vmatpush.msra.mxu3 %v1814_v57  ;;  %vm1334_vm14 = vmor %vm1332_vm13, %vm1333_vm12  ;;  %v1793_v50 = vld [vmem:[#allocation19 + $0x28] sm:$0xff] }
 0x285   :  { %v1329_v9 = vsub.f32 1.0, %v1328_v56  ;;  %v1321_v37 = vsel %vm1318_vm11, %v1320_v59, %v1316_v55  ;;  %1769 = vmatpush.msrb.mxu0 %v1709_v61  ;;  %1852 = vmatpush.msrb.mxu1 %v1809_v32  ;;  %v1790_v61 = vld [vmem:[#allocation19 + $0x10] sm:$0xff]  ;;  %v1936_v56 = vld [vmem:[#allocation21 + $0xf8] sm:$0xff]  ;;  %v1933_v59 = vld [vmem:[#allocation21 + $0xe0] sm:$0xff] }
 0x286   :  { %v1345_v62 = vmul.f32 %v5921_v53, %v1321_v37  ;;  %1872 = vmatpush.msrb.mxu2 %v1810_v1  ;;  %1892 = vmatpush.msra.mxu3 %v1811_v38  ;;  %v1789_v53 = vld [vmem:[#allocation19 + $0x8] sm:$0xff]  ;;  %v1935_v32 = vld [vmem:[#allocation21 + $0xf0] sm:$0xff]  ;;  %v2096_v37 = vld [vmem:[#allocation9 + $0xe0] sm:$0xff] }
 0x287   :  { %v1330_v51 = vmul.f32 %v7426_v18, %v1329_v9  ;;  %1770 = vmatpush.msrb.mxu0 %v1708_v42  ;;  %1853 = vmatpush.msrb.mxu1 %v1806_v16  ;;  %v1934_v1 = vld [vmem:[#allocation21 + $0xe8] sm:$0xff]  ;;  %v1991_v38 = vld [vmem:[#allocation22 + $0x70] sm:$0xff]  ;;  %v1932_v16 = vld [vmem:[#allocation21 + $0xd8] sm:$0xff] }
 0x288   :  { %v1346_v48 = vadd.f32 %v1345_v62, %v1301_v43  ;;  %1873 = vmatpush.msrb.mxu2 %v1807_v47  ;;  %1893 = vmatpush.msra.mxu3 %v1808_v52  ;;  %v2098_v55 = vld [vmem:[#allocation9 + $0xf0] sm:$0xff]  ;;  %v1929_v47 = vld [vmem:[#allocation21 + $0xc0] sm:$0xff] }
 0x289   :  { %v1331_v41 = vadd.f32 %v7426_v18, %v1330_v51  ;;  %1771 = vmatpush.msrb.mxu0 %v1707_v63  ;;  %1854 = vmatpush.msrb.mxu1 %v1803_v0  ;;  %v1931_v42 = vld [vmem:[#allocation21 + $0xd0] sm:$0xff]  ;;  %v1990_v9 = vld [vmem:[#allocation22 + $0x68] sm:$0xff]  ;;  %v1928_v63 = vld [vmem:[#allocation21 + $0xb8] sm:$0xff] }
 0x28a   :  { %6000 = vtanh.f32 %v1346_v48  ;;  %1874 = vmatpush.msrb.mxu2 %v1804_v15  ;;  %1894 = vmatpush.msra.mxu3 %v1805_v13  ;;  %v1930_v52 = vld [vmem:[#allocation21 + $0xc8] sm:$0xff]  ;;  %v1927_v62 = vld [vmem:[#allocation21 + $0xb0] sm:$0xff]  ;;  %v1988_v0 = vld [vmem:[#allocation22 + $0x58] sm:$0xff] }
 0x28b   :  { %v1335_v36 = vsel %vm1334_vm14, %v7426_v18, %v1331_v41  ;;  %1772 = vmatpush.msrb.mxu0 %v1706_v7  ;;  %1855 = vmatpush.msrb.mxu1 %v1800_v6  ;;  %v1702_v18 = vld [vmem:[#allocation16] sm:$0xff]  ;;  %v2094_v43 = vld [vmem:[#allocation9 + $0xd0] sm:$0xff] }
 0x28c   :  { %v1340_v31 = vsel %vm1337_vm15, %v1339_v8, %v1335_v36  ;;  %1875 = vmatpush.msrb.mxu2 %v1801_v4  ;;  %1895 = vmatpush.msra.mxu3 %v1802_v24  ;;  %v2092_v51 = vld [vmem:[#allocation9 + $0xc0] sm:$0xff]  ;;  %v1926_v15 = vld [vmem:[#allocation21 + $0xa8] sm:$0xff]  ;;  %v1987_v13 = vld [vmem:[#allocation22 + $0x50] sm:$0xff] }
 0x28d   :  { %1773 = vmatpush.msrb.mxu0 %v1705_v20  ;;  %1856 = vmatpush.msrb.mxu1 %v1797_v49  ;;  %v1348_v22 = vsub.f32 1.0, %v1340_v31  ;;  %v2090_v48 = vld [vmem:[#allocation9 + $0xb0] sm:$0xff]  ;;  %v1924_v6 = vld [vmem:[#allocation21 + $0x98] sm:$0xff]  ;;  %v1921_v24 = vld [vmem:[#allocation21 + $0x80] sm:$0xff] }
 0x28e   :  { %1876 = vmatpush.msrb.mxu2 %v1798_v54  ;;  %1896 = vmatpush.msra.mxu3 %v1799_v35  ;;  %v1923_v7 = vld [vmem:[#allocation21 + $0x90] sm:$0xff]  ;;  %v1986_v41 = vld [vmem:[#allocation22 + $0x48] sm:$0xff]  ;;  %v2088_v4 = vld [vmem:[#allocation9 + $0xa0] sm:$0xff] }
 0x28f   :  { %1774 = vmatpush.msrb.mxu0 %v1704_v45  ;;  %1857 = vmatpush.msrb.mxu1 %v1794_v46  ;;  %v1922_v8 = vld [vmem:[#allocation21 + $0x88] sm:$0xff]  ;;  %v1985_v20 = vld [vmem:[#allocation22 + $0x40] sm:$0xff]  ;;  %v1919_v36 = vld [vmem:[#allocation21 + $0x70] sm:$0xff] }
 0x290   :  { %v6001_v57 = vpop.eup %6000  ;;  %1877 = vmatpush.msrb.mxu2 %v1795_v25  ;;  %1897 = vmatpush.msra.mxu3 %v1796_v28  ;;  %v2086_v49 = vld [vmem:[#allocation9 + $0x90] sm:$0xff]  ;;  %v1920_v54 = vld [vmem:[#allocation21 + $0x78] sm:$0xff]  ;;  %v1917_v45 = vld [vmem:[#allocation21 + $0x60] sm:$0xff] }
 0x291   :  { %v7450_v26 = vmul.f32 %v6001_v57, %v1348_v22  ;;  %1775 = vmatpush.msrb.mxu0 %v1703_v3  ;;  %1858 = vmatpush.msrb.mxu1 %v1791_v21  ;;  %v1984_v35 = vld [vmem:[#allocation22 + $0x38] sm:$0xff]  ;;  %v1918_v46 = vld [vmem:[#allocation21 + $0x68] sm:$0xff]  ;;  %v1983_v25 = vld [vmem:[#allocation22 + $0x30] sm:$0xff] }
 0x292   :  { %1878 = vmatpush.msrb.mxu2 %v1792_v58  ;;  %1898 = vmatpush.msra.mxu3 %v1793_v50  ;;  %v2084_v31 = vld [vmem:[#allocation9 + $0x80] sm:$0xff]  ;;  %v1915_v28 = vld [vmem:[#allocation21 + $0x50] sm:$0xff]  ;;  %v1982_v21 = vld [vmem:[#allocation22 + $0x28] sm:$0xff] }
 0x293   :  { %1350 = vst [vmem:[#allocation3] sm:$0x1] %v7450_v26  ;;  %1776 = vmatpush.msrb.mxu0 %v1702_v18  ;;  %1859 = vmatpush.msrb.mxu1 %v1788_v29  ;;  %v1916_v3 = vld [vmem:[#allocation21 + $0x58] sm:$0xff]  ;;  %v1913_v22 = vld [vmem:[#allocation21 + $0x40] sm:$0xff]  ;;  %v1914_v58 = vld [vmem:[#allocation21 + $0x48] sm:$0xff] }
 0x294   :  { %1879 = vmatpush.msrb.mxu2 %v1789_v53  ;;  %1899 = vmatpush.msra.mxu3 %v1790_v61  ;;  %v1981_v50 = vld [vmem:[#allocation22 + $0x20] sm:$0xff]  ;;  %v1911_v57 = vld [vmem:[#allocation21 + $0x30] sm:$0xff]  ;;  %v1912_v18 = vld [vmem:[#allocation21 + $0x38] sm:$0xff] }
 0x295   :  { %1777 = vmatmul.f32.vlgmr.msrb.gmra.mxu0 %v7421_v44  ;;  %1860 = vmatmul.f32.vlgmr.msrb.gmra.mxu1 %v7421_v44  ;;  %v1980_v29 = vld [vmem:[#allocation22 + $0x18] sm:$0xff]  ;;  %v1909_v53 = vld [vmem:[#allocation21 + $0x20] sm:$0xff]  ;;  %v1910_v61 = vld [vmem:[#allocation21 + $0x28] sm:$0xff] }
 0x296   :  { %1880 = vmatmul.f32.vlgmr.msrb.gmra.mxu2 %v7421_v44  ;;  %1900 = vmatmul.f32.vlgmr.msra.gmra.mxu3 %v7421_v44 }
 0x297   :  { %1937 = vmatpush.msra.mxu0 %v1935_v32  ;;  %1957 = vmatpush.msra.mxu1 %v1936_v56  ;;  %v1979_v32 = vld [vmem:[#allocation22 + $0x10] sm:$0xff] }
 0x298   :  { %2036 = vmatpush.msra.mxu2 %v1992_v27  ;;  %2100 = vmatpush.msrb.mxu3 %v2098_v55  ;;  %v1907_v56 = vld [vmem:[#allocation21 + $0x10] sm:$0xff]  ;;  %v1908_v27 = vld [vmem:[#allocation21 + $0x18] sm:$0xff]  ;;  %v1977_v55 = vld [vmem:[#allocation22] sm:$0xff] }
 0x299   :  { %1938 = vmatpush.msra.mxu0 %v1933_v59  ;;  %1958 = vmatpush.msra.mxu1 %v1934_v1  ;;  %v1978_v59 = vld [vmem:[#allocation22 + $0x8] sm:$0xff]  ;;  %v1905_v1 = vld [vmem:[#allocation21] sm:$0xff] }
 0x29a   :  { %2037 = vmatpush.msra.mxu2 %v1991_v38  ;;  %2101 = vmatpush.msrb.mxu3 %v2096_v37  ;;  %v1906_v38 = vld [vmem:[#allocation21 + $0x8] sm:$0xff] }
 0x29b   :  { %1939 = vmatpush.msra.mxu0 %v1931_v42  ;;  %1959 = vmatpush.msra.mxu1 %v1932_v16  ;;  %v2099_v42 = vld [vmem:[#allocation9 + $0xf8] sm:$0xff]  ;;  %v2097_v37 = vld [vmem:[#allocation9 + $0xe8] sm:$0xff] }
 0x29c   :  { %2038 = vmatpush.msra.mxu2 %v1990_v9  ;;  %2102 = vmatpush.msrb.mxu3 %v2094_v43  ;;  %v2155_v16 = vld [vmem:[#allocation10 + $0x78] sm:$0xff]  ;;  %v2271_v9 = vld [vmem:[#allocation13 + $0x168] sm:$0xff] }
 0x29d   :  { %1940 = vmatpush.msra.mxu0 %v1929_v47  ;;  %1960 = vmatpush.msra.mxu1 %v1930_v52  ;;  %v2154_v47 = vld [vmem:[#allocation10 + $0x70] sm:$0xff]  ;;  %v2153_v43 = vld [vmem:[#allocation10 + $0x68] sm:$0xff] }
 0x29e   :  { %2039 = vmatpush.msra.mxu2 %v1989_v60  ;;  %2103 = vmatpush.msrb.mxu3 %v2092_v51  ;;  %v2268_v52 = vld [vmem:[#allocation13 + $0x150] sm:$0xff]  ;;  %v2262_v51 = vld [vmem:[#allocation13 + $0x120] sm:$0xff] }
 0x29f   :  { %1941 = vmatpush.msra.mxu0 %v1927_v62  ;;  %1961 = vmatpush.msra.mxu1 %v1928_v63  ;;  %v2095_v60 = vld [vmem:[#allocation9 + $0xd8] sm:$0xff]  ;;  %v2093_v63 = vld [vmem:[#allocation9 + $0xc8] sm:$0xff] }
 0x2a0   :  { %2040 = vmatpush.msra.mxu2 %v1988_v0  ;;  %2104 = vmatpush.msrb.mxu3 %v2090_v48  ;;  %v2265_v62 = vld [vmem:[#allocation13 + $0x138] sm:$0xff]  ;;  %v2089_v48 = vld [vmem:[#allocation9 + $0xa8] sm:$0xff] }
 0x2a1   :  { %1942 = vmatpush.msra.mxu0 %v1925_v2  ;;  %1962 = vmatpush.msra.mxu1 %v1926_v15  ;;  %v2152_v0 = vld [vmem:[#allocation10 + $0x60] sm:$0xff]  ;;  %v2091_v2 = vld [vmem:[#allocation9 + $0xb8] sm:$0xff] }
 0x2a2   :  { %2041 = vmatpush.msra.mxu2 %v1987_v13  ;;  %2105 = vmatpush.msrb.mxu3 %v2088_v4  ;;  %v2151_v15 = vld [vmem:[#allocation10 + $0x58] sm:$0xff]  ;;  %v2259_v13 = vld [vmem:[#allocation13 + $0x108] sm:$0xff] }
 0x2a3   :  { %1943 = vmatpush.msra.mxu0 %v1923_v7  ;;  %1963 = vmatpush.msra.mxu1 %v1924_v6  ;;  %v2150_v7 = vld [vmem:[#allocation10 + $0x50] sm:$0xff]  ;;  %v2149_v4 = vld [vmem:[#allocation10 + $0x48] sm:$0xff] }
 0x2a4   :  { %2042 = vmatpush.msra.mxu2 %v1986_v41  ;;  %2106 = vmatpush.msrb.mxu3 %v2086_v49  ;;  %v2256_v6 = vld [vmem:[#allocation13 + $0xf0] sm:$0xff]  ;;  %v2250_v49 = vld [vmem:[#allocation13 + $0xc0] sm:$0xff] }
 0x2a5   :  { %1944 = vmatpush.msra.mxu0 %v1921_v24  ;;  %1964 = vmatpush.msra.mxu1 %v1922_v8  ;;  %v2087_v41 = vld [vmem:[#allocation9 + $0x98] sm:$0xff]  ;;  %v2085_v8 = vld [vmem:[#allocation9 + $0x88] sm:$0xff] }
 0x2a6   :  { %2043 = vmatpush.msra.mxu2 %v1985_v20  ;;  %2107 = vmatpush.msrb.mxu3 %v2084_v31  ;;  %v2253_v24 = vld [vmem:[#allocation13 + $0xd8] sm:$0xff]  ;;  %v2247_v31 = vld [vmem:[#allocation13 + $0xa8] sm:$0xff] }
 0x2a7   :  { %1945 = vmatpush.msra.mxu0 %v1919_v36  ;;  %1965 = vmatpush.msra.mxu1 %v1920_v54  ;;  %v2148_v20 = vld [vmem:[#allocation10 + $0x40] sm:$0xff]  ;;  %v2082_v36 = vld [vmem:[#allocation9 + $0x70] sm:$0xff]  ;;  %v2083_v54 = vld [vmem:[#allocation9 + $0x78] sm:$0xff] }
 0x2a8   :  { %2044 = vmatpush.msra.mxu2 %v1984_v35  ;;  %v2147_v35 = vld [vmem:[#allocation10 + $0x38] sm:$0xff]  ;;  %2108 = vmatpush.msrb.mxu3 %v2082_v36 }
 0x2a9   :  { %1946 = vmatpush.msra.mxu0 %v1917_v45  ;;  %1966 = vmatpush.msra.mxu1 %v1918_v46  ;;  %v2080_v45 = vld [vmem:[#allocation9 + $0x60] sm:$0xff]  ;;  %v2081_v46 = vld [vmem:[#allocation9 + $0x68] sm:$0xff] }
 0x2aa   :  { %2045 = vmatpush.msra.mxu2 %v1983_v25  ;;  %v2146_v25 = vld [vmem:[#allocation10 + $0x30] sm:$0xff]  ;;  %2109 = vmatpush.msrb.mxu3 %v2080_v45  ;;  %v2261_v36 = vld [vmem:[#allocation13 + $0x118] sm:$0xff] }
 0x2ab   :  { %1947 = vmatpush.msra.mxu0 %v1915_v28  ;;  %1967 = vmatpush.msra.mxu1 %v1916_v3  ;;  %v2244_v28 = vld [vmem:[#allocation13 + $0x90] sm:$0xff]  ;;  %v2366_v45 = vld [vmem:[#allocation15 + $0xb8] sm:$0xff] }
 0x2ac   :  { %2046 = vmatpush.msra.mxu2 %v1982_v21  ;;  %v2078_v3 = vld [vmem:[#allocation9 + $0x50] sm:$0xff]  ;;  %v2079_v21 = vld [vmem:[#allocation9 + $0x58] sm:$0xff] }
 0x2ad   :  { %1948 = vmatpush.msra.mxu0 %v1913_v22  ;;  %1968 = vmatpush.msra.mxu1 %v1914_v58  ;;  %v2145_v22 = vld [vmem:[#allocation10 + $0x28] sm:$0xff]  ;;  %v2241_v58 = vld [vmem:[#allocation13 + $0x78] sm:$0xff] }
 0x2ae   :  { %2047 = vmatpush.msra.mxu2 %v1981_v50  ;;  %2110 = vmatpush.msrb.mxu3 %v2078_v3  ;;  %v2076_v50 = vld [vmem:[#allocation9 + $0x40] sm:$0xff] }
 0x2af   :  { %1949 = vmatpush.msra.mxu0 %v1911_v57  ;;  %1969 = vmatpush.msra.mxu1 %v1912_v18  ;;  %v2077_v57 = vld [vmem:[#allocation9 + $0x48] sm:$0xff]  ;;  %v2144_v18 = vld [vmem:[#allocation10 + $0x20] sm:$0xff] }
 0x2b0   :  { %2048 = vmatpush.msra.mxu2 %v1980_v29  ;;  %2111 = vmatpush.msrb.mxu3 %v2076_v50  ;;  %v2238_v29 = vld [vmem:[#allocation13 + $0x60] sm:$0xff]  ;;  %v2364_v50 = vld [vmem:[#allocation15 + $0xa8] sm:$0xff] }
 0x2b1   :  { %1950 = vmatpush.msra.mxu0 %v1909_v53  ;;  %1970 = vmatpush.msra.mxu1 %v1910_v61  ;;  %v2074_v53 = vld [vmem:[#allocation9 + $0x30] sm:$0xff]  ;;  %v2075_v61 = vld [vmem:[#allocation9 + $0x38] sm:$0xff]  ;;  %v2258_v3 = vld [vmem:[#allocation13 + $0x100] sm:$0xff] }
 0x2b2   :  { %2049 = vmatpush.msra.mxu2 %v1979_v32  ;;  %v2143_v32 = vld [vmem:[#allocation10 + $0x18] sm:$0xff]  ;;  %2112 = vmatpush.msrb.mxu3 %v2074_v53 }
 0x2b3   :  { %1951 = vmatpush.msra.mxu0 %v1907_v56  ;;  %1971 = vmatpush.msra.mxu1 %v1908_v27  ;;  %v2235_v56 = vld [vmem:[#allocation13 + $0x48] sm:$0xff]  ;;  %v2072_v27 = vld [vmem:[#allocation9 + $0x20] sm:$0xff] }
 0x2b4   :  { %2050 = vmatpush.msra.mxu2 %v1978_v59  ;;  %v2073_v59 = vld [vmem:[#allocation9 + $0x28] sm:$0xff]  ;;  %2113 = vmatpush.msrb.mxu3 %v2072_v27  ;;  %v2362_v53 = vld [vmem:[#allocation15 + $0x98] sm:$0xff] }
 0x2b5   :  { %1952 = vmatpush.msra.mxu0 %v1905_v1  ;;  %1972 = vmatpush.msra.mxu1 %v1906_v38  ;;  %v2142_v1 = vld [vmem:[#allocation10 + $0x10] sm:$0xff] }
 0x2b6   :  { %2051 = vmatpush.msra.mxu2 %v1977_v55  ;;  %1953 = vmatmul.f32.vlgmr.msra.gmra.mxu0 %v7450_v26  ;;  %v2232_v38 = vld [vmem:[#allocation13 + $0x30] sm:$0xff]  ;;  %v2360_v27 = vld [vmem:[#allocation15 + $0x88] sm:$0xff] }
 0x2b7   :  { %1973 = vmatmul.f32.vlgmr.msra.gmra.mxu1 %v7450_v26  ;;  %2052 = vmatmul.f32.vlgmr.msra.gmra.mxu2 %v7450_v26  ;;  %v2070_v55 = vld [vmem:[#allocation9 + $0x10] sm:$0xff] }
 0x2b8   :  { %2120 = vmatpush.msrb.mxu0 %v2099_v42  ;;  %2199 = vmatpush.msrb.mxu1 %v2155_v16  ;;  %v2071_v42 = vld [vmem:[#allocation9 + $0x18] sm:$0xff]  ;;  %v2141_v16 = vld [vmem:[#allocation10 + $0x8] sm:$0xff] }
 0x2b9   :  { %2282 = vmatpush.msrb.mxu2 %v2271_v9  ;;  %2114 = vmatpush.msrb.mxu3 %v2070_v55  ;;  %v2229_v9 = vld [vmem:[#allocation13 + $0x18] sm:$0xff] }
 0x2ba   :  { %2121 = vmatpush.msrb.mxu0 %v2097_v37  ;;  %2200 = vmatpush.msrb.mxu1 %v2154_v47  ;;  %v2068_v37 = vld [vmem:[#allocation9] sm:$0xff]  ;;  %v2069_v47 = vld [vmem:[#allocation9 + $0x8] sm:$0xff] }
 0x2bb   :  { %2283 = vmatpush.msrb.mxu2 %v2268_v52  ;;  %v2140_v52 = vld [vmem:[#allocation10] sm:$0xff]  ;;  %2115 = vmatpush.msrb.mxu3 %v2068_v37  ;;  %v2356_v37 = vld [vmem:[#allocation15 + $0x68] sm:$0xff] }
 0x2bc   :  { %2122 = vmatpush.msrb.mxu0 %v2095_v60  ;;  %2201 = vmatpush.msrb.mxu1 %v2153_v43  ;;  %v2226_v60 = vld [vmem:[#allocation13] sm:$0xff]  ;;  %v2272_v43 = vld [vmem:[#allocation13 + $0x170] sm:$0xff]  ;;  %v2358_v55 = vld [vmem:[#allocation15 + $0x78] sm:$0xff] }
 0x2bd   :  { %2284 = vmatpush.msrb.mxu2 %v2265_v62  ;;  %v2273_v62 = vld [vmem:[#allocation13 + $0x178] sm:$0xff]  ;;  %2302 = vmatpush.msra.mxu3 %v2272_v43 }
 0x2be   :  { %2123 = vmatpush.msrb.mxu0 %v2093_v63  ;;  %2202 = vmatpush.msrb.mxu1 %v2152_v0  ;;  %v2373_v63 = vld [vmem:[#allocation15 + $0xf0] sm:$0xff]  ;;  %v2374_v0 = vld [vmem:[#allocation15 + $0xf8] sm:$0xff] }
 0x2bf   :  { %2285 = vmatpush.msrb.mxu2 %v2262_v51  ;;  %v2269_v51 = vld [vmem:[#allocation13 + $0x158] sm:$0xff] }
 0x2c0   :  { %2124 = vmatpush.msrb.mxu0 %v2091_v2  ;;  %2203 = vmatpush.msrb.mxu1 %v2151_v15  ;;  %v2270_v2 = vld [vmem:[#allocation13 + $0x160] sm:$0xff] }
 0x2c1   :  { %2286 = vmatpush.msrb.mxu2 %v2259_v13  ;;  %v2371_v15 = vld [vmem:[#allocation15 + $0xe0] sm:$0xff]  ;;  %v2372_v13 = vld [vmem:[#allocation15 + $0xe8] sm:$0xff]  ;;  %2303 = vmatpush.msra.mxu3 %v2269_v51 }
 0x2c2   :  { %2125 = vmatpush.msrb.mxu0 %v2089_v48  ;;  %2204 = vmatpush.msrb.mxu1 %v2150_v7  ;;  %v2266_v48 = vld [vmem:[#allocation13 + $0x140] sm:$0xff]  ;;  %v2267_v7 = vld [vmem:[#allocation13 + $0x148] sm:$0xff] }
 0x2c3   :  { %2287 = vmatpush.msrb.mxu2 %v2256_v6  ;;  %v2369_v6 = vld [vmem:[#allocation15 + $0xd0] sm:$0xff]  ;;  %2304 = vmatpush.msra.mxu3 %v2266_v48  ;;  %v2239_v51 = vld [vmem:[#allocation13 + $0x68] sm:$0xff] }
 0x2c4   :  { %2126 = vmatpush.msrb.mxu0 %v2087_v41  ;;  %2205 = vmatpush.msrb.mxu1 %v2149_v4  ;;  %v2370_v41 = vld [vmem:[#allocation15 + $0xd8] sm:$0xff]  ;;  %v2263_v4 = vld [vmem:[#allocation13 + $0x128] sm:$0xff] }
 0x2c5   :  { %2288 = vmatpush.msrb.mxu2 %v2253_v24  ;;  %v2264_v24 = vld [vmem:[#allocation13 + $0x130] sm:$0xff]  ;;  %2305 = vmatpush.msra.mxu3 %v2263_v4  ;;  %v2352_v48 = vld [vmem:[#allocation15 + $0x48] sm:$0xff] }
 0x2c6   :  { %2127 = vmatpush.msrb.mxu0 %v2085_v8  ;;  %2206 = vmatpush.msrb.mxu1 %v2148_v20  ;;  %v2367_v8 = vld [vmem:[#allocation15 + $0xc0] sm:$0xff]  ;;  %v2368_v20 = vld [vmem:[#allocation15 + $0xc8] sm:$0xff] }
 0x2c7   :  { %2289 = vmatpush.msrb.mxu2 %v2250_v49  ;;  %v2260_v49 = vld [vmem:[#allocation13 + $0x110] sm:$0xff] }
 0x2c8   :  { %2128 = vmatpush.msrb.mxu0 %v2083_v54  ;;  %2207 = vmatpush.msrb.mxu1 %v2147_v35  ;;  %v2365_v54 = vld [vmem:[#allocation15 + $0xb0] sm:$0xff]  ;;  %v371_v35 = vadd.f32 %v7161_v11, %v8711_v40  ;;  %v2254_v11 = vld [vmem:[#allocation13 + $0xe0] sm:$0xff] }
 0x2c9   :  { %2290 = vmatpush.msrb.mxu2 %v2247_v31  ;;  %v412_v31 = vadd.f32 %v7145_v10, %v8713_v19  ;;  %2306 = vmatpush.msra.mxu3 %v2260_v49  ;;  %v2361_v10 = vld [vmem:[#allocation15 + $0x90] sm:$0xff]  ;;  %v2233_v49 = vld [vmem:[#allocation13 + $0x38] sm:$0xff] }
 0x2ca   :  { %2129 = vmatpush.msrb.mxu0 %v2081_v46  ;;  %2208 = vmatpush.msrb.mxu1 %v2146_v25 }
 0x2cb   :  { %2291 = vmatpush.msrb.mxu2 %v2244_v28  ;;  %v2257_v28 = vld [vmem:[#allocation13 + $0xf8] sm:$0xff] }
 0x2cc   :  { %2130 = vmatpush.msrb.mxu0 %v2079_v21  ;;  %2209 = vmatpush.msrb.mxu1 %v2145_v22  ;;  %v2363_v21 = vld [vmem:[#allocation15 + $0xa0] sm:$0xff] }
 0x2cd   :  { %2292 = vmatpush.msrb.mxu2 %v2241_v58  ;;  %2307 = vmatpush.msra.mxu3 %v2257_v28  ;;  %v2345_v28 = vld [vmem:[#allocation15 + $0x10] sm:$0xff] }
 0x2ce   :  { %2131 = vmatpush.msrb.mxu0 %v2077_v57  ;;  %2210 = vmatpush.msrb.mxu1 %v2144_v18  ;;  %v2255_v57 = vld [vmem:[#allocation13 + $0xe8] sm:$0xff] }
 0x2cf   :  { %2293 = vmatpush.msrb.mxu2 %v2238_v29  ;;  %2308 = vmatpush.msra.mxu3 %v2254_v11  ;;  %v2343_v11 = vld [vmem:[#allocation15] sm:$0xff] }
 0x2d0   :  { %2132 = vmatpush.msrb.mxu0 %v2075_v61  ;;  %2211 = vmatpush.msrb.mxu1 %v2143_v32  ;;  %v2251_v61 = vld [vmem:[#allocation13 + $0xc8] sm:$0xff]  ;;  %v2252_v32 = vld [vmem:[#allocation13 + $0xd0] sm:$0xff] }
 0x2d1   :  { %2294 = vmatpush.msrb.mxu2 %v2235_v56  ;;  %v2359_v56 = vld [vmem:[#allocation15 + $0x80] sm:$0xff]  ;;  %2309 = vmatpush.msra.mxu3 %v2251_v61 }
 0x2d2   :  { %2133 = vmatpush.msrb.mxu0 %v2073_v59  ;;  %2212 = vmatpush.msrb.mxu1 %v2142_v1  ;;  %v2248_v59 = vld [vmem:[#allocation13 + $0xb0] sm:$0xff]  ;;  %v2249_v1 = vld [vmem:[#allocation13 + $0xb8] sm:$0xff] }
 0x2d3   :  { %2295 = vmatpush.msrb.mxu2 %v2232_v38  ;;  %v2357_v38 = vld [vmem:[#allocation15 + $0x70] sm:$0xff]  ;;  %2310 = vmatpush.msra.mxu3 %v2248_v59 }
 0x2d4   :  { %2134 = vmatpush.msrb.mxu0 %v2071_v42  ;;  %2213 = vmatpush.msrb.mxu1 %v2141_v16  ;;  %v2245_v42 = vld [vmem:[#allocation13 + $0x98] sm:$0xff]  ;;  %v2246_v16 = vld [vmem:[#allocation13 + $0xa0] sm:$0xff] }
 0x2d5   :  { %2296 = vmatpush.msrb.mxu2 %v2229_v9  ;;  %v2355_v9 = vld [vmem:[#allocation15 + $0x60] sm:$0xff]  ;;  %2311 = vmatpush.msra.mxu3 %v2245_v42 }
 0x2d6   :  { %2135 = vmatpush.msrb.mxu0 %v2069_v47  ;;  %2214 = vmatpush.msrb.mxu1 %v2140_v52  ;;  %v2242_v47 = vld [vmem:[#allocation13 + $0x80] sm:$0xff]  ;;  %v2243_v52 = vld [vmem:[#allocation13 + $0x88] sm:$0xff] }
 0x2d7   :  { %2297 = vmatpush.msrb.mxu2 %v2226_v60  ;;  %v2353_v60 = vld [vmem:[#allocation15 + $0x50] sm:$0xff]  ;;  %2312 = vmatpush.msra.mxu3 %v2242_v47 }
 0x2d8   :  { %2322 = vmatpush.msra.mxu0 %v2273_v62  ;;  %2375 = vmatpush.msra.mxu1 %v2373_v63  ;;  %v2354_v62 = vld [vmem:[#allocation15 + $0x58] sm:$0xff] }
 0x2d9   :  { %2395 = vmatpush.msra.mxu2 %v2374_v0  ;;  %2313 = vmatpush.msra.mxu3 %v2239_v51 }
 0x2da   :  { %2323 = vmatpush.msra.mxu0 %v2270_v2  ;;  %2376 = vmatpush.msra.mxu1 %v2371_v15  ;;  %v2240_v2 = vld [vmem:[#allocation13 + $0x70] sm:$0xff]  ;;  %v2351_v15 = vld [vmem:[#allocation15 + $0x40] sm:$0xff] }
 0x2db   :  { %2396 = vmatpush.msra.mxu2 %v2372_v13 }
 0x2dc   :  { %2324 = vmatpush.msra.mxu0 %v2267_v7  ;;  %2377 = vmatpush.msra.mxu1 %v2369_v6  ;;  %v2236_v7 = vld [vmem:[#allocation13 + $0x50] sm:$0xff]  ;;  %v2237_v6 = vld [vmem:[#allocation13 + $0x58] sm:$0xff] }
 0x2dd   :  { %2397 = vmatpush.msra.mxu2 %v2370_v41  ;;  %v2349_v41 = vld [vmem:[#allocation15 + $0x30] sm:$0xff]  ;;  %2314 = vmatpush.msra.mxu3 %v2236_v7 }
 0x2de   :  { %2325 = vmatpush.msra.mxu0 %v2264_v24  ;;  %2378 = vmatpush.msra.mxu1 %v2367_v8  ;;  %v7475_v24 = vld [vmem:[%s8571_s9] sm:$0x7] }
 0x2df   :  { %2398 = vmatpush.msra.mxu2 %v2368_v20  ;;  %v2350_v20 = vld [vmem:[#allocation15 + $0x38] sm:$0xff]  ;;  %2315 = vmatpush.msra.mxu3 %v2233_v49 }
 0x2e0   :  { %2326 = vmatpush.msra.mxu0 %v2261_v36  ;;  %2379 = vmatpush.msra.mxu1 %v2365_v54  ;;  %v2234_v36 = vld [vmem:[#allocation13 + $0x40] sm:$0xff] }
 0x2e1   :  { %2399 = vmatpush.msra.mxu2 %v2366_v45  ;;  %v2347_v54 = vld [vmem:[#allocation15 + $0x20] sm:$0xff]  ;;  %v1564_v45 = vperm.slane %v7475_v24, 1 }
 0x2e2   :  { %2327 = vmatpush.msra.mxu0 %v2258_v3  ;;  %2380 = vmatpush.msra.mxu1 %v2363_v21  ;;  %v2346_v21 = vld [vmem:[#allocation15 + $0x18] sm:$0xff] }
 0x2e3   :  { %2400 = vmatpush.msra.mxu2 %v2364_v50  ;;  %v2228_v50 = vld [vmem:[#allocation13 + $0x10] sm:$0xff] }
 0x2e4   :  { %2328 = vmatpush.msra.mxu0 %v2255_v57  ;;  %2381 = vmatpush.msra.mxu1 %v2361_v10 }
 0x2e5   :  { %2401 = vmatpush.msra.mxu2 %v2362_v53 }
 0x2e6   :  { %2329 = vmatpush.msra.mxu0 %v2252_v32  ;;  %2382 = vmatpush.msra.mxu1 %v2359_v56 }
 0x2e7   :  { %2402 = vmatpush.msra.mxu2 %v2360_v27 }
 0x2e8   :  { %2330 = vmatpush.msra.mxu0 %v2249_v1  ;;  %2383 = vmatpush.msra.mxu1 %v2357_v38 }
 0x2e9   :  { %2403 = vmatpush.msra.mxu2 %v2358_v55 }
 0x2ea   :  { %2331 = vmatpush.msra.mxu0 %v2246_v16  ;;  %2384 = vmatpush.msra.mxu1 %v2355_v9  ;;  %v5922_v9 = vld [vmem:[#allocation12] ss:$0 sm:$0xff] }
 0x2eb   :  { %2404 = vmatpush.msra.mxu2 %v2356_v37 }
 0x2ec   :  { %2332 = vmatpush.msra.mxu0 %v2243_v52  ;;  %2385 = vmatpush.msra.mxu1 %v2353_v60 }
 0x2ed   :  { %2405 = vmatpush.msra.mxu2 %v2354_v62 }
 0x2ee   :  { %v1404_v46 = vpop.f32.mrf.mxu0  ;;  %v1424_v25 = vpop.f32.mrf.mxu1  ;;  %2333 = vmatpush.msra.mxu0 %v2240_v2  ;;  %2386 = vmatpush.msra.mxu1 %v2351_v15  ;;  %v453_v15 = vadd.f32 %v7147_v34, %v7047_v5 }
 0x2ef   :  { %v1443_v22 = vadd.f32 %v1404_v46, %v371_v35  ;;  %v1463_v58 = vadd.f32 %v1424_v25, %v412_v31  ;;  %2406 = vmatpush.msra.mxu2 %v2352_v48  ;;  %v2348_v35 = vld [vmem:[#allocation15 + $0x28] sm:$0xff]  ;;  %v1563_v31 = vperm.slane %v7475_v24, 0  ;;  %v2230_v46 = vld [vmem:[#allocation13 + $0x20] sm:$0xff] }
 0x2f0   :  { %2334 = vmatpush.msra.mxu0 %v2237_v6  ;;  %2387 = vmatpush.msra.mxu1 %v2349_v41  ;;  %v2231_v25 = vld [vmem:[#allocation13 + $0x28] sm:$0xff] }
 0x2f1   :  { %v5862_v18 = vmul.f32 -1.442695, %v1443_v22  ;;  %v5863_v29 = vmul.f32 -1.442695, %v1463_v58  ;;  %2407 = vmatpush.msra.mxu2 %v2350_v20  ;;  %2316 = vmatpush.msra.mxu3 %v2230_v46  ;;  %v2227_v58 = vld [vmem:[#allocation13 + $0x8] sm:$0xff] }
 0x2f2   :  { %2335 = vmatpush.msra.mxu0 %v2234_v36  ;;  %2388 = vmatpush.msra.mxu1 %v2347_v54 }
 0x2f3   :  { %6002 = vpow2.f32 %v5862_v18  ;;  %2408 = vmatpush.msra.mxu2 %v2348_v35  ;;  %v2344_v18 = vld [vmem:[#allocation15 + $0x8] sm:$0xff]  ;;  %2317 = vmatpush.msra.mxu3 %v2227_v58 }
 0x2f4   :  { %6004 = vpow2.f32 %v5863_v29  ;;  %2336 = vmatpush.msra.mxu0 %v2231_v25  ;;  %2389 = vmatpush.msra.mxu1 %v2345_v28 }
 0x2f5   :  { %v7470_v4 = vpop.f32.mrf.mxu2  ;;  %v1586_v8 = vpop.f32.mrf.mxu3  ;;  %2409 = vmatpush.msra.mxu2 %v2346_v21  ;;  %v2430_v21 = vld [vmem:[#allocation16 + $0x78] sm:$0xff] }
 0x2f6   :  { %v1587_v53 = vadd.f32 %v1586_v8, %v1563_v31  ;;  %2337 = vmatpush.msra.mxu0 %v2228_v50  ;;  %2390 = vmatpush.msra.mxu1 %v2343_v11  ;;  %v2547_v50 = vld [vmem:[#allocation19 + $0x170] sm:$0xff]  ;;  %v2548_v11 = vld [vmem:[#allocation19 + $0x178] sm:$0xff] }
 0x2f7   :  { %2410 = vmatpush.msra.mxu2 %v2344_v18  ;;  %v2543_v18 = vld [vmem:[#allocation19 + $0x150] sm:$0xff] }
 0x2f8   :  { %v1606_v3 = vpop.f32.mrf.mxu0 }
 0x2f9   :  { %v6003_v43 = vpop.eup %6002  ;;  %v1607_v61 = vadd.f32 %v1606_v3, %v1564_v45 }
 0x2fa   :  { %v6005_v63 = vpop.eup %6004  ;;  %v7464_v0 = vadd.f32 1.0, %v6003_v43 }
 0x2fb   :  { %v7466_v13 = vadd.f32 1.0, %v6005_v63  ;;  %v1504_v63 = vadd.f32 %v5922_v9, %v7470_v4  ;;  %v2542_v9 = vld [vmem:[#allocation19 + $0x148] sm:$0xff] }
 0x2fc   :  { %6006 = vrcp.f32 %v7464_v0  ;;  %v1459_v1 = vand.u32 2147483648, %v7464_v0  ;;  %v1457_v16 = vand.u32 2147483647, %v7464_v0  ;;  %vm1453_vm1 = vweird.f32 %v7464_v0 }
 0x2fd   :  { %6008 = vrcp.f32 %v7466_v13  ;;  %v1479_v48 = vand.u32 2147483648, %v7466_v13  ;;  %vm1473_vm5 = vweird.f32 %v7466_v13 }
 0x2fe   :  { %v1460_v43 = vor.u32 1.1754944e-38, %v1459_v1  ;;  %vm1458_vm3 = vcmp.eq.f32.partialorder %v1457_v16, 8.507059e+37  ;;  %v2428_v1 = vld [vmem:[#allocation16 + $0x68] sm:$0xff] }
 0x2ff   :  { %v1480_v4 = vor.u32 1.1754944e-38, %v1479_v48  ;;  %v2541_v16 = vld [vmem:[#allocation19 + $0x140] sm:$0xff] }
 0x302   :  { %v6007_v22 = vpop.eup %6006 }
 0x303   :  { %v6009_v57 = vpop.eup %6008  ;;  %v1449_v10 = vmul.f32 %v6007_v22, %v7464_v0  ;;  %vm1454_vm0 = vweird.f32 %v6007_v22  ;;  %v1477_v0 = vand.u32 2147483647, %v7466_v13 }
 0x304   :  { %v1469_v29 = vmul.f32 %v6009_v57, %v7466_v13  ;;  %vm1455_vm2 = vmor %vm1453_vm1, %vm1454_vm0  ;;  %vm1474_vm4 = vweird.f32 %v6009_v57 }
 0x305   :  { %v1450_v32 = vsub.f32 1.0, %v1449_v10  ;;  %v1679_v56 = vpop.f32.mrf.mxu2  ;;  %v1699_v27 = vpop.f32.mrf.mxu3  ;;  %vm1475_vm6 = vmor %vm1473_vm5, %vm1474_vm4  ;;  %vm1478_vm7 = vcmp.eq.f32.partialorder %v1477_v0, 8.507059e+37  ;;  %v2429_v10 = vld [vmem:[#allocation16 + $0x70] sm:$0xff] }
 0x306   :  { %v1470_v59 = vsub.f32 1.0, %v1469_v29  ;;  %v1718_v38 = vadd.f32 %v1679_v56, %v1587_v53  ;;  %v1738_v55 = vadd.f32 %v1699_v27, %v1607_v61  ;;  %v5923_v61 = vld [vmem:[#allocation18] ss:$0 sm:$0xff]  ;;  %v2545_v56 = vld [vmem:[#allocation19 + $0x160] sm:$0xff] }
 0x307   :  { %v1451_v42 = vmul.f32 %v6007_v22, %v1450_v32  ;;  %v2544_v32 = vld [vmem:[#allocation19 + $0x158] sm:$0xff] }
 0x308   :  { %v1471_v37 = vmul.f32 %v6009_v57, %v1470_v59  ;;  %v5864_v47 = vmul.f32 -1.442695, %v1718_v38  ;;  %v5865_v52 = vmul.f32 -1.442695, %v1738_v55  ;;  %v2540_v38 = vld [vmem:[#allocation19 + $0x138] sm:$0xff]  ;;  %v1565_v55 = vperm.slane %v7475_v24, 2 }
 0x309   :  { %v1452_v60 = vadd.f32 %v6007_v22, %v1451_v42 }
 0x30a   :  { %6010 = vpow2.f32 %v5864_v47  ;;  %v1472_v51 = vadd.f32 %v6009_v57, %v1471_v37  ;;  %v1626_v37 = vpop.f32.mrf.mxu1 }
 0x30b   :  { %v1456_v62 = vsel %vm1455_vm2, %v6007_v22, %v1452_v60  ;;  %6012 = vpow2.f32 %v5865_v52  ;;  %v2546_v22 = vld [vmem:[#allocation19 + $0x168] sm:$0xff]  ;;  %v2427_v60 = vld [vmem:[#allocation16 + $0x60] sm:$0xff]  ;;  %v1627_v48 = vadd.f32 %v1626_v37, %v1565_v55 }
 0x30c   :  { %v1461_v2 = vsel %vm1458_vm3, %v1460_v43, %v1456_v62  ;;  %v1476_v8 = vsel %vm1475_vm6, %v6009_v57, %v1472_v51  ;;  %v2537_v43 = vld [vmem:[#allocation19 + $0x120] sm:$0xff]  ;;  %v2539_v51 = vld [vmem:[#allocation19 + $0x130] sm:$0xff] }
 0x30d   :  { %v1506_v7 = vmul.f32 %v1504_v63, %v1461_v2  ;;  %v1481_v54 = vsel %vm1478_vm7, %v1480_v4, %v1476_v8  ;;  %v2538_v63 = vld [vmem:[#allocation19 + $0x128] sm:$0xff]  ;;  %v2536_v4 = vld [vmem:[#allocation19 + $0x118] sm:$0xff] }
 0x30e   :  { %v1509_v34 = vsub.f32 1.0, %v1481_v54  ;;  %v1511_v13 = vmul.f32 %v1481_v54, %v7377_v30 }
 0x30f   :  { %v1507_v6 = vadd.f32 %v1506_v7, %v453_v15 }
 0x310   :  { %v6011_v41 = vpop.eup %6010 }
 0x311   :  { %v6013_v20 = vpop.eup %6012  ;;  %6014 = vtanh.f32 %v1507_v6  ;;  %v1722_v49 = vadd.f32 1.0, %v6011_v41  ;;  %v2426_v6 = vld [vmem:[#allocation16 + $0x58] sm:$0xff]  ;;  %v2534_v41 = vld [vmem:[#allocation19 + $0x108] sm:$0xff] }
 0x312   :  { %v7490_v36 = vadd.f32 1.0, %v6013_v20  ;;  %v1778_v59 = vpop.f32.mrf.mxu0  ;;  %v2535_v20 = vld [vmem:[#allocation19 + $0x110] sm:$0xff] }
 0x313   :  { %6016 = vrcp.f32 %v1722_v49  ;;  %v1734_v30 = vand.u32 2147483648, %v1722_v49  ;;  %v1732_v53 = vand.u32 2147483647, %v1722_v49  ;;  %vm1728_vm9 = vweird.f32 %v1722_v49 }
 0x314   :  { %6018 = vrcp.f32 %v7490_v36  ;;  %v1779_v62 = vadd.f32 %v5923_v61, %v1778_v59  ;;  %v1754_v7 = vand.u32 2147483648, %v7490_v36  ;;  %vm1748_vm13 = vweird.f32 %v7490_v36  ;;  %v2523_v61 = vld [vmem:[#allocation19 + $0xb0] sm:$0xff] }
 0x315   :  { %v1735_v52 = vor.u32 1.1754944e-38, %v1734_v30  ;;  %vm1733_vm11 = vcmp.eq.f32.partialorder %v1732_v53, 8.507059e+37  ;;  %v1752_v8 = vand.u32 2147483647, %v7490_v36  ;;  %v2527_v30 = vld [vmem:[#allocation19 + $0xd0] sm:$0xff] }
 0x316   :  { %v2421_v59 = vld [vmem:[#allocation16 + $0x30] sm:$0xff] }
 0x317   :  { %v6015_v35 = vpop.eup %6014  ;;  %vm1753_vm15 = vcmp.eq.f32.partialorder %v1752_v8, 8.507059e+37  ;;  %v2510_v8 = vld [vmem:[#allocation19 + $0x48] sm:$0xff] }
 0x318   :  { %v1510_v31 = vmul.f32 %v6015_v35, %v1509_v34  ;;  %v2425_v34 = vld [vmem:[#allocation16 + $0x50] sm:$0xff] }
 0x319   :  { %v6017_v45 = vpop.eup %6016  ;;  %v2531_v35 = vld [vmem:[#allocation19 + $0xf0] sm:$0xff]  ;;  %v1881_v37 = vpop.f32.mrf.mxu2 }
 0x31a   :  { %v7494_v46 = vpop.eup %6018  ;;  %v7496_v25 = vadd.f32 %v1511_v13, %v1510_v31  ;;  %v1724_v28 = vmul.f32 %v6017_v45, %v1722_v49  ;;  %vm1729_vm8 = vweird.f32 %v6017_v45  ;;  %v2532_v31 = vld [vmem:[#allocation19 + $0xf8] sm:$0xff]  ;;  %v2533_v13 = vld [vmem:[#allocation19 + $0x100] sm:$0xff] }
 0x31b   :  { %v1744_v3 = vmul.f32 %v7494_v46, %v7490_v36  ;;  %vm7507_vm10 = vmor %vm1728_vm9, %vm1729_vm8  ;;  %vm1749_vm12 = vweird.f32 %v7494_v46  ;;  %v2512_v49 = vld [vmem:[#allocation19 + $0x58] sm:$0xff] }
 0x31c   :  { %v1725_v58 = vsub.f32 1.0, %v1724_v28  ;;  %2116 = vmatmul.f32.vlgmr.msrb.gmra.mxu3 %v7496_v25  ;;  %2136 = vmatmul.f32.vlgmr.msrb.gmra.mxu0 %v7496_v25  ;;  %vm7520_vm14 = vmor %vm1748_vm13, %vm1749_vm12  ;;  %v2424_v28 = vld [vmem:[#allocation16 + $0x48] sm:$0xff] }
 0x31d   :  { %v1745_v57 = vsub.f32 1.0, %v1744_v3  ;;  %2215 = vmatmul.f32.vlgmr.msrb.gmra.mxu1 %v7496_v25  ;;  %2298 = vmatmul.f32.vlgmr.msrb.gmra.mxu2 %v7496_v25  ;;  %v2528_v3 = vld [vmem:[#allocation19 + $0xd8] sm:$0xff] }
 0x31e   :  { %v1726_v29 = vmul.f32 %v6017_v45, %v1725_v58  ;;  %2474 = vmatpush.msrb.mxu3 %v2430_v21  ;;  %2557 = vmatpush.msrb.mxu0 %v2546_v22  ;;  %v2529_v21 = vld [vmem:[#allocation19 + $0xe0] sm:$0xff]  ;;  %v2530_v22 = vld [vmem:[#allocation19 + $0xe8] sm:$0xff] }
 0x31f   :  { %v1746_v27 = vmul.f32 %v7494_v46, %v1745_v57  ;;  %2577 = vmatpush.msrb.mxu1 %v2547_v50  ;;  %2597 = vmatpush.msrb.mxu2 %v2548_v11  ;;  %v2423_v50 = vld [vmem:[#allocation16 + $0x40] sm:$0xff]  ;;  %v7532_v11 = vld [vmem:[%s8576_s14] sm:$0x7]  ;;  %v2526_v57 = vld [vmem:[#allocation19 + $0xc8] sm:$0xff] }
 0x320   :  { %v1727_v42 = vadd.f32 %v6017_v45, %v1726_v29  ;;  %2475 = vmatpush.msrb.mxu3 %v2429_v10  ;;  %2558 = vmatpush.msrb.mxu0 %v2543_v18  ;;  %v1861_v10 = vpop.f32.mrf.mxu1  ;;  %v2422_v18 = vld [vmem:[#allocation16 + $0x38] sm:$0xff]  ;;  %v2522_v29 = vld [vmem:[#allocation19 + $0xa8] sm:$0xff] }
 0x321   :  { %2578 = vmatpush.msrb.mxu1 %v2544_v32  ;;  %2598 = vmatpush.msrb.mxu2 %v2545_v56  ;;  %v1747_v2 = vadd.f32 %v7494_v46, %v1746_v27  ;;  %v2524_v32 = vld [vmem:[#allocation19 + $0xb8] sm:$0xff]  ;;  %v1838_v27 = vperm.slane %v7532_v11, 0 }
 0x322   :  { %v1731_v24 = vsel %vm7507_vm10, %v6017_v45, %v1727_v42  ;;  %2476 = vmatpush.msrb.mxu3 %v2428_v1  ;;  %2559 = vmatpush.msrb.mxu0 %v2540_v38  ;;  %v1755_v45 = vor.u32 1.1754944e-38, %v1754_v7  ;;  %v2519_v1 = vld [vmem:[#allocation19 + $0x90] sm:$0xff]  ;;  %v1839_v42 = vperm.slane %v7532_v11, 1  ;;  %v2514_v7 = vld [vmem:[#allocation19 + $0x68] sm:$0xff] }
 0x323   :  { %v1736_v15 = vsel %vm1733_vm11, %v1735_v52, %v1731_v24  ;;  %2579 = vmatpush.msrb.mxu1 %v2541_v16  ;;  %2599 = vmatpush.msrb.mxu2 %v2542_v9  ;;  %v1751_v36 = vsel %vm7520_vm14, %v7494_v46, %v1747_v2  ;;  %v2525_v46 = vld [vmem:[#allocation19 + $0xc0] sm:$0xff]  ;;  %v2520_v16 = vld [vmem:[#allocation19 + $0x98] sm:$0xff] }
 0x324   :  { %v1781_v0 = vmul.f32 %v1779_v62, %v1736_v15  ;;  %2477 = vmatpush.msrb.mxu3 %v2427_v60  ;;  %2560 = vmatpush.msrb.mxu0 %v2537_v43  ;;  %v1756_v58 = vsel %vm1753_vm15, %v1755_v45, %v1751_v36  ;;  %v2521_v9 = vld [vmem:[#allocation19 + $0xa0] sm:$0xff]  ;;  %v2516_v60 = vld [vmem:[#allocation19 + $0x78] sm:$0xff]  ;;  %v1862_v43 = vadd.f32 %v1861_v10, %v1838_v27  ;;  %v2648_v10 = vld [vmem:[#allocation21 + $0xf0] sm:$0xff] }
 0x325   :  { %2580 = vmatpush.msrb.mxu1 %v2538_v63  ;;  %2600 = vmatpush.msrb.mxu2 %v2539_v51  ;;  %v1784_v53 = vsub.f32 1.0, %v1756_v58  ;;  %v1786_v55 = vmul.f32 %v1756_v58, %v7421_v44  ;;  %v2420_v52 = vld [vmem:[#allocation16 + $0x28] sm:$0xff]  ;;  %v1882_v62 = vadd.f32 %v1881_v37, %v1839_v42  ;;  %v2419_v51 = vld [vmem:[#allocation16 + $0x20] sm:$0xff] }
 0x326   :  { %v1782_v54 = vadd.f32 %v1781_v0, %v1627_v48  ;;  %2318 = vmatmul.f32.vlgmr.msra.gmra.mxu3 %v7496_v25  ;;  %2338 = vmatmul.f32.vlgmr.msra.gmra.mxu0 %v7496_v25  ;;  %v2517_v24 = vld [vmem:[#allocation19 + $0x80] sm:$0xff]  ;;  %v2518_v44 = vld [vmem:[#allocation19 + $0x88] sm:$0xff]  ;;  %v2515_v0 = vld [vmem:[#allocation19 + $0x70] sm:$0xff] }
 0x327   :  { %2478 = vmatpush.msrb.mxu3 %v2426_v6  ;;  %2561 = vmatpush.msrb.mxu0 %v2534_v41  ;;  %v2513_v2 = vld [vmem:[#allocation19 + $0x60] sm:$0xff]  ;;  %v2418_v41 = vld [vmem:[#allocation16 + $0x18] sm:$0xff]  ;;  %v2502_v58 = vld [vmem:[#allocation19 + $0x8] sm:$0xff] }
 0x328   :  { %6020 = vtanh.f32 %v1782_v54  ;;  %2581 = vmatpush.msrb.mxu1 %v2535_v20  ;;  %2601 = vmatpush.msrb.mxu2 %v2536_v4  ;;  %v2511_v4 = vld [vmem:[#allocation19 + $0x50] sm:$0xff]  ;;  %v2508_v36 = vld [vmem:[#allocation19 + $0x38] sm:$0xff]  ;;  %v2642_v42 = vld [vmem:[#allocation21 + $0xc0] sm:$0xff] }
 0x329   :  { %2479 = vmatpush.msrb.mxu3 %v2425_v34  ;;  %2562 = vmatpush.msrb.mxu0 %v2531_v35  ;;  %v2417_v34 = vld [vmem:[#allocation16 + $0x10] sm:$0xff]  ;;  %v2504_v45 = vld [vmem:[#allocation19 + $0x18] sm:$0xff] }
 0x32a   :  { %2582 = vmatpush.msrb.mxu1 %v2532_v31  ;;  %2602 = vmatpush.msrb.mxu2 %v2533_v13  ;;  %v2507_v35 = vld [vmem:[#allocation19 + $0x30] sm:$0xff]  ;;  %v2509_v31 = vld [vmem:[#allocation19 + $0x40] sm:$0xff] }
 0x32b   :  { %2480 = vmatpush.msrb.mxu3 %v2424_v28  ;;  %2563 = vmatpush.msrb.mxu0 %v2528_v3  ;;  %v2416_v13 = vld [vmem:[#allocation16 + $0x8] sm:$0xff] }
 0x32c   :  { %2583 = vmatpush.msrb.mxu1 %v2529_v21  ;;  %2603 = vmatpush.msrb.mxu2 %v2530_v22  ;;  %v2505_v28 = vld [vmem:[#allocation19 + $0x20] sm:$0xff]  ;;  %v2506_v3 = vld [vmem:[#allocation19 + $0x28] sm:$0xff] }
 0x32d   :  { %2481 = vmatpush.msrb.mxu3 %v2423_v50  ;;  %2564 = vmatpush.msrb.mxu0 %v2525_v46  ;;  %v2415_v21 = vld [vmem:[#allocation16] sm:$0xff]  ;;  %v2503_v50 = vld [vmem:[#allocation19 + $0x10] sm:$0xff] }
 0x32e   :  { %v6021_v56 = vpop.eup %6020  ;;  %2584 = vmatpush.msrb.mxu1 %v2526_v57  ;;  %2604 = vmatpush.msrb.mxu2 %v2527_v30  ;;  %v2501_v22 = vld [vmem:[#allocation19] sm:$0xff]  ;;  %v2811_v27 = vld [vmem:[#allocation9 + $0xf0] sm:$0xff] }
 0x32f   :  { %v1785_v38 = vmul.f32 %v6021_v56, %v1784_v53  ;;  %2482 = vmatpush.msrb.mxu3 %v2422_v18  ;;  %2565 = vmatpush.msrb.mxu0 %v2522_v29  ;;  %v2649_v18 = vld [vmem:[#allocation21 + $0xf8] sm:$0xff]  ;;  %v2704_v56 = vld [vmem:[#allocation22 + $0x70] sm:$0xff] }
 0x330   :  { %2585 = vmatpush.msrb.mxu1 %v2523_v61  ;;  %2605 = vmatpush.msrb.mxu2 %v2524_v32  ;;  %v2705_v53 = vld [vmem:[#allocation22 + $0x78] sm:$0xff]  ;;  %v2646_v61 = vld [vmem:[#allocation21 + $0xe0] sm:$0xff]  ;;  %v2647_v32 = vld [vmem:[#allocation21 + $0xe8] sm:$0xff] }
 0x331   :  { %v7537_v47 = vadd.f32 %v1786_v55, %v1785_v38  ;;  %2483 = vmatpush.msrb.mxu3 %v2421_v59  ;;  %2566 = vmatpush.msrb.mxu0 %v2519_v1  ;;  %v2644_v59 = vld [vmem:[#allocation21 + $0xd0] sm:$0xff]  ;;  %v2645_v1 = vld [vmem:[#allocation21 + $0xd8] sm:$0xff]  ;;  %v2703_v38 = vld [vmem:[#allocation22 + $0x68] sm:$0xff] }
 0x332   :  { %2586 = vmatpush.msrb.mxu1 %v2520_v16  ;;  %2606 = vmatpush.msrb.mxu2 %v2521_v9  ;;  %v2809_v55 = vld [vmem:[#allocation9 + $0xe0] sm:$0xff]  ;;  %v2643_v16 = vld [vmem:[#allocation21 + $0xc8] sm:$0xff] }
 0x333   :  { %v1954_v63 = vpop.f32.mrf.mxu0  ;;  %2391 = vmatmul.f32.vlgmr.msra.gmra.mxu1 %v7537_v47  ;;  %2411 = vmatmul.f32.vlgmr.msra.gmra.mxu2 %v7537_v47  ;;  %v2702_v9 = vld [vmem:[#allocation22 + $0x60] sm:$0xff]  ;;  %v2807_v37 = vld [vmem:[#allocation9 + $0xd0] sm:$0xff] }
 0x334   :  { %v1993_v15 = vadd.f32 %v1954_v63, %v1862_v43  ;;  %v1974_v48 = vpop.f32.mrf.mxu1  ;;  %2484 = vmatpush.msrb.mxu3 %v2420_v52  ;;  %2567 = vmatpush.msrb.mxu0 %v2516_v60  ;;  %v2640_v60 = vld [vmem:[#allocation21 + $0xb0] sm:$0xff]  ;;  %v2641_v43 = vld [vmem:[#allocation21 + $0xb8] sm:$0xff] }
 0x335   :  { %v2013_v6 = vadd.f32 %v1974_v48, %v1882_v62  ;;  %2587 = vmatpush.msrb.mxu1 %v2517_v24  ;;  %2607 = vmatpush.msrb.mxu2 %v2518_v44  ;;  %v2701_v62 = vld [vmem:[#allocation22 + $0x58] sm:$0xff] }
 0x336   :  { %v5866_v20 = vmul.f32 -1.442695, %v1993_v15  ;;  %2485 = vmatpush.msrb.mxu3 %v2419_v51  ;;  %2568 = vmatpush.msrb.mxu0 %v2513_v2  ;;  %v2805_v63 = vld [vmem:[#allocation9 + $0xc0] sm:$0xff]  ;;  %v2639_v15 = vld [vmem:[#allocation21 + $0xa8] sm:$0xff] }
 0x337   :  { %v5867_v54 = vmul.f32 -1.442695, %v2013_v6  ;;  %2588 = vmatpush.msrb.mxu1 %v2514_v7  ;;  %2608 = vmatpush.msrb.mxu2 %v2515_v0  ;;  %v2638_v2 = vld [vmem:[#allocation21 + $0xa0] sm:$0xff]  ;;  %v2700_v7 = vld [vmem:[#allocation22 + $0x50] sm:$0xff] }
 0x338   :  { %6022 = vpow2.f32 %v5866_v20  ;;  %2486 = vmatpush.msrb.mxu3 %v2418_v41  ;;  %2569 = vmatpush.msrb.mxu0 %v2510_v8  ;;  %v2803_v0 = vld [vmem:[#allocation9 + $0xb0] sm:$0xff]  ;;  %v2637_v20 = vld [vmem:[#allocation21 + $0x98] sm:$0xff] }
 0x339   :  { %6024 = vpow2.f32 %v5867_v54  ;;  %2589 = vmatpush.msrb.mxu1 %v2511_v4  ;;  %2609 = vmatpush.msrb.mxu2 %v2512_v49  ;;  %v2636_v8 = vld [vmem:[#allocation21 + $0x90] sm:$0xff] }
 0x33a   :  { %2487 = vmatpush.msrb.mxu3 %v2417_v34  ;;  %2570 = vmatpush.msrb.mxu0 %v2507_v35  ;;  %v5924_v54 = vld [vmem:[%s8577_s15] ss:$0 sm:$0xff]  ;;  %v2699_v34 = vld [vmem:[#allocation22 + $0x48] sm:$0xff] }
 0x33b   :  { %2590 = vmatpush.msrb.mxu1 %v2508_v36  ;;  %2610 = vmatpush.msrb.mxu2 %v2509_v31  ;;  %v2053_v36 = vpop.f32.mrf.mxu2  ;;  %v2634_v31 = vld [vmem:[#allocation21 + $0x80] sm:$0xff] }
 0x33c   :  { %2488 = vmatpush.msrb.mxu3 %v2416_v13  ;;  %2571 = vmatpush.msrb.mxu0 %v2504_v45  ;;  %v2635_v13 = vld [vmem:[#allocation21 + $0x88] sm:$0xff]  ;;  %v1840_v45 = vperm.slane %v7532_v11, 2 }
 0x33d   :  { %2591 = vmatpush.msrb.mxu1 %v2505_v28  ;;  %2611 = vmatpush.msrb.mxu2 %v2506_v3  ;;  %v2698_v3 = vld [vmem:[#allocation22 + $0x40] sm:$0xff] }
 0x33e   :  { %v6023_v46 = vpop.eup %6022  ;;  %2489 = vmatpush.msrb.mxu3 %v2415_v21  ;;  %2572 = vmatpush.msrb.mxu0 %v2501_v22  ;;  %v1901_v21 = vpop.f32.mrf.mxu3 }
 0x33f   :  { %v6025_v57 = vpop.eup %6024  ;;  %v7541_v30 = vadd.f32 1.0, %v6023_v46  ;;  %2592 = vmatpush.msrb.mxu1 %v2502_v58  ;;  %2612 = vmatpush.msrb.mxu2 %v2503_v50  ;;  %v2632_v58 = vld [vmem:[#allocation21 + $0x70] sm:$0xff]  ;;  %v2633_v50 = vld [vmem:[#allocation21 + $0x78] sm:$0xff] }
 0x340   :  { %v7543_v29 = vadd.f32 1.0, %v6025_v57  ;;  %2490 = vmatmul.f32.vlgmr.msrb.gmra.mxu3 %v7537_v47  ;;  %2573 = vmatmul.f32.vlgmr.msrb.gmra.mxu0 %v7537_v47  ;;  %v2054_v57 = vadd.f32 %v5924_v54, %v2053_v36  ;;  %v2984_v36 = vld [vmem:[#allocation13 + $0x168] sm:$0xff] }
 0x341   :  { %6026 = vrcp.f32 %v7541_v30  ;;  %2593 = vmatmul.f32.vlgmr.msrb.gmra.mxu1 %v7537_v47  ;;  %2613 = vmatmul.f32.vlgmr.msrb.gmra.mxu2 %v7537_v47  ;;  %v2009_v41 = vand.u32 2147483648, %v7541_v30  ;;  %v2007_v49 = vand.u32 2147483647, %v7541_v30  ;;  %vm2003_vm1 = vweird.f32 %v7541_v30 }
 0x342   :  { %6028 = vrcp.f32 %v7543_v29  ;;  %2650 = vmatpush.msra.mxu3 %v2648_v10  ;;  %2670 = vmatpush.msra.mxu0 %v2649_v18  ;;  %v2697_v10 = vld [vmem:[#allocation22 + $0x38] sm:$0xff]  ;;  %v2630_v18 = vld [vmem:[#allocation21 + $0x60] sm:$0xff]  ;;  %vm2023_vm5 = vweird.f32 %v7543_v29 }
 0x343   :  { %2749 = vmatpush.msra.mxu1 %v2705_v53  ;;  %2813 = vmatpush.msra.mxu2 %v2811_v27  ;;  %v2010_v22 = vor.u32 1.1754944e-38, %v2009_v41  ;;  %vm2008_vm3 = vcmp.eq.f32.partialorder %v2007_v49, 8.507059e+37  ;;  %v2631_v53 = vld [vmem:[#allocation21 + $0x68] sm:$0xff]  ;;  %v2696_v27 = vld [vmem:[#allocation22 + $0x30] sm:$0xff]  ;;  %v2690_v49 = vld [vmem:[#allocation22] sm:$0xff] }
 0x344   :  { %2651 = vmatpush.msra.mxu3 %v2646_v61  ;;  %2671 = vmatpush.msra.mxu0 %v2647_v32  ;;  %v1902_v61 = vadd.f32 %v1901_v21, %v1840_v45  ;;  %v2029_v32 = vand.u32 2147483648, %v7543_v29  ;;  %v2808_v45 = vld [vmem:[#allocation9 + $0xd8] sm:$0xff]  ;;  %v2806_v21 = vld [vmem:[#allocation9 + $0xc8] sm:$0xff] }
 0x345   :  { %2750 = vmatpush.msra.mxu1 %v2704_v56  ;;  %2814 = vmatpush.msra.mxu2 %v2809_v55  ;;  %v2795_v55 = vld [vmem:[#allocation9 + $0x70] sm:$0xff] }
 0x346   :  { %2652 = vmatpush.msra.mxu3 %v2644_v59  ;;  %2672 = vmatpush.msra.mxu0 %v2645_v1  ;;  %v2027_v59 = vand.u32 2147483647, %v7543_v29  ;;  %v2628_v1 = vld [vmem:[#allocation21 + $0x50] sm:$0xff] }
 0x347   :  { %v6027_v52 = vpop.eup %6026  ;;  %2751 = vmatpush.msra.mxu1 %v2703_v38  ;;  %2815 = vmatpush.msra.mxu2 %v2807_v37  ;;  %v2629_v38 = vld [vmem:[#allocation21 + $0x58] sm:$0xff]  ;;  %v2626_v37 = vld [vmem:[#allocation21 + $0x40] sm:$0xff] }
 0x348   :  { %v7551_v24 = vpop.eup %6028  ;;  %v1999_v44 = vmul.f32 %v6027_v52, %v7541_v30  ;;  %2653 = vmatpush.msra.mxu3 %v2642_v42  ;;  %2673 = vmatpush.msra.mxu0 %v2643_v16  ;;  %vm2004_vm0 = vweird.f32 %v6027_v52  ;;  %v2695_v16 = vld [vmem:[#allocation22 + $0x28] sm:$0xff]  ;;  %vm2028_vm7 = vcmp.eq.f32.partialorder %v2027_v59, 8.507059e+37 }
 0x349   :  { %v2019_v51 = vmul.f32 %v7551_v24, %v7543_v29  ;;  %2752 = vmatpush.msra.mxu1 %v2702_v9  ;;  %2816 = vmatpush.msra.mxu2 %v2805_v63  ;;  %vm2005_vm2 = vmor %vm2003_vm1, %vm2004_vm0  ;;  %vm2024_vm4 = vweird.f32 %v7551_v24  ;;  %v2627_v29 = vld [vmem:[#allocation21 + $0x48] sm:$0xff]  ;;  %v2693_v63 = vld [vmem:[#allocation22 + $0x18] sm:$0xff] }
 0x34a   :  { %v2000_v48 = vsub.f32 1.0, %v1999_v44  ;;  %2654 = vmatpush.msra.mxu3 %v2640_v60  ;;  %2674 = vmatpush.msra.mxu0 %v2641_v43  ;;  %vm7572_vm6 = vmor %vm2023_vm5, %vm2024_vm4  ;;  %v2694_v60 = vld [vmem:[#allocation22 + $0x20] sm:$0xff]  ;;  %v2624_v43 = vld [vmem:[#allocation21 + $0x30] sm:$0xff] }
 0x34b   :  { %v2020_v6 = vsub.f32 1.0, %v2019_v51  ;;  %2753 = vmatpush.msra.mxu1 %v2701_v62  ;;  %2817 = vmatpush.msra.mxu2 %v2803_v0  ;;  %v2625_v44 = vld [vmem:[#allocation21 + $0x38] sm:$0xff]  ;;  %v2622_v51 = vld [vmem:[#allocation21 + $0x20] sm:$0xff] }
 0x34c   :  { %v2001_v4 = vmul.f32 %v6027_v52, %v2000_v48  ;;  %2655 = vmatpush.msra.mxu3 %v2638_v2  ;;  %2675 = vmatpush.msra.mxu0 %v2639_v15  ;;  %v2623_v2 = vld [vmem:[#allocation21 + $0x28] sm:$0xff]  ;;  %v2620_v48 = vld [vmem:[#allocation21 + $0x10] sm:$0xff] }
 0x34d   :  { %v2021_v35 = vmul.f32 %v7551_v24, %v2020_v6  ;;  %2754 = vmatpush.msra.mxu1 %v2700_v7  ;;  %v2621_v7 = vld [vmem:[#allocation21 + $0x18] sm:$0xff]  ;;  %v2691_v6 = vld [vmem:[#allocation22 + $0x8] sm:$0xff] }
 0x34e   :  { %v2002_v28 = vadd.f32 %v6027_v52, %v2001_v4  ;;  %2656 = vmatpush.msra.mxu3 %v2636_v8  ;;  %2676 = vmatpush.msra.mxu0 %v2637_v20  ;;  %v2618_v8 = vld [vmem:[#allocation21] sm:$0xff]  ;;  %v2619_v20 = vld [vmem:[#allocation21 + $0x8] sm:$0xff] }
 0x34f   :  { %2755 = vmatpush.msra.mxu1 %v2699_v34  ;;  %v2022_v11 = vadd.f32 %v7551_v24, %v2021_v35  ;;  %v2812_v34 = vld [vmem:[#allocation9 + $0xf8] sm:$0xff]  ;;  %v2798_v59 = vld [vmem:[#allocation9 + $0x88] sm:$0xff] }
 0x350   :  { %v2006_v46 = vsel %vm2005_vm2, %v6027_v52, %v2002_v28  ;;  %2657 = vmatpush.msra.mxu3 %v2634_v31  ;;  %2677 = vmatpush.msra.mxu0 %v2635_v13  ;;  %v2030_v52 = vor.u32 1.1754944e-38, %v2029_v32  ;;  %v2868_v35 = vld [vmem:[#allocation10 + $0x78] sm:$0xff]  ;;  %v2867_v31 = vld [vmem:[#allocation10 + $0x70] sm:$0xff]  ;;  %v2866_v28 = vld [vmem:[#allocation10 + $0x68] sm:$0xff] }
 0x351   :  { %v2011_v30 = vsel %vm2008_vm3, %v2010_v22, %v2006_v46  ;;  %2756 = vmatpush.msra.mxu1 %v2698_v3  ;;  %v2026_v9 = vsel %vm7572_vm6, %v7551_v24, %v2022_v11  ;;  %v2692_v24 = vld [vmem:[#allocation22 + $0x10] sm:$0xff]  ;;  %v2865_v22 = vld [vmem:[#allocation10 + $0x60] sm:$0xff]  ;;  %v2802_v11 = vld [vmem:[#allocation9 + $0xa8] sm:$0xff] }
 0x352   :  { %v2056_v56 = vmul.f32 %v2054_v57, %v2011_v30  ;;  %2658 = vmatpush.msra.mxu3 %v2632_v58  ;;  %2678 = vmatpush.msra.mxu0 %v2633_v50  ;;  %v2031_v62 = vsel %vm2028_vm7, %v2030_v52, %v2026_v9  ;;  %v2981_v13 = vld [vmem:[#allocation13 + $0x150] sm:$0xff]  ;;  %v2978_v3 = vld [vmem:[#allocation13 + $0x138] sm:$0xff]  ;;  %v2975_v58 = vld [vmem:[#allocation13 + $0x120] sm:$0xff] }
 0x353   :  { %2757 = vmatpush.msra.mxu1 %v2697_v10  ;;  %v2059_v15 = vsub.f32 1.0, %v2031_v62  ;;  %v2061_v4 = vmul.f32 %v2031_v62, %v7450_v26  ;;  %v2810_v26 = vld [vmem:[#allocation9 + $0xe8] sm:$0xff]  ;;  %v2804_v50 = vld [vmem:[#allocation9 + $0xb8] sm:$0xff]  ;;  %v2801_v10 = vld [vmem:[#allocation9 + $0xa0] sm:$0xff] }
 0x354   :  { %v2057_v42 = vadd.f32 %v2056_v56, %v1902_v61  ;;  %2659 = vmatpush.msra.mxu3 %v2630_v18  ;;  %2679 = vmatpush.msra.mxu0 %v2631_v53  ;;  %v2864_v46 = vld [vmem:[#allocation10 + $0x58] sm:$0xff]  ;;  %v2972_v57 = vld [vmem:[#allocation13 + $0x108] sm:$0xff] }
 0x355   :  { %2758 = vmatpush.msra.mxu1 %v2696_v27  ;;  %2818 = vmatpush.msra.mxu2 %v2801_v10  ;;  %v2863_v30 = vld [vmem:[#allocation10 + $0x50] sm:$0xff]  ;;  %v2800_v61 = vld [vmem:[#allocation9 + $0x98] sm:$0xff]  ;;  %v2862_v32 = vld [vmem:[#allocation10 + $0x48] sm:$0xff] }
 0x356   :  { %6030 = vtanh.f32 %v2057_v42  ;;  %2660 = vmatpush.msra.mxu3 %v2628_v1  ;;  %2680 = vmatpush.msra.mxu0 %v2629_v38  ;;  %v2969_v18 = vld [vmem:[#allocation13 + $0xf0] sm:$0xff]  ;;  %v2966_v56 = vld [vmem:[#allocation13 + $0xd8] sm:$0xff]  ;;  %v2963_v38 = vld [vmem:[#allocation13 + $0xc0] sm:$0xff] }
 0x357   :  { %2759 = vmatpush.msra.mxu1 %v2695_v16  ;;  %v2799_v53 = vld [vmem:[#allocation9 + $0x90] sm:$0xff]  ;;  %v2797_v27 = vld [vmem:[#allocation9 + $0x80] sm:$0xff]  ;;  %v2796_v42 = vld [vmem:[#allocation9 + $0x78] sm:$0xff] }
 0x358   :  { %2661 = vmatpush.msra.mxu3 %v2626_v37  ;;  %2681 = vmatpush.msra.mxu0 %v2627_v29  ;;  %v2861_v1 = vld [vmem:[#allocation10 + $0x40] sm:$0xff]  ;;  %v2860_v16 = vld [vmem:[#allocation10 + $0x38] sm:$0xff]  ;;  %v2960_v9 = vld [vmem:[#allocation13 + $0xa8] sm:$0xff] }
 0x359   :  { %2760 = vmatpush.msra.mxu1 %v2694_v60  ;;  %2819 = vmatpush.msra.mxu2 %v2799_v53  ;;  %v2793_v37 = vld [vmem:[#allocation9 + $0x60] sm:$0xff]  ;;  %v2794_v29 = vld [vmem:[#allocation9 + $0x68] sm:$0xff]  ;;  %v2859_v52 = vld [vmem:[#allocation10 + $0x30] sm:$0xff] }
 0x35a   :  { %2662 = vmatpush.msra.mxu3 %v2624_v43  ;;  %2682 = vmatpush.msra.mxu0 %v2625_v44  ;;  %v2957_v60 = vld [vmem:[#allocation13 + $0x90] sm:$0xff]  ;;  %v2858_v62 = vld [vmem:[#allocation10 + $0x28] sm:$0xff] }
 0x35b   :  { %2761 = vmatpush.msra.mxu1 %v2693_v63  ;;  %2820 = vmatpush.msra.mxu2 %v2797_v27  ;;  %v2791_v43 = vld [vmem:[#allocation9 + $0x50] sm:$0xff]  ;;  %v2792_v44 = vld [vmem:[#allocation9 + $0x58] sm:$0xff] }
 0x35c   :  { %v6031_v0 = vpop.eup %6030  ;;  %2663 = vmatpush.msra.mxu3 %v2622_v51  ;;  %2683 = vmatpush.msra.mxu0 %v2623_v2  ;;  %v2954_v63 = vld [vmem:[#allocation13 + $0x78] sm:$0xff]  ;;  %v2790_v2 = vld [vmem:[#allocation9 + $0x48] sm:$0xff]  ;;  %v3082_v53 = vld [vmem:[#allocation15 + $0xd0] sm:$0xff] }
 0x35d   :  { %v2060_v41 = vmul.f32 %v6031_v0, %v2059_v15  ;;  %2762 = vmatpush.msra.mxu1 %v2692_v24  ;;  %2821 = vmatpush.msra.mxu2 %v2795_v55  ;;  %v2789_v51 = vld [vmem:[#allocation9 + $0x40] sm:$0xff]  ;;  %v2856_v0 = vld [vmem:[#allocation10 + $0x18] sm:$0xff]  ;;  %v3085_v10 = vld [vmem:[#allocation15 + $0xe8] sm:$0xff] }
 0x35e   :  { %2664 = vmatpush.msra.mxu3 %v2620_v48  ;;  %2684 = vmatpush.msra.mxu0 %v2621_v7  ;;  %v2857_v24 = vld [vmem:[#allocation10 + $0x20] sm:$0xff]  ;;  %v2787_v48 = vld [vmem:[#allocation9 + $0x30] sm:$0xff]  ;;  %v2788_v7 = vld [vmem:[#allocation9 + $0x38] sm:$0xff] }
 0x35f   :  { %2763 = vmatpush.msra.mxu1 %v2691_v6  ;;  %v7580_v54 = vadd.f32 %v2061_v4, %v2060_v41  ;;  %2822 = vmatpush.msra.mxu2 %v2793_v37  ;;  %v2951_v15 = vld [vmem:[#allocation13 + $0x60] sm:$0xff]  ;;  %v2948_v6 = vld [vmem:[#allocation13 + $0x48] sm:$0xff]  ;;  %v2945_v4 = vld [vmem:[#allocation13 + $0x30] sm:$0xff] }
 0x360   :  { %2665 = vmatpush.msra.mxu3 %v2618_v8  ;;  %2685 = vmatpush.msra.mxu0 %v2619_v20  ;;  %v2785_v41 = vld [vmem:[#allocation9 + $0x20] sm:$0xff]  ;;  %v2786_v8 = vld [vmem:[#allocation9 + $0x28] sm:$0xff]  ;;  %v2855_v20 = vld [vmem:[#allocation10 + $0x10] sm:$0xff] }
 0x361   :  { %2764 = vmatpush.msra.mxu1 %v2690_v49  ;;  %2063 = vst [vmem:[#allocation3 + $0x1] sm:$0x1] %v7580_v54  ;;  %2666 = vmatmul.f32.vlgmr.msra.gmra.mxu3 %v7580_v54  ;;  %v2783_v49 = vld [vmem:[#allocation9 + $0x10] sm:$0xff]  ;;  %v2974_v55 = vld [vmem:[#allocation13 + $0x118] sm:$0xff] }
 0x362   :  { %2686 = vmatmul.f32.vlgmr.msra.gmra.mxu0 %v7580_v54  ;;  %2765 = vmatmul.f32.vlgmr.msra.gmra.mxu1 %v7580_v54  ;;  %v2977_v27 = vld [vmem:[#allocation13 + $0x130] sm:$0xff] }
 0x363   :  { %2833 = vmatpush.msrb.mxu3 %v2812_v34  ;;  %2912 = vmatpush.msrb.mxu0 %v2868_v35  ;;  %v2784_v34 = vld [vmem:[#allocation9 + $0x18] sm:$0xff]  ;;  %v2854_v35 = vld [vmem:[#allocation10 + $0x8] sm:$0xff] }
 0x364   :  { %2995 = vmatpush.msrb.mxu1 %v2984_v36  ;;  %2823 = vmatpush.msra.mxu2 %v2791_v43  ;;  %v2942_v36 = vld [vmem:[#allocation13 + $0x18] sm:$0xff] }
 0x365   :  { %2834 = vmatpush.msrb.mxu3 %v2810_v26  ;;  %2913 = vmatpush.msrb.mxu0 %v2867_v31  ;;  %v2781_v26 = vld [vmem:[#allocation9] sm:$0xff]  ;;  %v2782_v31 = vld [vmem:[#allocation9 + $0x8] sm:$0xff] }
 0x366   :  { %2996 = vmatpush.msrb.mxu1 %v2981_v13  ;;  %2824 = vmatpush.msra.mxu2 %v2789_v51  ;;  %v2853_v13 = vld [vmem:[#allocation10] sm:$0xff]  ;;  %v3074_v51 = vld [vmem:[#allocation15 + $0x90] sm:$0xff] }
 0x367   :  { %2835 = vmatpush.msrb.mxu3 %v2808_v45  ;;  %2914 = vmatpush.msrb.mxu0 %v2866_v28  ;;  %v2939_v45 = vld [vmem:[#allocation13] sm:$0xff]  ;;  %v2985_v28 = vld [vmem:[#allocation13 + $0x170] sm:$0xff] }
 0x368   :  { %2997 = vmatpush.msrb.mxu1 %v2978_v3  ;;  %2825 = vmatpush.msra.mxu2 %v2787_v48  ;;  %v2986_v3 = vld [vmem:[#allocation13 + $0x178] sm:$0xff]  ;;  %v3072_v48 = vld [vmem:[#allocation15 + $0x80] sm:$0xff] }
 0x369   :  { %2836 = vmatpush.msrb.mxu3 %v2806_v21  ;;  %2915 = vmatpush.msrb.mxu0 %v2865_v22  ;;  %v3086_v21 = vld [vmem:[#allocation15 + $0xf0] sm:$0xff]  ;;  %v3087_v22 = vld [vmem:[#allocation15 + $0xf8] sm:$0xff] }
 0x36a   :  { %2998 = vmatpush.msrb.mxu1 %v2975_v58  ;;  %2826 = vmatpush.msra.mxu2 %v2785_v41  ;;  %v2982_v58 = vld [vmem:[#allocation13 + $0x158] sm:$0xff]  ;;  %v2961_v41 = vld [vmem:[#allocation13 + $0xb0] sm:$0xff] }
 0x36b   :  { %2837 = vmatpush.msrb.mxu3 %v2804_v50  ;;  %2916 = vmatpush.msrb.mxu0 %v2864_v46  ;;  %v2983_v50 = vld [vmem:[#allocation13 + $0x160] sm:$0xff] }
 0x36c   :  { %2999 = vmatpush.msrb.mxu1 %v2972_v57  ;;  %2827 = vmatpush.msra.mxu2 %v2783_v49  ;;  %v3084_v46 = vld [vmem:[#allocation15 + $0xe0] sm:$0xff]  ;;  %v415_v57 = vadd.f32 %v7149_v14, %v8713_v19  ;;  %v3081_v14 = vld [vmem:[#allocation15 + $0xc8] sm:$0xff]  ;;  %v2958_v49 = vld [vmem:[#allocation13 + $0x98] sm:$0xff] }
 0x36d   :  { %2838 = vmatpush.msrb.mxu3 %v2802_v11  ;;  %2917 = vmatpush.msrb.mxu0 %v2863_v30  ;;  %v2979_v30 = vld [vmem:[#allocation13 + $0x140] sm:$0xff] }
 0x36e   :  { %3000 = vmatpush.msrb.mxu1 %v2969_v18  ;;  %2828 = vmatpush.msra.mxu2 %v2781_v26  ;;  %v2980_v18 = vld [vmem:[#allocation13 + $0x148] sm:$0xff]  ;;  %v7598_v26 = vld [vmem:[%s8571_s9] sm:$0x7] }
 0x36f   :  { %2839 = vmatpush.msrb.mxu3 %v2800_v61  ;;  %2918 = vmatpush.msrb.mxu0 %v2862_v32  ;;  %v3083_v32 = vld [vmem:[#allocation15 + $0xd8] sm:$0xff] }
 0x370   :  { %3001 = vmatpush.msrb.mxu1 %v2966_v56  ;;  %3015 = vmatpush.msrb.mxu2 %v2985_v28  ;;  %v2976_v56 = vld [vmem:[#allocation13 + $0x128] sm:$0xff]  ;;  %v3066_v28 = vld [vmem:[#allocation15 + $0x50] sm:$0xff] }
 0x371   :  { %2840 = vmatpush.msrb.mxu3 %v2798_v59  ;;  %2919 = vmatpush.msrb.mxu0 %v2861_v1  ;;  %v3080_v59 = vld [vmem:[#allocation15 + $0xc0] sm:$0xff] }
 0x372   :  { %3002 = vmatpush.msrb.mxu1 %v2963_v38  ;;  %3016 = vmatpush.msrb.mxu2 %v2982_v58  ;;  %v2973_v38 = vld [vmem:[#allocation13 + $0x110] sm:$0xff]  ;;  %v2276_v58 = vperm.slane %v7598_v26, 0 }
 0x373   :  { %2841 = vmatpush.msrb.mxu3 %v2796_v42  ;;  %2920 = vmatpush.msrb.mxu0 %v2860_v16  ;;  %v3078_v42 = vld [vmem:[#allocation15 + $0xb0] sm:$0xff]  ;;  %v374_v16 = vadd.f32 %v7167_v23, %v8711_v40 }
 0x374   :  { %3003 = vmatpush.msrb.mxu1 %v2960_v9  ;;  %3017 = vmatpush.msrb.mxu2 %v2979_v30  ;;  %v3079_v9 = vld [vmem:[#allocation15 + $0xb8] sm:$0xff]  ;;  %v2949_v30 = vld [vmem:[#allocation13 + $0x50] sm:$0xff] }
 0x375   :  { %2842 = vmatpush.msrb.mxu3 %v2794_v29  ;;  %2921 = vmatpush.msrb.mxu0 %v2859_v52  ;;  %v2970_v29 = vld [vmem:[#allocation13 + $0xf8] sm:$0xff]  ;;  %v2971_v52 = vld [vmem:[#allocation13 + $0x100] sm:$0xff] }
 0x376   :  { %3004 = vmatpush.msrb.mxu1 %v2957_v60  ;;  %3018 = vmatpush.msrb.mxu2 %v2976_v56  ;;  %v3076_v60 = vld [vmem:[#allocation15 + $0xa0] sm:$0xff] }
 0x377   :  { %2843 = vmatpush.msrb.mxu3 %v2792_v44  ;;  %2922 = vmatpush.msrb.mxu0 %v2858_v62  ;;  %v3077_v44 = vld [vmem:[#allocation15 + $0xa8] sm:$0xff]  ;;  %v2967_v62 = vld [vmem:[#allocation13 + $0xe0] sm:$0xff] }
 0x378   :  { %3005 = vmatpush.msrb.mxu1 %v2954_v63  ;;  %3019 = vmatpush.msrb.mxu2 %v2973_v38  ;;  %v2968_v63 = vld [vmem:[#allocation13 + $0xe8] sm:$0xff] }
 0x379   :  { %2844 = vmatpush.msrb.mxu3 %v2790_v2  ;;  %2923 = vmatpush.msrb.mxu0 %v2857_v24  ;;  %v3075_v2 = vld [vmem:[#allocation15 + $0x98] sm:$0xff]  ;;  %v2964_v24 = vld [vmem:[#allocation13 + $0xc8] sm:$0xff] }
 0x37a   :  { %3006 = vmatpush.msrb.mxu1 %v2951_v15  ;;  %3020 = vmatpush.msrb.mxu2 %v2970_v29  ;;  %v2965_v15 = vld [vmem:[#allocation13 + $0xd0] sm:$0xff]  ;;  %v3061_v38 = vld [vmem:[#allocation15 + $0x28] sm:$0xff] }
 0x37b   :  { %2845 = vmatpush.msrb.mxu3 %v2788_v7  ;;  %2924 = vmatpush.msrb.mxu0 %v2856_v0  ;;  %v3073_v0 = vld [vmem:[#allocation15 + $0x88] sm:$0xff]  ;;  %v3058_v29 = vld [vmem:[#allocation15 + $0x10] sm:$0xff] }
 0x37c   :  { %3007 = vmatpush.msrb.mxu1 %v2948_v6  ;;  %3021 = vmatpush.msrb.mxu2 %v2967_v62  ;;  %v2940_v62 = vld [vmem:[#allocation13 + $0x8] sm:$0xff] }
 0x37d   :  { %2846 = vmatpush.msrb.mxu3 %v2786_v8  ;;  %2925 = vmatpush.msrb.mxu0 %v2855_v20  ;;  %v2962_v8 = vld [vmem:[#allocation13 + $0xb8] sm:$0xff]  ;;  %v3070_v20 = vld [vmem:[#allocation15 + $0x70] sm:$0xff] }
 0x37e   :  { %3008 = vmatpush.msrb.mxu1 %v2945_v4  ;;  %3022 = vmatpush.msrb.mxu2 %v2964_v24  ;;  %v3071_v4 = vld [vmem:[#allocation15 + $0x78] sm:$0xff] }
 0x37f   :  { %2847 = vmatpush.msrb.mxu3 %v2784_v34  ;;  %2926 = vmatpush.msrb.mxu0 %v2854_v35  ;;  %v2959_v34 = vld [vmem:[#allocation13 + $0xa0] sm:$0xff] }
 0x380   :  { %3009 = vmatpush.msrb.mxu1 %v2942_v36  ;;  %3023 = vmatpush.msrb.mxu2 %v2961_v41  ;;  %v3068_v35 = vld [vmem:[#allocation15 + $0x60] sm:$0xff] }
 0x381   :  { %2848 = vmatpush.msrb.mxu3 %v2782_v31  ;;  %2927 = vmatpush.msrb.mxu0 %v2853_v13  ;;  %v3069_v31 = vld [vmem:[#allocation15 + $0x68] sm:$0xff]  ;;  %v2955_v13 = vld [vmem:[#allocation13 + $0x80] sm:$0xff] }
 0x382   :  { %3010 = vmatpush.msrb.mxu1 %v2939_v45  ;;  %3024 = vmatpush.msrb.mxu2 %v2958_v49  ;;  %v2956_v45 = vld [vmem:[#allocation13 + $0x88] sm:$0xff] }
 0x383   :  { %3035 = vmatpush.msra.mxu3 %v2986_v3  ;;  %3088 = vmatpush.msra.mxu0 %v3086_v21  ;;  %v3067_v21 = vld [vmem:[#allocation15 + $0x58] sm:$0xff] }
 0x384   :  { %3108 = vmatpush.msra.mxu1 %v3087_v22  ;;  %3025 = vmatpush.msrb.mxu2 %v2955_v13 }
 0x385   :  { %3036 = vmatpush.msra.mxu3 %v2983_v50  ;;  %3089 = vmatpush.msra.mxu0 %v3084_v46  ;;  %v2952_v50 = vld [vmem:[#allocation13 + $0x68] sm:$0xff]  ;;  %v2953_v46 = vld [vmem:[#allocation13 + $0x70] sm:$0xff] }
 0x386   :  { %3109 = vmatpush.msra.mxu1 %v3085_v10  ;;  %3026 = vmatpush.msrb.mxu2 %v2952_v50  ;;  %v456_v50 = vadd.f32 %v7151_v33, %v7047_v5 }
 0x387   :  { %3037 = vmatpush.msra.mxu3 %v2980_v18  ;;  %3090 = vmatpush.msra.mxu0 %v3082_v53  ;;  %v2950_v18 = vld [vmem:[#allocation13 + $0x58] sm:$0xff]  ;;  %v3062_v53 = vld [vmem:[#allocation15 + $0x30] sm:$0xff] }
 0x388   :  { %3110 = vmatpush.msra.mxu1 %v3083_v32  ;;  %v3063_v32 = vld [vmem:[#allocation15 + $0x38] sm:$0xff]  ;;  %3027 = vmatpush.msrb.mxu2 %v2949_v30 }
 0x389   :  { %3038 = vmatpush.msra.mxu3 %v2977_v27  ;;  %3091 = vmatpush.msra.mxu0 %v3080_v59  ;;  %v2946_v27 = vld [vmem:[#allocation13 + $0x38] sm:$0xff]  ;;  %v2947_v59 = vld [vmem:[#allocation13 + $0x40] sm:$0xff] }
 0x38a   :  { %3111 = vmatpush.msra.mxu1 %v3081_v14  ;;  %v3060_v14 = vld [vmem:[#allocation15 + $0x20] sm:$0xff]  ;;  %3028 = vmatpush.msrb.mxu2 %v2946_v27 }
 0x38b   :  { %3039 = vmatpush.msra.mxu3 %v2974_v55  ;;  %3092 = vmatpush.msra.mxu0 %v3078_v42  ;;  %v2277_v42 = vperm.slane %v7598_v26, 1 }
 0x38c   :  { %3112 = vmatpush.msra.mxu1 %v3079_v9  ;;  %v2943_v9 = vld [vmem:[#allocation13 + $0x20] sm:$0xff] }
 0x38d   :  { %3040 = vmatpush.msra.mxu3 %v2971_v52  ;;  %3093 = vmatpush.msra.mxu0 %v3076_v60  ;;  %v3059_v60 = vld [vmem:[#allocation15 + $0x18] sm:$0xff] }
 0x38e   :  { %3113 = vmatpush.msra.mxu1 %v3077_v44  ;;  %3029 = vmatpush.msrb.mxu2 %v2943_v9 }
 0x38f   :  { %3041 = vmatpush.msra.mxu3 %v2968_v63  ;;  %3094 = vmatpush.msra.mxu0 %v3074_v51  ;;  %v2941_v63 = vld [vmem:[#allocation13 + $0x10] sm:$0xff]  ;;  %v3056_v51 = vld [vmem:[#allocation15] sm:$0xff] }
 0x390   :  { %3114 = vmatpush.msra.mxu1 %v3075_v2  ;;  %v3057_v2 = vld [vmem:[#allocation15 + $0x8] sm:$0xff]  ;;  %3030 = vmatpush.msrb.mxu2 %v2940_v62 }
 0x391   :  { %3042 = vmatpush.msra.mxu3 %v2965_v15  ;;  %3095 = vmatpush.msra.mxu0 %v3072_v48 }
 0x392   :  { %3115 = vmatpush.msra.mxu1 %v3073_v0 }
 0x393   :  { %3043 = vmatpush.msra.mxu3 %v2962_v8  ;;  %3096 = vmatpush.msra.mxu0 %v3070_v20  ;;  %v5925_v8 = vld [vmem:[#allocation12] ss:$0 sm:$0xff] }
 0x394   :  { %3116 = vmatpush.msra.mxu1 %v3071_v4 }
 0x395   :  { %3044 = vmatpush.msra.mxu3 %v2959_v34  ;;  %3097 = vmatpush.msra.mxu0 %v3068_v35 }
 0x396   :  { %3117 = vmatpush.msra.mxu1 %v3069_v31 }
 0x397   :  { %3045 = vmatpush.msra.mxu3 %v2956_v45  ;;  %3098 = vmatpush.msra.mxu0 %v3066_v28 }
 0x398   :  { %3118 = vmatpush.msra.mxu1 %v3067_v21 }
 0x399   :  { %v2137_v11 = vpop.f32.mrf.mxu0  ;;  %3046 = vmatpush.msra.mxu3 %v2953_v46 }
 0x39a   :  { %v2176_v61 = vadd.f32 %v2137_v11, %v415_v57  ;;  %v7593_v36 = vpop.f32.mrf.mxu1  ;;  %v3064_v57 = vld [vmem:[#allocation15 + $0x40] sm:$0xff]  ;;  %v3065_v11 = vld [vmem:[#allocation15 + $0x48] sm:$0xff] }
 0x39b   :  { %3099 = vmatpush.msra.mxu0 %v3064_v57  ;;  %3119 = vmatpush.msra.mxu1 %v3065_v11  ;;  %v2217_v45 = vadd.f32 %v5925_v8, %v7593_v36  ;;  %v3257_v8 = vld [vmem:[#allocation19 + $0x158] sm:$0xff] }
 0x39c   :  { %v5869_v1 = vmul.f32 -1.442695, %v2176_v61  ;;  %3047 = vmatpush.msra.mxu3 %v2950_v18 }
 0x39d   :  { %3100 = vmatpush.msra.mxu0 %v3062_v53  ;;  %3120 = vmatpush.msra.mxu1 %v3063_v32 }
 0x39e   :  { %6032 = vpow2.f32 %v5869_v1  ;;  %3048 = vmatpush.msra.mxu3 %v2947_v59 }
 0x39f   :  { %v2117_v37 = vpop.f32.mrf.mxu3  ;;  %3101 = vmatpush.msra.mxu0 %v3060_v14  ;;  %3121 = vmatpush.msra.mxu1 %v3061_v38 }
 0x3a0   :  { %v2156_v43 = vadd.f32 %v2117_v37, %v374_v16  ;;  %v2299_v10 = vpop.f32.mrf.mxu2  ;;  %v2944_v37 = vld [vmem:[#allocation13 + $0x28] sm:$0xff] }
 0x3a1   :  { %v2300_v56 = vadd.f32 %v2299_v10, %v2276_v58  ;;  %3049 = vmatpush.msra.mxu3 %v2944_v37  ;;  %3102 = vmatpush.msra.mxu0 %v3058_v29 }
 0x3a2   :  { %v5868_v23 = vmul.f32 -1.442695, %v2156_v43  ;;  %3122 = vmatpush.msra.mxu1 %v3059_v60 }
 0x3a3   :  { %3050 = vmatpush.msra.mxu3 %v2941_v63  ;;  %3103 = vmatpush.msra.mxu0 %v3056_v51  ;;  %v2339_v37 = vpop.f32.mrf.mxu0 }
 0x3a4   :  { %v6033_v7 = vpop.eup %6032  ;;  %6034 = vpow2.f32 %v5868_v23  ;;  %3123 = vmatpush.msra.mxu1 %v3057_v2 }
 0x3a5   :  { %v7590_v6 = vadd.f32 1.0, %v6033_v7 }
 0x3a7   :  { %6036 = vrcp.f32 %v7590_v6  ;;  %v2192_v46 = vand.u32 2147483648, %v7590_v6  ;;  %vm2186_vm13 = vweird.f32 %v7590_v6  ;;  %v2190_v57 = vand.u32 2147483647, %v7590_v6 }
 0x3a9   :  { %v2319_v52 = vpop.f32.mrf.mxu3  ;;  %v2193_v30 = vor.u32 1.1754944e-38, %v2192_v46  ;;  %vm2191_vm15 = vcmp.eq.f32.partialorder %v2190_v57, 8.507059e+37  ;;  %v3251_v46 = vld [vmem:[#allocation19 + $0x128] sm:$0xff] }
 0x3aa   :  { %v6035_v3 = vpop.eup %6034  ;;  %v2320_v15 = vadd.f32 %v2319_v52, %v2277_v42 }
 0x3ab   :  { %v7600_v22 = vadd.f32 1.0, %v6035_v3 }
 0x3ad   :  { %6038 = vrcp.f32 %v7600_v22  ;;  %v7604_v61 = vpop.eup %6036  ;;  %v2172_v0 = vand.u32 2147483648, %v7600_v22  ;;  %v2170_v4 = vand.u32 2147483647, %v7600_v22  ;;  %vm2166_vm9 = vweird.f32 %v7600_v22 }
 0x3ae   :  { %v2182_v55 = vmul.f32 %v7604_v61, %v7590_v6  ;;  %vm2187_vm12 = vweird.f32 %v7604_v61 }
 0x3af   :  { %v2173_v13 = vor.u32 1.1754944e-38, %v2172_v0  ;;  %vm2171_vm11 = vcmp.eq.f32.partialorder %v2170_v4, 8.507059e+37  ;;  %vm2188_vm14 = vmor %vm2186_vm13, %vm2187_vm12 }
 0x3b0   :  { %v2392_v1 = vpop.f32.mrf.mxu1  ;;  %v2183_v24 = vsub.f32 1.0, %v2182_v55 }
 0x3b1   :  { %v2431_v16 = vadd.f32 %v2392_v1, %v2300_v56 }
 0x3b2   :  { %v2184_v49 = vmul.f32 %v7604_v61, %v2183_v24 }
 0x3b3   :  { %v6039_v43 = vpop.eup %6038  ;;  %v5870_v44 = vmul.f32 -1.442695, %v2431_v16  ;;  %v2278_v16 = vperm.slane %v7598_v26, 2  ;;  %v3260_v26 = vld [vmem:[#allocation19 + $0x170] sm:$0xff] }
 0x3b4   :  { %v2162_v23 = vmul.f32 %v6039_v43, %v7600_v22  ;;  %vm2167_vm8 = vweird.f32 %v6039_v43  ;;  %v2185_v21 = vadd.f32 %v7604_v61, %v2184_v49  ;;  %v3141_v49 = vld [vmem:[#allocation16 + $0x68] sm:$0xff] }
 0x3b5   :  { %6040 = vpow2.f32 %v5870_v44  ;;  %vm2168_vm10 = vmor %vm2166_vm9, %vm2167_vm8  ;;  %v3259_v44 = vld [vmem:[#allocation19 + $0x168] sm:$0xff]  ;;  %v2340_v2 = vadd.f32 %v2339_v37, %v2278_v16 }
 0x3b6   :  { %v2163_v48 = vsub.f32 1.0, %v2162_v23  ;;  %v2412_v7 = vpop.f32.mrf.mxu2  ;;  %v2189_v11 = vsel %vm2188_vm14, %v7604_v61, %v2185_v21  ;;  %v5926_v61 = vld [vmem:[#allocation18] ss:$0 sm:$0xff]  ;;  %v3250_v21 = vld [vmem:[#allocation19 + $0x120] sm:$0xff]  ;;  %v3243_v16 = vld [vmem:[#allocation19 + $0xe8] sm:$0xff] }
 0x3b7   :  { %v2451_v41 = vadd.f32 %v2412_v7, %v2320_v15  ;;  %v2194_v33 = vsel %vm2191_vm15, %v2193_v30, %v2189_v11  ;;  %v3261_v23 = vld [vmem:[#allocation19 + $0x178] sm:$0xff]  ;;  %v3142_v15 = vld [vmem:[#allocation16 + $0x70] sm:$0xff] }
 0x3b8   :  { %v2164_v20 = vmul.f32 %v6039_v43, %v2163_v48  ;;  %v2222_v56 = vsub.f32 1.0, %v2194_v33  ;;  %v2224_v6 = vmul.f32 %v2194_v33, %v7496_v25  ;;  %v3256_v48 = vld [vmem:[#allocation19 + $0x150] sm:$0xff]  ;;  %v3249_v30 = vld [vmem:[#allocation19 + $0x118] sm:$0xff] }
 0x3b9   :  { %v5871_v34 = vmul.f32 -1.442695, %v2451_v41  ;;  %v3248_v11 = vld [vmem:[#allocation19 + $0x110] sm:$0xff] }
 0x3ba   :  { %v2165_v35 = vadd.f32 %v6039_v43, %v2164_v20  ;;  %v3258_v20 = vld [vmem:[#allocation19 + $0x160] sm:$0xff]  ;;  %v3138_v33 = vld [vmem:[#allocation16 + $0x50] sm:$0xff] }
 0x3bb   :  { %v6041_v31 = vpop.eup %6040  ;;  %6042 = vpow2.f32 %v5871_v34  ;;  %v3253_v34 = vld [vmem:[#allocation19 + $0x138] sm:$0xff] }
 0x3bc   :  { %v2169_v28 = vsel %vm2168_vm10, %v6039_v43, %v2165_v35  ;;  %v2435_v3 = vadd.f32 1.0, %v6041_v31  ;;  %v3143_v43 = vld [vmem:[#allocation16 + $0x78] sm:$0xff] }
 0x3bd   :  { %v2174_v58 = vsel %vm2171_vm11, %v2173_v13, %v2169_v28  ;;  %v3254_v13 = vld [vmem:[#allocation19 + $0x140] sm:$0xff]  ;;  %v3228_v28 = vld [vmem:[#allocation19 + $0x70] sm:$0xff] }
 0x3be   :  { %v2219_v22 = vmul.f32 %v2217_v45, %v2174_v58  ;;  %6044 = vrcp.f32 %v2435_v3  ;;  %v2447_v1 = vand.u32 2147483648, %v2435_v3  ;;  %v2445_v38 = vand.u32 2147483647, %v2435_v3  ;;  %v3255_v45 = vld [vmem:[#allocation19 + $0x148] sm:$0xff] }
 0x3bf   :  { %vm2441_vm1 = vweird.f32 %v2435_v3 }
 0x3c0   :  { %v2220_v36 = vadd.f32 %v2219_v22, %v456_v50  ;;  %v2448_v25 = vor.u32 1.1754944e-38, %v2447_v1  ;;  %vm2446_vm3 = vcmp.eq.f32.partialorder %v2445_v38, 8.507059e+37  ;;  %v3252_v22 = vld [vmem:[#allocation19 + $0x130] sm:$0xff]  ;;  %v3137_v1 = vld [vmem:[#allocation16 + $0x48] sm:$0xff] }
 0x3c1   :  { %v6043_v10 = vpop.eup %6042 }
 0x3c2   :  { %6046 = vtanh.f32 %v2220_v36  ;;  %v7623_v18 = vadd.f32 1.0, %v6043_v10  ;;  %v3139_v36 = vld [vmem:[#allocation16 + $0x58] sm:$0xff]  ;;  %v3247_v10 = vld [vmem:[#allocation19 + $0x108] sm:$0xff] }
 0x3c3   :  { %v2491_v9 = vpop.f32.mrf.mxu3 }
 0x3c4   :  { %v6045_v53 = vpop.eup %6044  ;;  %6048 = vrcp.f32 %v7623_v18  ;;  %v2492_v51 = vadd.f32 %v5926_v61, %v2491_v9  ;;  %v2467_v0 = vand.u32 2147483648, %v7623_v18  ;;  %v2465_v4 = vand.u32 2147483647, %v7623_v18  ;;  %v2594_v9 = vpop.f32.mrf.mxu1 }
 0x3c5   :  { %v2437_v32 = vmul.f32 %v6045_v53, %v2435_v3  ;;  %vm2442_vm0 = vweird.f32 %v6045_v53  ;;  %vm2461_vm5 = vweird.f32 %v7623_v18  ;;  %v3140_v3 = vld [vmem:[#allocation16 + $0x60] sm:$0xff] }
 0x3c6   :  { %vm2443_vm2 = vmor %vm2441_vm1, %vm2442_vm0  ;;  %v2468_v58 = vor.u32 1.1754944e-38, %v2467_v0  ;;  %vm2466_vm7 = vcmp.eq.f32.partialorder %v2465_v4, 8.507059e+37  ;;  %v3230_v4 = vld [vmem:[#allocation19 + $0x80] sm:$0xff] }
 0x3c7   :  { %v2438_v27 = vsub.f32 1.0, %v2437_v32  ;;  %v3244_v32 = vld [vmem:[#allocation19 + $0xf0] sm:$0xff] }
 0x3c8   :  { %v6047_v59 = vpop.eup %6046 }
 0x3c9   :  { %v2439_v14 = vmul.f32 %v6045_v53, %v2438_v27  ;;  %v2223_v55 = vmul.f32 %v6047_v59, %v2222_v56  ;;  %v3245_v27 = vld [vmem:[#allocation19 + $0xf8] sm:$0xff]  ;;  %v3246_v59 = vld [vmem:[#allocation19 + $0x100] sm:$0xff] }
 0x3ca   :  { %v7627_v42 = vpop.eup %6048 }
 0x3cb   :  { %v2457_v29 = vmul.f32 %v7627_v42, %v7623_v18  ;;  %v2440_v52 = vadd.f32 %v6045_v53, %v2439_v14  ;;  %v7632_v60 = vadd.f32 %v2224_v6, %v2223_v55  ;;  %vm2462_vm4 = vweird.f32 %v7627_v42  ;;  %v7656_v18 = vld [vmem:[%s8576_s14] sm:$0x7]  ;;  %v3241_v14 = vld [vmem:[#allocation19 + $0xd8] sm:$0xff] }
 0x3cc   :  { %vm7646_vm6 = vmor %vm2461_vm5, %vm2462_vm4  ;;  %v2552_v38 = vperm.slane %v7656_v18, 1 }
 0x3cd   :  { %v2458_v62 = vsub.f32 1.0, %v2457_v29  ;;  %v2444_v63 = vsel %vm2443_vm2, %v6045_v53, %v2440_v52  ;;  %2829 = vmatmul.f32.vlgmr.msra.gmra.mxu2 %v7632_v60  ;;  %2849 = vmatmul.f32.vlgmr.msrb.gmra.mxu3 %v7632_v60  ;;  %v2574_v53 = vpop.f32.mrf.mxu0  ;;  %v3136_v29 = vld [vmem:[#allocation16 + $0x40] sm:$0xff] }
 0x3ce   :  { %v2449_v24 = vsel %vm2446_vm3, %v2448_v25, %v2444_v63  ;;  %2928 = vmatmul.f32.vlgmr.msrb.gmra.mxu0 %v7632_v60  ;;  %3011 = vmatmul.f32.vlgmr.msrb.gmra.mxu1 %v7632_v60  ;;  %v3238_v52 = vld [vmem:[#allocation19 + $0xc0] sm:$0xff]  ;;  %v3239_v25 = vld [vmem:[#allocation19 + $0xc8] sm:$0xff]  ;;  %v2551_v63 = vperm.slane %v7656_v18, 0 }
 0x3cf   :  { %v2459_v7 = vmul.f32 %v7627_v42, %v2458_v62  ;;  %v2494_v41 = vmul.f32 %v2492_v51, %v2449_v24  ;;  %3187 = vmatpush.msra.mxu2 %v3143_v43  ;;  %3270 = vmatpush.msrb.mxu3 %v3259_v44  ;;  %v3240_v43 = vld [vmem:[#allocation19 + $0xd0] sm:$0xff]  ;;  %v2595_v44 = vadd.f32 %v2594_v9, %v2552_v38  ;;  %v3235_v62 = vld [vmem:[#allocation19 + $0xa8] sm:$0xff] }
 0x3d0   :  { %3290 = vmatpush.msrb.mxu0 %v3260_v26  ;;  %3310 = vmatpush.msrb.mxu1 %v3261_v23  ;;  %v3236_v26 = vld [vmem:[#allocation19 + $0xb0] sm:$0xff]  ;;  %v3237_v23 = vld [vmem:[#allocation19 + $0xb8] sm:$0xff]  ;;  %v3360_v9 = vld [vmem:[#allocation21 + $0xe8] sm:$0xff] }
 0x3d1   :  { %v2460_v35 = vadd.f32 %v7627_v42, %v2459_v7  ;;  %v2495_v31 = vadd.f32 %v2494_v41, %v2340_v2  ;;  %3188 = vmatpush.msra.mxu2 %v3142_v15  ;;  %3271 = vmatpush.msrb.mxu3 %v3256_v48  ;;  %v3134_v24 = vld [vmem:[#allocation16 + $0x30] sm:$0xff]  ;;  %v3233_v48 = vld [vmem:[#allocation19 + $0x98] sm:$0xff]  ;;  %v3234_v7 = vld [vmem:[#allocation19 + $0xa0] sm:$0xff] }
 0x3d2   :  { %3291 = vmatpush.msrb.mxu0 %v3257_v8  ;;  %3311 = vmatpush.msrb.mxu1 %v3258_v20  ;;  %v3232_v15 = vld [vmem:[#allocation19 + $0x90] sm:$0xff]  ;;  %v3133_v41 = vld [vmem:[#allocation16 + $0x28] sm:$0xff]  ;;  %v3229_v8 = vld [vmem:[#allocation19 + $0x78] sm:$0xff]  ;;  %v2575_v20 = vadd.f32 %v2574_v53, %v2551_v63 }
 0x3d3   :  { %v2464_v50 = vsel %vm7646_vm6, %v7627_v42, %v2460_v35  ;;  %6050 = vtanh.f32 %v2495_v31  ;;  %3189 = vmatpush.msra.mxu2 %v3141_v49  ;;  %3272 = vmatpush.msrb.mxu3 %v3253_v34  ;;  %v3242_v42 = vld [vmem:[#allocation19 + $0xe0] sm:$0xff]  ;;  %v3231_v49 = vld [vmem:[#allocation19 + $0x88] sm:$0xff]  ;;  %v3217_v53 = vld [vmem:[#allocation19 + $0x18] sm:$0xff] }
 0x3d4   :  { %3292 = vmatpush.msrb.mxu0 %v3254_v13  ;;  %3312 = vmatpush.msrb.mxu1 %v3255_v45  ;;  %v2469_v57 = vsel %vm2466_vm7, %v2468_v58, %v2464_v50  ;;  %v3132_v35 = vld [vmem:[#allocation16 + $0x20] sm:$0xff]  ;;  %v3227_v45 = vld [vmem:[#allocation19 + $0x68] sm:$0xff]  ;;  %v3224_v50 = vld [vmem:[#allocation19 + $0x50] sm:$0xff] }
 0x3d5   :  { %3190 = vmatpush.msra.mxu2 %v3140_v3  ;;  %3273 = vmatpush.msrb.mxu3 %v3250_v21  ;;  %v2497_v56 = vsub.f32 1.0, %v2469_v57  ;;  %v2499_v55 = vmul.f32 %v2469_v57, %v7537_v47  ;;  %v3135_v47 = vld [vmem:[#allocation16 + $0x38] sm:$0xff]  ;;  %v3226_v31 = vld [vmem:[#allocation19 + $0x60] sm:$0xff]  ;;  %v3223_v21 = vld [vmem:[#allocation19 + $0x48] sm:$0xff] }
 0x3d6   :  { %3293 = vmatpush.msrb.mxu0 %v3251_v46  ;;  %3313 = vmatpush.msrb.mxu1 %v3252_v22  ;;  %v3131_v3 = vld [vmem:[#allocation16 + $0x18] sm:$0xff]  ;;  %v3130_v22 = vld [vmem:[#allocation16 + $0x10] sm:$0xff] }
 0x3d7   :  { %3031 = vmatmul.f32.vlgmr.msrb.gmra.mxu2 %v7632_v60  ;;  %3051 = vmatmul.f32.vlgmr.msra.gmra.mxu3 %v7632_v60  ;;  %v3225_v46 = vld [vmem:[#allocation19 + $0x58] sm:$0xff]  ;;  %v3220_v57 = vld [vmem:[#allocation19 + $0x30] sm:$0xff] }
 0x3d8   :  { %3191 = vmatpush.msra.mxu2 %v3139_v36  ;;  %3274 = vmatpush.msrb.mxu3 %v3247_v10  ;;  %v3221_v36 = vld [vmem:[#allocation19 + $0x38] sm:$0xff]  ;;  %v3222_v10 = vld [vmem:[#allocation19 + $0x40] sm:$0xff] }
 0x3d9   :  { %v6051_v6 = vpop.eup %6050  ;;  %3294 = vmatpush.msrb.mxu0 %v3248_v11  ;;  %3314 = vmatpush.msrb.mxu1 %v3249_v30  ;;  %v3129_v30 = vld [vmem:[#allocation16 + $0x8] sm:$0xff] }
 0x3da   :  { %v2498_v61 = vmul.f32 %v6051_v6, %v2497_v56  ;;  %3192 = vmatpush.msra.mxu2 %v3138_v33  ;;  %3275 = vmatpush.msrb.mxu3 %v3244_v32  ;;  %v3218_v32 = vld [vmem:[#allocation19 + $0x20] sm:$0xff]  ;;  %v3219_v56 = vld [vmem:[#allocation19 + $0x28] sm:$0xff] }
 0x3db   :  { %3295 = vmatpush.msrb.mxu0 %v3245_v27  ;;  %3315 = vmatpush.msrb.mxu1 %v3246_v59  ;;  %v3128_v27 = vld [vmem:[#allocation16] sm:$0xff]  ;;  %v3215_v6 = vld [vmem:[#allocation19 + $0x8] sm:$0xff] }
 0x3dc   :  { %v7662_v37 = vadd.f32 %v2499_v55, %v2498_v61  ;;  %3193 = vmatpush.msra.mxu2 %v3137_v1  ;;  %3276 = vmatpush.msrb.mxu3 %v3241_v14  ;;  %v3214_v59 = vld [vmem:[#allocation19] sm:$0xff]  ;;  %v3216_v1 = vld [vmem:[#allocation19 + $0x10] sm:$0xff]  ;;  %v3362_v55 = vld [vmem:[#allocation21 + $0xf8] sm:$0xff] }
 0x3dd   :  { %3296 = vmatpush.msrb.mxu0 %v3242_v42  ;;  %3316 = vmatpush.msrb.mxu1 %v3243_v16  ;;  %v3361_v61 = vld [vmem:[#allocation21 + $0xf0] sm:$0xff]  ;;  %v3418_v42 = vld [vmem:[#allocation22 + $0x78] sm:$0xff]  ;;  %v3359_v16 = vld [vmem:[#allocation21 + $0xe0] sm:$0xff] }
 0x3de   :  { %3104 = vmatmul.f32.vlgmr.msra.gmra.mxu0 %v7662_v37  ;;  %3124 = vmatmul.f32.vlgmr.msra.gmra.mxu1 %v7662_v37 }
 0x3df   :  { %v2687_v51 = vpop.f32.mrf.mxu0  ;;  %3194 = vmatpush.msra.mxu2 %v3136_v29  ;;  %3277 = vmatpush.msrb.mxu3 %v3238_v52  ;;  %v3417_v52 = vld [vmem:[#allocation22 + $0x70] sm:$0xff] }
 0x3e0   :  { %v2726_v2 = vadd.f32 %v2687_v51, %v2595_v44  ;;  %3297 = vmatpush.msrb.mxu0 %v3239_v25  ;;  %3317 = vmatpush.msrb.mxu1 %v3240_v43  ;;  %v3524_v25 = vld [vmem:[#allocation9 + $0xf0] sm:$0xff]  ;;  %v3358_v44 = vld [vmem:[#allocation21 + $0xd8] sm:$0xff]  ;;  %v3355_v51 = vld [vmem:[#allocation21 + $0xc0] sm:$0xff] }
 0x3e1   :  { %3195 = vmatpush.msra.mxu2 %v3135_v47  ;;  %3278 = vmatpush.msrb.mxu3 %v3235_v62  ;;  %v3357_v43 = vld [vmem:[#allocation21 + $0xd0] sm:$0xff]  ;;  %v3416_v47 = vld [vmem:[#allocation22 + $0x68] sm:$0xff]  ;;  %v3522_v62 = vld [vmem:[#allocation9 + $0xe0] sm:$0xff] }
 0x3e2   :  { %v5873_v0 = vmul.f32 -1.442695, %v2726_v2  ;;  %3298 = vmatpush.msrb.mxu0 %v3236_v26  ;;  %3318 = vmatpush.msrb.mxu1 %v3237_v23  ;;  %v3356_v26 = vld [vmem:[#allocation21 + $0xc8] sm:$0xff]  ;;  %v3415_v23 = vld [vmem:[#allocation22 + $0x60] sm:$0xff] }
 0x3e3   :  { %3196 = vmatpush.msra.mxu2 %v3134_v24  ;;  %3279 = vmatpush.msrb.mxu3 %v3232_v15  ;;  %v3520_v2 = vld [vmem:[#allocation9 + $0xd0] sm:$0xff] }
 0x3e4   :  { %6052 = vpow2.f32 %v5873_v0  ;;  %v2667_v34 = vpop.f32.mrf.mxu3  ;;  %3299 = vmatpush.msrb.mxu0 %v3233_v48  ;;  %3319 = vmatpush.msrb.mxu1 %v3234_v7  ;;  %v3353_v15 = vld [vmem:[#allocation21 + $0xb0] sm:$0xff]  ;;  %v3354_v48 = vld [vmem:[#allocation21 + $0xb8] sm:$0xff] }
 0x3e5   :  { %v2706_v13 = vadd.f32 %v2667_v34, %v2575_v20  ;;  %3197 = vmatpush.msra.mxu2 %v3133_v41  ;;  %3280 = vmatpush.msrb.mxu3 %v3229_v8  ;;  %v3414_v0 = vld [vmem:[#allocation22 + $0x58] sm:$0xff]  ;;  %v3351_v20 = vld [vmem:[#allocation21 + $0xa0] sm:$0xff]  ;;  %v3413_v34 = vld [vmem:[#allocation22 + $0x50] sm:$0xff] }
 0x3e6   :  { %3300 = vmatpush.msrb.mxu0 %v3230_v4  ;;  %3320 = vmatpush.msrb.mxu1 %v3231_v49  ;;  %v3518_v41 = vld [vmem:[#allocation9 + $0xc0] sm:$0xff]  ;;  %v3352_v4 = vld [vmem:[#allocation21 + $0xa8] sm:$0xff] }
 0x3e7   :  { %v5872_v58 = vmul.f32 -1.442695, %v2706_v13  ;;  %3198 = vmatpush.msra.mxu2 %v3132_v35  ;;  %3281 = vmatpush.msrb.mxu3 %v3226_v31  ;;  %v3516_v35 = vld [vmem:[#allocation9 + $0xb0] sm:$0xff] }
 0x3e8   :  { %3301 = vmatpush.msrb.mxu0 %v3227_v45  ;;  %3321 = vmatpush.msrb.mxu1 %v3228_v28  ;;  %v3349_v13 = vld [vmem:[#allocation21 + $0x90] sm:$0xff]  ;;  %v3350_v45 = vld [vmem:[#allocation21 + $0x98] sm:$0xff] }
 0x3e9   :  { %6054 = vpow2.f32 %v5872_v58  ;;  %3199 = vmatpush.msra.mxu2 %v3131_v3  ;;  %3282 = vmatpush.msrb.mxu3 %v3223_v21  ;;  %v5927_v28 = vld [vmem:[%s8577_s15] ss:$0 sm:$0xff]  ;;  %v3412_v58 = vld [vmem:[#allocation22 + $0x48] sm:$0xff] }
 0x3ea   :  { %v6053_v11 = vpop.eup %6052  ;;  %3302 = vmatpush.msrb.mxu0 %v3224_v50  ;;  %3322 = vmatpush.msrb.mxu1 %v3225_v46  ;;  %v2766_v46 = vpop.f32.mrf.mxu1 }
 0x3eb   :  { %v7667_v33 = vadd.f32 1.0, %v6053_v11  ;;  %3200 = vmatpush.msra.mxu2 %v3130_v22  ;;  %3283 = vmatpush.msrb.mxu3 %v3220_v57  ;;  %v3347_v22 = vld [vmem:[#allocation21 + $0x80] sm:$0xff]  ;;  %v3348_v57 = vld [vmem:[#allocation21 + $0x88] sm:$0xff] }
 0x3ec   :  { %3303 = vmatpush.msrb.mxu0 %v3221_v36  ;;  %3323 = vmatpush.msrb.mxu1 %v3222_v10  ;;  %v2553_v36 = vperm.slane %v7656_v18, 2  ;;  %v3411_v11 = vld [vmem:[#allocation22 + $0x40] sm:$0xff] }
 0x3ed   :  { %6056 = vrcp.f32 %v7667_v33  ;;  %3201 = vmatpush.msra.mxu2 %v3129_v30  ;;  %3284 = vmatpush.msrb.mxu3 %v3217_v53  ;;  %v2614_v30 = vpop.f32.mrf.mxu2  ;;  %vm2736_vm13 = vweird.f32 %v7667_v33 }
 0x3ee   :  { %3304 = vmatpush.msrb.mxu0 %v3218_v32  ;;  %3324 = vmatpush.msrb.mxu1 %v3219_v56  ;;  %v3345_v32 = vld [vmem:[#allocation21 + $0x70] sm:$0xff]  ;;  %v3346_v56 = vld [vmem:[#allocation21 + $0x78] sm:$0xff] }
 0x3ef   :  { %v6055_v14 = vpop.eup %6054  ;;  %3202 = vmatpush.msra.mxu2 %v3128_v27  ;;  %3285 = vmatpush.msrb.mxu3 %v3214_v59  ;;  %v2767_v27 = vadd.f32 %v5927_v28, %v2766_v46  ;;  %v3525_v28 = vld [vmem:[#allocation9 + $0xf8] sm:$0xff] }
 0x3f0   :  { %v7670_v38 = vadd.f32 1.0, %v6055_v14  ;;  %3305 = vmatpush.msrb.mxu0 %v3215_v6  ;;  %3325 = vmatpush.msrb.mxu1 %v3216_v1  ;;  %v3410_v6 = vld [vmem:[#allocation22 + $0x38] sm:$0xff]  ;;  %v3343_v14 = vld [vmem:[#allocation21 + $0x60] sm:$0xff] }
 0x3f1   :  { %3203 = vmatmul.f32.vlgmr.msra.gmra.mxu2 %v7662_v37  ;;  %3286 = vmatmul.f32.vlgmr.msrb.gmra.mxu3 %v7662_v37  ;;  %v3521_v46 = vld [vmem:[#allocation9 + $0xd8] sm:$0xff] }
 0x3f2   :  { %6058 = vrcp.f32 %v7670_v38  ;;  %3306 = vmatmul.f32.vlgmr.msrb.gmra.mxu0 %v7662_v37  ;;  %3326 = vmatmul.f32.vlgmr.msrb.gmra.mxu1 %v7662_v37  ;;  %v2722_v31 = vand.u32 2147483648, %v7670_v38  ;;  %v2720_v21 = vand.u32 2147483647, %v7670_v38  ;;  %vm2716_vm9 = vweird.f32 %v7670_v38 }
 0x3f3   :  { %v7677_v29 = vpop.eup %6056  ;;  %3363 = vmatpush.msrb.mxu2 %v3361_v61  ;;  %3383 = vmatpush.msra.mxu3 %v3362_v55  ;;  %v2615_v61 = vadd.f32 %v2614_v30, %v2553_v36  ;;  %v2742_v55 = vand.u32 2147483648, %v7667_v33  ;;  %v3519_v36 = vld [vmem:[#allocation9 + $0xc8] sm:$0xff]  ;;  %v3517_v30 = vld [vmem:[#allocation9 + $0xb8] sm:$0xff] }
 0x3f4   :  { %3462 = vmatpush.msra.mxu0 %v3418_v42  ;;  %3526 = vmatpush.msra.mxu1 %v3524_v25  ;;  %v2732_v63 = vmul.f32 %v7677_v29, %v7667_v33  ;;  %v2723_v53 = vor.u32 1.1754944e-38, %v2722_v31  ;;  %vm2721_vm11 = vcmp.eq.f32.partialorder %v2720_v21, 8.507059e+37  ;;  %vm2737_vm12 = vweird.f32 %v7677_v29  ;;  %v3342_v25 = vld [vmem:[#allocation21 + $0x58] sm:$0xff]  ;;  %v3697_v21 = vld [vmem:[#allocation13 + $0x168] sm:$0xff] }
 0x3f5   :  { %3364 = vmatpush.msrb.mxu2 %v3359_v16  ;;  %3384 = vmatpush.msra.mxu3 %v3360_v9  ;;  %v3409_v16 = vld [vmem:[#allocation22 + $0x30] sm:$0xff]  ;;  %v2740_v9 = vand.u32 2147483647, %v7667_v33  ;;  %vm7698_vm14 = vmor %vm2736_vm13, %vm2737_vm12 }
 0x3f6   :  { %3463 = vmatpush.msra.mxu0 %v3417_v52  ;;  %3527 = vmatpush.msra.mxu1 %v3522_v62  ;;  %v2733_v8 = vsub.f32 1.0, %v2732_v63  ;;  %v3341_v52 = vld [vmem:[#allocation21 + $0x50] sm:$0xff]  ;;  %v3339_v62 = vld [vmem:[#allocation21 + $0x40] sm:$0xff]  ;;  %v3340_v63 = vld [vmem:[#allocation21 + $0x48] sm:$0xff] }
 0x3f7   :  { %3365 = vmatpush.msrb.mxu2 %v3357_v43  ;;  %3385 = vmatpush.msra.mxu3 %v3358_v44  ;;  %v3408_v44 = vld [vmem:[#allocation22 + $0x28] sm:$0xff]  ;;  %vm2741_vm15 = vcmp.eq.f32.partialorder %v2740_v9, 8.507059e+37 }
 0x3f8   :  { %v6059_v24 = vpop.eup %6058  ;;  %3464 = vmatpush.msra.mxu0 %v3416_v47  ;;  %3528 = vmatpush.msra.mxu1 %v3520_v2  ;;  %v2734_v50 = vmul.f32 %v7677_v29, %v2733_v8  ;;  %v3338_v2 = vld [vmem:[#allocation21 + $0x38] sm:$0xff]  ;;  %v3508_v9 = vld [vmem:[#allocation9 + $0x70] sm:$0xff] }
 0x3f9   :  { %v2712_v7 = vmul.f32 %v6059_v24, %v7670_v38  ;;  %3366 = vmatpush.msrb.mxu2 %v3355_v51  ;;  %3386 = vmatpush.msra.mxu3 %v3356_v26  ;;  %vm2717_vm8 = vweird.f32 %v6059_v24  ;;  %v3344_v38 = vld [vmem:[#allocation21 + $0x68] sm:$0xff]  ;;  %v2743_v51 = vor.u32 1.1754944e-38, %v2742_v55  ;;  %v3407_v26 = vld [vmem:[#allocation22 + $0x20] sm:$0xff] }
 0x3fa   :  { %3465 = vmatpush.msra.mxu0 %v3415_v23  ;;  %3529 = vmatpush.msra.mxu1 %v3518_v41  ;;  %vm2718_vm10 = vmor %vm2716_vm9, %vm2717_vm8  ;;  %v2735_v18 = vadd.f32 %v7677_v29, %v2734_v50  ;;  %v3337_v23 = vld [vmem:[#allocation21 + $0x30] sm:$0xff]  ;;  %v3334_v41 = vld [vmem:[#allocation21 + $0x18] sm:$0xff] }
 0x3fb   :  { %v2713_v49 = vsub.f32 1.0, %v2712_v7  ;;  %3367 = vmatpush.msrb.mxu2 %v3353_v15  ;;  %3387 = vmatpush.msra.mxu3 %v3354_v48  ;;  %v3335_v48 = vld [vmem:[#allocation21 + $0x20] sm:$0xff]  ;;  %v3336_v7 = vld [vmem:[#allocation21 + $0x28] sm:$0xff] }
 0x3fc   :  { %3466 = vmatpush.msra.mxu0 %v3414_v0  ;;  %3530 = vmatpush.msra.mxu1 %v3516_v35  ;;  %v2739_v33 = vsel %vm7698_vm14, %v7677_v29, %v2735_v18  ;;  %v3405_v0 = vld [vmem:[#allocation22 + $0x10] sm:$0xff]  ;;  %v3511_v55 = vld [vmem:[#allocation9 + $0x88] sm:$0xff] }
 0x3fd   :  { %v2714_v3 = vmul.f32 %v6059_v24, %v2713_v49  ;;  %3368 = vmatpush.msrb.mxu2 %v3351_v20  ;;  %3388 = vmatpush.msra.mxu3 %v3352_v4  ;;  %v2744_v15 = vsel %vm2741_vm15, %v2743_v51, %v2739_v33  ;;  %v3333_v29 = vld [vmem:[#allocation21 + $0x10] sm:$0xff]  ;;  %v3404_v4 = vld [vmem:[#allocation22 + $0x8] sm:$0xff]  ;;  %v3331_v49 = vld [vmem:[#allocation21] sm:$0xff] }
 0x3fe   :  { %3467 = vmatpush.msra.mxu0 %v3413_v34  ;;  %v2772_v8 = vsub.f32 1.0, %v2744_v15  ;;  %v3332_v34 = vld [vmem:[#allocation21 + $0x8] sm:$0xff]  ;;  %v2774_v31 = vmul.f32 %v2744_v15, %v7580_v54  ;;  %v3505_v51 = vld [vmem:[#allocation9 + $0x58] sm:$0xff]  ;;  %v3570_v15 = vld [vmem:[#allocation10 + $0x20] sm:$0xff] }
 0x3ff   :  { %v2715_v10 = vadd.f32 %v6059_v24, %v2714_v3  ;;  %3369 = vmatpush.msrb.mxu2 %v3349_v13  ;;  %3389 = vmatpush.msra.mxu3 %v3350_v45  ;;  %v3403_v13 = vld [vmem:[#allocation22] sm:$0xff]  ;;  %v3581_v3 = vld [vmem:[#allocation10 + $0x78] sm:$0xff]  ;;  %v3512_v18 = vld [vmem:[#allocation9 + $0x90] sm:$0xff] }
 0x400   :  { %3468 = vmatpush.msra.mxu0 %v3412_v58  ;;  %v3523_v54 = vld [vmem:[#allocation9 + $0xe8] sm:$0xff]  ;;  %v3580_v58 = vld [vmem:[#allocation10 + $0x70] sm:$0xff] }
 0x401   :  { %v2719_v59 = vsel %vm2718_vm10, %v6059_v24, %v2715_v10  ;;  %3370 = vmatpush.msrb.mxu2 %v3347_v22  ;;  %3390 = vmatpush.msra.mxu3 %v3348_v57  ;;  %v3406_v24 = vld [vmem:[#allocation22 + $0x18] sm:$0xff]  ;;  %v3694_v50 = vld [vmem:[#allocation13 + $0x150] sm:$0xff]  ;;  %v3579_v22 = vld [vmem:[#allocation10 + $0x68] sm:$0xff] }
 0x402   :  { %v2724_v1 = vsel %vm2721_vm11, %v2723_v53, %v2719_v59  ;;  %3469 = vmatpush.msra.mxu0 %v3411_v11  ;;  %v3691_v57 = vld [vmem:[#allocation13 + $0x138] sm:$0xff]  ;;  %v3688_v11 = vld [vmem:[#allocation13 + $0x120] sm:$0xff]  ;;  %v3576_v59 = vld [vmem:[#allocation10 + $0x50] sm:$0xff] }
 0x403   :  { %v2769_v42 = vmul.f32 %v2767_v27, %v2724_v1  ;;  %3371 = vmatpush.msrb.mxu2 %v3345_v32  ;;  %3391 = vmatpush.msra.mxu3 %v3346_v56  ;;  %v3578_v10 = vld [vmem:[#allocation10 + $0x60] sm:$0xff]  ;;  %v3577_v53 = vld [vmem:[#allocation10 + $0x58] sm:$0xff]  ;;  %v3685_v32 = vld [vmem:[#allocation13 + $0x108] sm:$0xff] }
 0x404   :  { %3470 = vmatpush.msra.mxu0 %v3410_v6  ;;  %v3514_v56 = vld [vmem:[#allocation9 + $0xa0] sm:$0xff]  ;;  %v3515_v27 = vld [vmem:[#allocation9 + $0xa8] sm:$0xff]  ;;  %v3682_v6 = vld [vmem:[#allocation13 + $0xf0] sm:$0xff] }
 0x405   :  { %3372 = vmatpush.msrb.mxu2 %v3343_v14  ;;  %3392 = vmatpush.msra.mxu3 %v3344_v38  ;;  %v2770_v47 = vadd.f32 %v2769_v42, %v2615_v61  ;;  %v3513_v1 = vld [vmem:[#allocation9 + $0x98] sm:$0xff]  ;;  %v3575_v14 = vld [vmem:[#allocation10 + $0x48] sm:$0xff]  ;;  %v3510_v61 = vld [vmem:[#allocation9 + $0x80] sm:$0xff] }
 0x406   :  { %3471 = vmatpush.msra.mxu0 %v3409_v16  ;;  %3531 = vmatpush.msra.mxu1 %v3514_v56  ;;  %v3679_v38 = vld [vmem:[#allocation13 + $0xd8] sm:$0xff]  ;;  %v3676_v16 = vld [vmem:[#allocation13 + $0xc0] sm:$0xff]  ;;  %v3673_v43 = vld [vmem:[#allocation13 + $0xa8] sm:$0xff] }
 0x407   :  { %3373 = vmatpush.msrb.mxu2 %v3341_v52  ;;  %3393 = vmatpush.msra.mxu3 %v3342_v25  ;;  %6060 = vtanh.f32 %v2770_v47  ;;  %v3574_v42 = vld [vmem:[#allocation10 + $0x40] sm:$0xff]  ;;  %v3509_v52 = vld [vmem:[#allocation9 + $0x78] sm:$0xff]  ;;  %v3507_v47 = vld [vmem:[#allocation9 + $0x68] sm:$0xff] }
 0x408   :  { %3472 = vmatpush.msra.mxu0 %v3408_v44  ;;  %3532 = vmatpush.msra.mxu1 %v3512_v18  ;;  %v3573_v25 = vld [vmem:[#allocation10 + $0x38] sm:$0xff]  ;;  %v3506_v44 = vld [vmem:[#allocation9 + $0x60] sm:$0xff]  ;;  %v3504_v33 = vld [vmem:[#allocation9 + $0x50] sm:$0xff] }
 0x409   :  { %3374 = vmatpush.msrb.mxu2 %v3339_v62  ;;  %3394 = vmatpush.msra.mxu3 %v3340_v63  ;;  %v3572_v62 = vld [vmem:[#allocation10 + $0x30] sm:$0xff]  ;;  %v3796_v56 = vld [vmem:[#allocation15 + $0xd8] sm:$0xff] }
 0x40a   :  { %3473 = vmatpush.msra.mxu0 %v3407_v26  ;;  %3533 = vmatpush.msra.mxu1 %v3510_v61  ;;  %v3670_v63 = vld [vmem:[#allocation13 + $0x90] sm:$0xff]  ;;  %v3571_v26 = vld [vmem:[#allocation10 + $0x28] sm:$0xff]  ;;  %v377_v61 = vadd.f32 %v7207_v12, %v8711_v40 }
 0x40b   :  { %3375 = vmatpush.msrb.mxu2 %v3337_v23  ;;  %3395 = vmatpush.msra.mxu3 %v3338_v2  ;;  %v3667_v23 = vld [vmem:[#allocation13 + $0x78] sm:$0xff]  ;;  %v3794_v18 = vld [vmem:[#allocation15 + $0xc8] sm:$0xff] }
 0x40c   :  { %3474 = vmatpush.msra.mxu0 %v3406_v24  ;;  %3534 = vmatpush.msra.mxu1 %v3508_v9  ;;  %v3502_v2 = vld [vmem:[#allocation9 + $0x40] sm:$0xff]  ;;  %v3503_v24 = vld [vmem:[#allocation9 + $0x48] sm:$0xff] }
 0x40d   :  { %v6061_v20 = vpop.eup %6060  ;;  %3376 = vmatpush.msrb.mxu2 %v3335_v48  ;;  %3396 = vmatpush.msra.mxu3 %v3336_v7  ;;  %v3664_v48 = vld [vmem:[#allocation13 + $0x60] sm:$0xff]  ;;  %v3500_v7 = vld [vmem:[#allocation9 + $0x30] sm:$0xff] }
 0x40e   :  { %3475 = vmatpush.msra.mxu0 %v3405_v0  ;;  %v2773_v35 = vmul.f32 %v6061_v20, %v2772_v8  ;;  %3535 = vmatpush.msra.mxu1 %v3506_v44  ;;  %v3501_v0 = vld [vmem:[#allocation9 + $0x38] sm:$0xff]  ;;  %v3498_v8 = vld [vmem:[#allocation9 + $0x20] sm:$0xff]  ;;  %v3499_v20 = vld [vmem:[#allocation9 + $0x28] sm:$0xff] }
 0x40f   :  { %3377 = vmatpush.msrb.mxu2 %v3333_v29  ;;  %3397 = vmatpush.msra.mxu3 %v3334_v41  ;;  %v3569_v29 = vld [vmem:[#allocation10 + $0x18] sm:$0xff]  ;;  %v3661_v41 = vld [vmem:[#allocation13 + $0x48] sm:$0xff] }
 0x410   :  { %3476 = vmatpush.msra.mxu0 %v3404_v4  ;;  %v7706_v45 = vadd.f32 %v2774_v31, %v2773_v35  ;;  %3536 = vmatpush.msra.mxu1 %v3504_v33  ;;  %v3568_v4 = vld [vmem:[#allocation10 + $0x10] sm:$0xff]  ;;  %v3497_v35 = vld [vmem:[#allocation9 + $0x18] sm:$0xff]  ;;  %v3567_v31 = vld [vmem:[#allocation10 + $0x8] sm:$0xff] }
 0x411   :  { %3378 = vmatpush.msrb.mxu2 %v3331_v49  ;;  %3398 = vmatpush.msra.mxu3 %v3332_v34  ;;  %v3658_v49 = vld [vmem:[#allocation13 + $0x30] sm:$0xff] }
 0x412   :  { %3477 = vmatpush.msra.mxu0 %v3403_v13  ;;  %2776 = vst [vmem:[#allocation3 + $0x2] sm:$0x1] %v7706_v45  ;;  %3379 = vmatmul.f32.vlgmr.msrb.gmra.mxu2 %v7706_v45  ;;  %v3496_v34 = vld [vmem:[#allocation9 + $0x10] sm:$0xff]  ;;  %v3655_v13 = vld [vmem:[#allocation13 + $0x18] sm:$0xff] }
 0x413   :  { %3399 = vmatmul.f32.vlgmr.msra.gmra.mxu3 %v7706_v45  ;;  %3478 = vmatmul.f32.vlgmr.msra.gmra.mxu0 %v7706_v45  ;;  %v7719_v44 = vld [vmem:[%s8571_s9] sm:$0x7] }
 0x414   :  { %3546 = vmatpush.msra.mxu2 %v3525_v28  ;;  %3625 = vmatpush.msrb.mxu3 %v3581_v3  ;;  %v3494_v28 = vld [vmem:[#allocation9] sm:$0xff]  ;;  %v3495_v3 = vld [vmem:[#allocation9 + $0x8] sm:$0xff]  ;;  %v3787_v33 = vld [vmem:[#allocation15 + $0x90] sm:$0xff] }
 0x415   :  { %3708 = vmatpush.msrb.mxu0 %v3697_v21  ;;  %3537 = vmatpush.msra.mxu1 %v3502_v2  ;;  %v3566_v21 = vld [vmem:[#allocation10] sm:$0xff] }
 0x416   :  { %3547 = vmatpush.msra.mxu2 %v3523_v54  ;;  %3626 = vmatpush.msrb.mxu3 %v3580_v58  ;;  %v3652_v54 = vld [vmem:[#allocation13] sm:$0xff]  ;;  %v3698_v58 = vld [vmem:[#allocation13 + $0x170] sm:$0xff]  ;;  %v3788_v2 = vld [vmem:[#allocation15 + $0x98] sm:$0xff] }
 0x417   :  { %3709 = vmatpush.msrb.mxu0 %v3694_v50  ;;  %3538 = vmatpush.msra.mxu1 %v3500_v7  ;;  %v3699_v50 = vld [vmem:[#allocation13 + $0x178] sm:$0xff]  ;;  %v3785_v7 = vld [vmem:[#allocation15 + $0x80] sm:$0xff] }
 0x418   :  { %3548 = vmatpush.msra.mxu2 %v3521_v46  ;;  %3627 = vmatpush.msrb.mxu3 %v3579_v22  ;;  %v3799_v46 = vld [vmem:[#allocation15 + $0xf0] sm:$0xff]  ;;  %v3800_v22 = vld [vmem:[#allocation15 + $0xf8] sm:$0xff] }
 0x419   :  { %3710 = vmatpush.msrb.mxu0 %v3691_v57  ;;  %3539 = vmatpush.msra.mxu1 %v3498_v8  ;;  %v3695_v57 = vld [vmem:[#allocation13 + $0x158] sm:$0xff] }
 0x41a   :  { %3549 = vmatpush.msra.mxu2 %v3519_v36  ;;  %3628 = vmatpush.msrb.mxu3 %v3578_v10  ;;  %v3696_v36 = vld [vmem:[#allocation13 + $0x160] sm:$0xff]  ;;  %v3675_v8 = vld [vmem:[#allocation13 + $0xb8] sm:$0xff] }
 0x41b   :  { %3711 = vmatpush.msrb.mxu0 %v3688_v11  ;;  %3540 = vmatpush.msra.mxu1 %v3496_v34  ;;  %v3797_v10 = vld [vmem:[#allocation15 + $0xe0] sm:$0xff]  ;;  %v3798_v11 = vld [vmem:[#allocation15 + $0xe8] sm:$0xff]  ;;  %v3671_v34 = vld [vmem:[#allocation13 + $0x98] sm:$0xff] }
 0x41c   :  { %3550 = vmatpush.msra.mxu2 %v3517_v30  ;;  %3629 = vmatpush.msrb.mxu3 %v3577_v53  ;;  %v3692_v30 = vld [vmem:[#allocation13 + $0x140] sm:$0xff]  ;;  %v3693_v53 = vld [vmem:[#allocation13 + $0x148] sm:$0xff] }
 0x41d   :  { %3712 = vmatpush.msrb.mxu0 %v3685_v32  ;;  %3541 = vmatpush.msra.mxu1 %v3494_v28  ;;  %v3795_v32 = vld [vmem:[#allocation15 + $0xd0] sm:$0xff] }
 0x41e   :  { %3551 = vmatpush.msra.mxu2 %v3515_v27  ;;  %3630 = vmatpush.msrb.mxu3 %v3576_v59  ;;  %v3689_v27 = vld [vmem:[#allocation13 + $0x128] sm:$0xff]  ;;  %v3690_v59 = vld [vmem:[#allocation13 + $0x130] sm:$0xff] }
 0x41f   :  { %3713 = vmatpush.msrb.mxu0 %v3682_v6  ;;  %3728 = vmatpush.msrb.mxu1 %v3698_v58  ;;  %v3793_v6 = vld [vmem:[#allocation15 + $0xc0] sm:$0xff]  ;;  %v3779_v58 = vld [vmem:[#allocation15 + $0x50] sm:$0xff] }
 0x420   :  { %3552 = vmatpush.msra.mxu2 %v3513_v1  ;;  %3631 = vmatpush.msrb.mxu3 %v3575_v14  ;;  %v3686_v1 = vld [vmem:[#allocation13 + $0x110] sm:$0xff]  ;;  %v3687_v14 = vld [vmem:[#allocation13 + $0x118] sm:$0xff] }
 0x421   :  { %3714 = vmatpush.msrb.mxu0 %v3679_v38  ;;  %3729 = vmatpush.msrb.mxu1 %v3695_v57  ;;  %v3791_v38 = vld [vmem:[#allocation15 + $0xb0] sm:$0xff]  ;;  %v3780_v57 = vld [vmem:[#allocation15 + $0x58] sm:$0xff] }
 0x422   :  { %3553 = vmatpush.msra.mxu2 %v3511_v55  ;;  %3632 = vmatpush.msrb.mxu3 %v3574_v42  ;;  %v418_v55 = vadd.f32 %v7153_v17, %v8713_v19  ;;  %v3792_v42 = vld [vmem:[#allocation15 + $0xb8] sm:$0xff]  ;;  %v3790_v17 = vld [vmem:[#allocation15 + $0xa8] sm:$0xff] }
 0x423   :  { %3715 = vmatpush.msrb.mxu0 %v3676_v16  ;;  %3730 = vmatpush.msrb.mxu1 %v3692_v30 }
 0x424   :  { %3554 = vmatpush.msra.mxu2 %v3509_v52  ;;  %3633 = vmatpush.msrb.mxu3 %v3573_v25  ;;  %v3683_v52 = vld [vmem:[#allocation13 + $0xf8] sm:$0xff]  ;;  %v3684_v25 = vld [vmem:[#allocation13 + $0x100] sm:$0xff] }
 0x425   :  { %3716 = vmatpush.msrb.mxu0 %v3673_v43  ;;  %3731 = vmatpush.msrb.mxu1 %v3689_v27  ;;  %v3789_v43 = vld [vmem:[#allocation15 + $0xa0] sm:$0xff] }
 0x426   :  { %3555 = vmatpush.msra.mxu2 %v3507_v47  ;;  %3634 = vmatpush.msrb.mxu3 %v3572_v62  ;;  %v3680_v62 = vld [vmem:[#allocation13 + $0xe0] sm:$0xff] }
 0x427   :  { %3717 = vmatpush.msrb.mxu0 %v3670_v63  ;;  %3732 = vmatpush.msrb.mxu1 %v3686_v1  ;;  %v3681_v63 = vld [vmem:[#allocation13 + $0xe8] sm:$0xff]  ;;  %v3663_v1 = vld [vmem:[#allocation13 + $0x58] sm:$0xff] }
 0x428   :  { %3556 = vmatpush.msra.mxu2 %v3505_v51  ;;  %3635 = vmatpush.msrb.mxu3 %v3571_v26 }
 0x429   :  { %3718 = vmatpush.msrb.mxu0 %v3667_v23  ;;  %3733 = vmatpush.msrb.mxu1 %v3683_v52  ;;  %v3774_v52 = vld [vmem:[#allocation15 + $0x28] sm:$0xff] }
 0x42a   :  { %3557 = vmatpush.msra.mxu2 %v3503_v24  ;;  %3636 = vmatpush.msrb.mxu3 %v3570_v15  ;;  %v3677_v15 = vld [vmem:[#allocation13 + $0xc8] sm:$0xff] }
 0x42b   :  { %3719 = vmatpush.msrb.mxu0 %v3664_v48  ;;  %3734 = vmatpush.msrb.mxu1 %v3680_v62  ;;  %v3678_v48 = vld [vmem:[#allocation13 + $0xd0] sm:$0xff]  ;;  %v3653_v62 = vld [vmem:[#allocation13 + $0x8] sm:$0xff] }
 0x42c   :  { %3558 = vmatpush.msra.mxu2 %v3501_v0  ;;  %3637 = vmatpush.msrb.mxu3 %v3569_v29  ;;  %v3786_v0 = vld [vmem:[#allocation15 + $0x88] sm:$0xff]  ;;  %v2989_v29 = vperm.slane %v7719_v44, 0 }
 0x42d   :  { %3720 = vmatpush.msrb.mxu0 %v3661_v41  ;;  %3735 = vmatpush.msrb.mxu1 %v3677_v15  ;;  %v3674_v41 = vld [vmem:[#allocation13 + $0xb0] sm:$0xff] }
 0x42e   :  { %3559 = vmatpush.msra.mxu2 %v3499_v20  ;;  %3638 = vmatpush.msrb.mxu3 %v3568_v4  ;;  %v2990_v20 = vperm.slane %v7719_v44, 1  ;;  %v3783_v4 = vld [vmem:[#allocation15 + $0x70] sm:$0xff] }
 0x42f   :  { %3721 = vmatpush.msrb.mxu0 %v3658_v49  ;;  %v3784_v49 = vld [vmem:[#allocation15 + $0x78] sm:$0xff]  ;;  %3736 = vmatpush.msrb.mxu1 %v3674_v41 }
 0x430   :  { %3560 = vmatpush.msra.mxu2 %v3497_v35  ;;  %3639 = vmatpush.msrb.mxu3 %v3567_v31  ;;  %v3672_v35 = vld [vmem:[#allocation13 + $0xa0] sm:$0xff]  ;;  %v5928_v41 = vld [vmem:[#allocation12] ss:$0 sm:$0xff] }
 0x431   :  { %3722 = vmatpush.msrb.mxu0 %v3655_v13  ;;  %v3781_v31 = vld [vmem:[#allocation15 + $0x60] sm:$0xff]  ;;  %v3782_v13 = vld [vmem:[#allocation15 + $0x68] sm:$0xff]  ;;  %3737 = vmatpush.msrb.mxu1 %v3671_v34 }
 0x432   :  { %3561 = vmatpush.msra.mxu2 %v3495_v3  ;;  %3640 = vmatpush.msrb.mxu3 %v3566_v21  ;;  %v3668_v21 = vld [vmem:[#allocation13 + $0x80] sm:$0xff] }
 0x433   :  { %3723 = vmatpush.msrb.mxu0 %v3652_v54  ;;  %v3669_v54 = vld [vmem:[#allocation13 + $0x88] sm:$0xff]  ;;  %3738 = vmatpush.msrb.mxu1 %v3668_v21 }
 0x434   :  { %3748 = vmatpush.msrb.mxu2 %v3699_v50  ;;  %3801 = vmatpush.msra.mxu3 %v3799_v46 }
 0x435   :  { %3821 = vmatpush.msra.mxu0 %v3800_v22 }
 0x436   :  { %3749 = vmatpush.msrb.mxu2 %v3696_v36  ;;  %3802 = vmatpush.msra.mxu3 %v3797_v10 }
 0x437   :  { %3822 = vmatpush.msra.mxu0 %v3798_v11 }
 0x438   :  { %3750 = vmatpush.msrb.mxu2 %v3693_v53  ;;  %3803 = vmatpush.msra.mxu3 %v3795_v32  ;;  %v3665_v53 = vld [vmem:[#allocation13 + $0x68] sm:$0xff]  ;;  %v3666_v32 = vld [vmem:[#allocation13 + $0x70] sm:$0xff] }
 0x439   :  { %3823 = vmatpush.msra.mxu0 %v3796_v56  ;;  %v3777_v56 = vld [vmem:[#allocation15 + $0x40] sm:$0xff]  ;;  %3739 = vmatpush.msrb.mxu1 %v3665_v53 }
 0x43a   :  { %3751 = vmatpush.msrb.mxu2 %v3690_v59  ;;  %3804 = vmatpush.msra.mxu3 %v3793_v6  ;;  %v3778_v6 = vld [vmem:[#allocation15 + $0x48] sm:$0xff] }
 0x43b   :  { %3824 = vmatpush.msra.mxu0 %v3794_v18  ;;  %v3662_v18 = vld [vmem:[#allocation13 + $0x50] sm:$0xff] }
 0x43c   :  { %3752 = vmatpush.msrb.mxu2 %v3687_v14  ;;  %3805 = vmatpush.msra.mxu3 %v3791_v38  ;;  %v3775_v14 = vld [vmem:[#allocation15 + $0x30] sm:$0xff]  ;;  %v3776_v38 = vld [vmem:[#allocation15 + $0x38] sm:$0xff] }
 0x43d   :  { %3825 = vmatpush.msra.mxu0 %v3792_v42  ;;  %3740 = vmatpush.msrb.mxu1 %v3662_v18  ;;  %v3659_v42 = vld [vmem:[#allocation13 + $0x38] sm:$0xff] }
 0x43e   :  { %3753 = vmatpush.msrb.mxu2 %v3684_v25  ;;  %3806 = vmatpush.msra.mxu3 %v3789_v43  ;;  %v3656_v25 = vld [vmem:[#allocation13 + $0x20] sm:$0xff]  ;;  %v3657_v43 = vld [vmem:[#allocation13 + $0x28] sm:$0xff] }
 0x43f   :  { %3826 = vmatpush.msra.mxu0 %v3790_v17  ;;  %3741 = vmatpush.msrb.mxu1 %v3659_v42 }
 0x440   :  { %3754 = vmatpush.msrb.mxu2 %v3681_v63  ;;  %3807 = vmatpush.msra.mxu3 %v3787_v33  ;;  %v3654_v63 = vld [vmem:[#allocation13 + $0x10] sm:$0xff]  ;;  %v3769_v33 = vld [vmem:[#allocation15] sm:$0xff] }
 0x441   :  { %3827 = vmatpush.msra.mxu0 %v3788_v2  ;;  %3742 = vmatpush.msrb.mxu1 %v3656_v25  ;;  %v3770_v2 = vld [vmem:[#allocation15 + $0x8] sm:$0xff] }
 0x442   :  { %3755 = vmatpush.msrb.mxu2 %v3678_v48  ;;  %3808 = vmatpush.msra.mxu3 %v3785_v7 }
 0x443   :  { %3828 = vmatpush.msra.mxu0 %v3786_v0  ;;  %3743 = vmatpush.msrb.mxu1 %v3653_v62 }
 0x444   :  { %3756 = vmatpush.msrb.mxu2 %v3675_v8  ;;  %3809 = vmatpush.msra.mxu3 %v3783_v4 }
 0x445   :  { %3829 = vmatpush.msra.mxu0 %v3784_v49 }
 0x446   :  { %3757 = vmatpush.msrb.mxu2 %v3672_v35  ;;  %3810 = vmatpush.msra.mxu3 %v3781_v31 }
 0x447   :  { %3830 = vmatpush.msra.mxu0 %v3782_v13 }
 0x448   :  { %3758 = vmatpush.msrb.mxu2 %v3669_v54  ;;  %3811 = vmatpush.msra.mxu3 %v3779_v58  ;;  %v459_v54 = vadd.f32 %v7157_v39, %v7047_v5 }
 0x449   :  { %3831 = vmatpush.msra.mxu0 %v3780_v57 }
 0x44a   :  { %3759 = vmatpush.msrb.mxu2 %v3666_v32  ;;  %3812 = vmatpush.msra.mxu3 %v3777_v56 }
 0x44b   :  { %v7721_v51 = vpop.f32.mrf.mxu0  ;;  %v3012_v24 = vpop.f32.mrf.mxu1  ;;  %3832 = vmatpush.msra.mxu0 %v3778_v6 }
 0x44c   :  { %v3013_v28 = vadd.f32 %v3012_v24, %v2989_v29  ;;  %3760 = vmatpush.msrb.mxu2 %v3663_v1  ;;  %3813 = vmatpush.msra.mxu3 %v3775_v14  ;;  %v2930_v13 = vadd.f32 %v5928_v41, %v7721_v51  ;;  %v3970_v41 = vld [vmem:[#allocation19 + $0x158] sm:$0xff] }
 0x44d   :  { %3833 = vmatpush.msra.mxu0 %v3776_v38  ;;  %v2991_v38 = vperm.slane %v7719_v44, 2 }
 0x44f   :  { %3834 = vmatpush.msra.mxu0 %v3774_v52 }
 0x450   :  { %v2830_v16 = vpop.f32.mrf.mxu2  ;;  %v2850_v9 = vpop.f32.mrf.mxu3 }
 0x451   :  { %v2869_v47 = vadd.f32 %v2830_v16, %v377_v61  ;;  %v2889_v12 = vadd.f32 %v2850_v9, %v418_v55  ;;  %v3660_v16 = vld [vmem:[#allocation13 + $0x40] sm:$0xff] }
 0x452   :  { %v3773_v9 = vld [vmem:[#allocation15 + $0x20] sm:$0xff]  ;;  %3761 = vmatpush.msrb.mxu2 %v3660_v16 }
 0x453   :  { %v5874_v26 = vmul.f32 -1.442695, %v2869_v47  ;;  %v5875_v23 = vmul.f32 -1.442695, %v2889_v12  ;;  %3814 = vmatpush.msra.mxu3 %v3773_v9  ;;  %v3771_v47 = vld [vmem:[#allocation15 + $0x10] sm:$0xff]  ;;  %v3772_v12 = vld [vmem:[#allocation15 + $0x18] sm:$0xff] }
 0x454   :  { %3762 = vmatpush.msrb.mxu2 %v3657_v43  ;;  %3835 = vmatpush.msra.mxu0 %v3772_v12 }
 0x455   :  { %6062 = vpow2.f32 %v5874_v26  ;;  %3815 = vmatpush.msra.mxu3 %v3771_v47 }
 0x456   :  { %6064 = vpow2.f32 %v5875_v23  ;;  %3763 = vmatpush.msrb.mxu2 %v3654_v63  ;;  %3836 = vmatpush.msra.mxu0 %v3770_v2 }
 0x457   :  { %3816 = vmatpush.msra.mxu3 %v3769_v33 }
 0x45a   :  { %v3032_v3 = vpop.f32.mrf.mxu2  ;;  %v3052_v42 = vpop.f32.mrf.mxu3 }
 0x45b   :  { %v6063_v50 = vpop.eup %6062  ;;  %v3033_v46 = vadd.f32 %v3032_v3, %v2990_v20  ;;  %v3105_v22 = vpop.f32.mrf.mxu0  ;;  %v3053_v44 = vadd.f32 %v3052_v42, %v2991_v38  ;;  %v3848_v38 = vld [vmem:[#allocation16 + $0x38] sm:$0xff] }
 0x45c   :  { %v6065_v36 = vpop.eup %6064  ;;  %v7725_v10 = vadd.f32 1.0, %v6063_v50  ;;  %v3144_v11 = vadd.f32 %v3105_v22, %v3013_v28  ;;  %v3125_v30 = vpop.f32.mrf.mxu1  ;;  %v3949_v42 = vld [vmem:[#allocation19 + $0xb0] sm:$0xff] }
 0x45d   :  { %v7727_v27 = vadd.f32 1.0, %v6065_v36  ;;  %v3164_v59 = vadd.f32 %v3125_v30, %v3033_v46 }
 0x45e   :  { %6066 = vrcp.f32 %v7725_v10  ;;  %v5876_v61 = vmul.f32 -1.442695, %v3144_v11  ;;  %v2885_v7 = vand.u32 2147483648, %v7725_v10  ;;  %v2883_v20 = vand.u32 2147483647, %v7725_v10 }
 0x45f   :  { %6068 = vrcp.f32 %v7727_v27  ;;  %v5877_v55 = vmul.f32 -1.442695, %v3164_v59  ;;  %vm2879_vm1 = vweird.f32 %v7725_v10  ;;  %v2905_v50 = vand.u32 2147483648, %v7727_v27 }
 0x460   :  { %6070 = vpow2.f32 %v5876_v61  ;;  %v2886_v31 = vor.u32 1.1754944e-38, %v2885_v7  ;;  %vm2884_vm3 = vcmp.eq.f32.partialorder %v2883_v20, 8.507059e+37  ;;  %vm2899_vm5 = vweird.f32 %v7727_v27  ;;  %v3855_v7 = vld [vmem:[#allocation16 + $0x70] sm:$0xff]  ;;  %v3854_v20 = vld [vmem:[#allocation16 + $0x68] sm:$0xff] }
 0x461   :  { %6072 = vpow2.f32 %v5877_v55  ;;  %v2903_v46 = vand.u32 2147483647, %v7727_v27  ;;  %v2906_v11 = vor.u32 1.1754944e-38, %v2905_v50  ;;  %v3960_v50 = vld [vmem:[#allocation19 + $0x108] sm:$0xff] }
 0x463   :  { %vm2904_vm7 = vcmp.eq.f32.partialorder %v2903_v46, 8.507059e+37 }
 0x464   :  { %v6067_v17 = vpop.eup %6066 }
 0x465   :  { %v6069_v26 = vpop.eup %6068  ;;  %v2875_v23 = vmul.f32 %v6067_v17, %v7725_v10  ;;  %vm2880_vm0 = vweird.f32 %v6067_v17 }
 0x466   :  { %v2895_v24 = vmul.f32 %v6069_v26, %v7727_v27  ;;  %v6071_v48 = vpop.eup %6070  ;;  %vm2881_vm2 = vmor %vm2879_vm1, %vm2880_vm0  ;;  %vm2900_vm4 = vweird.f32 %v6069_v26  ;;  %v5929_v27 = vld [vmem:[#allocation18] ss:$0 sm:$0xff] }
 0x467   :  { %v2876_v15 = vsub.f32 1.0, %v2875_v23  ;;  %v6073_v29 = vpop.eup %6072  ;;  %v3148_v4 = vadd.f32 1.0, %v6071_v48  ;;  %vm2901_vm6 = vmor %vm2899_vm5, %vm2900_vm4  ;;  %v3972_v23 = vld [vmem:[#allocation19 + $0x168] sm:$0xff] }
 0x468   :  { %v2896_v0 = vsub.f32 1.0, %v2895_v24  ;;  %v7735_v34 = vadd.f32 1.0, %v6073_v29  ;;  %v3973_v24 = vld [vmem:[#allocation19 + $0x170] sm:$0xff] }
 0x469   :  { %v2877_v8 = vmul.f32 %v6067_v17, %v2876_v15  ;;  %6074 = vrcp.f32 %v3148_v4  ;;  %v3158_v56 = vand.u32 2147483647, %v3148_v4  ;;  %v3160_v59 = vand.u32 2147483648, %v3148_v4  ;;  %v3974_v15 = vld [vmem:[#allocation19 + $0x178] sm:$0xff] }
 0x46a   :  { %v2897_v49 = vmul.f32 %v6069_v26, %v2896_v0  ;;  %6076 = vrcp.f32 %v7735_v34  ;;  %vm3154_vm9 = vweird.f32 %v3148_v4  ;;  %v3180_v62 = vand.u32 2147483648, %v7735_v34  ;;  %v3969_v0 = vld [vmem:[#allocation19 + $0x150] sm:$0xff] }
 0x46b   :  { %v2878_v35 = vadd.f32 %v6067_v17, %v2877_v8  ;;  %vm3159_vm11 = vcmp.eq.f32.partialorder %v3158_v56, 8.507059e+37  ;;  %v3161_v16 = vor.u32 1.1754944e-38, %v3160_v59  ;;  %vm3174_vm13 = vweird.f32 %v7735_v34  ;;  %v3971_v8 = vld [vmem:[#allocation19 + $0x160] sm:$0xff]  ;;  %v3956_v56 = vld [vmem:[#allocation19 + $0xe8] sm:$0xff] }
 0x46c   :  { %v2898_v21 = vadd.f32 %v6069_v26, %v2897_v49  ;;  %v3178_v33 = vand.u32 2147483647, %v7735_v34  ;;  %v3181_v29 = vor.u32 1.1754944e-38, %v3180_v62  ;;  %v3849_v59 = vld [vmem:[#allocation16 + $0x40] sm:$0xff] }
 0x46d   :  { %v2882_v28 = vsel %vm2881_vm2, %v6067_v17, %v2878_v35  ;;  %v3968_v35 = vld [vmem:[#allocation19 + $0x148] sm:$0xff]  ;;  %v3942_v62 = vld [vmem:[#allocation19 + $0x78] sm:$0xff] }
 0x46e   :  { %v2887_v3 = vsel %vm2884_vm3, %v2886_v31, %v2882_v28  ;;  %v2902_v51 = vsel %vm2901_vm6, %v6069_v26, %v2898_v21  ;;  %v3856_v26 = vld [vmem:[#allocation16 + $0x78] sm:$0xff]  ;;  %vm3179_vm15 = vcmp.eq.f32.partialorder %v3178_v33, 8.507059e+37  ;;  %v3853_v31 = vld [vmem:[#allocation16 + $0x60] sm:$0xff]  ;;  %v3964_v28 = vld [vmem:[#allocation19 + $0x128] sm:$0xff] }
 0x46f   :  { %v2932_v58 = vmul.f32 %v2930_v13, %v2887_v3  ;;  %v6075_v22 = vpop.eup %6074  ;;  %v2907_v53 = vsel %vm2904_vm7, %v2906_v11, %v2902_v51  ;;  %v3963_v13 = vld [vmem:[#allocation19 + $0x120] sm:$0xff]  ;;  %v3965_v3 = vld [vmem:[#allocation19 + $0x130] sm:$0xff] }
 0x470   :  { %v7745_v36 = vpop.eup %6076  ;;  %v3150_v10 = vmul.f32 %v6075_v22, %v3148_v4  ;;  %vm3155_vm8 = vweird.f32 %v6075_v22  ;;  %v2935_v14 = vsub.f32 1.0, %v2907_v53  ;;  %v2937_v52 = vmul.f32 %v2907_v53, %v7632_v60  ;;  %v3966_v4 = vld [vmem:[#allocation19 + $0x138] sm:$0xff]  ;;  %v3957_v11 = vld [vmem:[#allocation19 + $0xf0] sm:$0xff]  ;;  %v3943_v33 = vld [vmem:[#allocation19 + $0x80] sm:$0xff] }
 0x471   :  { %v2933_v57 = vadd.f32 %v2932_v58, %v459_v54  ;;  %v3170_v30 = vmul.f32 %v7745_v36, %v7735_v34  ;;  %vm3156_vm10 = vmor %vm3154_vm9, %vm3155_vm8  ;;  %vm3175_vm12 = vweird.f32 %v7745_v36  ;;  %v3967_v34 = vld [vmem:[#allocation19 + $0x140] sm:$0xff]  ;;  %v3852_v58 = vld [vmem:[#allocation16 + $0x58] sm:$0xff] }
 0x472   :  { %v3151_v39 = vsub.f32 1.0, %v3150_v10  ;;  %vm7759_vm14 = vmor %vm3174_vm13, %vm3175_vm12  ;;  %v3851_v10 = vld [vmem:[#allocation16 + $0x50] sm:$0xff]  ;;  %v3954_v53 = vld [vmem:[#allocation19 + $0xd8] sm:$0xff] }
 0x473   :  { %6078 = vtanh.f32 %v2933_v57  ;;  %v3171_v32 = vsub.f32 1.0, %v3170_v30  ;;  %v3961_v57 = vld [vmem:[#allocation19 + $0x110] sm:$0xff]  ;;  %v3958_v30 = vld [vmem:[#allocation19 + $0xf8] sm:$0xff] }
 0x474   :  { %v3152_v6 = vmul.f32 %v6075_v22, %v3151_v39  ;;  %v3204_v1 = vpop.f32.mrf.mxu2  ;;  %v3959_v39 = vld [vmem:[#allocation19 + $0x100] sm:$0xff] }
 0x475   :  { %v3172_v18 = vmul.f32 %v7745_v36, %v3171_v32  ;;  %v3205_v43 = vadd.f32 %v5929_v27, %v3204_v1  ;;  %v3955_v32 = vld [vmem:[#allocation19 + $0xe0] sm:$0xff]  ;;  %v7780_v27 = vld [vmem:[%s8576_s14] sm:$0x7]  ;;  %v3952_v1 = vld [vmem:[#allocation19 + $0xc8] sm:$0xff] }
 0x476   :  { %v3153_v61 = vadd.f32 %v6075_v22, %v3152_v6  ;;  %v3951_v6 = vld [vmem:[#allocation19 + $0xc0] sm:$0xff] }
 0x477   :  { %v3173_v47 = vadd.f32 %v7745_v36, %v3172_v18  ;;  %v3287_v18 = vpop.f32.mrf.mxu3 }
 0x478   :  { %v3157_v25 = vsel %vm3156_vm10, %v6075_v22, %v3153_v61  ;;  %v3948_v61 = vld [vmem:[#allocation19 + $0xa8] sm:$0xff] }
 0x479   :  { %v6079_v55 = vpop.eup %6078  ;;  %v3162_v12 = vsel %vm3159_vm11, %v3161_v16, %v3157_v25  ;;  %v3177_v48 = vsel %vm7759_vm14, %v7745_v36, %v3173_v47  ;;  %v3962_v36 = vld [vmem:[#allocation19 + $0x118] sm:$0xff]  ;;  %v3945_v25 = vld [vmem:[#allocation19 + $0x90] sm:$0xff] }
 0x47a   :  { %v2936_v9 = vmul.f32 %v6079_v55, %v2935_v14  ;;  %v3207_v63 = vmul.f32 %v3205_v43, %v3162_v12  ;;  %v3182_v49 = vsel %vm3179_vm15, %v3181_v29, %v3177_v48  ;;  %v3953_v14 = vld [vmem:[#allocation19 + $0xd0] sm:$0xff]  ;;  %v3264_v55 = vperm.slane %v7780_v27, 0  ;;  %v3950_v16 = vld [vmem:[#allocation19 + $0xb8] sm:$0xff]  ;;  %v3307_v43 = vpop.f32.mrf.mxu0  ;;  %v3947_v12 = vld [vmem:[#allocation19 + $0xa0] sm:$0xff] }
 0x47b   :  { %v3210_v21 = vsub.f32 1.0, %v3182_v49  ;;  %v3212_v22 = vmul.f32 %v3182_v49, %v7662_v37  ;;  %v3850_v37 = vld [vmem:[#allocation16 + $0x48] sm:$0xff]  ;;  %v3946_v47 = vld [vmem:[#allocation19 + $0x98] sm:$0xff] }
 0x47c   :  { %v7754_v17 = vadd.f32 %v2937_v52, %v2936_v9  ;;  %v3208_v2 = vadd.f32 %v3207_v63, %v3053_v44  ;;  %v3265_v9 = vperm.slane %v7780_v27, 1  ;;  %v3847_v52 = vld [vmem:[#allocation16 + $0x30] sm:$0xff]  ;;  %v3846_v44 = vld [vmem:[#allocation16 + $0x28] sm:$0xff]  ;;  %v3288_v63 = vadd.f32 %v3287_v18, %v3264_v55  ;;  %v3938_v49 = vld [vmem:[#allocation19 + $0x58] sm:$0xff] }
 0x47d   :  { %v4070_v18 = vld [vmem:[#allocation21 + $0xd0] sm:$0xff]  ;;  %v4069_v55 = vld [vmem:[#allocation21 + $0xc8] sm:$0xff] }
 0x47e   :  { %3542 = vmatmul.f32.vlgmr.msra.gmra.mxu1 %v7754_v17  ;;  %3562 = vmatmul.f32.vlgmr.msra.gmra.mxu2 %v7754_v17  ;;  %6080 = vtanh.f32 %v3208_v2  ;;  %v3845_v2 = vld [vmem:[#allocation16 + $0x20] sm:$0xff] }
 0x47f   :  { %3641 = vmatmul.f32.vlgmr.msrb.gmra.mxu3 %v7754_v17  ;;  %3724 = vmatmul.f32.vlgmr.msrb.gmra.mxu0 %v7754_v17 }
 0x480   :  { %3900 = vmatpush.msra.mxu1 %v3856_v26  ;;  %3983 = vmatpush.msra.mxu2 %v3972_v23  ;;  %v3944_v26 = vld [vmem:[#allocation19 + $0x88] sm:$0xff]  ;;  %v3308_v23 = vadd.f32 %v3307_v43, %v3265_v9 }
 0x481   :  { %4003 = vmatpush.msrb.mxu3 %v3973_v24  ;;  %4023 = vmatpush.msrb.mxu0 %v3974_v15  ;;  %v3939_v24 = vld [vmem:[#allocation19 + $0x60] sm:$0xff] }
 0x482   :  { %3901 = vmatpush.msra.mxu1 %v3855_v7  ;;  %3984 = vmatpush.msra.mxu2 %v3969_v0  ;;  %v3940_v7 = vld [vmem:[#allocation19 + $0x68] sm:$0xff]  ;;  %v3941_v0 = vld [vmem:[#allocation19 + $0x70] sm:$0xff] }
 0x483   :  { %4004 = vmatpush.msrb.mxu3 %v3970_v41  ;;  %4024 = vmatpush.msrb.mxu0 %v3971_v8  ;;  %v3844_v41 = vld [vmem:[#allocation16 + $0x18] sm:$0xff]  ;;  %v3936_v8 = vld [vmem:[#allocation19 + $0x48] sm:$0xff] }
 0x484   :  { %3902 = vmatpush.msra.mxu1 %v3854_v20  ;;  %3985 = vmatpush.msra.mxu2 %v3966_v4  ;;  %v6081_v54 = vpop.eup %6080  ;;  %v3937_v4 = vld [vmem:[#allocation19 + $0x50] sm:$0xff] }
 0x485   :  { %4005 = vmatpush.msrb.mxu3 %v3967_v34  ;;  %4025 = vmatpush.msrb.mxu0 %v3968_v35  ;;  %v3211_v46 = vmul.f32 %v6081_v54, %v3210_v21  ;;  %v3843_v35 = vld [vmem:[#allocation16 + $0x10] sm:$0xff]  ;;  %v3930_v21 = vld [vmem:[#allocation19 + $0x18] sm:$0xff]  ;;  %v3931_v54 = vld [vmem:[#allocation19 + $0x20] sm:$0xff] }
 0x486   :  { %3903 = vmatpush.msra.mxu1 %v3853_v31  ;;  %3986 = vmatpush.msra.mxu2 %v3963_v13  ;;  %v3933_v31 = vld [vmem:[#allocation19 + $0x30] sm:$0xff]  ;;  %v3934_v13 = vld [vmem:[#allocation19 + $0x38] sm:$0xff] }
 0x487   :  { %4006 = vmatpush.msrb.mxu3 %v3964_v28  ;;  %4026 = vmatpush.msrb.mxu0 %v3965_v3  ;;  %v7773_v51 = vadd.f32 %v3212_v22, %v3211_v46  ;;  %v3935_v28 = vld [vmem:[#allocation19 + $0x40] sm:$0xff]  ;;  %v3928_v22 = vld [vmem:[#allocation19 + $0x8] sm:$0xff] }
 0x488   :  { %3744 = vmatmul.f32.vlgmr.msrb.gmra.mxu1 %v7754_v17  ;;  %3764 = vmatmul.f32.vlgmr.msrb.gmra.mxu2 %v7754_v17  ;;  %v3842_v3 = vld [vmem:[#allocation16 + $0x8] sm:$0xff] }
 0x489   :  { %3904 = vmatpush.msra.mxu1 %v3852_v58  ;;  %3987 = vmatpush.msra.mxu2 %v3960_v50  ;;  %v3932_v58 = vld [vmem:[#allocation19 + $0x28] sm:$0xff]  ;;  %v3841_v50 = vld [vmem:[#allocation16] sm:$0xff] }
 0x48a   :  { %4007 = vmatpush.msrb.mxu3 %v3961_v57  ;;  %4027 = vmatpush.msrb.mxu0 %v3962_v36  ;;  %v3927_v46 = vld [vmem:[#allocation19] sm:$0xff]  ;;  %v3929_v57 = vld [vmem:[#allocation19 + $0x10] sm:$0xff] }
 0x48b   :  { %3817 = vmatmul.f32.vlgmr.msra.gmra.mxu3 %v7773_v51  ;;  %3837 = vmatmul.f32.vlgmr.msra.gmra.mxu0 %v7773_v51 }
 0x48c   :  { %3905 = vmatpush.msra.mxu1 %v3851_v10  ;;  %3988 = vmatpush.msra.mxu2 %v3957_v11 }
 0x48d   :  { %4008 = vmatpush.msrb.mxu3 %v3958_v30  ;;  %4028 = vmatpush.msrb.mxu0 %v3959_v39  ;;  %v4074_v30 = vld [vmem:[#allocation21 + $0xf0] sm:$0xff]  ;;  %v4075_v39 = vld [vmem:[#allocation21 + $0xf8] sm:$0xff] }
 0x48e   :  { %3906 = vmatpush.msra.mxu1 %v3850_v37  ;;  %3989 = vmatpush.msra.mxu2 %v3954_v53  ;;  %v4131_v53 = vld [vmem:[#allocation22 + $0x78] sm:$0xff] }
 0x48f   :  { %4009 = vmatpush.msrb.mxu3 %v3955_v32  ;;  %4029 = vmatpush.msrb.mxu0 %v3956_v56  ;;  %v4072_v32 = vld [vmem:[#allocation21 + $0xe0] sm:$0xff]  ;;  %v4073_v56 = vld [vmem:[#allocation21 + $0xe8] sm:$0xff] }
 0x490   :  { %3907 = vmatpush.msra.mxu1 %v3849_v59  ;;  %3990 = vmatpush.msra.mxu2 %v3951_v6  ;;  %v4130_v59 = vld [vmem:[#allocation22 + $0x70] sm:$0xff] }
 0x491   :  { %4010 = vmatpush.msrb.mxu3 %v3952_v1  ;;  %4030 = vmatpush.msrb.mxu0 %v3953_v14  ;;  %v4237_v6 = vld [vmem:[#allocation9 + $0xf0] sm:$0xff]  ;;  %v4071_v1 = vld [vmem:[#allocation21 + $0xd8] sm:$0xff] }
 0x492   :  { %3908 = vmatpush.msra.mxu1 %v3848_v38  ;;  %3991 = vmatpush.msra.mxu2 %v3948_v61  ;;  %v4129_v14 = vld [vmem:[#allocation22 + $0x68] sm:$0xff]  ;;  %v4235_v38 = vld [vmem:[#allocation9 + $0xe0] sm:$0xff] }
 0x493   :  { %4011 = vmatpush.msrb.mxu3 %v3949_v42  ;;  %4031 = vmatpush.msrb.mxu0 %v3950_v16  ;;  %v4068_v61 = vld [vmem:[#allocation21 + $0xc0] sm:$0xff]  ;;  %v4233_v16 = vld [vmem:[#allocation9 + $0xd0] sm:$0xff] }
 0x494   :  { %3909 = vmatpush.msra.mxu1 %v3847_v52  ;;  %3992 = vmatpush.msra.mxu2 %v3945_v25  ;;  %v4128_v42 = vld [vmem:[#allocation22 + $0x60] sm:$0xff]  ;;  %v4066_v52 = vld [vmem:[#allocation21 + $0xb0] sm:$0xff]  ;;  %v4067_v25 = vld [vmem:[#allocation21 + $0xb8] sm:$0xff] }
 0x495   :  { %v3380_v60 = vpop.f32.mrf.mxu2  ;;  %4012 = vmatpush.msrb.mxu3 %v3946_v47  ;;  %4032 = vmatpush.msrb.mxu0 %v3947_v12  ;;  %v4127_v12 = vld [vmem:[#allocation22 + $0x58] sm:$0xff] }
 0x496   :  { %v3419_v15 = vadd.f32 %v3380_v60, %v3288_v63  ;;  %v3400_v48 = vpop.f32.mrf.mxu3  ;;  %3910 = vmatpush.msra.mxu1 %v3846_v44  ;;  %3993 = vmatpush.msra.mxu2 %v3942_v62  ;;  %v4231_v44 = vld [vmem:[#allocation9 + $0xc0] sm:$0xff]  ;;  %v4229_v60 = vld [vmem:[#allocation9 + $0xb0] sm:$0xff] }
 0x497   :  { %v3439_v29 = vadd.f32 %v3400_v48, %v3308_v23  ;;  %4013 = vmatpush.msrb.mxu3 %v3943_v33  ;;  %4033 = vmatpush.msrb.mxu0 %v3944_v26  ;;  %v4064_v63 = vld [vmem:[#allocation21 + $0xa0] sm:$0xff]  ;;  %v4065_v33 = vld [vmem:[#allocation21 + $0xa8] sm:$0xff]  ;;  %v4126_v23 = vld [vmem:[#allocation22 + $0x50] sm:$0xff] }
 0x498   :  { %v5878_v20 = vmul.f32 -1.442695, %v3419_v15  ;;  %3911 = vmatpush.msra.mxu1 %v3845_v2  ;;  %3994 = vmatpush.msra.mxu2 %v3939_v24  ;;  %v4062_v15 = vld [vmem:[#allocation21 + $0x90] sm:$0xff]  ;;  %v4063_v48 = vld [vmem:[#allocation21 + $0x98] sm:$0xff] }
 0x499   :  { %v5879_v34 = vmul.f32 -1.442695, %v3439_v29  ;;  %4014 = vmatpush.msrb.mxu3 %v3940_v7  ;;  %4034 = vmatpush.msrb.mxu0 %v3941_v0  ;;  %v5930_v7 = vld [vmem:[%s8577_s15] ss:$0 sm:$0xff] }
 0x49a   :  { %6082 = vpow2.f32 %v5878_v20  ;;  %3912 = vmatpush.msra.mxu1 %v3844_v41  ;;  %3995 = vmatpush.msra.mxu2 %v3936_v8  ;;  %v4125_v41 = vld [vmem:[#allocation22 + $0x48] sm:$0xff]  ;;  %v4227_v8 = vld [vmem:[#allocation9 + $0xa0] sm:$0xff]  ;;  %v3479_v20 = vpop.f32.mrf.mxu0 }
 0x49b   :  { %6084 = vpow2.f32 %v5879_v34  ;;  %4015 = vmatpush.msrb.mxu3 %v3937_v4  ;;  %4035 = vmatpush.msrb.mxu0 %v3938_v49  ;;  %v4060_v49 = vld [vmem:[#allocation21 + $0x80] sm:$0xff]  ;;  %v4061_v34 = vld [vmem:[#allocation21 + $0x88] sm:$0xff] }
 0x49c   :  { %3913 = vmatpush.msra.mxu1 %v3843_v35  ;;  %3996 = vmatpush.msra.mxu2 %v3933_v31  ;;  %v3266_v35 = vperm.slane %v7780_v27, 2 }
 0x49d   :  { %4016 = vmatpush.msrb.mxu3 %v3934_v13  ;;  %4036 = vmatpush.msrb.mxu0 %v3935_v28  ;;  %v4124_v13 = vld [vmem:[#allocation22 + $0x40] sm:$0xff]  ;;  %v4225_v28 = vld [vmem:[#allocation9 + $0x90] sm:$0xff] }
 0x49e   :  { %3914 = vmatpush.msra.mxu1 %v3842_v3  ;;  %3997 = vmatpush.msra.mxu2 %v3930_v21  ;;  %v3327_v3 = vpop.f32.mrf.mxu1 }
 0x49f   :  { %4017 = vmatpush.msrb.mxu3 %v3931_v54  ;;  %4037 = vmatpush.msrb.mxu0 %v3932_v58  ;;  %v4058_v54 = vld [vmem:[#allocation21 + $0x70] sm:$0xff]  ;;  %v4059_v58 = vld [vmem:[#allocation21 + $0x78] sm:$0xff] }
 0x4a0   :  { %v6083_v36 = vpop.eup %6082  ;;  %3915 = vmatpush.msra.mxu1 %v3841_v50  ;;  %3998 = vmatpush.msra.mxu2 %v3927_v46  ;;  %v3480_v50 = vadd.f32 %v5930_v7, %v3479_v20  ;;  %v4123_v46 = vld [vmem:[#allocation22 + $0x38] sm:$0xff] }
 0x4a1   :  { %v6085_v10 = vpop.eup %6084  ;;  %v7784_v11 = vadd.f32 1.0, %v6083_v36  ;;  %4018 = vmatpush.msrb.mxu3 %v3928_v22  ;;  %4038 = vmatpush.msrb.mxu0 %v3929_v57  ;;  %v4223_v22 = vld [vmem:[#allocation9 + $0x80] sm:$0xff]  ;;  %v4238_v7 = vld [vmem:[#allocation9 + $0xf8] sm:$0xff] }
 0x4a2   :  { %v7786_v37 = vadd.f32 1.0, %v6085_v10  ;;  %3916 = vmatmul.f32.vlgmr.msra.gmra.mxu1 %v7773_v51  ;;  %3999 = vmatmul.f32.vlgmr.msra.gmra.mxu2 %v7773_v51  ;;  %v4056_v10 = vld [vmem:[#allocation21 + $0x60] sm:$0xff]  ;;  %v4234_v20 = vld [vmem:[#allocation9 + $0xd8] sm:$0xff] }
 0x4a3   :  { %6086 = vrcp.f32 %v7784_v11  ;;  %4019 = vmatmul.f32.vlgmr.msrb.gmra.mxu3 %v7773_v51  ;;  %4039 = vmatmul.f32.vlgmr.msrb.gmra.mxu0 %v7773_v51  ;;  %v3435_v2 = vand.u32 2147483648, %v7784_v11  ;;  %v3433_v29 = vand.u32 2147483647, %v7784_v11  ;;  %vm3429_vm1 = vweird.f32 %v7784_v11 }
 0x4a4   :  { %6088 = vrcp.f32 %v7786_v37  ;;  %4076 = vmatpush.msrb.mxu1 %v4074_v30  ;;  %4096 = vmatpush.msrb.mxu2 %v4075_v39  ;;  %v3328_v30 = vadd.f32 %v3327_v3, %v3266_v35  ;;  %vm3449_vm5 = vweird.f32 %v7786_v37  ;;  %v4291_v35 = vld [vmem:[#allocation10 + $0x60] sm:$0xff]  ;;  %v4398_v3 = vld [vmem:[#allocation13 + $0x108] sm:$0xff] }
 0x4a5   :  { %4175 = vmatpush.msra.mxu3 %v4131_v53  ;;  %4239 = vmatpush.msra.mxu0 %v4237_v6  ;;  %v3436_v21 = vor.u32 1.1754944e-38, %v3435_v2  ;;  %vm3434_vm3 = vcmp.eq.f32.partialorder %v3433_v29, 8.507059e+37  ;;  %v3455_v53 = vand.u32 2147483648, %v7786_v37  ;;  %v4055_v6 = vld [vmem:[#allocation21 + $0x58] sm:$0xff]  ;;  %v4410_v29 = vld [vmem:[#allocation13 + $0x168] sm:$0xff] }
 0x4a6   :  { %4077 = vmatpush.msrb.mxu1 %v4072_v32  ;;  %4097 = vmatpush.msrb.mxu2 %v4073_v56  ;;  %v4122_v32 = vld [vmem:[#allocation22 + $0x30] sm:$0xff]  ;;  %v3453_v56 = vand.u32 2147483647, %v7786_v37 }
 0x4a7   :  { %4176 = vmatpush.msra.mxu3 %v4130_v59  ;;  %4240 = vmatpush.msra.mxu0 %v4235_v38  ;;  %v4054_v59 = vld [vmem:[#allocation21 + $0x50] sm:$0xff]  ;;  %v4052_v38 = vld [vmem:[#allocation21 + $0x40] sm:$0xff] }
 0x4a8   :  { %4078 = vmatpush.msrb.mxu1 %v4070_v18  ;;  %4098 = vmatpush.msrb.mxu2 %v4071_v1  ;;  %v4121_v1 = vld [vmem:[#allocation22 + $0x28] sm:$0xff]  ;;  %vm3454_vm7 = vcmp.eq.f32.partialorder %v3453_v56, 8.507059e+37  ;;  %v4218_v18 = vld [vmem:[#allocation9 + $0x58] sm:$0xff] }
 0x4a9   :  { %v7794_v9 = vpop.eup %6086  ;;  %4177 = vmatpush.msra.mxu3 %v4129_v14  ;;  %4241 = vmatpush.msra.mxu0 %v4233_v16  ;;  %v4050_v16 = vld [vmem:[#allocation21 + $0x30] sm:$0xff] }
 0x4aa   :  { %v7796_v43 = vpop.eup %6088  ;;  %v3425_v47 = vmul.f32 %v7794_v9, %v7784_v11  ;;  %4079 = vmatpush.msrb.mxu1 %v4068_v61  ;;  %4099 = vmatpush.msrb.mxu2 %v4069_v55  ;;  %vm3430_vm0 = vweird.f32 %v7794_v9  ;;  %v4057_v11 = vld [vmem:[#allocation21 + $0x68] sm:$0xff]  ;;  %v3456_v55 = vor.u32 1.1754944e-38, %v3455_v53  ;;  %v4219_v53 = vld [vmem:[#allocation9 + $0x60] sm:$0xff] }
 0x4ab   :  { %v3445_v62 = vmul.f32 %v7796_v43, %v7786_v37  ;;  %4178 = vmatpush.msra.mxu3 %v4128_v42  ;;  %4242 = vmatpush.msra.mxu0 %v4231_v44  ;;  %vm3431_vm2 = vmor %vm3429_vm1, %vm3430_vm0  ;;  %vm3450_vm4 = vweird.f32 %v7796_v43  ;;  %v4053_v61 = vld [vmem:[#allocation21 + $0x48] sm:$0xff]  ;;  %v4120_v42 = vld [vmem:[#allocation22 + $0x20] sm:$0xff] }
 0x4ac   :  { %v3426_v26 = vsub.f32 1.0, %v3425_v47  ;;  %4080 = vmatpush.msrb.mxu1 %v4066_v52  ;;  %4100 = vmatpush.msrb.mxu2 %v4067_v25  ;;  %vm7823_vm6 = vmor %vm3449_vm5, %vm3450_vm4  ;;  %v4119_v52 = vld [vmem:[#allocation22 + $0x18] sm:$0xff]  ;;  %v4048_v47 = vld [vmem:[#allocation21 + $0x20] sm:$0xff] }
 0x4ad   :  { %v3446_v24 = vsub.f32 1.0, %v3445_v62  ;;  %4179 = vmatpush.msra.mxu3 %v4127_v12  ;;  %4243 = vmatpush.msra.mxu0 %v4229_v60  ;;  %v4049_v12 = vld [vmem:[#allocation21 + $0x28] sm:$0xff]  ;;  %v4118_v44 = vld [vmem:[#allocation22 + $0x10] sm:$0xff]  ;;  %v4047_v62 = vld [vmem:[#allocation21 + $0x18] sm:$0xff] }
 0x4ae   :  { %v3427_v0 = vmul.f32 %v7794_v9, %v3426_v26  ;;  %4081 = vmatpush.msrb.mxu1 %v4064_v63  ;;  %4101 = vmatpush.msrb.mxu2 %v4065_v33  ;;  %v4117_v26 = vld [vmem:[#allocation22 + $0x8] sm:$0xff] }
 0x4af   :  { %v3447_v4 = vmul.f32 %v7796_v43, %v3446_v24  ;;  %4180 = vmatpush.msra.mxu3 %v4126_v23  ;;  %4244 = vmatpush.msra.mxu0 %v4227_v8  ;;  %v4044_v23 = vld [vmem:[#allocation21] sm:$0xff]  ;;  %v4045_v60 = vld [vmem:[#allocation21 + $0x8] sm:$0xff] }
 0x4b0   :  { %v3428_v31 = vadd.f32 %v7794_v9, %v3427_v0  ;;  %4082 = vmatpush.msrb.mxu1 %v4062_v15  ;;  %4102 = vmatpush.msrb.mxu2 %v4063_v48  ;;  %v4116_v15 = vld [vmem:[#allocation22] sm:$0xff]  ;;  %v4294_v0 = vld [vmem:[#allocation10 + $0x78] sm:$0xff]  ;;  %v4285_v56 = vld [vmem:[#allocation10 + $0x30] sm:$0xff] }
 0x4b1   :  { %4181 = vmatpush.msra.mxu3 %v4125_v41  ;;  %4245 = vmatpush.msra.mxu0 %v4225_v28  ;;  %v3448_v36 = vadd.f32 %v7796_v43, %v3447_v4  ;;  %v4293_v41 = vld [vmem:[#allocation10 + $0x70] sm:$0xff]  ;;  %v4292_v4 = vld [vmem:[#allocation10 + $0x68] sm:$0xff]  ;;  %v4290_v28 = vld [vmem:[#allocation10 + $0x58] sm:$0xff] }
 0x4b2   :  { %v3432_v27 = vsel %vm3431_vm2, %v7794_v9, %v3428_v31  ;;  %4083 = vmatpush.msrb.mxu1 %v4060_v49  ;;  %4103 = vmatpush.msrb.mxu2 %v4061_v34  ;;  %v4051_v9 = vld [vmem:[#allocation21 + $0x38] sm:$0xff]  ;;  %v4407_v8 = vld [vmem:[#allocation13 + $0x150] sm:$0xff]  ;;  %v4232_v34 = vld [vmem:[#allocation9 + $0xc8] sm:$0xff] }
 0x4b3   :  { %v3437_v57 = vsel %vm3434_vm3, %v3436_v21, %v3432_v27  ;;  %4182 = vmatpush.msra.mxu3 %v4124_v13  ;;  %4246 = vmatpush.msra.mxu0 %v4223_v22  ;;  %v3452_v37 = vsel %vm7823_vm6, %v7796_v43, %v3448_v36  ;;  %v4046_v43 = vld [vmem:[#allocation21 + $0x10] sm:$0xff]  ;;  %v4401_v31 = vld [vmem:[#allocation13 + $0x120] sm:$0xff] }
 0x4b4   :  { %v3482_v39 = vmul.f32 %v3480_v50, %v3437_v57  ;;  %4084 = vmatpush.msrb.mxu1 %v4058_v54  ;;  %4104 = vmatpush.msrb.mxu2 %v4059_v58  ;;  %v3457_v25 = vsel %vm3454_vm7, %v3456_v55, %v3452_v37  ;;  %v4404_v49 = vld [vmem:[#allocation13 + $0x138] sm:$0xff]  ;;  %v4228_v21 = vld [vmem:[#allocation9 + $0xa8] sm:$0xff]  ;;  %v4289_v54 = vld [vmem:[#allocation10 + $0x50] sm:$0xff] }
 0x4b5   :  { %4183 = vmatpush.msra.mxu3 %v4123_v46  ;;  %v3485_v63 = vsub.f32 1.0, %v3457_v25  ;;  %v3487_v24 = vmul.f32 %v3457_v25, %v7706_v45  ;;  %v4236_v45 = vld [vmem:[#allocation9 + $0xe8] sm:$0xff]  ;;  %v4230_v13 = vld [vmem:[#allocation9 + $0xb8] sm:$0xff]  ;;  %v4287_v57 = vld [vmem:[#allocation10 + $0x40] sm:$0xff] }
 0x4b6   :  { %4085 = vmatpush.msrb.mxu1 %v4056_v10  ;;  %4105 = vmatpush.msrb.mxu2 %v4057_v11  ;;  %v3483_v14 = vadd.f32 %v3482_v39, %v3328_v30  ;;  %v4395_v58 = vld [vmem:[#allocation13 + $0xf0] sm:$0xff]  ;;  %v4288_v27 = vld [vmem:[#allocation10 + $0x48] sm:$0xff]  ;;  %v4392_v46 = vld [vmem:[#allocation13 + $0xd8] sm:$0xff] }
 0x4b7   :  { %4184 = vmatpush.msra.mxu3 %v4122_v32  ;;  %v4226_v50 = vld [vmem:[#allocation9 + $0x98] sm:$0xff]  ;;  %v4224_v22 = vld [vmem:[#allocation9 + $0x88] sm:$0xff]  ;;  %v4221_v10 = vld [vmem:[#allocation9 + $0x70] sm:$0xff] }
 0x4b8   :  { %4086 = vmatpush.msrb.mxu1 %v4054_v59  ;;  %4106 = vmatpush.msrb.mxu2 %v4055_v6  ;;  %6090 = vtanh.f32 %v3483_v14  ;;  %v4389_v36 = vld [vmem:[#allocation13 + $0xc0] sm:$0xff]  ;;  %v4222_v11 = vld [vmem:[#allocation9 + $0x78] sm:$0xff]  ;;  %v4386_v39 = vld [vmem:[#allocation13 + $0xa8] sm:$0xff] }
 0x4b9   :  { %4185 = vmatpush.msra.mxu3 %v4121_v1  ;;  %v4286_v30 = vld [vmem:[#allocation10 + $0x38] sm:$0xff]  ;;  %4247 = vmatpush.msra.mxu0 %v4221_v10  ;;  %v4220_v32 = vld [vmem:[#allocation9 + $0x68] sm:$0xff]  ;;  %v4217_v6 = vld [vmem:[#allocation9 + $0x50] sm:$0xff] }
 0x4ba   :  { %4087 = vmatpush.msrb.mxu1 %v4052_v38  ;;  %4107 = vmatpush.msrb.mxu2 %v4053_v61  ;;  %v4383_v59 = vld [vmem:[#allocation13 + $0x90] sm:$0xff]  ;;  %v4284_v1 = vld [vmem:[#allocation10 + $0x28] sm:$0xff]  ;;  %v4380_v14 = vld [vmem:[#allocation13 + $0x78] sm:$0xff] }
 0x4bb   :  { %4186 = vmatpush.msra.mxu3 %v4120_v42  ;;  %4248 = vmatpush.msra.mxu0 %v4219_v53  ;;  %v4215_v38 = vld [vmem:[#allocation9 + $0x40] sm:$0xff]  ;;  %v4216_v61 = vld [vmem:[#allocation9 + $0x48] sm:$0xff]  ;;  %v4213_v42 = vld [vmem:[#allocation9 + $0x30] sm:$0xff] }
 0x4bc   :  { %4088 = vmatpush.msrb.mxu1 %v4050_v16  ;;  %4108 = vmatpush.msrb.mxu2 %v4051_v9  ;;  %v4283_v37 = vld [vmem:[#allocation10 + $0x20] sm:$0xff]  ;;  %v4214_v16 = vld [vmem:[#allocation9 + $0x38] sm:$0xff] }
 0x4bd   :  { %4187 = vmatpush.msra.mxu3 %v4119_v52  ;;  %4249 = vmatpush.msra.mxu0 %v4217_v6  ;;  %v4377_v55 = vld [vmem:[#allocation13 + $0x60] sm:$0xff]  ;;  %v4282_v9 = vld [vmem:[#allocation10 + $0x18] sm:$0xff]  ;;  %v4374_v52 = vld [vmem:[#allocation13 + $0x48] sm:$0xff] }
 0x4be   :  { %v6091_v33 = vpop.eup %6090  ;;  %4089 = vmatpush.msrb.mxu1 %v4048_v47  ;;  %4109 = vmatpush.msrb.mxu2 %v4049_v12  ;;  %v4211_v25 = vld [vmem:[#allocation9 + $0x20] sm:$0xff]  ;;  %v4212_v47 = vld [vmem:[#allocation9 + $0x28] sm:$0xff]  ;;  %v4281_v12 = vld [vmem:[#allocation10 + $0x10] sm:$0xff] }
 0x4bf   :  { %4188 = vmatpush.msra.mxu3 %v4118_v44  ;;  %v3486_v2 = vmul.f32 %v6091_v33, %v3485_v63  ;;  %4250 = vmatpush.msra.mxu0 %v4215_v38  ;;  %v4371_v44 = vld [vmem:[#allocation13 + $0x30] sm:$0xff]  ;;  %v4280_v63 = vld [vmem:[#allocation10 + $0x8] sm:$0xff]  ;;  %v4368_v33 = vld [vmem:[#allocation13 + $0x18] sm:$0xff] }
 0x4c0   :  { %4090 = vmatpush.msrb.mxu1 %v4046_v43  ;;  %4110 = vmatpush.msrb.mxu2 %v4047_v62  ;;  %v4209_v43 = vld [vmem:[#allocation9 + $0x10] sm:$0xff]  ;;  %v4210_v62 = vld [vmem:[#allocation9 + $0x18] sm:$0xff] }
 0x4c1   :  { %4189 = vmatpush.msra.mxu3 %v4117_v26  ;;  %v7831_v48 = vadd.f32 %v3487_v24, %v3486_v2  ;;  %4251 = vmatpush.msra.mxu0 %v4213_v42  ;;  %v4207_v26 = vld [vmem:[#allocation9] sm:$0xff]  ;;  %v4411_v24 = vld [vmem:[#allocation13 + $0x170] sm:$0xff]  ;;  %v4390_v6 = vld [vmem:[#allocation13 + $0xc8] sm:$0xff] }
 0x4c2   :  { %4091 = vmatpush.msrb.mxu1 %v4044_v23  ;;  %4111 = vmatpush.msrb.mxu2 %v4045_v60  ;;  %v4208_v23 = vld [vmem:[#allocation9 + $0x8] sm:$0xff]  ;;  %v4279_v60 = vld [vmem:[#allocation10] sm:$0xff]  ;;  %v4500_v53 = vld [vmem:[#allocation15 + $0x90] sm:$0xff] }
 0x4c3   :  { %4190 = vmatpush.msra.mxu3 %v4116_v15  ;;  %3489 = vst [vmem:[#allocation3 + $0x3] sm:$0x1] %v7831_v48  ;;  %4092 = vmatmul.f32.vlgmr.msrb.gmra.mxu1 %v7831_v48  ;;  %v4365_v2 = vld [vmem:[#allocation13] sm:$0xff]  ;;  %v4412_v15 = vld [vmem:[#allocation13 + $0x178] sm:$0xff]  ;;  %v4387_v42 = vld [vmem:[#allocation13 + $0xb0] sm:$0xff] }
 0x4c4   :  { %4112 = vmatmul.f32.vlgmr.msrb.gmra.mxu2 %v7831_v48  ;;  %4191 = vmatmul.f32.vlgmr.msra.gmra.mxu3 %v7831_v48 }
 0x4c5   :  { %4259 = vmatpush.msra.mxu1 %v4238_v7  ;;  %4338 = vmatpush.msra.mxu2 %v4294_v0  ;;  %v4512_v7 = vld [vmem:[#allocation15 + $0xf0] sm:$0xff]  ;;  %v4513_v0 = vld [vmem:[#allocation15 + $0xf8] sm:$0xff] }
 0x4c6   :  { %4421 = vmatpush.msrb.mxu3 %v4410_v29  ;;  %4252 = vmatpush.msra.mxu0 %v4211_v25  ;;  %v4408_v29 = vld [vmem:[#allocation13 + $0x158] sm:$0xff]  ;;  %v4496_v25 = vld [vmem:[#allocation15 + $0x70] sm:$0xff] }
 0x4c7   :  { %4260 = vmatpush.msra.mxu1 %v4236_v45  ;;  %4339 = vmatpush.msra.mxu2 %v4293_v41  ;;  %v4409_v45 = vld [vmem:[#allocation13 + $0x160] sm:$0xff] }
 0x4c8   :  { %4422 = vmatpush.msrb.mxu3 %v4407_v8  ;;  %4253 = vmatpush.msra.mxu0 %v4209_v43  ;;  %v4510_v41 = vld [vmem:[#allocation15 + $0xe0] sm:$0xff]  ;;  %v4511_v8 = vld [vmem:[#allocation15 + $0xe8] sm:$0xff] }
 0x4c9   :  { %4261 = vmatpush.msra.mxu1 %v4234_v20  ;;  %4340 = vmatpush.msra.mxu2 %v4292_v4  ;;  %v4405_v20 = vld [vmem:[#allocation13 + $0x140] sm:$0xff]  ;;  %v4406_v4 = vld [vmem:[#allocation13 + $0x148] sm:$0xff] }
 0x4ca   :  { %4423 = vmatpush.msrb.mxu3 %v4404_v49  ;;  %4254 = vmatpush.msra.mxu0 %v4207_v26  ;;  %v4508_v49 = vld [vmem:[#allocation15 + $0xd0] sm:$0xff]  ;;  %v4494_v43 = vld [vmem:[#allocation15 + $0x60] sm:$0xff] }
 0x4cb   :  { %4262 = vmatpush.msra.mxu1 %v4232_v34  ;;  %4341 = vmatpush.msra.mxu2 %v4291_v35  ;;  %v4509_v34 = vld [vmem:[#allocation15 + $0xd8] sm:$0xff]  ;;  %v4402_v35 = vld [vmem:[#allocation13 + $0x128] sm:$0xff] }
 0x4cc   :  { %4424 = vmatpush.msrb.mxu3 %v4401_v31  ;;  %4441 = vmatpush.msrb.mxu0 %v4411_v24  ;;  %v4403_v31 = vld [vmem:[#allocation13 + $0x130] sm:$0xff] }
 0x4cd   :  { %4263 = vmatpush.msra.mxu1 %v4230_v13  ;;  %4342 = vmatpush.msra.mxu2 %v4290_v28  ;;  %v4506_v13 = vld [vmem:[#allocation15 + $0xc0] sm:$0xff]  ;;  %v4507_v28 = vld [vmem:[#allocation15 + $0xc8] sm:$0xff] }
 0x4ce   :  { %4425 = vmatpush.msrb.mxu3 %v4398_v3  ;;  %4442 = vmatpush.msrb.mxu0 %v4408_v29  ;;  %v4399_v3 = vld [vmem:[#allocation13 + $0x110] sm:$0xff]  ;;  %v4378_v29 = vld [vmem:[#allocation13 + $0x68] sm:$0xff] }
 0x4cf   :  { %4264 = vmatpush.msra.mxu1 %v4228_v21  ;;  %4343 = vmatpush.msra.mxu2 %v4289_v54  ;;  %v4400_v21 = vld [vmem:[#allocation13 + $0x118] sm:$0xff]  ;;  %v4504_v54 = vld [vmem:[#allocation15 + $0xb0] sm:$0xff] }
 0x4d0   :  { %4426 = vmatpush.msrb.mxu3 %v4395_v58  ;;  %4443 = vmatpush.msrb.mxu0 %v4405_v20  ;;  %v8737_v58 = vld [vmem:[#allocation55_spill] sm:$0xff] }
 0x4d1   :  { %4265 = vmatpush.msra.mxu1 %v4226_v50  ;;  %4344 = vmatpush.msra.mxu2 %v4288_v27  ;;  %v380_v50 = vadd.f32 %v8737_v58, %v8711_v40  ;;  %v4505_v27 = vld [vmem:[#allocation15 + $0xb8] sm:$0xff] }
 0x4d2   :  { %4427 = vmatpush.msrb.mxu3 %v4392_v46  ;;  %4444 = vmatpush.msrb.mxu0 %v4402_v35 }
 0x4d3   :  { %4266 = vmatpush.msra.mxu1 %v4224_v22  ;;  %4345 = vmatpush.msra.mxu2 %v4287_v57  ;;  %v4396_v22 = vld [vmem:[#allocation13 + $0xf8] sm:$0xff]  ;;  %v4397_v57 = vld [vmem:[#allocation13 + $0x100] sm:$0xff] }
 0x4d4   :  { %4428 = vmatpush.msrb.mxu3 %v4389_v36  ;;  %4445 = vmatpush.msrb.mxu0 %v4399_v3  ;;  %v4502_v36 = vld [vmem:[#allocation15 + $0xa0] sm:$0xff] }
 0x4d5   :  { %4267 = vmatpush.msra.mxu1 %v4222_v11  ;;  %4346 = vmatpush.msra.mxu2 %v4286_v30  ;;  %v4503_v11 = vld [vmem:[#allocation15 + $0xa8] sm:$0xff]  ;;  %v4393_v30 = vld [vmem:[#allocation13 + $0xe0] sm:$0xff] }
 0x4d6   :  { %4429 = vmatpush.msrb.mxu3 %v4386_v39  ;;  %4446 = vmatpush.msrb.mxu0 %v4396_v22  ;;  %v4394_v39 = vld [vmem:[#allocation13 + $0xe8] sm:$0xff]  ;;  %v4373_v3 = vld [vmem:[#allocation13 + $0x40] sm:$0xff] }
 0x4d7   :  { %4268 = vmatpush.msra.mxu1 %v4220_v32  ;;  %4347 = vmatpush.msra.mxu2 %v4285_v56  ;;  %v4501_v56 = vld [vmem:[#allocation15 + $0x98] sm:$0xff]  ;;  %v4370_v22 = vld [vmem:[#allocation13 + $0x28] sm:$0xff] }
 0x4d8   :  { %4430 = vmatpush.msrb.mxu3 %v4383_v59  ;;  %4447 = vmatpush.msrb.mxu0 %v4393_v30 }
 0x4d9   :  { %4269 = vmatpush.msra.mxu1 %v4218_v18  ;;  %4348 = vmatpush.msra.mxu2 %v4284_v1  ;;  %v4391_v18 = vld [vmem:[#allocation13 + $0xd0] sm:$0xff]  ;;  %v4498_v1 = vld [vmem:[#allocation15 + $0x80] sm:$0xff] }
 0x4da   :  { %4431 = vmatpush.msrb.mxu3 %v4380_v14  ;;  %v8738_v14 = vld [vmem:[#allocation47_spill] sm:$0xff]  ;;  %4448 = vmatpush.msrb.mxu0 %v4390_v6 }
 0x4db   :  { %4270 = vmatpush.msra.mxu1 %v4216_v61  ;;  %4349 = vmatpush.msra.mxu2 %v4283_v37  ;;  %v421_v38 = vadd.f32 %v8738_v14, %v8713_v19  ;;  %v4499_v61 = vld [vmem:[#allocation15 + $0x88] sm:$0xff]  ;;  %v7846_v37 = vld [vmem:[%s8571_s9] sm:$0x7] }
 0x4dc   :  { %4432 = vmatpush.msrb.mxu3 %v4377_v55  ;;  %4449 = vmatpush.msrb.mxu0 %v4387_v42  ;;  %v3702_v35 = vperm.slane %v7846_v37, 0 }
 0x4dd   :  { %4271 = vmatpush.msra.mxu1 %v4214_v16  ;;  %4350 = vmatpush.msra.mxu2 %v4282_v9  ;;  %v4388_v16 = vld [vmem:[#allocation13 + $0xb8] sm:$0xff] }
 0x4de   :  { %4433 = vmatpush.msrb.mxu3 %v4374_v52  ;;  %v3703_v52 = vperm.slane %v7846_v37, 1 }
 0x4df   :  { %4272 = vmatpush.msra.mxu1 %v4212_v47  ;;  %4351 = vmatpush.msra.mxu2 %v4281_v12  ;;  %v4497_v47 = vld [vmem:[#allocation15 + $0x78] sm:$0xff] }
 0x4e0   :  { %4434 = vmatpush.msrb.mxu3 %v4371_v44  ;;  %v4384_v12 = vld [vmem:[#allocation13 + $0x98] sm:$0xff]  ;;  %v4385_v44 = vld [vmem:[#allocation13 + $0xa0] sm:$0xff] }
 0x4e1   :  { %4273 = vmatpush.msra.mxu1 %v4210_v62  ;;  %4352 = vmatpush.msra.mxu2 %v4280_v63 }
 0x4e2   :  { %4435 = vmatpush.msrb.mxu3 %v4368_v33  ;;  %v4495_v33 = vld [vmem:[#allocation15 + $0x68] sm:$0xff]  ;;  %4450 = vmatpush.msrb.mxu0 %v4384_v12 }
 0x4e3   :  { %4274 = vmatpush.msra.mxu1 %v4208_v23  ;;  %4353 = vmatpush.msra.mxu2 %v4279_v60  ;;  %v4381_v23 = vld [vmem:[#allocation13 + $0x80] sm:$0xff]  ;;  %v4382_v60 = vld [vmem:[#allocation13 + $0x88] sm:$0xff] }
 0x4e4   :  { %4436 = vmatpush.msrb.mxu3 %v4365_v2  ;;  %v4492_v2 = vld [vmem:[#allocation15 + $0x50] sm:$0xff]  ;;  %4451 = vmatpush.msrb.mxu0 %v4381_v23 }
 0x4e5   :  { %4461 = vmatpush.msrb.mxu1 %v4412_v15  ;;  %4514 = vmatpush.msrb.mxu2 %v4512_v7  ;;  %v4493_v7 = vld [vmem:[#allocation15 + $0x58] sm:$0xff] }
 0x4e6   :  { %4534 = vmatpush.msra.mxu3 %v4513_v0  ;;  %4452 = vmatpush.msrb.mxu0 %v4378_v29 }
 0x4e7   :  { %4462 = vmatpush.msrb.mxu1 %v4409_v45  ;;  %4515 = vmatpush.msrb.mxu2 %v4510_v41  ;;  %v4379_v45 = vld [vmem:[#allocation13 + $0x70] sm:$0xff]  ;;  %v4490_v41 = vld [vmem:[#allocation15 + $0x40] sm:$0xff] }
 0x4e8   :  { %4535 = vmatpush.msra.mxu3 %v4511_v8  ;;  %v4491_v8 = vld [vmem:[#allocation15 + $0x48] sm:$0xff] }
 0x4e9   :  { %4463 = vmatpush.msrb.mxu1 %v4406_v4  ;;  %4516 = vmatpush.msrb.mxu2 %v4508_v49  ;;  %v4375_v4 = vld [vmem:[#allocation13 + $0x50] sm:$0xff]  ;;  %v4376_v49 = vld [vmem:[#allocation13 + $0x58] sm:$0xff] }
 0x4ea   :  { %4536 = vmatpush.msra.mxu3 %v4509_v34  ;;  %v4488_v34 = vld [vmem:[#allocation15 + $0x30] sm:$0xff]  ;;  %4453 = vmatpush.msrb.mxu0 %v4375_v4 }
 0x4eb   :  { %4464 = vmatpush.msrb.mxu1 %v4403_v31  ;;  %4517 = vmatpush.msrb.mxu2 %v4506_v13  ;;  %v4489_v13 = vld [vmem:[#allocation15 + $0x38] sm:$0xff] }
 0x4ec   :  { %4537 = vmatpush.msra.mxu3 %v4507_v28  ;;  %v4372_v28 = vld [vmem:[#allocation13 + $0x38] sm:$0xff] }
 0x4ed   :  { %4465 = vmatpush.msrb.mxu1 %v4400_v21  ;;  %4518 = vmatpush.msrb.mxu2 %v4504_v54  ;;  %v4486_v21 = vld [vmem:[#allocation15 + $0x20] sm:$0xff] }
 0x4ee   :  { %4538 = vmatpush.msra.mxu3 %v4505_v27  ;;  %4454 = vmatpush.msrb.mxu0 %v4372_v28 }
 0x4ef   :  { %4466 = vmatpush.msrb.mxu1 %v4397_v57  ;;  %4519 = vmatpush.msrb.mxu2 %v4502_v36  ;;  %v4484_v57 = vld [vmem:[#allocation15 + $0x10] sm:$0xff] }
 0x4f0   :  { %4539 = vmatpush.msra.mxu3 %v4503_v11  ;;  %v4485_v11 = vld [vmem:[#allocation15 + $0x18] sm:$0xff] }
 0x4f1   :  { %4467 = vmatpush.msrb.mxu1 %v4394_v39  ;;  %4520 = vmatpush.msrb.mxu2 %v4500_v53  ;;  %v4366_v39 = vld [vmem:[#allocation13 + $0x8] sm:$0xff]  ;;  %v4367_v53 = vld [vmem:[#allocation13 + $0x10] sm:$0xff] }
 0x4f2   :  { %4540 = vmatpush.msra.mxu3 %v4501_v56 }
 0x4f3   :  { %4468 = vmatpush.msrb.mxu1 %v4391_v18  ;;  %4521 = vmatpush.msrb.mxu2 %v4498_v1  ;;  %v4483_v18 = vld [vmem:[#allocation15 + $0x8] sm:$0xff] }
 0x4f4   :  { %4541 = vmatpush.msra.mxu3 %v4499_v61 }
 0x4f5   :  { %4469 = vmatpush.msrb.mxu1 %v4388_v16  ;;  %4522 = vmatpush.msrb.mxu2 %v4496_v25 }
 0x4f6   :  { %4542 = vmatpush.msra.mxu3 %v4497_v47 }
 0x4f7   :  { %4470 = vmatpush.msrb.mxu1 %v4385_v44  ;;  %4523 = vmatpush.msrb.mxu2 %v4494_v43 }
 0x4f8   :  { %4543 = vmatpush.msra.mxu3 %v4495_v33 }
 0x4f9   :  { %4471 = vmatpush.msrb.mxu1 %v4382_v60  ;;  %4524 = vmatpush.msrb.mxu2 %v4492_v2 }
 0x4fa   :  { %4544 = vmatpush.msra.mxu3 %v4493_v7 }
 0x4fb   :  { %v3543_v46 = vpop.f32.mrf.mxu1  ;;  %4472 = vmatpush.msrb.mxu1 %v4379_v45  ;;  %4525 = vmatpush.msrb.mxu2 %v4490_v41 }
 0x4fc   :  { %v3582_v10 = vadd.f32 %v3543_v46, %v380_v50  ;;  %v7839_v59 = vpop.f32.mrf.mxu0  ;;  %4545 = vmatpush.msra.mxu3 %v4491_v8  ;;  %v4487_v50 = vld [vmem:[#allocation15 + $0x28] sm:$0xff]  ;;  %v4369_v46 = vld [vmem:[#allocation13 + $0x20] sm:$0xff] }
 0x4fd   :  { %4473 = vmatpush.msrb.mxu1 %v4376_v49  ;;  %4526 = vmatpush.msrb.mxu2 %v4488_v34  ;;  %v3726_v36 = vadd.f32 %v7839_v59, %v3702_v35 }
 0x4fe   :  { %v5880_v32 = vmul.f32 -1.442695, %v3582_v10  ;;  %4546 = vmatpush.msra.mxu3 %v4489_v13  ;;  %4455 = vmatpush.msrb.mxu0 %v4369_v46  ;;  %v4569_v46 = vld [vmem:[#allocation16 + $0x78] sm:$0xff] }
 0x4ff   :  { %4474 = vmatpush.msrb.mxu1 %v4373_v3  ;;  %4527 = vmatpush.msrb.mxu2 %v4486_v21 }
 0x500   :  { %6092 = vpow2.f32 %v5880_v32  ;;  %4547 = vmatpush.msra.mxu3 %v4487_v50  ;;  %v4482_v32 = vld [vmem:[#allocation15] sm:$0xff]  ;;  %4456 = vmatpush.msrb.mxu0 %v4366_v39  ;;  %v4568_v39 = vld [vmem:[#allocation16 + $0x70] sm:$0xff] }
 0x501   :  { %v3563_v55 = vpop.f32.mrf.mxu2  ;;  %4475 = vmatpush.msrb.mxu1 %v4370_v22  ;;  %4528 = vmatpush.msrb.mxu2 %v4484_v57  ;;  %v4685_v22 = vld [vmem:[#allocation19 + $0x168] sm:$0xff] }
 0x502   :  { %v3602_v9 = vadd.f32 %v3563_v55, %v421_v38  ;;  %v7849_v63 = vpop.f32.mrf.mxu3  ;;  %4548 = vmatpush.msra.mxu3 %v4485_v11  ;;  %v5931_v38 = vld [vmem:[#allocation12] ss:$0 sm:$0xff]  ;;  %v3704_v11 = vperm.slane %v7846_v37, 2 }
 0x503   :  { %4476 = vmatpush.msrb.mxu1 %v4367_v53  ;;  %4529 = vmatpush.msrb.mxu2 %v4482_v32  ;;  %v3643_v12 = vadd.f32 %v5931_v38, %v7849_v63  ;;  %v4682_v53 = vld [vmem:[#allocation19 + $0x150] sm:$0xff]  ;;  %v4679_v38 = vld [vmem:[#allocation19 + $0x138] sm:$0xff] }
 0x504   :  { %v5881_v62 = vmul.f32 -1.442695, %v3602_v9  ;;  %4549 = vmatpush.msra.mxu3 %v4483_v18  ;;  %v4683_v18 = vld [vmem:[#allocation19 + $0x158] sm:$0xff] }
 0x505   :  { %v3745_v26 = vpop.f32.mrf.mxu1 }
 0x506   :  { %v6093_v24 = vpop.eup %6092  ;;  %6094 = vpow2.f32 %v5881_v62  ;;  %v3746_v15 = vadd.f32 %v3745_v26, %v3703_v52  ;;  %v8739_v62 = vld [vmem:[#allocation49_spill] sm:$0xff] }
 0x507   :  { %v7851_v0 = vadd.f32 1.0, %v6093_v24  ;;  %v462_v33 = vadd.f32 %v8739_v62, %v7047_v5  ;;  %v4677_v62 = vld [vmem:[#allocation19 + $0x128] sm:$0xff] }
 0x508   :  { %v3838_v20 = vpop.f32.mrf.mxu0 }
 0x509   :  { %6096 = vrcp.f32 %v7851_v0  ;;  %v3877_v31 = vadd.f32 %v3838_v20, %v3746_v15  ;;  %v3598_v14 = vand.u32 2147483648, %v7851_v0  ;;  %v3596_v42 = vand.u32 2147483647, %v7851_v0 }
 0x50a   :  { %vm3592_vm9 = vweird.f32 %v7851_v0 }
 0x50b   :  { %v5883_v58 = vmul.f32 -1.442695, %v3877_v31  ;;  %v3599_v47 = vor.u32 1.1754944e-38, %v3598_v14  ;;  %vm3597_vm11 = vcmp.eq.f32.partialorder %v3596_v42, 8.507059e+37  ;;  %v3765_v32 = vpop.f32.mrf.mxu2  ;;  %v4567_v14 = vld [vmem:[#allocation16 + $0x68] sm:$0xff] }
 0x50c   :  { %v6095_v54 = vpop.eup %6094  ;;  %v4680_v42 = vld [vmem:[#allocation19 + $0x140] sm:$0xff] }
 0x50d   :  { %v7855_v27 = vadd.f32 1.0, %v6095_v54  ;;  %6098 = vpow2.f32 %v5883_v58 }
 0x50e   :  { %v3818_v10 = vpop.f32.mrf.mxu3 }
 0x50f   :  { %v6097_v30 = vpop.eup %6096  ;;  %6100 = vrcp.f32 %v7855_v27  ;;  %v3857_v6 = vadd.f32 %v3818_v10, %v3726_v36  ;;  %v3618_v2 = vand.u32 2147483648, %v7855_v27  ;;  %v3616_v15 = vand.u32 2147483647, %v7855_v27  ;;  %v4686_v10 = vld [vmem:[#allocation19 + $0x170] sm:$0xff] }
 0x510   :  { %v3588_v56 = vmul.f32 %v6097_v30, %v7851_v0  ;;  %vm3593_vm8 = vweird.f32 %v6097_v30  ;;  %vm3612_vm13 = vweird.f32 %v7855_v27 }
 0x511   :  { %v5882_v1 = vmul.f32 -1.442695, %v3857_v6  ;;  %vm3594_vm10 = vmor %vm3592_vm9, %vm3593_vm8  ;;  %v3619_v45 = vor.u32 1.1754944e-38, %v3618_v2  ;;  %vm3617_vm15 = vcmp.eq.f32.partialorder %v3616_v15, 8.507059e+37  ;;  %v4673_v2 = vld [vmem:[#allocation19 + $0x108] sm:$0xff]  ;;  %v4674_v15 = vld [vmem:[#allocation19 + $0x110] sm:$0xff] }
 0x512   :  { %v3589_v59 = vsub.f32 1.0, %v3588_v56 }
 0x513   :  { %v6099_v61 = vpop.eup %6098  ;;  %6102 = vpow2.f32 %v5882_v1 }
 0x514   :  { %v3590_v55 = vmul.f32 %v6097_v30, %v3589_v59  ;;  %v7862_v9 = vadd.f32 1.0, %v6099_v61  ;;  %v4684_v59 = vld [vmem:[#allocation19 + $0x160] sm:$0xff] }
 0x515   :  { %v6101_v16 = vpop.eup %6100 }
 0x516   :  { %v3608_v52 = vmul.f32 %v6101_v16, %v7855_v27  ;;  %v3591_v25 = vadd.f32 %v6097_v30, %v3590_v55  ;;  %6104 = vrcp.f32 %v7862_v9  ;;  %vm3613_vm12 = vweird.f32 %v6101_v16  ;;  %v5932_v27 = vld [vmem:[#allocation18] ss:$0 sm:$0xff] }
 0x517   :  { %vm3614_vm14 = vmor %vm3612_vm13, %vm3613_vm12  ;;  %vm3887_vm5 = vweird.f32 %v7862_v9 }
 0x518   :  { %v3609_v44 = vsub.f32 1.0, %v3608_v52  ;;  %v3595_v43 = vsel %vm3594_vm10, %v6097_v30, %v3591_v25  ;;  %v3893_v52 = vand.u32 2147483648, %v7862_v9  ;;  %v3766_v25 = vadd.f32 %v3765_v32, %v3704_v11  ;;  %v4658_v11 = vld [vmem:[#allocation19 + $0x90] sm:$0xff]  ;;  %v4655_v32 = vld [vmem:[#allocation19 + $0x78] sm:$0xff] }
 0x519   :  { %v3600_v26 = vsel %vm3597_vm11, %v3599_v47, %v3595_v43  ;;  %v6103_v23 = vpop.eup %6102  ;;  %v3891_v43 = vand.u32 2147483647, %v7862_v9 }
 0x51a   :  { %v3610_v60 = vmul.f32 %v6101_v16, %v3609_v44  ;;  %v3645_v24 = vmul.f32 %v3643_v12, %v3600_v26  ;;  %v3861_v7 = vadd.f32 1.0, %v6103_v23  ;;  %v4566_v12 = vld [vmem:[#allocation16 + $0x60] sm:$0xff] }
 0x51b   :  { %v4676_v44 = vld [vmem:[#allocation19 + $0x120] sm:$0xff]  ;;  %vm3892_vm7 = vcmp.eq.f32.partialorder %v3891_v43, 8.507059e+37  ;;  %v7933_v43 = vld [vmem:[#allocation19 + $0x30] sm:$0xff] }
 0x51c   :  { %v3611_v0 = vadd.f32 %v6101_v16, %v3610_v60  ;;  %v3646_v63 = vadd.f32 %v3645_v24, %v462_v33  ;;  %6106 = vrcp.f32 %v3861_v7  ;;  %v7873_v29 = vpop.eup %6104  ;;  %v3873_v54 = vand.u32 2147483648, %v3861_v7  ;;  %v4678_v33 = vld [vmem:[#allocation19 + $0x130] sm:$0xff] }
 0x51d   :  { %v3883_v20 = vmul.f32 %v7873_v29, %v7862_v9  ;;  %v3871_v50 = vand.u32 2147483647, %v3861_v7  ;;  %vm3867_vm1 = vweird.f32 %v3861_v7  ;;  %vm3888_vm4 = vweird.f32 %v7873_v29  ;;  %v4565_v9 = vld [vmem:[#allocation16 + $0x58] sm:$0xff] }
 0x51e   :  { %v3615_v41 = vsel %vm3614_vm14, %v6101_v16, %v3611_v0  ;;  %6108 = vtanh.f32 %v3646_v63  ;;  %v3874_v6 = vor.u32 1.1754944e-38, %v3873_v54  ;;  %v4681_v16 = vld [vmem:[#allocation19 + $0x148] sm:$0xff]  ;;  %vm7900_vm6 = vmor %vm3887_vm5, %vm3888_vm4  ;;  %v3894_v24 = vor.u32 1.1754944e-38, %v3893_v52  ;;  %v4670_v63 = vld [vmem:[#allocation19 + $0xf0] sm:$0xff] }
 0x51f   :  { %v3620_v8 = vsel %vm3617_vm15, %v3619_v45, %v3615_v41  ;;  %v3884_v28 = vsub.f32 1.0, %v3883_v20  ;;  %v3917_v36 = vpop.f32.mrf.mxu1  ;;  %vm3872_vm3 = vcmp.eq.f32.partialorder %v3871_v50, 8.507059e+37  ;;  %v4564_v0 = vld [vmem:[#allocation16 + $0x50] sm:$0xff]  ;;  %v4672_v41 = vld [vmem:[#allocation19 + $0x100] sm:$0xff]  ;;  %v4667_v20 = vld [vmem:[#allocation19 + $0xd8] sm:$0xff] }
 0x520   :  { %v3648_v49 = vsub.f32 1.0, %v3620_v8  ;;  %v3650_v13 = vmul.f32 %v3620_v8, %v7754_v17  ;;  %v4687_v17 = vld [vmem:[#allocation19 + $0x178] sm:$0xff]  ;;  %v3918_v1 = vadd.f32 %v5932_v27, %v3917_v36  ;;  %v4563_v8 = vld [vmem:[#allocation16 + $0x48] sm:$0xff]  ;;  %v4662_v36 = vld [vmem:[#allocation19 + $0xb0] sm:$0xff] }
 0x521   :  { %v3885_v57 = vmul.f32 %v7873_v29, %v3884_v28  ;;  %v4665_v28 = vld [vmem:[#allocation19 + $0xc8] sm:$0xff]  ;;  %v4561_v50 = vld [vmem:[#allocation16 + $0x38] sm:$0xff] }
 0x522   :  { %v6107_v4 = vpop.eup %6106  ;;  %v4661_v27 = vld [vmem:[#allocation19 + $0xa8] sm:$0xff] }
 0x523   :  { %v3863_v35 = vmul.f32 %v6107_v4, %v3861_v7  ;;  %vm3868_vm0 = vweird.f32 %v6107_v4  ;;  %v3886_v61 = vadd.f32 %v7873_v29, %v3885_v57  ;;  %v4675_v7 = vld [vmem:[#allocation19 + $0x118] sm:$0xff] }
 0x524   :  { %v6109_v34 = vpop.eup %6108  ;;  %vm7887_vm2 = vmor %vm3867_vm1, %vm3868_vm0 }
 0x525   :  { %v3649_v31 = vmul.f32 %v6109_v34, %v3648_v49  ;;  %v3864_v3 = vsub.f32 1.0, %v3863_v35  ;;  %v3890_v60 = vsel %vm7900_vm6, %v7873_v29, %v3886_v61  ;;  %v4671_v29 = vld [vmem:[#allocation19 + $0xf8] sm:$0xff]  ;;  %v4669_v49 = vld [vmem:[#allocation19 + $0xe8] sm:$0xff]  ;;  %v4654_v61 = vld [vmem:[#allocation19 + $0x70] sm:$0xff] }
 0x526   :  { %v3895_v45 = vsel %vm3892_vm7, %v3894_v24, %v3890_v60  ;;  %v4562_v35 = vld [vmem:[#allocation16 + $0x40] sm:$0xff]  ;;  %v4020_v52 = vpop.f32.mrf.mxu3  ;;  %v4645_v24 = vld [vmem:[#allocation19 + $0x28] sm:$0xff] }
 0x527   :  { %v7878_v21 = vadd.f32 %v3650_v13, %v3649_v31  ;;  %v3865_v58 = vmul.f32 %v6107_v4, %v3864_v3  ;;  %v3923_v34 = vsub.f32 1.0, %v3895_v45  ;;  %v4664_v31 = vld [vmem:[#allocation19 + $0xc0] sm:$0xff]  ;;  %v4666_v3 = vld [vmem:[#allocation19 + $0xd0] sm:$0xff]  ;;  %v4643_v60 = vld [vmem:[#allocation19 + $0x18] sm:$0xff] }
 0x529   :  { %4255 = vmatmul.f32.vlgmr.msra.gmra.mxu0 %v7878_v21  ;;  %4275 = vmatmul.f32.vlgmr.msra.gmra.mxu1 %v7878_v21  ;;  %v3866_v30 = vadd.f32 %v6107_v4, %v3865_v58  ;;  %v3925_v58 = vmul.f32 %v3895_v45, %v7773_v51  ;;  %v4000_v51 = vpop.f32.mrf.mxu2  ;;  %v4642_v45 = vld [vmem:[#allocation19 + $0x10] sm:$0xff] }
 0x52a   :  { %4354 = vmatmul.f32.vlgmr.msra.gmra.mxu2 %v7878_v21  ;;  %4437 = vmatmul.f32.vlgmr.msrb.gmra.mxu3 %v7878_v21 }
 0x52b   :  { %4613 = vmatpush.msra.mxu0 %v4569_v46  ;;  %4696 = vmatpush.msra.mxu1 %v4685_v22  ;;  %v3870_v37 = vsel %vm7887_vm2, %v6107_v4, %v3866_v30  ;;  %v4668_v4 = vld [vmem:[#allocation19 + $0xe0] sm:$0xff]  ;;  %v7913_v46 = vld [vmem:[%s8576_s14] sm:$0x7]  ;;  %v4659_v30 = vld [vmem:[#allocation19 + $0x98] sm:$0xff] }
 0x52c   :  { %4716 = vmatpush.msra.mxu2 %v4686_v10  ;;  %4736 = vmatpush.msrb.mxu3 %v4687_v17  ;;  %v3875_v55 = vsel %vm3872_vm3, %v3874_v6, %v3870_v37  ;;  %v3977_v57 = vperm.slane %v7913_v46, 0  ;;  %v4663_v10 = vld [vmem:[#allocation19 + $0xb8] sm:$0xff]  ;;  %v4560_v17 = vld [vmem:[#allocation16 + $0x30] sm:$0xff]  ;;  %v4656_v6 = vld [vmem:[#allocation19 + $0x80] sm:$0xff] }
 0x52d   :  { %4614 = vmatpush.msra.mxu0 %v4568_v39  ;;  %4697 = vmatpush.msra.mxu1 %v4682_v53  ;;  %v3920_v47 = vmul.f32 %v3918_v1, %v3875_v55  ;;  %v4660_v39 = vld [vmem:[#allocation19 + $0xa0] sm:$0xff]  ;;  %v3978_v55 = vperm.slane %v7913_v46, 1 }
 0x52e   :  { %4717 = vmatpush.msra.mxu2 %v4683_v18  ;;  %4737 = vmatpush.msrb.mxu3 %v4684_v59  ;;  %v4559_v53 = vld [vmem:[#allocation16 + $0x28] sm:$0xff]  ;;  %v4001_v56 = vadd.f32 %v4000_v51, %v3977_v57  ;;  %v7920_v37 = vld [vmem:[#allocation16 + $0x20] sm:$0xff]  ;;  %v4955_v51 = vld [vmem:[#allocation13 + $0x138] sm:$0xff] }
 0x52f   :  { %4615 = vmatpush.msra.mxu0 %v4567_v14  ;;  %4698 = vmatpush.msra.mxu1 %v4679_v38  ;;  %v3921_v23 = vadd.f32 %v3920_v47, %v3766_v25  ;;  %v4657_v18 = vld [vmem:[#allocation19 + $0x88] sm:$0xff]  ;;  %v7922_v1 = vld [vmem:[#allocation19 + $0x60] sm:$0xff]  ;;  %v4650_v47 = vld [vmem:[#allocation19 + $0x50] sm:$0xff]  ;;  %v4021_v26 = vadd.f32 %v4020_v52, %v3978_v55 }
 0x530   :  { %4718 = vmatpush.msra.mxu2 %v4680_v42  ;;  %4738 = vmatpush.msrb.mxu3 %v4681_v16  ;;  %v4653_v38 = vld [vmem:[#allocation19 + $0x68] sm:$0xff]  ;;  %v7925_v42 = vld [vmem:[#allocation16 + $0x18] sm:$0xff] }
 0x531   :  { %4616 = vmatpush.msra.mxu0 %v4566_v12  ;;  %4699 = vmatpush.msra.mxu1 %v4676_v44  ;;  %6110 = vtanh.f32 %v3921_v23  ;;  %v7927_v16 = vld [vmem:[#allocation19 + $0x48] sm:$0xff]  ;;  %v4651_v12 = vld [vmem:[#allocation19 + $0x58] sm:$0xff] }
 0x532   :  { %4719 = vmatpush.msra.mxu2 %v4677_v62  ;;  %4739 = vmatpush.msrb.mxu3 %v4678_v33  ;;  %v7931_v44 = vld [vmem:[#allocation16 + $0x10] sm:$0xff]  ;;  %v4647_v62 = vld [vmem:[#allocation19 + $0x38] sm:$0xff]  ;;  %v4648_v33 = vld [vmem:[#allocation19 + $0x40] sm:$0xff] }
 0x533   :  { %4457 = vmatmul.f32.vlgmr.msrb.gmra.mxu0 %v7878_v21  ;;  %4477 = vmatmul.f32.vlgmr.msrb.gmra.mxu1 %v7878_v21  ;;  %v4555_v23 = vld [vmem:[#allocation16 + $0x8] sm:$0xff] }
 0x534   :  { %4617 = vmatpush.msra.mxu0 %v4565_v9  ;;  %4700 = vmatpush.msra.mxu1 %v4673_v2  ;;  %v4644_v2 = vld [vmem:[#allocation19 + $0x20] sm:$0xff]  ;;  %v4782_v57 = vld [vmem:[#allocation21 + $0xc8] sm:$0xff] }
 0x535   :  { %4720 = vmatpush.msra.mxu2 %v4674_v15  ;;  %4740 = vmatpush.msrb.mxu3 %v4675_v7  ;;  %v4554_v7 = vld [vmem:[#allocation16] sm:$0xff]  ;;  %v4838_v52 = vld [vmem:[#allocation22 + $0x48] sm:$0xff] }
 0x536   :  { %4618 = vmatpush.msra.mxu0 %v4564_v0  ;;  %4701 = vmatpush.msra.mxu1 %v4670_v63  ;;  %v4640_v0 = vld [vmem:[#allocation19] sm:$0xff]  ;;  %v4641_v63 = vld [vmem:[#allocation19 + $0x8] sm:$0xff] }
 0x537   :  { %4721 = vmatpush.msra.mxu2 %v4671_v29  ;;  %4741 = vmatpush.msrb.mxu3 %v4672_v41  ;;  %v6111_v13 = vpop.eup %6110 }
 0x538   :  { %4619 = vmatpush.msra.mxu0 %v4563_v8  ;;  %4702 = vmatpush.msra.mxu1 %v4667_v20  ;;  %v3924_v54 = vmul.f32 %v6111_v13, %v3923_v34  ;;  %v4787_v20 = vld [vmem:[#allocation21 + $0xf0] sm:$0xff]  ;;  %v4785_v34 = vld [vmem:[#allocation21 + $0xe0] sm:$0xff] }
 0x539   :  { %4722 = vmatpush.msra.mxu2 %v4668_v4  ;;  %4742 = vmatpush.msrb.mxu3 %v4669_v49  ;;  %v4788_v4 = vld [vmem:[#allocation21 + $0xf8] sm:$0xff]  ;;  %v4783_v13 = vld [vmem:[#allocation21 + $0xd0] sm:$0xff] }
 0x53a   :  { %4620 = vmatpush.msra.mxu0 %v4562_v35  ;;  %4703 = vmatpush.msra.mxu1 %v4664_v31  ;;  %v7915_v22 = vadd.f32 %v3925_v58, %v3924_v54  ;;  %v4844_v49 = vld [vmem:[#allocation22 + $0x78] sm:$0xff]  ;;  %v4786_v35 = vld [vmem:[#allocation21 + $0xe8] sm:$0xff]  ;;  %v4843_v31 = vld [vmem:[#allocation22 + $0x70] sm:$0xff] }
 0x53b   :  { %4723 = vmatpush.msra.mxu2 %v4665_v28  ;;  %4743 = vmatpush.msrb.mxu3 %v4666_v3  ;;  %v4784_v28 = vld [vmem:[#allocation21 + $0xd8] sm:$0xff]  ;;  %v4961_v3 = vld [vmem:[#allocation13 + $0x168] sm:$0xff]  ;;  %v4958_v58 = vld [vmem:[#allocation13 + $0x150] sm:$0xff] }
 0x53c   :  { %4621 = vmatpush.msra.mxu0 %v4561_v50  ;;  %4704 = vmatpush.msra.mxu1 %v4661_v27  ;;  %v4842_v54 = vld [vmem:[#allocation22 + $0x68] sm:$0xff]  ;;  %v4781_v27 = vld [vmem:[#allocation21 + $0xc0] sm:$0xff] }
 0x53d   :  { %4530 = vmatmul.f32.vlgmr.msrb.gmra.mxu2 %v7915_v22  ;;  %4550 = vmatmul.f32.vlgmr.msra.gmra.mxu3 %v7915_v22 }
 0x53e   :  { %4724 = vmatpush.msra.mxu2 %v4662_v36  ;;  %4744 = vmatpush.msrb.mxu3 %v4663_v10  ;;  %v4841_v10 = vld [vmem:[#allocation22 + $0x60] sm:$0xff] }
 0x53f   :  { %4622 = vmatpush.msra.mxu0 %v4560_v17  ;;  %4705 = vmatpush.msra.mxu1 %v4658_v11  ;;  %v4779_v11 = vld [vmem:[#allocation21 + $0xb0] sm:$0xff] }
 0x540   :  { %v4093_v59 = vpop.f32.mrf.mxu1  ;;  %4725 = vmatpush.msra.mxu2 %v4659_v30  ;;  %4745 = vmatpush.msrb.mxu3 %v4660_v39  ;;  %v4780_v30 = vld [vmem:[#allocation21 + $0xb8] sm:$0xff] }
 0x541   :  { %v4132_v14 = vadd.f32 %v4093_v59, %v4001_v56  ;;  %4623 = vmatpush.msra.mxu0 %v4559_v53  ;;  %4706 = vmatpush.msra.mxu1 %v4655_v32  ;;  %v4840_v39 = vld [vmem:[#allocation22 + $0x58] sm:$0xff]  ;;  %v4777_v56 = vld [vmem:[#allocation21 + $0xa0] sm:$0xff] }
 0x542   :  { %4726 = vmatpush.msra.mxu2 %v4656_v6  ;;  %4746 = vmatpush.msrb.mxu3 %v4657_v18  ;;  %v4952_v53 = vld [vmem:[#allocation13 + $0x120] sm:$0xff]  ;;  %v4778_v6 = vld [vmem:[#allocation21 + $0xa8] sm:$0xff]  ;;  %v4839_v18 = vld [vmem:[#allocation22 + $0x50] sm:$0xff] }
 0x543   :  { %v5884_v25 = vmul.f32 -1.442695, %v4132_v14  ;;  %4624 = vmatpush.msra.mxu0 %v7920_v37  ;;  %4707 = vmatpush.msra.mxu1 %v7922_v1  ;;  %v4949_v59 = vld [vmem:[#allocation13 + $0x108] sm:$0xff] }
 0x544   :  { %4727 = vmatpush.msra.mxu2 %v4653_v38  ;;  %4747 = vmatpush.msrb.mxu3 %v4654_v61  ;;  %v4775_v38 = vld [vmem:[#allocation21 + $0x90] sm:$0xff]  ;;  %v4776_v61 = vld [vmem:[#allocation21 + $0x98] sm:$0xff] }
 0x545   :  { %6112 = vpow2.f32 %v5884_v25  ;;  %4625 = vmatpush.msra.mxu0 %v7925_v42  ;;  %4708 = vmatpush.msra.mxu1 %v7927_v16  ;;  %v4946_v25 = vld [vmem:[#allocation13 + $0xf0] sm:$0xff] }
 0x546   :  { %4728 = vmatpush.msra.mxu2 %v4650_v47  ;;  %4748 = vmatpush.msrb.mxu3 %v4651_v12 }
 0x547   :  { %v4113_v9 = vpop.f32.mrf.mxu2  ;;  %4626 = vmatpush.msra.mxu0 %v7931_v44  ;;  %4709 = vmatpush.msra.mxu1 %v7933_v43 }
 0x548   :  { %v4152_v15 = vadd.f32 %v4113_v9, %v4021_v26  ;;  %4729 = vmatpush.msra.mxu2 %v4647_v62  ;;  %4749 = vmatpush.msrb.mxu3 %v4648_v33  ;;  %v5933_v62 = vld [vmem:[%s8577_s15] ss:$0 sm:$0xff]  ;;  %v4773_v33 = vld [vmem:[#allocation21 + $0x80] sm:$0xff]  ;;  %v4774_v26 = vld [vmem:[#allocation21 + $0x88] sm:$0xff]  ;;  %v4192_v9 = vpop.f32.mrf.mxu3 }
 0x549   :  { %4627 = vmatpush.msra.mxu0 %v4555_v23  ;;  %4710 = vmatpush.msra.mxu1 %v4643_v60  ;;  %v3979_v60 = vperm.slane %v7913_v46, 2  ;;  %v4956_v46 = vld [vmem:[#allocation13 + $0x140] sm:$0xff] }
 0x54a   :  { %v5885_v29 = vmul.f32 -1.442695, %v4152_v15  ;;  %4730 = vmatpush.msra.mxu2 %v4644_v2  ;;  %4750 = vmatpush.msrb.mxu3 %v4645_v24  ;;  %v4837_v2 = vld [vmem:[#allocation22 + $0x40] sm:$0xff]  ;;  %v4943_v24 = vld [vmem:[#allocation13 + $0xd8] sm:$0xff]  ;;  %v4040_v15 = vpop.f32.mrf.mxu0 }
 0x54b   :  { %v6113_v41 = vpop.eup %6112  ;;  %4628 = vmatpush.msra.mxu0 %v4554_v7  ;;  %4711 = vmatpush.msra.mxu1 %v4640_v0 }
 0x54c   :  { %v7939_v8 = vadd.f32 1.0, %v6113_v41  ;;  %6114 = vpow2.f32 %v5885_v29  ;;  %4731 = vmatpush.msra.mxu2 %v4641_v63  ;;  %4751 = vmatpush.msrb.mxu3 %v4642_v45  ;;  %v4771_v63 = vld [vmem:[#allocation21 + $0x70] sm:$0xff]  ;;  %v4772_v45 = vld [vmem:[#allocation21 + $0x78] sm:$0xff] }
 0x54d   :  { %4629 = vmatmul.f32.vlgmr.msra.gmra.mxu0 %v7915_v22  ;;  %4712 = vmatmul.f32.vlgmr.msra.gmra.mxu1 %v7915_v22  ;;  %v4836_v41 = vld [vmem:[#allocation22 + $0x38] sm:$0xff] }
 0x54e   :  { %6116 = vrcp.f32 %v7939_v8  ;;  %4732 = vmatmul.f32.vlgmr.msra.gmra.mxu2 %v7915_v22  ;;  %4752 = vmatmul.f32.vlgmr.msrb.gmra.mxu3 %v7915_v22  ;;  %v4148_v55 = vand.u32 2147483648, %v7939_v8  ;;  %v4146_v12 = vand.u32 2147483647, %v7939_v8  ;;  %vm4142_vm9 = vweird.f32 %v7939_v8 }
 0x54f   :  { %4789 = vmatpush.msrb.mxu0 %v4787_v20  ;;  %4809 = vmatpush.msrb.mxu1 %v4788_v4  ;;  %v4940_v20 = vld [vmem:[#allocation13 + $0xc0] sm:$0xff] }
 0x550   :  { %4888 = vmatpush.msrb.mxu2 %v4844_v49  ;;  %4972 = vmatpush.msra.mxu3 %v4961_v3  ;;  %v4149_v29 = vor.u32 1.1754944e-38, %v4148_v55  ;;  %vm4147_vm11 = vcmp.eq.f32.partialorder %v4146_v12, 8.507059e+37  ;;  %v4193_v49 = vadd.f32 %v5933_v62, %v4192_v9  ;;  %v4760_v55 = vld [vmem:[#allocation21 + $0x18] sm:$0xff]  ;;  %v4757_v12 = vld [vmem:[#allocation21] sm:$0xff]  ;;  %v4758_v62 = vld [vmem:[#allocation21 + $0x8] sm:$0xff] }
 0x551   :  { %4790 = vmatpush.msrb.mxu0 %v4785_v34  ;;  %4810 = vmatpush.msrb.mxu1 %v4786_v35  ;;  %v4769_v34 = vld [vmem:[#allocation21 + $0x60] sm:$0xff]  ;;  %v4770_v35 = vld [vmem:[#allocation21 + $0x68] sm:$0xff] }
 0x552   :  { %v6115_v50 = vpop.eup %6114  ;;  %4889 = vmatpush.msrb.mxu2 %v4843_v31  ;;  %4973 = vmatpush.msra.mxu3 %v4958_v58  ;;  %v4041_v31 = vadd.f32 %v4040_v15, %v3979_v60  ;;  %v6185_v9 = vld [vmem:[#allocation13 + $0x170] sm:$0xff]  ;;  %v4931_v15 = vld [vmem:[#allocation13 + $0x78] sm:$0xff] }
 0x553   :  { %v7946_v36 = vadd.f32 1.0, %v6115_v50  ;;  %4791 = vmatpush.msrb.mxu0 %v4783_v13  ;;  %4811 = vmatpush.msrb.mxu1 %v4784_v28  ;;  %v4835_v28 = vld [vmem:[#allocation22 + $0x30] sm:$0xff] }
 0x554   :  { %v7948_v17 = vpop.eup %6116  ;;  %4890 = vmatpush.msrb.mxu2 %v4842_v54  ;;  %4974 = vmatpush.msra.mxu3 %v4955_v51  ;;  %v4767_v50 = vld [vmem:[#allocation21 + $0x50] sm:$0xff] }
 0x555   :  { %6118 = vrcp.f32 %v7946_v36  ;;  %4792 = vmatpush.msrb.mxu0 %v4781_v27  ;;  %4812 = vmatpush.msrb.mxu1 %v4782_v57  ;;  %v4138_v32 = vmul.f32 %v7948_v17, %v7939_v8  ;;  %vm4143_vm8 = vweird.f32 %v7948_v17  ;;  %v4168_v54 = vand.u32 2147483648, %v7946_v36  ;;  %v4768_v27 = vld [vmem:[#allocation21 + $0x58] sm:$0xff] }
 0x556   :  { %4891 = vmatpush.msrb.mxu2 %v4841_v10  ;;  %4975 = vmatpush.msra.mxu3 %v4952_v53  ;;  %vm7969_vm10 = vmor %vm4142_vm9, %vm4143_vm8  ;;  %v4166_v57 = vand.u32 2147483647, %v7946_v36  ;;  %v4834_v10 = vld [vmem:[#allocation22 + $0x28] sm:$0xff]  ;;  %vm4162_vm13 = vweird.f32 %v7946_v36 }
 0x557   :  { %4793 = vmatpush.msrb.mxu0 %v4779_v11  ;;  %4813 = vmatpush.msrb.mxu1 %v4780_v30  ;;  %v4139_v14 = vsub.f32 1.0, %v4138_v32  ;;  %v4765_v11 = vld [vmem:[#allocation21 + $0x40] sm:$0xff]  ;;  %v4766_v30 = vld [vmem:[#allocation21 + $0x48] sm:$0xff]  ;;  %v4169_v53 = vor.u32 1.1754944e-38, %v4168_v54  ;;  %v5064_v54 = vld [vmem:[#allocation15 + $0xf8] sm:$0xff] }
 0x558   :  { %4892 = vmatpush.msrb.mxu2 %v4840_v39  ;;  %4976 = vmatpush.msra.mxu3 %v4949_v59  ;;  %v4833_v39 = vld [vmem:[#allocation22 + $0x20] sm:$0xff]  ;;  %vm4167_vm15 = vcmp.eq.f32.partialorder %v4166_v57, 8.507059e+37 }
 0x559   :  { %4794 = vmatpush.msrb.mxu0 %v4777_v56  ;;  %4814 = vmatpush.msrb.mxu1 %v4778_v6  ;;  %v4140_v47 = vmul.f32 %v7948_v17, %v4139_v14  ;;  %v4763_v56 = vld [vmem:[#allocation21 + $0x30] sm:$0xff]  ;;  %v4764_v6 = vld [vmem:[#allocation21 + $0x38] sm:$0xff]  ;;  %v4761_v59 = vld [vmem:[#allocation21 + $0x20] sm:$0xff] }
 0x55a   :  { %4893 = vmatpush.msrb.mxu2 %v4839_v18  ;;  %4977 = vmatpush.msra.mxu3 %v4946_v25  ;;  %v4762_v14 = vld [vmem:[#allocation21 + $0x28] sm:$0xff] }
 0x55b   :  { %v7960_v23 = vpop.eup %6118  ;;  %4795 = vmatpush.msrb.mxu0 %v4775_v38  ;;  %4815 = vmatpush.msrb.mxu1 %v4776_v61  ;;  %v4141_v0 = vadd.f32 %v7948_v17, %v4140_v47  ;;  %v4831_v38 = vld [vmem:[#allocation22 + $0x10] sm:$0xff]  ;;  %v4830_v25 = vld [vmem:[#allocation22 + $0x8] sm:$0xff] }
 0x55c   :  { %v4158_v7 = vmul.f32 %v7960_v23, %v7946_v36  ;;  %4894 = vmatpush.msrb.mxu2 %v4838_v52  ;;  %4978 = vmatpush.msra.mxu3 %v4943_v24  ;;  %vm4163_vm12 = vweird.f32 %v7960_v23  ;;  %v4832_v36 = vld [vmem:[#allocation22 + $0x18] sm:$0xff]  ;;  %v4759_v61 = vld [vmem:[#allocation21 + $0x10] sm:$0xff]  ;;  %v4937_v24 = vld [vmem:[#allocation13 + $0xa8] sm:$0xff] }
 0x55d   :  { %4796 = vmatpush.msrb.mxu0 %v4773_v33  ;;  %4816 = vmatpush.msrb.mxu1 %v4774_v26  ;;  %v4145_v8 = vsel %vm7969_vm10, %v7948_v17, %v4141_v0  ;;  %vm4164_vm14 = vmor %vm4162_vm13, %vm4163_vm12  ;;  %v4829_v26 = vld [vmem:[#allocation22] sm:$0xff]  ;;  %v4959_v0 = vld [vmem:[#allocation13 + $0x158] sm:$0xff] }
 0x55e   :  { %v4159_v4 = vsub.f32 1.0, %v4158_v7  ;;  %4895 = vmatpush.msrb.mxu2 %v4837_v2  ;;  %v4150_v13 = vsel %vm4147_vm11, %v4149_v29, %v4145_v8  ;;  %4979 = vmatpush.msra.mxu3 %v4940_v20  ;;  %v6186_v2 = vld [vmem:[#allocation13 + $0x178] sm:$0xff]  ;;  %v4928_v7 = vld [vmem:[#allocation13 + $0x60] sm:$0xff]  ;;  %v4957_v29 = vld [vmem:[#allocation13 + $0x148] sm:$0xff] }
 0x55f   :  { %4797 = vmatpush.msrb.mxu0 %v4771_v63  ;;  %4817 = vmatpush.msrb.mxu1 %v4772_v45  ;;  %v4195_v58 = vmul.f32 %v4193_v49, %v4150_v13  ;;  %v4960_v63 = vld [vmem:[#allocation13 + $0x160] sm:$0xff]  ;;  %v4925_v45 = vld [vmem:[#allocation13 + $0x48] sm:$0xff]  ;;  %v4919_v8 = vld [vmem:[#allocation13 + $0x18] sm:$0xff] }
 0x560   :  { %v4160_v3 = vmul.f32 %v7960_v23, %v4159_v4  ;;  %4896 = vmatpush.msrb.mxu2 %v4836_v41  ;;  %4980 = vmatpush.msra.mxu3 %v4937_v24  ;;  %v4922_v41 = vld [vmem:[#allocation13 + $0x30] sm:$0xff]  ;;  %v4953_v20 = vld [vmem:[#allocation13 + $0x128] sm:$0xff]  ;;  %v4947_v13 = vld [vmem:[#allocation13 + $0xf8] sm:$0xff] }
 0x561   :  { %4798 = vmatpush.msrb.mxu0 %v4769_v34  ;;  %4818 = vmatpush.msrb.mxu1 %v4770_v35  ;;  %v4196_v17 = vadd.f32 %v4195_v58, %v4041_v31  ;;  %v4954_v4 = vld [vmem:[#allocation13 + $0x130] sm:$0xff]  ;;  %v4951_v34 = vld [vmem:[#allocation13 + $0x118] sm:$0xff]  ;;  %v4916_v31 = vld [vmem:[#allocation13] sm:$0xff] }
 0x562   :  { %v4161_v51 = vadd.f32 %v7960_v23, %v4160_v3  ;;  %4897 = vmatpush.msrb.mxu2 %v4835_v28  ;;  %v4950_v49 = vld [vmem:[#allocation13 + $0x110] sm:$0xff]  ;;  %v4948_v28 = vld [vmem:[#allocation13 + $0x100] sm:$0xff]  ;;  %v5062_v57 = vld [vmem:[#allocation15 + $0xe8] sm:$0xff] }
 0x563   :  { %4799 = vmatpush.msrb.mxu0 %v4767_v50  ;;  %4819 = vmatpush.msrb.mxu1 %v4768_v27  ;;  %6120 = vtanh.f32 %v4196_v17  ;;  %v5063_v35 = vld [vmem:[#allocation15 + $0xf0] sm:$0xff]  ;;  %v5061_v3 = vld [vmem:[#allocation15 + $0xe0] sm:$0xff]  ;;  %v4945_v50 = vld [vmem:[#allocation13 + $0xe8] sm:$0xff] }
 0x564   :  { %v4165_v32 = vsel %vm4164_vm14, %v7960_v23, %v4161_v51  ;;  %4898 = vmatpush.msrb.mxu2 %v4834_v10  ;;  %v4944_v58 = vld [vmem:[#allocation13 + $0xe0] sm:$0xff]  ;;  %v5059_v27 = vld [vmem:[#allocation15 + $0xd0] sm:$0xff]  ;;  %v4941_v10 = vld [vmem:[#allocation13 + $0xc8] sm:$0xff] }
 0x565   :  { %4800 = vmatpush.msrb.mxu0 %v4765_v11  ;;  %4820 = vmatpush.msrb.mxu1 %v4766_v30  ;;  %v4170_v18 = vsel %vm4167_vm15, %v4169_v53, %v4165_v32  ;;  %v4942_v51 = vld [vmem:[#allocation13 + $0xd0] sm:$0xff]  ;;  %v5057_v17 = vld [vmem:[#allocation15 + $0xc0] sm:$0xff]  ;;  %v5060_v11 = vld [vmem:[#allocation15 + $0xd8] sm:$0xff] }
 0x566   :  { %4899 = vmatpush.msrb.mxu2 %v4833_v39  ;;  %v4198_v52 = vsub.f32 1.0, %v4170_v18  ;;  %v4200_v23 = vmul.f32 %v4170_v18, %v7831_v48  ;;  %v4934_v48 = vld [vmem:[#allocation13 + $0x90] sm:$0xff]  ;;  %v4939_v39 = vld [vmem:[#allocation13 + $0xb8] sm:$0xff]  ;;  %v5058_v32 = vld [vmem:[#allocation15 + $0xc8] sm:$0xff] }
 0x567   :  { %4801 = vmatpush.msrb.mxu0 %v4763_v56  ;;  %4821 = vmatpush.msrb.mxu1 %v4764_v6  ;;  %v4938_v30 = vld [vmem:[#allocation13 + $0xb0] sm:$0xff]  ;;  %v4935_v56 = vld [vmem:[#allocation13 + $0x98] sm:$0xff]  ;;  %v4936_v6 = vld [vmem:[#allocation13 + $0xa0] sm:$0xff] }
 0x568   :  { %4900 = vmatpush.msrb.mxu2 %v4832_v36  ;;  %4981 = vmatpush.msra.mxu3 %v4934_v48  ;;  %v5055_v53 = vld [vmem:[#allocation15 + $0xb0] sm:$0xff]  ;;  %v5053_v36 = vld [vmem:[#allocation15 + $0xa0] sm:$0xff] }
 0x569   :  { %4802 = vmatpush.msrb.mxu0 %v4761_v59  ;;  %4822 = vmatpush.msrb.mxu1 %v4762_v14  ;;  %v6121_v47 = vpop.eup %6120  ;;  %v8746_v18 = vld [vmem:[#allocation37_spill] sm:$0xff]  ;;  %v8747_v14 = vld [vmem:[#allocation51_spill] sm:$0xff] }
 0x56a   :  { %4901 = vmatpush.msrb.mxu2 %v4831_v38  ;;  %v4199_v33 = vmul.f32 %v6121_v47, %v4198_v52  ;;  %4982 = vmatpush.msra.mxu3 %v4931_v15  ;;  %v383_v59 = vadd.f32 %v8746_v18, %v8711_v40  ;;  %v424_v38 = vadd.f32 %v8747_v14, %v8713_v19  ;;  %v4933_v47 = vld [vmem:[#allocation13 + $0x88] sm:$0xff]  ;;  %v5049_v40 = vld [vmem:[#allocation15 + $0x80] sm:$0xff]  ;;  %v6188_v24 = vld [vmem:[#allocation13 + $0x70] sm:$0xff] }
 0x56b   :  { %4803 = vmatpush.msrb.mxu0 %v4759_v61  ;;  %4823 = vmatpush.msrb.mxu1 %v4760_v55  ;;  %v5056_v61 = vld [vmem:[#allocation15 + $0xb8] sm:$0xff]  ;;  %v5047_v48 = vld [vmem:[#allocation15 + $0x70] sm:$0xff]  ;;  %v5033_v14 = vld [vmem:[#allocation15] sm:$0xff] }
 0x56c   :  { %4902 = vmatpush.msrb.mxu2 %v4830_v25  ;;  %v7986_v60 = vadd.f32 %v4200_v23, %v4199_v33  ;;  %4983 = vmatpush.msra.mxu3 %v4928_v7  ;;  %v4932_v25 = vld [vmem:[#allocation13 + $0x80] sm:$0xff]  ;;  %v6189_v15 = vld [vmem:[#allocation13 + $0x50] sm:$0xff]  ;;  %v5050_v7 = vld [vmem:[#allocation15 + $0x88] sm:$0xff] }
 0x56d   :  { %4804 = vmatpush.msrb.mxu0 %v4757_v12  ;;  %4824 = vmatpush.msrb.mxu1 %v4758_v62  ;;  %v5051_v12 = vld [vmem:[#allocation15 + $0x90] sm:$0xff] }
 0x56e   :  { %4903 = vmatpush.msrb.mxu2 %v4829_v26  ;;  %4202 = vst [vmem:[#allocation3 + $0x4] sm:$0x1] %v7986_v60  ;;  %4805 = vmatmul.f32.vlgmr.msrb.gmra.mxu0 %v7986_v60  ;;  %v5054_v26 = vld [vmem:[#allocation15 + $0xa8] sm:$0xff]  ;;  %v8017_v18 = vld [vmem:[%s8571_s9] sm:$0x7] }
 0x56f   :  { %4992 = vmatpush.msra.mxu0 %v6185_v9  ;;  %4825 = vmatmul.f32.vlgmr.msrb.gmra.mxu1 %v7986_v60  ;;  %v6187_v9 = vld [vmem:[#allocation13 + $0x68] sm:$0xff] }
 0x570   :  { %4904 = vmatmul.f32.vlgmr.msrb.gmra.mxu2 %v7986_v60  ;;  %5012 = vmatpush.msra.mxu1 %v6186_v2  ;;  %v5052_v2 = vld [vmem:[#allocation15 + $0x98] sm:$0xff] }
 0x571   :  { %4993 = vmatpush.msra.mxu0 %v4959_v0  ;;  %4984 = vmatpush.msra.mxu3 %v4925_v45  ;;  %v6190_v0 = vld [vmem:[#allocation13 + $0x58] sm:$0xff] }
 0x572   :  { %5013 = vmatpush.msra.mxu1 %v4960_v63  ;;  %5065 = vmatpush.msra.mxu2 %v5063_v35  ;;  %v5045_v63 = vld [vmem:[#allocation15 + $0x60] sm:$0xff]  ;;  %v6191_v45 = vld [vmem:[#allocation13 + $0x38] sm:$0xff] }
 0x573   :  { %4994 = vmatpush.msra.mxu0 %v4956_v46  ;;  %4985 = vmatpush.msra.mxu3 %v4922_v41  ;;  %v5048_v46 = vld [vmem:[#allocation15 + $0x78] sm:$0xff]  ;;  %v4920_v41 = vld [vmem:[#allocation13 + $0x20] sm:$0xff] }
 0x574   :  { %5014 = vmatpush.msra.mxu1 %v4957_v29  ;;  %5066 = vmatpush.msra.mxu2 %v5061_v3  ;;  %v6192_v29 = vld [vmem:[#allocation13 + $0x40] sm:$0xff]  ;;  %v7996_v3 = vld [vmem:[#allocation19 + $0x168] sm:$0xff] }
 0x575   :  { %4995 = vmatpush.msra.mxu0 %v4953_v20  ;;  %4986 = vmatpush.msra.mxu3 %v4919_v8  ;;  %v4921_v20 = vld [vmem:[#allocation13 + $0x28] sm:$0xff]  ;;  %v5041_v35 = vld [vmem:[#allocation15 + $0x40] sm:$0xff] }
 0x576   :  { %5015 = vmatpush.msra.mxu1 %v4954_v4  ;;  %5067 = vmatpush.msra.mxu2 %v5059_v27  ;;  %v5043_v4 = vld [vmem:[#allocation15 + $0x50] sm:$0xff]  ;;  %v5046_v8 = vld [vmem:[#allocation15 + $0x68] sm:$0xff] }
 0x577   :  { %4996 = vmatpush.msra.mxu0 %v4950_v49  ;;  %4987 = vmatpush.msra.mxu3 %v4916_v31  ;;  %v4917_v49 = vld [vmem:[#allocation13 + $0x8] sm:$0xff] }
 0x578   :  { %5016 = vmatpush.msra.mxu1 %v4951_v34  ;;  %5068 = vmatpush.msra.mxu2 %v5057_v17  ;;  %v4918_v34 = vld [vmem:[#allocation13 + $0x10] sm:$0xff]  ;;  %v5037_v17 = vld [vmem:[#allocation15 + $0x20] sm:$0xff] }
 0x579   :  { %4997 = vmatpush.msra.mxu0 %v4947_v13  ;;  %5085 = vmatpush.msrb.mxu3 %v5064_v54  ;;  %v5044_v13 = vld [vmem:[#allocation15 + $0x58] sm:$0xff] }
 0x57a   :  { %5017 = vmatpush.msra.mxu1 %v4948_v28  ;;  %5069 = vmatpush.msra.mxu2 %v5055_v53  ;;  %v5120_v28 = vld [vmem:[#allocation16 + $0x78] sm:$0xff]  ;;  %v5035_v53 = vld [vmem:[#allocation15 + $0x10] sm:$0xff] }
 0x57b   :  { %4998 = vmatpush.msra.mxu0 %v4944_v58  ;;  %5086 = vmatpush.msrb.mxu3 %v5062_v57  ;;  %v5042_v57 = vld [vmem:[#allocation15 + $0x48] sm:$0xff] }
 0x57c   :  { %5018 = vmatpush.msra.mxu1 %v4945_v50  ;;  %5070 = vmatpush.msra.mxu2 %v5053_v36  ;;  %v5039_v50 = vld [vmem:[#allocation15 + $0x30] sm:$0xff] }
 0x57d   :  { %4999 = vmatpush.msra.mxu0 %v4941_v10  ;;  %5087 = vmatpush.msrb.mxu3 %v5060_v11  ;;  %v5119_v10 = vld [vmem:[#allocation16 + $0x70] sm:$0xff]  ;;  %v5040_v11 = vld [vmem:[#allocation15 + $0x38] sm:$0xff] }
 0x57e   :  { %5019 = vmatpush.msra.mxu1 %v4942_v51  ;;  %5071 = vmatpush.msra.mxu2 %v5051_v12  ;;  %v8002_v51 = vld [vmem:[#allocation19 + $0x150] sm:$0xff] }
 0x57f   :  { %5000 = vmatpush.msra.mxu0 %v4938_v30  ;;  %5088 = vmatpush.msrb.mxu3 %v5058_v32  ;;  %v5118_v30 = vld [vmem:[#allocation16 + $0x68] sm:$0xff] }
 0x580   :  { %5020 = vmatpush.msra.mxu1 %v4939_v39  ;;  %5072 = vmatpush.msra.mxu2 %v5049_v40  ;;  %v8007_v39 = vld [vmem:[#allocation19 + $0x138] sm:$0xff]  ;;  %v5038_v32 = vld [vmem:[#allocation15 + $0x28] sm:$0xff]  ;;  %v5115_v40 = vld [vmem:[#allocation16 + $0x50] sm:$0xff] }
 0x581   :  { %5001 = vmatpush.msra.mxu0 %v4935_v56  ;;  %5089 = vmatpush.msrb.mxu3 %v5056_v61  ;;  %v5117_v56 = vld [vmem:[#allocation16 + $0x60] sm:$0xff]  ;;  %v5116_v61 = vld [vmem:[#allocation16 + $0x58] sm:$0xff] }
 0x582   :  { %5021 = vmatpush.msra.mxu1 %v4936_v6  ;;  %5073 = vmatpush.msra.mxu2 %v5047_v48  ;;  %v8010_v6 = vld [vmem:[#allocation19 + $0x120] sm:$0xff]  ;;  %v5934_v48 = vld [vmem:[#allocation12] ss:$0 sm:$0xff] }
 0x583   :  { %5002 = vmatpush.msra.mxu0 %v4932_v25  ;;  %5090 = vmatpush.msrb.mxu3 %v5054_v26  ;;  %v8025_v25 = vld [vmem:[#allocation19 + $0x170] sm:$0xff]  ;;  %v5034_v26 = vld [vmem:[#allocation15 + $0x8] sm:$0xff] }
 0x584   :  { %5022 = vmatpush.msra.mxu1 %v4933_v47  ;;  %5074 = vmatpush.msra.mxu2 %v5045_v63 }
 0x585   :  { %5003 = vmatpush.msra.mxu0 %v6187_v9  ;;  %5091 = vmatpush.msrb.mxu3 %v5052_v2  ;;  %v8039_v2 = vld [vmem:[#allocation19 + $0x158] sm:$0xff] }
 0x586   :  { %5023 = vmatpush.msra.mxu1 %v6188_v24  ;;  %5075 = vmatpush.msra.mxu2 %v5043_v4  ;;  %v5113_v4 = vld [vmem:[#allocation16 + $0x40] sm:$0xff] }
 0x587   :  { %5004 = vmatpush.msra.mxu0 %v6189_v15  ;;  %5092 = vmatpush.msrb.mxu3 %v5050_v7  ;;  %v5114_v15 = vld [vmem:[#allocation16 + $0x48] sm:$0xff]  ;;  %v8041_v7 = vld [vmem:[#allocation19 + $0xd8] sm:$0xff] }
 0x588   :  { %5024 = vmatpush.msra.mxu1 %v6190_v0  ;;  %5076 = vmatpush.msra.mxu2 %v5041_v35 }
 0x589   :  { %5005 = vmatpush.msra.mxu0 %v6191_v45  ;;  %5093 = vmatpush.msrb.mxu3 %v5048_v46  ;;  %v8047_v46 = vld [vmem:[#allocation19 + $0x140] sm:$0xff] }
 0x58a   :  { %5025 = vmatpush.msra.mxu1 %v6192_v29  ;;  %5077 = vmatpush.msra.mxu2 %v5039_v50  ;;  %v5112_v50 = vld [vmem:[#allocation16 + $0x38] sm:$0xff] }
 0x58b   :  { %5006 = vmatpush.msra.mxu0 %v4920_v41  ;;  %5094 = vmatpush.msrb.mxu3 %v5046_v8  ;;  %v8051_v8 = vld [vmem:[#allocation19 + $0xc0] sm:$0xff] }
 0x58c   :  { %5026 = vmatpush.msra.mxu1 %v4921_v20  ;;  %5078 = vmatpush.msra.mxu2 %v5037_v17 }
 0x58d   :  { %5007 = vmatpush.msra.mxu0 %v4917_v49  ;;  %5095 = vmatpush.msrb.mxu3 %v5044_v13  ;;  %v8053_v49 = vld [vmem:[#allocation19 + $0x128] sm:$0xff] }
 0x58e   :  { %5027 = vmatpush.msra.mxu1 %v4918_v34  ;;  %5079 = vmatpush.msra.mxu2 %v5035_v53 }
 0x58f   :  { %5164 = vmatpush.msrb.mxu0 %v5120_v28  ;;  %5096 = vmatpush.msrb.mxu3 %v5042_v57  ;;  %v8060_v57 = vld [vmem:[#allocation19 + $0xa8] sm:$0xff] }
 0x590   :  { %5247 = vmatpush.msrb.mxu1 %v7996_v3  ;;  %5080 = vmatpush.msra.mxu2 %v5033_v14 }
 0x591   :  { %5165 = vmatpush.msrb.mxu0 %v5119_v10  ;;  %5097 = vmatpush.msrb.mxu3 %v5040_v11  ;;  %v8062_v10 = vld [vmem:[#allocation19 + $0x110] sm:$0xff] }
 0x592   :  { %5248 = vmatpush.msrb.mxu1 %v8002_v51  ;;  %5267 = vmatpush.msrb.mxu2 %v8025_v25 }
 0x593   :  { %5166 = vmatpush.msrb.mxu0 %v5118_v30  ;;  %5098 = vmatpush.msrb.mxu3 %v5038_v32  ;;  %v5111_v32 = vld [vmem:[#allocation16 + $0x30] sm:$0xff] }
 0x594   :  { %5249 = vmatpush.msrb.mxu1 %v8007_v39  ;;  %5268 = vmatpush.msrb.mxu2 %v8039_v2 }
 0x595   :  { %5167 = vmatpush.msrb.mxu0 %v5117_v56  ;;  %v8070_v56 = vld [vmem:[#allocation19 + $0x90] sm:$0xff] }
 0x596   :  { %5250 = vmatpush.msrb.mxu1 %v8010_v6  ;;  %5269 = vmatpush.msrb.mxu2 %v8047_v46 }
 0x597   :  { %5168 = vmatpush.msrb.mxu0 %v5116_v61  ;;  %v8748_v61 = vld [vmem:[#allocation53_spill] sm:$0xff] }
 0x598   :  { %5270 = vmatpush.msrb.mxu2 %v8053_v49 }
 0x599   :  { %5169 = vmatpush.msrb.mxu0 %v5115_v40 }
 0x59a   :  { %5271 = vmatpush.msrb.mxu2 %v8062_v10 }
 0x59b   :  { %5170 = vmatpush.msrb.mxu0 %v5114_v15 }
 0x59d   :  { %5171 = vmatpush.msrb.mxu0 %v5113_v4  ;;  %v8125_v4 = vld [vmem:[#allocation19] sm:$0xff] }
 0x59e   :  { %8752 = vst [vmem:[#allocation38_spill] sm:$0xff] %v8125_v4 }
 0x59f   :  { %5172 = vmatpush.msrb.mxu0 %v5112_v50 }
 0x5a1   :  { %5173 = vmatpush.msrb.mxu0 %v5111_v32 }
 0x5a6   :  { %v4256_v55 = vpop.f32.mrf.mxu0  ;;  %v4276_v52 = vpop.f32.mrf.mxu1 }
 0x5a7   :  { %v4295_v62 = vadd.f32 %v4256_v55, %v383_v59  ;;  %v4315_v33 = vadd.f32 %v4276_v52, %v424_v38  ;;  %v5036_v38 = vld [vmem:[#allocation15 + $0x18] sm:$0xff]  ;;  %v8020_v55 = vld [vmem:[#allocation19 + $0x108] sm:$0xff] }
 0x5a8   :  { %5099 = vmatpush.msrb.mxu3 %v5036_v38  ;;  %5251 = vmatpush.msrb.mxu1 %v8020_v55  ;;  %v8076_v38 = vld [vmem:[#allocation19 + $0xf8] sm:$0xff] }
 0x5a9   :  { %v5886_v23 = vmul.f32 -1.442695, %v4295_v62  ;;  %v5887_v19 = vmul.f32 -1.442695, %v4315_v33  ;;  %v4415_v62 = vperm.slane %v8017_v18, 0  ;;  %v4416_v33 = vperm.slane %v8017_v18, 1  ;;  %5272 = vmatpush.msrb.mxu2 %v8076_v38 }
 0x5aa   :  { %5100 = vmatpush.msrb.mxu3 %v5034_v26  ;;  %v8083_v26 = vld [vmem:[#allocation19 + $0xe0] sm:$0xff] }
 0x5ab   :  { %6122 = vpow2.f32 %v5886_v23  ;;  %v8033_v23 = vld [vmem:[#allocation19 + $0xf0] sm:$0xff]  ;;  %5273 = vmatpush.msrb.mxu2 %v8083_v26 }
 0x5ac   :  { %6124 = vpow2.f32 %v5887_v19  ;;  %5252 = vmatpush.msrb.mxu1 %v8033_v23 }
 0x5ad   :  { %v8012_v36 = vpop.f32.mrf.mxu2  ;;  %v4438_v59 = vpop.f32.mrf.mxu3 }
 0x5ae   :  { %v4439_v41 = vadd.f32 %v4438_v59, %v4415_v62  ;;  %5253 = vmatpush.msrb.mxu1 %v8041_v7  ;;  %v5110_v62 = vld [vmem:[#allocation16 + $0x28] sm:$0xff] }
 0x5af   :  { %5174 = vmatpush.msrb.mxu0 %v5110_v62 }
 0x5b0   :  { %v4458_v9 = vpop.f32.mrf.mxu0  ;;  %5254 = vmatpush.msrb.mxu1 %v8051_v8 }
 0x5b1   :  { %v6123_v31 = vpop.eup %6122  ;;  %v4459_v20 = vadd.f32 %v4458_v9, %v4416_v33  ;;  %v8081_v33 = vld [vmem:[#allocation19 + $0x78] sm:$0xff]  ;;  %v8095_v9 = vld [vmem:[#allocation19 + $0xc8] sm:$0xff]  ;;  %5175 = vmatpush.msrb.mxu0 %v7920_v37 }
 0x5b2   :  { %v6125_v54 = vpop.eup %6124  ;;  %v7998_v58 = vadd.f32 1.0, %v6123_v31  ;;  %5255 = vmatpush.msrb.mxu1 %v8060_v57  ;;  %5274 = vmatpush.msrb.mxu2 %v8095_v9 }
 0x5b3   :  { %v8000_v27 = vadd.f32 1.0, %v6125_v54  ;;  %5176 = vmatpush.msrb.mxu0 %v7925_v42 }
 0x5b4   :  { %6126 = vrcp.f32 %v7998_v58  ;;  %v4309_v63 = vand.u32 2147483647, %v7998_v58  ;;  %v4311_v45 = vand.u32 2147483648, %v7998_v58  ;;  %vm4305_vm1 = vweird.f32 %v7998_v58  ;;  %5256 = vmatpush.msrb.mxu1 %v8070_v56 }
 0x5b5   :  { %6128 = vrcp.f32 %v8000_v27  ;;  %vm4325_vm5 = vweird.f32 %v8000_v27  ;;  %v4329_v40 = vand.u32 2147483647, %v8000_v27  ;;  %5177 = vmatpush.msrb.mxu0 %v7931_v44  ;;  %v8127_v44 = vld [vmem:[#allocation19 + $0x68] sm:$0xff] }
 0x5b6   :  { %vm4310_vm3 = vcmp.eq.f32.partialorder %v4309_v63, 8.507059e+37  ;;  %v4312_v17 = vor.u32 1.1754944e-38, %v4311_v45  ;;  %5257 = vmatpush.msrb.mxu1 %v8081_v33 }
 0x5b7   :  { %vm4330_vm7 = vcmp.eq.f32.partialorder %v4329_v40, 8.507059e+37 }
 0x5b8   :  { %5258 = vmatpush.msrb.mxu1 %v7922_v1  ;;  %v5106_v1 = vld [vmem:[#allocation16 + $0x8] sm:$0xff] }
 0x5b9   :  { %5178 = vmatpush.msrb.mxu0 %v5106_v1  ;;  %v8174_v1 = vld [vmem:[#allocation19 + $0x100] sm:$0xff] }
 0x5ba   :  { %v8022_v52 = vpop.eup %6126  ;;  %5259 = vmatpush.msrb.mxu1 %v7927_v16  ;;  %v5105_v16 = vld [vmem:[#allocation16] sm:$0xff] }
 0x5bb   :  { %v8027_v47 = vpop.eup %6128  ;;  %v4301_v12 = vmul.f32 %v8022_v52, %v7998_v58  ;;  %vm4306_vm0 = vweird.f32 %v8022_v52  ;;  %v4356_v58 = vadd.f32 %v5934_v48, %v8012_v36  ;;  %v465_v36 = vadd.f32 %v8748_v61, %v7047_v5  ;;  %v8103_v48 = vld [vmem:[#allocation19 + $0xb0] sm:$0xff]  ;;  %5179 = vmatpush.msrb.mxu0 %v5105_v16  ;;  %v8163_v5 = vld [vmem:[#allocation19 + $0x118] sm:$0xff] }
 0x5bc   :  { %v4321_v19 = vmul.f32 %v8027_v47, %v8000_v27  ;;  %vm4307_vm2 = vmor %vm4305_vm1, %vm4306_vm0  ;;  %vm4326_vm4 = vweird.f32 %v8027_v47  ;;  %5275 = vmatpush.msrb.mxu2 %v8103_v48  ;;  %5260 = vmatpush.msrb.mxu1 %v7933_v43 }
 0x5bd   :  { %v4302_v24 = vsub.f32 1.0, %v4301_v12  ;;  %vm8091_vm6 = vmor %vm4325_vm5, %vm4326_vm4 }
 0x5be   :  { %v4322_v0 = vsub.f32 1.0, %v4321_v19 }
 0x5bf   :  { %v4303_v29 = vmul.f32 %v8022_v52, %v4302_v24 }
 0x5c0   :  { %v4323_v34 = vmul.f32 %v8027_v47, %v4322_v0  ;;  %v4531_v35 = vpop.f32.mrf.mxu2  ;;  %v4551_v31 = vpop.f32.mrf.mxu3 }
 0x5c1   :  { %v4304_v13 = vadd.f32 %v8022_v52, %v4303_v29  ;;  %v4570_v28 = vadd.f32 %v4531_v35, %v4439_v41  ;;  %v4590_v54 = vadd.f32 %v4551_v31, %v4459_v20  ;;  %v8117_v29 = vld [vmem:[#allocation19 + $0x18] sm:$0xff]  ;;  %v8119_v41 = vld [vmem:[#allocation19 + $0x80] sm:$0xff] }
 0x5c2   :  { %v4324_v59 = vadd.f32 %v8027_v47, %v4323_v34  ;;  %8751 = vst [vmem:[#allocation57_spill] sm:$0xff] %v8117_v29  ;;  %5261 = vmatpush.msrb.mxu1 %v8117_v29  ;;  %v8132_v31 = vld [vmem:[#allocation19 + $0x178] sm:$0xff] }
 0x5c3   :  { %v4308_v11 = vsel %vm4307_vm2, %v8022_v52, %v4304_v13  ;;  %v5888_v30 = vmul.f32 -1.442695, %v4570_v28  ;;  %v5889_v53 = vmul.f32 -1.442695, %v4590_v54  ;;  %v4331_v52 = vand.u32 2147483648, %v8000_v27  ;;  %v8136_v13 = vld [vmem:[#allocation19 + $0x50] sm:$0xff] }
 0x5c4   :  { %v4313_v14 = vsel %vm4310_vm3, %v4312_v17, %v4308_v11  ;;  %v4328_v24 = vsel %vm8091_vm6, %v8027_v47, %v4324_v59  ;;  %v8108_v47 = vld [vmem:[#allocation19 + $0x98] sm:$0xff]  ;;  %5262 = vmatpush.msrb.mxu1 %v8125_v4  ;;  %v8138_v54 = vld [vmem:[#allocation19 + $0x160] sm:$0xff] }
 0x5c5   :  { %v4358_v12 = vmul.f32 %v4356_v58, %v4313_v14  ;;  %6130 = vpow2.f32 %v5888_v30  ;;  %v4332_v27 = vor.u32 1.1754944e-38, %v4331_v52  ;;  %5276 = vmatpush.msrb.mxu2 %v8108_v47  ;;  %v8144_v17 = vld [vmem:[#allocation19 + $0x38] sm:$0xff]  ;;  %v8148_v58 = vld [vmem:[#allocation19 + $0x148] sm:$0xff]  ;;  %v8155_v14 = vld [vmem:[#allocation19 + $0x130] sm:$0xff] }
 0x5c6   :  { %6132 = vpow2.f32 %v5889_v53  ;;  %v8152_v53 = vld [vmem:[#allocation19 + $0x20] sm:$0xff]  ;;  %v5935_v52 = vld [vmem:[#allocation18] ss:$0 sm:$0xff] }
 0x5c7   :  { %v4359_v19 = vadd.f32 %v4358_v12, %v465_v36  ;;  %v4333_v0 = vsel %vm4330_vm7, %v4332_v27, %v4328_v24  ;;  %5277 = vmatpush.msrb.mxu2 %v8119_v41  ;;  %v8160_v12 = vld [vmem:[#allocation19 + $0x8] sm:$0xff]  ;;  %v8169_v27 = vld [vmem:[#allocation21 + $0xf0] sm:$0xff] }
 0x5c8   :  { %v4361_v20 = vsub.f32 1.0, %v4333_v0  ;;  %v4363_v35 = vmul.f32 %v4333_v0, %v7878_v21  ;;  %8753 = vst [vmem:[#allocation59_spill] sm:$0xff] %v8160_v12  ;;  %v4478_v0 = vpop.f32.mrf.mxu1 }
 0x5c9   :  { %6134 = vtanh.f32 %v4359_v19  ;;  %5278 = vmatpush.msrb.mxu2 %v8127_v44  ;;  %v4417_v19 = vperm.slane %v8017_v18, 2 }
 0x5ca   :  { %v4630_v40 = vpop.f32.mrf.mxu0 }
 0x5cb   :  { %v6131_v15 = vpop.eup %6130  ;;  %5279 = vmatpush.msrb.mxu2 %v8136_v13 }
 0x5cc   :  { %v6133_v63 = vpop.eup %6132  ;;  %v8110_v45 = vadd.f32 1.0, %v6131_v15  ;;  %v8171_v15 = vld [vmem:[#allocation21 + $0xf8] sm:$0xff] }
 0x5cd   :  { %v8114_v37 = vadd.f32 1.0, %v6133_v63  ;;  %5280 = vmatpush.msrb.mxu2 %v8144_v17  ;;  %8754 = vst [vmem:[#allocation39_spill] sm:$0xff] %v8171_v15 }
 0x5ce   :  { %6136 = vrcp.f32 %v8110_v45  ;;  %v4586_v59 = vand.u32 2147483648, %v8110_v45  ;;  %v4584_v36 = vand.u32 2147483647, %v8110_v45  ;;  %vm4580_vm9 = vweird.f32 %v8110_v45 }
 0x5cf   :  { %v6135_v42 = vpop.eup %6134  ;;  %6138 = vrcp.f32 %v8114_v37  ;;  %5281 = vmatpush.msrb.mxu2 %v8152_v53  ;;  %vm4600_vm13 = vweird.f32 %v8114_v37 }
 0x5d0   :  { %v4362_v34 = vmul.f32 %v6135_v42, %v4361_v20  ;;  %v4587_v63 = vor.u32 1.1754944e-38, %v4586_v59  ;;  %vm4585_vm11 = vcmp.eq.f32.partialorder %v4584_v36, 8.507059e+37  ;;  %v4631_v20 = vadd.f32 %v5935_v52, %v4630_v40  ;;  %v8182_v42 = vld [vmem:[#allocation21 + $0xe8] sm:$0xff]  ;;  %v8198_v59 = vld [vmem:[#allocation19 + $0xd0] sm:$0xff]  ;;  %v8209_v52 = vld [vmem:[#allocation21 + $0xc0] sm:$0xff] }
 0x5d1   :  { %5282 = vmatpush.msrb.mxu2 %v8160_v12  ;;  %8755 = vst [vmem:[#allocation61_spill] sm:$0xff] %v8182_v42  ;;  %v8216_v40 = vld [vmem:[#allocation19 + $0xb8] sm:$0xff] }
 0x5d2   :  { %v4364_v43 = vadd.f32 %v4363_v35, %v4362_v34  ;;  %v8186_v35 = vld [vmem:[#allocation19 + $0xe8] sm:$0xff] }
 0x5d4   :  { %v6137_v28 = vpop.eup %6136  ;;  %4988 = vmatmul.f32.vlgmr.msra.gmra.mxu3 %v4364_v43  ;;  %5008 = vmatmul.f32.vlgmr.msra.gmra.mxu0 %v4364_v43 }
 0x5d5   :  { %v8140_v21 = vpop.eup %6138  ;;  %v4576_v50 = vmul.f32 %v6137_v28, %v8110_v45  ;;  %5028 = vmatmul.f32.vlgmr.msra.gmra.mxu1 %v4364_v43  ;;  %5287 = vmatpush.msra.mxu3 %v8132_v31  ;;  %vm4581_vm8 = vweird.f32 %v6137_v28  ;;  %v8180_v45 = vld [vmem:[#allocation21 + $0xe0] sm:$0xff]  ;;  %v4479_v43 = vadd.f32 %v4478_v0, %v4417_v19  ;;  %v8223_v0 = vld [vmem:[#allocation21 + $0xb8] sm:$0xff] }
 0x5d6   :  { %v4596_v11 = vmul.f32 %v8140_v21, %v8114_v37  ;;  %vm4582_vm10 = vmor %vm4580_vm9, %vm4581_vm8  ;;  %5340 = vmatpush.msra.mxu0 %v8169_v27  ;;  %5360 = vmatpush.msra.mxu1 %v8171_v15  ;;  %vm4601_vm12 = vweird.f32 %v8140_v21  ;;  %8760 = vst [vmem:[#allocation41_spill] sm:$0xff] %v8223_v0  ;;  %v8260_v15 = vld [vmem:[#allocation19 + $0x58] sm:$0xff] }
 0x5d7   :  { %v4577_v30 = vsub.f32 1.0, %v4576_v50  ;;  %5288 = vmatpush.msra.mxu3 %v8138_v54  ;;  %vm8203_vm14 = vmor %vm4600_vm13, %vm4601_vm12 }
 0x5d8   :  { %v4597_v32 = vsub.f32 1.0, %v4596_v11  ;;  %5341 = vmatpush.msra.mxu0 %v8180_v45  ;;  %5361 = vmatpush.msra.mxu1 %v8182_v42  ;;  %v8192_v11 = vld [vmem:[#allocation21 + $0xd0] sm:$0xff] }
 0x5d9   :  { %v4578_v61 = vmul.f32 %v6137_v28, %v4577_v30  ;;  %5289 = vmatpush.msra.mxu3 %v8148_v58  ;;  %v8194_v30 = vld [vmem:[#allocation21 + $0xd8] sm:$0xff] }
 0x5da   :  { %v4598_v62 = vmul.f32 %v8140_v21, %v4597_v32  ;;  %8756 = vst [vmem:[#allocation40_spill] sm:$0xff] %v8194_v30  ;;  %v4604_v32 = vand.u32 2147483647, %v8114_v37  ;;  %5342 = vmatpush.msra.mxu0 %v8192_v11  ;;  %5362 = vmatpush.msra.mxu1 %v8194_v30  ;;  %v8257_v30 = vld [vmem:[#allocation21 + $0x88] sm:$0xff] }
 0x5db   :  { %v4579_v24 = vadd.f32 %v6137_v28, %v4578_v61  ;;  %5290 = vmatpush.msra.mxu3 %v8155_v14  ;;  %v8248_v61 = vld [vmem:[#allocation21 + $0x98] sm:$0xff]  ;;  %8765 = vst [vmem:[#allocation50_spill] sm:$0xff] %v8257_v30 }
 0x5dc   :  { %v4599_v16 = vadd.f32 %v8140_v21, %v4598_v62  ;;  %v8211_v62 = vld [vmem:[#allocation21 + $0xc8] sm:$0xff]  ;;  %5343 = vmatpush.msra.mxu0 %v8209_v52  ;;  %vm4605_vm15 = vcmp.eq.f32.partialorder %v4604_v32, 8.507059e+37  ;;  %v8246_v32 = vld [vmem:[#allocation21 + $0x90] sm:$0xff]  ;;  %8764 = vst [vmem:[#allocation48_spill] sm:$0xff] %v8248_v61 }
 0x5dd   :  { %v4583_v18 = vsel %vm4582_vm10, %v6137_v28, %v4579_v24  ;;  %5291 = vmatpush.msra.mxu3 %v8163_v5  ;;  %v4606_v28 = vand.u32 2147483648, %v8114_v37  ;;  %8759 = vst [vmem:[#allocation63_spill] sm:$0xff] %v8211_v62  ;;  %5363 = vmatpush.msra.mxu1 %v8211_v62  ;;  %v8221_v24 = vld [vmem:[#allocation21 + $0xb0] sm:$0xff]  ;;  %v8255_v62 = vld [vmem:[#allocation21 + $0x80] sm:$0xff] }
 0x5de   :  { %v4588_v34 = vsel %vm4585_vm11, %v4587_v63, %v4583_v18  ;;  %v4603_v37 = vsel %vm8203_vm14, %v8140_v21, %v4599_v16  ;;  %v8228_v63 = vld [vmem:[%s8576_s14] sm:$0x7]  ;;  %v4713_v21 = vpop.f32.mrf.mxu1  ;;  %v8230_v18 = vld [vmem:[#allocation19 + $0xa0] sm:$0xff]  ;;  %5344 = vmatpush.msra.mxu0 %v8221_v24  ;;  %8763 = vst [vmem:[#allocation44_spill] sm:$0xff] %v8246_v32 }
 0x5df   :  { %v4633_v50 = vmul.f32 %v4631_v20, %v4588_v34  ;;  %5292 = vmatpush.msra.mxu3 %v8174_v1  ;;  %v4607_v19 = vor.u32 1.1754944e-38, %v4606_v28  ;;  %5364 = vmatpush.msra.mxu1 %v8223_v0  ;;  %v8235_v16 = vld [vmem:[#allocation21 + $0xa0] sm:$0xff]  ;;  %v8237_v34 = vld [vmem:[#allocation21 + $0xa8] sm:$0xff]  ;;  %v4690_v28 = vperm.slane %v8228_v63, 0 }
 0x5e0   :  { %8761 = vst [vmem:[#allocation42_spill] sm:$0xff] %v8235_v16  ;;  %5345 = vmatpush.msra.mxu0 %v8235_v16 }
 0x5e1   :  { %v4634_v36 = vadd.f32 %v4633_v50, %v4479_v43  ;;  %5293 = vmatpush.msra.mxu3 %v8186_v35  ;;  %v4608_v20 = vsel %vm4605_vm15, %v4607_v19, %v4603_v37  ;;  %8762 = vst [vmem:[#allocation43_spill] sm:$0xff] %v8237_v34  ;;  %v8239_v43 = vld [vmem:[#allocation19 + $0x88] sm:$0xff]  ;;  %v4691_v50 = vperm.slane %v8228_v63, 1  ;;  %5365 = vmatpush.msra.mxu1 %v8237_v34  ;;  %v4733_v37 = vpop.f32.mrf.mxu2  ;;  %v8250_v19 = vld [vmem:[#allocation19 + $0x70] sm:$0xff] }
 0x5e2   :  { %5346 = vmatpush.msra.mxu0 %v8246_v32  ;;  %v4638_v42 = vmul.f32 %v4608_v20, %v7915_v22  ;;  %v4714_v4 = vadd.f32 %v4713_v21, %v4690_v28  ;;  %v8265_v32 = vld [vmem:[#allocation21 + $0x70] sm:$0xff]  ;;  %v8273_v21 = vld [vmem:[#allocation19 + $0x40] sm:$0xff]  ;;  %v8275_v28 = vld [vmem:[#allocation22 + $0x78] sm:$0xff] }
 0x5e3   :  { %6140 = vtanh.f32 %v4634_v36  ;;  %5294 = vmatpush.msra.mxu3 %v8198_v59  ;;  %v4636_v36 = vsub.f32 1.0, %v4608_v20  ;;  %5366 = vmatpush.msra.mxu1 %v8248_v61  ;;  %v4734_v29 = vadd.f32 %v4733_v37, %v4691_v50  ;;  %8766 = vst [vmem:[#allocation52_spill] sm:$0xff] %v8265_v32  ;;  %v8267_v61 = vld [vmem:[#allocation21 + $0x78] sm:$0xff] }
 0x5e4   :  { %5347 = vmatpush.msra.mxu0 %v8255_v62  ;;  %8767 = vst [vmem:[#allocation54_spill] sm:$0xff] %v8267_v61  ;;  %v8294_v37 = vld [vmem:[#allocation21 + $0x58] sm:$0xff] }
 0x5e5   :  { %5295 = vmatpush.msra.mxu3 %v8216_v40  ;;  %5367 = vmatpush.msra.mxu1 %v8257_v30  ;;  %8772 = vst [vmem:[#allocation45_spill] sm:$0xff] %v8294_v37  ;;  %v8322_v30 = vld [vmem:[#allocation22 + $0x58] sm:$0xff] }
 0x5e6   :  { %5348 = vmatpush.msra.mxu0 %v8265_v32 }
 0x5e7   :  { %5296 = vmatpush.msra.mxu3 %v8230_v18  ;;  %5368 = vmatpush.msra.mxu1 %v8267_v61  ;;  %v8306_v61 = vld [vmem:[#allocation21 + $0x48] sm:$0xff] }
 0x5e8   :  { %8775 = vst [vmem:[#allocation47_spill] sm:$0xff] %v8306_v61 }
 0x5e9   :  { %v6141_v0 = vpop.eup %6140  ;;  %5297 = vmatpush.msra.mxu3 %v8239_v43 }
 0x5ea   :  { %v4637_v34 = vmul.f32 %v6141_v0, %v4636_v36 }
 0x5eb   :  { %5298 = vmatpush.msra.mxu3 %v8250_v19  ;;  %v4806_v16 = vpop.f32.mrf.mxu0 }
 0x5ec   :  { %v8269_v12 = vadd.f32 %v4638_v42, %v4637_v34  ;;  %v4826_v0 = vpop.f32.mrf.mxu1  ;;  %v4845_v22 = vadd.f32 %v4806_v16, %v4714_v4  ;;  %v8280_v42 = vld [vmem:[#allocation21 + $0x60] sm:$0xff]  ;;  %v8282_v34 = vld [vmem:[#allocation21 + $0x68] sm:$0xff]  ;;  %v8288_v4 = vld [vmem:[#allocation22 + $0x70] sm:$0xff] }
 0x5ed   :  { %v4865_v20 = vadd.f32 %v4826_v0, %v4734_v29  ;;  %5299 = vmatpush.msra.mxu3 %v8260_v15  ;;  %8769 = vst [vmem:[#allocation58_spill] sm:$0xff] %v8280_v42  ;;  %v8286_v29 = vld [vmem:[#allocation19 + $0x28] sm:$0xff]  ;;  %v8292_v16 = vld [vmem:[#allocation21 + $0x50] sm:$0xff]  ;;  %5349 = vmatpush.msra.mxu0 %v8280_v42 }
 0x5ee   :  { %8768 = vst [vmem:[#allocation56_spill] sm:$0xff] %v8269_v12  ;;  %5081 = vmatmul.f32.vlgmr.msra.gmra.mxu2 %v8269_v12  ;;  %5101 = vmatmul.f32.vlgmr.msrb.gmra.mxu3 %v8269_v12  ;;  %v5890_v50 = vmul.f32 -1.442695, %v4845_v22  ;;  %v8296_v0 = vld [vmem:[#allocation19 + $0x10] sm:$0xff]  ;;  %v8298_v22 = vld [vmem:[#allocation22 + $0x68] sm:$0xff] }
 0x5ef   :  { %8770 = vst [vmem:[#allocation60_spill] sm:$0xff] %v8282_v34  ;;  %v5891_v36 = vmul.f32 -1.442695, %v4865_v20  ;;  %5180 = vmatmul.f32.vlgmr.msrb.gmra.mxu0 %v8269_v12  ;;  %5263 = vmatmul.f32.vlgmr.msrb.gmra.mxu1 %v8269_v12  ;;  %v8304_v20 = vld [vmem:[#allocation21 + $0x40] sm:$0xff]  ;;  %v8328_v42 = vld [vmem:[#allocation21 + $0x28] sm:$0xff] }
 0x5f0   :  { %5300 = vmatpush.msra.mxu3 %v8273_v21  ;;  %5439 = vmatpush.msra.mxu2 %v8275_v28  ;;  %8771 = vst [vmem:[#allocation62_spill] sm:$0xff] %v8292_v16  ;;  %6142 = vpow2.f32 %v5890_v50  ;;  %v8312_v50 = vld [vmem:[#allocation22 + $0x60] sm:$0xff] }
 0x5f1   :  { %8773 = vst [vmem:[#allocation46_spill] sm:$0xff] %v8298_v22  ;;  %5369 = vmatpush.msra.mxu1 %v8282_v34  ;;  %6144 = vpow2.f32 %v5891_v36  ;;  %5350 = vmatpush.msra.mxu0 %v8292_v16  ;;  %v8314_v34 = vld [vmem:[#allocation21 + $0x30] sm:$0xff]  ;;  %v8318_v36 = vld [vmem:[#allocation21 + $0x38] sm:$0xff] }
 0x5f2   :  { %5301 = vmatpush.msra.mxu3 %v8286_v29  ;;  %5440 = vmatpush.msra.mxu2 %v8288_v4  ;;  %8774 = vst [vmem:[#allocation55_spill] sm:$0xff] %v8304_v20 }
 0x5f3   :  { %5370 = vmatpush.msra.mxu1 %v8294_v37  ;;  %8776 = vst [vmem:[#allocation49_spill] sm:$0xff] %v8312_v50  ;;  %5351 = vmatpush.msra.mxu0 %v8304_v20  ;;  %v8324_v37 = vld [vmem:[#allocation21 + $0x20] sm:$0xff] }
 0x5f4   :  { %5302 = vmatpush.msra.mxu3 %v8296_v0  ;;  %5441 = vmatpush.msra.mxu2 %v8298_v22  ;;  %8777 = vst [vmem:[#allocation37_spill] sm:$0xff] %v8314_v34  ;;  %v8335_v22 = vld [vmem:[#allocation21 + $0x10] sm:$0xff] }
 0x5f5   :  { %5371 = vmatpush.msra.mxu1 %v8306_v61  ;;  %8778 = vst [vmem:[#allocation51_spill] sm:$0xff] %v8318_v36  ;;  %5352 = vmatpush.msra.mxu0 %v8314_v34  ;;  %v8332_v61 = vld [vmem:[#allocation22 + $0x50] sm:$0xff]  ;;  %v8342_v34 = vld [vmem:[#allocation21 + $0x18] sm:$0xff] }
 0x5f6   :  { %5283 = vmatmul.f32.vlgmr.msrb.gmra.mxu2 %v8269_v12  ;;  %5303 = vmatmul.f32.vlgmr.msra.gmra.mxu3 %v8269_v12  ;;  %v6143_v16 = vpop.eup %6142  ;;  %8779 = vst [vmem:[#allocation53_spill] sm:$0xff] %v8328_v42 }
 0x5f7   :  { %5442 = vmatpush.msra.mxu2 %v8312_v50  ;;  %v6145_v20 = vpop.eup %6144  ;;  %v8330_v32 = vadd.f32 1.0, %v6143_v16  ;;  %5372 = vmatpush.msra.mxu1 %v8318_v36  ;;  %8780 = vst [vmem:[#allocation64_spill] sm:$0xff] %v8342_v34  ;;  %v8345_v16 = vld [vmem:[#allocation22 + $0x48] sm:$0xff]  ;;  %v8348_v50 = vld [vmem:[#allocation21] sm:$0xff]  ;;  %v8368_v36 = vld [vmem:[#allocation22 + $0x30] sm:$0xff] }
 0x5f8   :  { %5523 = vmatpush.msrb.mxu3 %v7996_v3  ;;  %v8338_v12 = vadd.f32 1.0, %v6145_v20  ;;  %5353 = vmatpush.msra.mxu0 %v8324_v37  ;;  %8781 = vst [vmem:[#allocation65_spill] sm:$0xff] %v8348_v50  ;;  %v8354_v3 = vld [vmem:[#allocation21 + $0x8] sm:$0xff]  ;;  %v8356_v20 = vld [vmem:[#allocation22 + $0x40] sm:$0xff] }
 0x5f9   :  { %5443 = vmatpush.msra.mxu2 %v8322_v30  ;;  %6146 = vrcp.f32 %v8330_v32  ;;  %5373 = vmatpush.msra.mxu1 %v8328_v42  ;;  %8782 = vst [vmem:[#allocation66_spill] sm:$0xff] %v8354_v3  ;;  %v8362_v42 = vld [vmem:[#allocation22 + $0x38] sm:$0xff]  ;;  %vm4855_vm1 = vweird.f32 %v8330_v32 }
 0x5fa   :  { %5524 = vmatpush.msrb.mxu3 %v8002_v51  ;;  %6148 = vrcp.f32 %v8338_v12  ;;  %5354 = vmatpush.msra.mxu0 %v8335_v22  ;;  %vm4875_vm5 = vweird.f32 %v8338_v12 }
 0x5fb   :  { %5444 = vmatpush.msra.mxu2 %v8332_v61  ;;  %5374 = vmatpush.msra.mxu1 %v8342_v34 }
 0x5fc   :  { %5525 = vmatpush.msrb.mxu3 %v8007_v39  ;;  %5355 = vmatpush.msra.mxu0 %v8348_v50  ;;  %v8386_v50 = vld [vmem:[#allocation22 + $0x20] sm:$0xff] }
 0x5fd   :  { %5445 = vmatpush.msra.mxu2 %v8345_v16  ;;  %5375 = vmatpush.msra.mxu1 %v8354_v3  ;;  %v8379_v3 = vld [vmem:[#allocation22 + $0x28] sm:$0xff] }
 0x5fe   :  { %5543 = vmatpush.msrb.mxu0 %v8025_v25  ;;  %5526 = vmatpush.msrb.mxu3 %v8010_v6 }
 0x5ff   :  { %5446 = vmatpush.msra.mxu2 %v8356_v20  ;;  %5563 = vmatpush.msrb.mxu1 %v8132_v31  ;;  %v6147_v51 = vpop.eup %6146  ;;  %v4861_v31 = vand.u32 2147483648, %v8330_v32 }
 0x600   :  { %5544 = vmatpush.msrb.mxu0 %v8039_v2  ;;  %v8372_v39 = vpop.eup %6148  ;;  %v4851_v34 = vmul.f32 %v6147_v51, %v8330_v32  ;;  %5527 = vmatpush.msrb.mxu3 %v8020_v55  ;;  %vm4856_vm0 = vweird.f32 %v6147_v51  ;;  %v5936_v55 = vld [vmem:[%s8577_s15] ss:$0 sm:$0xff] }
 0x601   :  { %5447 = vmatpush.msra.mxu2 %v8362_v42  ;;  %5564 = vmatpush.msrb.mxu1 %v8138_v54  ;;  %v4871_v25 = vmul.f32 %v8372_v39, %v8338_v12  ;;  %vm4857_vm2 = vmor %vm4855_vm1, %vm4856_vm0  ;;  %vm4876_vm4 = vweird.f32 %v8372_v39 }
 0x602   :  { %5545 = vmatpush.msrb.mxu0 %v8047_v46  ;;  %v4852_v2 = vsub.f32 1.0, %v4851_v34  ;;  %5528 = vmatpush.msrb.mxu3 %v8033_v23  ;;  %v4859_v46 = vand.u32 2147483647, %v8330_v32  ;;  %v4905_v34 = vpop.f32.mrf.mxu2  ;;  %v4692_v23 = vperm.slane %v8228_v63, 2  ;;  %v8414_v32 = vld [vmem:[#allocation22 + $0x8] sm:$0xff]  ;;  %vm4877_vm6 = vmor %vm4875_vm5, %vm4876_vm4 }
 0x603   :  { %5448 = vmatpush.msra.mxu2 %v8368_v36  ;;  %5565 = vmatpush.msrb.mxu1 %v8148_v58  ;;  %v4872_v6 = vsub.f32 1.0, %v4871_v25  ;;  %v8397_v25 = vld [vmem:[#allocation22 + $0x18] sm:$0xff] }
 0x604   :  { %5546 = vmatpush.msrb.mxu0 %v8053_v49  ;;  %v4853_v54 = vmul.f32 %v6147_v51, %v4852_v2  ;;  %5529 = vmatpush.msrb.mxu3 %v8041_v7  ;;  %v4753_v2 = vpop.f32.mrf.mxu3  ;;  %vm4860_vm3 = vcmp.eq.f32.partialorder %v4859_v46, 8.507059e+37 }
 0x605   :  { %5449 = vmatpush.msra.mxu2 %v8379_v3  ;;  %5566 = vmatpush.msrb.mxu1 %v8155_v14  ;;  %v4873_v58 = vmul.f32 %v8372_v39, %v4872_v6  ;;  %v4862_v14 = vor.u32 1.1754944e-38, %v4861_v31  ;;  %v8406_v6 = vld [vmem:[#allocation22 + $0x10] sm:$0xff]  ;;  %v8423_v31 = vld [vmem:[#allocation22] sm:$0xff] }
 0x606   :  { %5547 = vmatpush.msrb.mxu0 %v8062_v10  ;;  %v4854_v49 = vadd.f32 %v6147_v51, %v4853_v54  ;;  %5530 = vmatpush.msrb.mxu3 %v8051_v8  ;;  %v4906_v10 = vadd.f32 %v5936_v55, %v4905_v34  ;;  %v4881_v8 = vand.u32 2147483648, %v8338_v12  ;;  %v8797_v54 = vld [vmem:[#allocation61_spill] sm:$0xff]  ;;  %v8798_v34 = vld [vmem:[#allocation40_spill] sm:$0xff] }
 0x607   :  { %5450 = vmatpush.msra.mxu2 %v8386_v50  ;;  %5567 = vmatpush.msrb.mxu1 %v8163_v5  ;;  %v4874_v63 = vadd.f32 %v8372_v39, %v4873_v58 }
 0x608   :  { %5548 = vmatpush.msrb.mxu0 %v8076_v38  ;;  %v4858_v7 = vsel %vm4857_vm2, %v6147_v51, %v4854_v49  ;;  %5531 = vmatpush.msrb.mxu3 %v8060_v57  ;;  %v4754_v38 = vadd.f32 %v4753_v2, %v4692_v23  ;;  %v8799_v2 = vld [vmem:[#allocation63_spill] sm:$0xff] }
 0x609   :  { %5451 = vmatpush.msra.mxu2 %v8397_v25  ;;  %5568 = vmatpush.msrb.mxu1 %v8174_v1  ;;  %v4863_v5 = vsel %vm4860_vm3, %v4862_v14, %v4858_v7  ;;  %v4879_v1 = vand.u32 2147483647, %v8338_v12  ;;  %v4882_v12 = vor.u32 1.1754944e-38, %v4881_v8  ;;  %v5937_v7 = vld [vmem:[#allocation18] ss:$0 sm:$0xff] }
 0x60a   :  { %5549 = vmatpush.msrb.mxu0 %v8083_v26  ;;  %v4908_v51 = vmul.f32 %v4906_v10, %v4863_v5  ;;  %5532 = vmatpush.msrb.mxu3 %v8070_v56  ;;  %v4878_v26 = vsel %vm4877_vm6, %v8372_v39, %v4874_v63  ;;  %v8796_v39 = vld [vmem:[#allocation39_spill] sm:$0xff]  ;;  %v8800_v5 = vld [vmem:[#allocation41_spill] sm:$0xff] }
 0x60b   :  { %5452 = vmatpush.msra.mxu2 %v8406_v6  ;;  %5569 = vmatpush.msrb.mxu1 %v8186_v35  ;;  %vm4880_vm7 = vcmp.eq.f32.partialorder %v4879_v1, 8.507059e+37  ;;  %v8791_v35 = vld [vmem:[#allocation55_spill] sm:$0xff] }
 0x60c   :  { %5550 = vmatpush.msrb.mxu0 %v8095_v9  ;;  %v4909_v57 = vadd.f32 %v4908_v51, %v4754_v38  ;;  %5533 = vmatpush.msrb.mxu3 %v8081_v33  ;;  %v4883_v56 = vsel %vm4880_vm7, %v4882_v12, %v4878_v26  ;;  %v8801_v1 = vld [vmem:[#allocation43_spill] sm:$0xff]  ;;  %v8802_v12 = vld [vmem:[#allocation48_spill] sm:$0xff] }
 0x60d   :  { %5453 = vmatpush.msra.mxu2 %v8414_v32  ;;  %5570 = vmatpush.msrb.mxu1 %v8198_v59  ;;  %v4911_v33 = vsub.f32 1.0, %v4883_v56  ;;  %v8492_v59 = vld [vmem:[%s8571_s9] sm:$0x7] }
 0x60e   :  { %5551 = vmatpush.msrb.mxu0 %v8103_v48  ;;  %6150 = vtanh.f32 %v4909_v57  ;;  %v4968_v8 = vperm.slane %v8492_v59, 2 }
 0x60f   :  { %5454 = vmatpush.msra.mxu2 %v8423_v31  ;;  %5571 = vmatpush.msrb.mxu1 %v8216_v40  ;;  %v4966_v40 = vperm.slane %v8492_v59, 0 }
 0x610   :  { %5552 = vmatpush.msrb.mxu0 %v8108_v47  ;;  %v4913_v47 = vmul.f32 %v4883_v56, %v7986_v60  ;;  %v8783_v60 = vld [vmem:[#allocation42_spill] sm:$0xff] }
 0x611   :  { %5616 = vmatpush.msrb.mxu2 %v8169_v27  ;;  %5572 = vmatpush.msrb.mxu1 %v8230_v18  ;;  %v8787_v27 = vld [vmem:[#allocation52_spill] sm:$0xff]  ;;  %v8509_v56 = vld [vmem:[%s8576_s14] sm:$0x7] }
 0x612   :  { %5553 = vmatpush.msrb.mxu0 %v8119_v41 }
 0x613   :  { %5617 = vmatpush.msrb.mxu2 %v8180_v45  ;;  %5573 = vmatpush.msrb.mxu1 %v8239_v43  ;;  %v8790_v45 = vld [vmem:[#allocation62_spill] sm:$0xff] }
 0x614   :  { %5554 = vmatpush.msrb.mxu0 %v8127_v44  ;;  %v6151_v9 = vpop.eup %6150  ;;  %v8784_v44 = vld [vmem:[#allocation59_spill] sm:$0xff] }
 0x615   :  { %5618 = vmatpush.msrb.mxu2 %v8192_v11  ;;  %5574 = vmatpush.msrb.mxu1 %v8250_v19  ;;  %v4912_v48 = vmul.f32 %v6151_v9, %v4911_v33  ;;  %v8792_v11 = vld [vmem:[#allocation37_spill] sm:$0xff] }
 0x616   :  { %5555 = vmatpush.msrb.mxu0 %v8136_v13  ;;  %v8785_v13 = vld [vmem:[#allocation44_spill] sm:$0xff] }
 0x617   :  { %5619 = vmatpush.msrb.mxu2 %v8209_v52  ;;  %5575 = vmatpush.msrb.mxu1 %v8260_v15  ;;  %v8449_v41 = vadd.f32 %v4913_v47, %v4912_v48  ;;  %v8789_v15 = vld [vmem:[#allocation58_spill] sm:$0xff] }
 0x618   :  { %5556 = vmatpush.msrb.mxu0 %v8144_v17  ;;  %v8786_v17 = vld [vmem:[#allocation46_spill] sm:$0xff] }
 0x619   :  { %5620 = vmatpush.msrb.mxu2 %v8221_v24  ;;  %5576 = vmatpush.msrb.mxu1 %v8273_v21  ;;  %4915 = vst [vmem:[#allocation3 + $0x5] sm:$0x1] %v8449_v41 }
 0x61a   :  { %5356 = vmatmul.f32.vlgmr.msra.gmra.mxu0 %v8449_v41  ;;  %5376 = vmatmul.f32.vlgmr.msra.gmra.mxu1 %v8449_v41 }
 0x61b   :  { %5455 = vmatmul.f32.vlgmr.msra.gmra.mxu2 %v8449_v41  ;;  %5557 = vmatpush.msrb.mxu0 %v8152_v53  ;;  %v8788_v53 = vld [vmem:[#allocation49_spill] sm:$0xff] }
 0x61c   :  { %5577 = vmatpush.msrb.mxu1 %v8286_v29  ;;  %5621 = vmatpush.msrb.mxu2 %v8783_v60 }
 0x61d   :  { %5558 = vmatpush.msrb.mxu0 %v8784_v44 }
 0x61e   :  { %5578 = vmatpush.msrb.mxu1 %v8296_v0  ;;  %5622 = vmatpush.msrb.mxu2 %v8785_v13  ;;  %v8803_v13 = vld [vmem:[#allocation50_spill] sm:$0xff] }
 0x61f   :  { %5715 = vmatpush.msra.mxu0 %v8275_v28 }
 0x620   :  { %5623 = vmatpush.msrb.mxu2 %v8255_v62  ;;  %v4967_v62 = vperm.slane %v8492_v59, 1  ;;  %v8805_v59 = vld [vmem:[#allocation60_spill] sm:$0xff] }
 0x621   :  { %5716 = vmatpush.msra.mxu0 %v8288_v4  ;;  %v5479_v4 = vld [vmem:[#allocation19 + $0x60] sm:$0xff] }
 0x622   :  { %5624 = vmatpush.msrb.mxu2 %v8787_v27  ;;  %5534 = vmatpush.msrb.mxu3 %v5479_v4  ;;  %v5241_v27 = vperm.slane %v8509_v56, 0 }
 0x623   :  { %5717 = vmatpush.msra.mxu0 %v8786_v17 }
 0x624   :  { %5625 = vmatpush.msrb.mxu2 %v8789_v15 }
 0x625   :  { %5718 = vmatpush.msra.mxu0 %v8788_v53  ;;  %v5242_v53 = vperm.slane %v8509_v56, 1 }
 0x626   :  { %5626 = vmatpush.msrb.mxu2 %v8790_v45  ;;  %v8804_v45 = vld [vmem:[#allocation54_spill] sm:$0xff] }
 0x627   :  { %5719 = vmatpush.msra.mxu0 %v8322_v30  ;;  %v8793_v30 = vld [vmem:[#allocation65_spill] sm:$0xff] }
 0x628   :  { %5627 = vmatpush.msrb.mxu2 %v8791_v35 }
 0x629   :  { %5720 = vmatpush.msra.mxu0 %v8332_v61 }
 0x62a   :  { %5628 = vmatpush.msrb.mxu2 %v8792_v11 }
 0x62b   :  { %5721 = vmatpush.msra.mxu0 %v8345_v16 }
 0x62c   :  { %5629 = vmatpush.msrb.mxu2 %v8324_v37  ;;  %v5476_v37 = vld [vmem:[#allocation19 + $0x48] sm:$0xff] }
 0x62d   :  { %5722 = vmatpush.msra.mxu0 %v8356_v20  ;;  %5535 = vmatpush.msrb.mxu3 %v5476_v37  ;;  %v8795_v20 = vld [vmem:[#allocation38_spill] sm:$0xff]  ;;  %v8808_v37 = vld [vmem:[#allocation51_spill] sm:$0xff] }
 0x62e   :  { %5630 = vmatpush.msrb.mxu2 %v8335_v22  ;;  %v5473_v22 = vld [vmem:[#allocation19 + $0x30] sm:$0xff] }
 0x62f   :  { %5723 = vmatpush.msra.mxu0 %v8362_v42  ;;  %5536 = vmatpush.msrb.mxu3 %v5473_v22  ;;  %v8809_v22 = vld [vmem:[#allocation56_spill] sm:$0xff] }
 0x630   :  { %5631 = vmatpush.msrb.mxu2 %v8793_v30 }
 0x631   :  { %5724 = vmatpush.msra.mxu0 %v8368_v36 }
 0x633   :  { %5725 = vmatpush.msra.mxu0 %v8379_v3  ;;  %v8794_v3 = vld [vmem:[#allocation57_spill] sm:$0xff] }
 0x634   :  { %5537 = vmatpush.msrb.mxu3 %v8794_v3  ;;  %v8811_v3 = vld [vmem:[#allocation64_spill] sm:$0xff] }
 0x635   :  { %5726 = vmatpush.msra.mxu0 %v8386_v50 }
 0x636   :  { %5538 = vmatpush.msrb.mxu3 %v8795_v20  ;;  %v8812_v20 = vld [vmem:[#allocation66_spill] sm:$0xff] }
 0x637   :  { %5727 = vmatpush.msra.mxu0 %v8397_v25 }
 0x638   :  { %5636 = vmatpush.msra.mxu3 %v8796_v39 }
 0x639   :  { %5728 = vmatpush.msra.mxu0 %v8406_v6 }
 0x63a   :  { %5637 = vmatpush.msra.mxu3 %v8797_v54 }
 0x63b   :  { %5729 = vmatpush.msra.mxu0 %v8414_v32 }
 0x63c   :  { %5638 = vmatpush.msra.mxu3 %v8798_v34 }
 0x63d   :  { %5730 = vmatpush.msra.mxu0 %v8423_v31 }
 0x63e   :  { %5639 = vmatpush.msra.mxu3 %v8799_v2 }
 0x640   :  { %5640 = vmatpush.msra.mxu3 %v8800_v5 }
 0x642   :  { %5641 = vmatpush.msra.mxu3 %v8801_v1 }
 0x644   :  { %5642 = vmatpush.msra.mxu3 %v8802_v12 }
 0x646   :  { %5643 = vmatpush.msra.mxu3 %v8803_v13 }
 0x648   :  { %5644 = vmatpush.msra.mxu3 %v8804_v45  ;;  %v5759_v45 = vld [vmem:[#allocation24 + $0x78] sm:$0xff] }
 0x649   :  { %5764 = vmatpush.msra.mxu1 %v5759_v45  ;;  %v5794_v45 = vld [vmem:[#allocation25 + $0x48] sm:$0xff] }
 0x64a   :  { %5645 = vmatpush.msra.mxu3 %v8805_v59 }
 0x651   :  { %v5009_v24 = vpop.f32.mrf.mxu0 }
 0x652   :  { %v5010_v18 = vadd.f32 %v5009_v24, %v4967_v62  ;;  %v5029_v25 = vpop.f32.mrf.mxu1  ;;  %v8806_v24 = vld [vmem:[#allocation45_spill] sm:$0xff] }
 0x653   :  { %v5030_v47 = vadd.f32 %v5029_v25, %v4968_v8  ;;  %5646 = vmatpush.msra.mxu3 %v8806_v24 }
 0x657   :  { %v4989_v52 = vpop.f32.mrf.mxu3 }
 0x658   :  { %v4990_v43 = vadd.f32 %v4989_v52, %v4966_v40 }
 0x66c   :  { %v5181_v32 = vpop.f32.mrf.mxu0  ;;  %v5264_v33 = vpop.f32.mrf.mxu1 }
 0x66d   :  { %v5182_v57 = vadd.f32 %v5937_v7, %v5181_v32  ;;  %v5265_v52 = vadd.f32 %v5264_v33, %v5241_v27  ;;  %v5243_v32 = vperm.slane %v8509_v56, 2 }
 0x671   :  { %v5082_v61 = vpop.f32.mrf.mxu2  ;;  %v5102_v19 = vpop.f32.mrf.mxu3 }
 0x672   :  { %v5121_v21 = vadd.f32 %v5082_v61, %v4990_v43  ;;  %v5141_v28 = vadd.f32 %v5102_v19, %v5010_v18 }
 0x674   :  { %v5892_v42 = vmul.f32 -1.442695, %v5121_v21  ;;  %v5893_v29 = vmul.f32 -1.442695, %v5141_v28  ;;  %v8807_v21 = vld [vmem:[#allocation47_spill] sm:$0xff] }
 0x675   :  { %5647 = vmatpush.msra.mxu3 %v8807_v21 }
 0x676   :  { %6152 = vpow2.f32 %v5892_v42 }
 0x677   :  { %6154 = vpow2.f32 %v5893_v29  ;;  %5648 = vmatpush.msra.mxu3 %v8808_v37  ;;  %v5753_v37 = vld [vmem:[#allocation24 + $0x48] sm:$0xff] }
 0x679   :  { %v5284_v35 = vpop.f32.mrf.mxu2  ;;  %v5304_v8 = vpop.f32.mrf.mxu3 }
 0x67a   :  { %v5285_v62 = vadd.f32 %v5284_v35, %v5242_v53  ;;  %v5305_v12 = vadd.f32 %v5304_v8, %v5243_v32  ;;  %v8537_v35 = vld [vmem:[%s8576_s14] sm:$0x7] }
 0x67b   :  { %v5517_v59 = vperm.slane %v8537_v35, 0  ;;  %v5939_v32 = vld [vmem:[%s8577_s15] ss:$0 sm:$0xff] }
 0x67c   :  { %v6153_v0 = vpop.eup %6152 }
 0x67d   :  { %v6155_v50 = vpop.eup %6154  ;;  %v5125_v36 = vadd.f32 1.0, %v6153_v0 }
 0x67e   :  { %v5145_v16 = vadd.f32 1.0, %v6155_v50 }
 0x67f   :  { %6156 = vrcp.f32 %v5125_v36  ;;  %v5137_v14 = vand.u32 2147483648, %v5125_v36  ;;  %v5135_v63 = vand.u32 2147483647, %v5125_v36  ;;  %vm5131_vm9 = vweird.f32 %v5125_v36 }
 0x680   :  { %6158 = vrcp.f32 %v5145_v16  ;;  %v5157_v44 = vand.u32 2147483648, %v5145_v16  ;;  %vm5151_vm13 = vweird.f32 %v5145_v16  ;;  %v5155_v17 = vand.u32 2147483647, %v5145_v16 }
 0x681   :  { %v5138_v31 = vor.u32 1.1754944e-38, %v5137_v14  ;;  %vm5136_vm11 = vcmp.eq.f32.partialorder %v5135_v63, 8.507059e+37 }
 0x682   :  { %v5158_v30 = vor.u32 1.1754944e-38, %v5157_v44  ;;  %vm5156_vm15 = vcmp.eq.f32.partialorder %v5155_v17, 8.507059e+37 }
 0x685   :  { %v6157_v46 = vpop.eup %6156 }
 0x686   :  { %v6159_v55 = vpop.eup %6158  ;;  %v5127_v58 = vmul.f32 %v6157_v46, %v5125_v36  ;;  %vm5132_vm8 = vweird.f32 %v6157_v46  ;;  %v8810_v36 = vld [vmem:[#allocation53_spill] sm:$0xff] }
 0x687   :  { %v5147_v23 = vmul.f32 %v6159_v55, %v5145_v16  ;;  %vm5133_vm10 = vmor %vm5131_vm9, %vm5132_vm8  ;;  %vm5152_vm12 = vweird.f32 %v6159_v55  ;;  %5649 = vmatpush.msra.mxu3 %v8810_v36 }
 0x688   :  { %v5128_v49 = vsub.f32 1.0, %v5127_v58  ;;  %vm5153_vm14 = vmor %vm5151_vm13, %vm5152_vm12 }
 0x689   :  { %v5148_v6 = vsub.f32 1.0, %v5147_v23  ;;  %5650 = vmatpush.msra.mxu3 %v8811_v3 }
 0x68a   :  { %v5129_v10 = vmul.f32 %v6157_v46, %v5128_v49 }
 0x68b   :  { %v5149_v38 = vmul.f32 %v6159_v55, %v5148_v6  ;;  %5651 = vmatpush.msra.mxu3 %v8812_v20 }
 0x68c   :  { %v5130_v51 = vadd.f32 %v6157_v46, %v5129_v10  ;;  %v5938_v10 = vld [vmem:[%s8577_s15] ss:$0 sm:$0xff] }
 0x68d   :  { %v5150_v48 = vadd.f32 %v6159_v55, %v5149_v38 }
 0x68e   :  { %v5134_v26 = vsel %vm5133_vm10, %v6157_v46, %v5130_v51 }
 0x68f   :  { %v5139_v9 = vsel %vm5136_vm11, %v5138_v31, %v5134_v26  ;;  %v5154_v11 = vsel %vm5153_vm14, %v6159_v55, %v5150_v48 }
 0x690   :  { %v5184_v60 = vmul.f32 %v5182_v57, %v5139_v9  ;;  %v5159_v40 = vsel %vm5156_vm15, %v5158_v30, %v5154_v11  ;;  %v5758_v30 = vld [vmem:[#allocation24 + $0x70] sm:$0xff] }
 0x691   :  { %v5187_v28 = vsub.f32 1.0, %v5159_v40  ;;  %v5189_v50 = vmul.f32 %v5159_v40, %v8809_v22  ;;  %5765 = vmatpush.msra.mxu1 %v5758_v30  ;;  %v5756_v40 = vld [vmem:[#allocation24 + $0x60] sm:$0xff]  ;;  %v5751_v22 = vld [vmem:[#allocation24 + $0x38] sm:$0xff] }
 0x692   :  { %v5185_v15 = vadd.f32 %v5184_v60, %v5030_v47  ;;  %v5793_v30 = vld [vmem:[#allocation25 + $0x40] sm:$0xff] }
 0x694   :  { %6160 = vtanh.f32 %v5185_v15 }
 0x697   :  { %v5357_v18 = vpop.f32.mrf.mxu0  ;;  %v5377_v43 = vpop.f32.mrf.mxu1 }
 0x698   :  { %v5396_v61 = vadd.f32 %v5357_v18, %v5265_v52  ;;  %v5416_v19 = vadd.f32 %v5377_v43, %v5285_v62  ;;  %v5757_v52 = vld [vmem:[#allocation24 + $0x68] sm:$0xff]  ;;  %v5755_v43 = vld [vmem:[#allocation24 + $0x58] sm:$0xff] }
 0x699   :  { %5766 = vmatpush.msra.mxu1 %v5757_v52 }
 0x69a   :  { %v6161_v42 = vpop.eup %6160  ;;  %v5894_v29 = vmul.f32 -1.442695, %v5396_v61  ;;  %v5895_v4 = vmul.f32 -1.442695, %v5416_v19 }
 0x69b   :  { %v5188_v0 = vmul.f32 %v6161_v42, %v5187_v28  ;;  %5767 = vmatpush.msra.mxu1 %v5756_v40  ;;  %v5754_v42 = vld [vmem:[#allocation24 + $0x50] sm:$0xff] }
 0x69c   :  { %6162 = vpow2.f32 %v5894_v29 }
 0x69d   :  { %6164 = vpow2.f32 %v5895_v4  ;;  %v5190_v16 = vadd.f32 %v5189_v50, %v5188_v0  ;;  %5768 = vmatpush.msra.mxu1 %v5755_v43  ;;  %v5752_v0 = vld [vmem:[#allocation24 + $0x40] sm:$0xff]  ;;  %v5750_v50 = vld [vmem:[#allocation24 + $0x30] sm:$0xff] }
 0x69e   :  { %v5456_v5 = vpop.f32.mrf.mxu2 }
 0x69f   :  { %5539 = vmatmul.f32.vlgmr.msrb.gmra.mxu3 %v5190_v16  ;;  %5559 = vmatmul.f32.vlgmr.msrb.gmra.mxu0 %v5190_v16  ;;  %v5457_v31 = vadd.f32 %v5938_v10, %v5456_v5  ;;  %v5798_v5 = vld [vmem:[#allocation25 + $0x68] sm:$0xff] }
 0x6a0   :  { %5579 = vmatmul.f32.vlgmr.msrb.gmra.mxu1 %v5190_v16  ;;  %v5749_v16 = vld [vmem:[#allocation24 + $0x28] sm:$0xff] }
 0x6a1   :  { %5769 = vmatpush.msra.mxu1 %v5754_v42  ;;  %v5788_v42 = vld [vmem:[#allocation25 + $0x18] sm:$0xff] }
 0x6a2   :  { %v6163_v39 = vpop.eup %6162 }
 0x6a3   :  { %v6165_v54 = vpop.eup %6164  ;;  %v5400_v46 = vadd.f32 1.0, %v6163_v39  ;;  %5770 = vmatpush.msra.mxu1 %v5753_v37  ;;  %v5785_v37 = vld [vmem:[#allocation25] sm:$0xff] }
 0x6a4   :  { %v5420_v55 = vadd.f32 1.0, %v6165_v54  ;;  %v5748_v54 = vld [vmem:[#allocation24 + $0x20] sm:$0xff] }
 0x6a5   :  { %6166 = vrcp.f32 %v5400_v46  ;;  %v5412_v14 = vand.u32 2147483648, %v5400_v46  ;;  %v5410_v7 = vand.u32 2147483647, %v5400_v46  ;;  %vm5406_vm1 = vweird.f32 %v5400_v46  ;;  %5771 = vmatpush.msra.mxu1 %v5752_v0  ;;  %v5940_v0 = vld [vmem:[%s8579_s17] ss:$0 sm:$0xff] }
 0x6a6   :  { %6168 = vrcp.f32 %v5420_v55  ;;  %v5432_v33 = vand.u32 2147483648, %v5420_v55  ;;  %vm5426_vm5 = vweird.f32 %v5420_v55  ;;  %v5430_v48 = vand.u32 2147483647, %v5420_v55 }
 0x6a7   :  { %v5413_v51 = vor.u32 1.1754944e-38, %v5412_v14  ;;  %vm5411_vm3 = vcmp.eq.f32.partialorder %v5410_v7, 8.507059e+37  ;;  %5772 = vmatpush.msra.mxu1 %v5751_v22  ;;  %v5800_v14 = vld [vmem:[#allocation25 + $0x78] sm:$0xff] }
 0x6a8   :  { %v5433_v56 = vor.u32 1.1754944e-38, %v5432_v33  ;;  %vm5431_vm7 = vcmp.eq.f32.partialorder %v5430_v48, 8.507059e+37  ;;  %5805 = vmatpush.msra.mxu2 %v5800_v14 }
 0x6a9   :  { %5773 = vmatpush.msra.mxu1 %v5750_v50 }
 0x6ab   :  { %v6167_v58 = vpop.eup %6166  ;;  %5774 = vmatpush.msra.mxu1 %v5749_v16 }
 0x6ac   :  { %v6169_v34 = vpop.eup %6168  ;;  %v5402_v25 = vmul.f32 %v6167_v58, %v5400_v46  ;;  %vm5407_vm0 = vweird.f32 %v6167_v58  ;;  %v5747_v46 = vld [vmem:[#allocation24 + $0x18] sm:$0xff] }
 0x6ad   :  { %v5422_v23 = vmul.f32 %v6169_v34, %v5420_v55  ;;  %vm5408_vm2 = vmor %vm5406_vm1, %vm5407_vm0  ;;  %vm5427_vm4 = vweird.f32 %v6169_v34  ;;  %5775 = vmatpush.msra.mxu1 %v5748_v54  ;;  %v5746_v55 = vld [vmem:[#allocation24 + $0x10] sm:$0xff] }
 0x6ae   :  { %v5403_v49 = vsub.f32 1.0, %v5402_v25  ;;  %vm5428_vm6 = vmor %vm5426_vm5, %vm5427_vm4 }
 0x6af   :  { %v5423_v2 = vsub.f32 1.0, %v5422_v23  ;;  %5776 = vmatpush.msra.mxu1 %v5747_v46 }
 0x6b0   :  { %v5404_v6 = vmul.f32 %v6167_v58, %v5403_v49 }
 0x6b1   :  { %v5424_v63 = vmul.f32 %v6169_v34, %v5423_v2  ;;  %5777 = vmatpush.msra.mxu1 %v5746_v55 }
 0x6b2   :  { %v5405_v38 = vadd.f32 %v6167_v58, %v5404_v6  ;;  %v5799_v6 = vld [vmem:[#allocation25 + $0x70] sm:$0xff] }
 0x6b3   :  { %v5425_v57 = vadd.f32 %v6169_v34, %v5424_v63  ;;  %5806 = vmatpush.msra.mxu2 %v5799_v6 }
 0x6b4   :  { %v5409_v1 = vsel %vm5408_vm2, %v6167_v58, %v5405_v38  ;;  %v5745_v58 = vld [vmem:[#allocation24 + $0x8] sm:$0xff] }
 0x6b5   :  { %v5414_v26 = vsel %vm5411_vm3, %v5413_v51, %v5409_v1  ;;  %v5429_v60 = vsel %vm5428_vm6, %v6169_v34, %v5425_v57  ;;  %v5744_v34 = vld [vmem:[#allocation24] sm:$0xff]  ;;  %5778 = vmatpush.msra.mxu1 %v5745_v58  ;;  %v5519_v57 = vperm.slane %v8537_v35, 2  ;;  %5807 = vmatpush.msra.mxu2 %v5798_v5 }
 0x6b6   :  { %v5459_v9 = vmul.f32 %v5457_v31, %v5414_v26  ;;  %v5434_v44 = vsel %vm5431_vm7, %v5433_v56, %v5429_v60  ;;  %v5797_v31 = vld [vmem:[#allocation25 + $0x60] sm:$0xff] }
 0x6b7   :  { %v5462_v13 = vsub.f32 1.0, %v5434_v44  ;;  %v5464_v53 = vmul.f32 %v5434_v44, %v8449_v41  ;;  %v5518_v41 = vperm.slane %v8537_v35, 1  ;;  %5779 = vmatpush.msra.mxu1 %v5744_v34  ;;  %5808 = vmatpush.msra.mxu2 %v5797_v31  ;;  %v5795_v44 = vld [vmem:[#allocation25 + $0x50] sm:$0xff] }
 0x6b8   :  { %v5460_v47 = vadd.f32 %v5459_v9, %v5305_v12  ;;  %v5796_v9 = vld [vmem:[#allocation25 + $0x58] sm:$0xff] }
 0x6b9   :  { %5809 = vmatpush.msra.mxu2 %v5796_v9 }
 0x6ba   :  { %6170 = vtanh.f32 %v5460_v47 }
 0x6bb   :  { %5810 = vmatpush.msra.mxu2 %v5795_v44 }
 0x6bd   :  { %5811 = vmatpush.msra.mxu2 %v5794_v45 }
 0x6bf   :  { %5812 = vmatpush.msra.mxu2 %v5793_v30 }
 0x6c0   :  { %v6171_v17 = vpop.eup %6170 }
 0x6c1   :  { %v5463_v27 = vmul.f32 %v6171_v17, %v5462_v13 }
 0x6c3   :  { %v8528_v15 = vadd.f32 %v5464_v53, %v5463_v27 }
 0x6c5   :  { %5466 = vst [vmem:[#allocation3 + $0x6] sm:$0x1] %v8528_v15  ;;  %5632 = vmatmul.f32.vlgmr.msrb.gmra.mxu2 %v8528_v15  ;;  %5652 = vmatmul.f32.vlgmr.msra.gmra.mxu3 %v8528_v15 }
 0x6c6   :  { %5731 = vmatmul.f32.vlgmr.msra.gmra.mxu0 %v8528_v15 }
 0x71c   :  { %v5560_v62 = vpop.f32.mrf.mxu0 }
 0x71d   :  { %v5561_v24 = vadd.f32 %v5560_v62, %v5518_v41  ;;  %v5580_v12 = vpop.f32.mrf.mxu1  ;;  %v5791_v62 = vld [vmem:[#allocation25 + $0x30] sm:$0xff] }
 0x71e   :  { %v5581_v13 = vadd.f32 %v5580_v12, %v5519_v57 }
 0x722   :  { %v5540_v11 = vpop.f32.mrf.mxu3 }
 0x723   :  { %v5541_v18 = vadd.f32 %v5540_v11, %v5517_v59  ;;  %v5792_v59 = vld [vmem:[#allocation25 + $0x38] sm:$0xff] }
 0x724   :  { %5813 = vmatpush.msra.mxu2 %v5792_v59 }
 0x726   :  { %5814 = vmatpush.msra.mxu2 %v5791_v62 }
 0x743   :  { %v5732_v51 = vpop.f32.mrf.mxu0 }
 0x744   :  { %v5733_v48 = vadd.f32 %v5939_v32, %v5732_v51 }
 0x748   :  { %v5633_v61 = vpop.f32.mrf.mxu2  ;;  %v5653_v19 = vpop.f32.mrf.mxu3 }
 0x749   :  { %v5672_v21 = vadd.f32 %v5633_v61, %v5541_v18  ;;  %v5692_v28 = vadd.f32 %v5653_v19, %v5561_v24  ;;  %v5790_v24 = vld [vmem:[#allocation25 + $0x28] sm:$0xff] }
 0x74a   :  { %5815 = vmatpush.msra.mxu2 %v5790_v24 }
 0x74b   :  { %v5896_v29 = vmul.f32 -1.442695, %v5672_v21  ;;  %v5897_v4 = vmul.f32 -1.442695, %v5692_v28  ;;  %v5789_v28 = vld [vmem:[#allocation25 + $0x20] sm:$0xff] }
 0x74c   :  { %5816 = vmatpush.msra.mxu2 %v5789_v28 }
 0x74d   :  { %6172 = vpow2.f32 %v5896_v29  ;;  %v5787_v29 = vld [vmem:[#allocation25 + $0x10] sm:$0xff] }
 0x74e   :  { %6174 = vpow2.f32 %v5897_v4  ;;  %5817 = vmatpush.msra.mxu2 %v5788_v42  ;;  %v5786_v4 = vld [vmem:[#allocation25 + $0x8] sm:$0xff] }
 0x750   :  { %5818 = vmatpush.msra.mxu2 %v5787_v29 }
 0x752   :  { %5819 = vmatpush.msra.mxu2 %v5786_v4 }
 0x753   :  { %v6173_v36 = vpop.eup %6172 }
 0x754   :  { %v6175_v3 = vpop.eup %6174  ;;  %v5676_v20 = vadd.f32 1.0, %v6173_v36  ;;  %5820 = vmatpush.msra.mxu2 %v5785_v37  ;;  %v5941_v36 = vld [vmem:[%s8581_s19] ss:$0 sm:$0xff] }
 0x755   :  { %v8541_v39 = vadd.f32 1.0, %v6175_v3 }
 0x756   :  { %6176 = vrcp.f32 %v5676_v20  ;;  %v5688_v10 = vand.u32 2147483648, %v5676_v20  ;;  %v5686_v8 = vand.u32 2147483647, %v5676_v20  ;;  %vm5682_vm9 = vweird.f32 %v5676_v20 }
 0x757   :  { %6178 = vrcp.f32 %v8541_v39  ;;  %v5708_v27 = vand.u32 2147483648, %v8541_v39  ;;  %vm5702_vm13 = vweird.f32 %v8541_v39  ;;  %v5706_v53 = vand.u32 2147483647, %v8541_v39 }
 0x758   :  { %v5689_v33 = vor.u32 1.1754944e-38, %v5688_v10  ;;  %vm5687_vm11 = vcmp.eq.f32.partialorder %v5686_v8, 8.507059e+37 }
 0x759   :  { %v5709_v41 = vor.u32 1.1754944e-38, %v5708_v27  ;;  %vm5707_vm15 = vcmp.eq.f32.partialorder %v5706_v53, 8.507059e+37 }
 0x75c   :  { %v6177_v25 = vpop.eup %6176 }
 0x75d   :  { %v6179_v23 = vpop.eup %6178  ;;  %v5678_v49 = vmul.f32 %v6177_v25, %v5676_v20  ;;  %vm5683_vm8 = vweird.f32 %v6177_v25 }
 0x75e   :  { %v5698_v2 = vmul.f32 %v6179_v23, %v8541_v39  ;;  %vm5684_vm10 = vmor %vm5682_vm9, %vm5683_vm8  ;;  %vm5703_vm12 = vweird.f32 %v6179_v23 }
 0x75f   :  { %v5679_v7 = vsub.f32 1.0, %v5678_v49  ;;  %vm5704_vm14 = vmor %vm5702_vm13, %vm5703_vm12 }
 0x760   :  { %v5699_v63 = vsub.f32 1.0, %v5698_v2 }
 0x761   :  { %v5680_v38 = vmul.f32 %v6177_v25, %v5679_v7 }
 0x762   :  { %v5700_v1 = vmul.f32 %v6179_v23, %v5699_v63 }
 0x763   :  { %v5681_v26 = vadd.f32 %v6177_v25, %v5680_v38 }
 0x764   :  { %v5701_v56 = vadd.f32 %v6179_v23, %v5700_v1 }
 0x765   :  { %v5685_v47 = vsel %vm5684_vm10, %v6177_v25, %v5681_v26 }
 0x766   :  { %v5690_v60 = vsel %vm5687_vm11, %v5689_v33, %v5685_v47  ;;  %v5705_v11 = vsel %vm5704_vm14, %v6179_v23, %v5701_v56 }
 0x767   :  { %v5735_v17 = vmul.f32 %v5733_v48, %v5690_v60  ;;  %v5710_v52 = vsel %vm5707_vm15, %v5709_v41, %v5705_v11 }
 0x768   :  { %v5738_v40 = vsub.f32 1.0, %v5710_v52  ;;  %v5740_v61 = vmul.f32 %v5710_v52, %v8528_v15 }
 0x769   :  { %v5736_v35 = vadd.f32 %v5735_v17, %v5581_v13 }
 0x76b   :  { %6180 = vtanh.f32 %v5736_v35 }
 0x771   :  { %v6181_v18 = vpop.eup %6180 }
 0x772   :  { %v5739_v43 = vmul.f32 %v6181_v18, %v5738_v40 }
 0x774   :  { %v5741_v19 = vadd.f32 %v5740_v61, %v5739_v43 }
 0x776   :  { %5742 = vst [vmem:[#allocation3 + $0x7] sm:$0x1] %v5741_v19 }
 0x77d   :  { %v5743_v21 = vld [vmem:[#allocation3] sm:$0xff] }
 0x77e   :  { %5780 = vmatmul.f32.vlgmr.msra.gmra.mxu1 %v5743_v21 }
 0x7fb   :  { %v5781_v15 = vpop.f32.mrf.mxu1 }
 0x7fc   :  { %v5782_v22 = vadd.f32 %v5940_v0, %v5781_v15 }
 0x7fe   :  { %6182 = vtanh.f32 %v5782_v22 }
 0x804   :  { %v6183_v50 = vpop.eup %6182 }
 0x805   :  { %5821 = vmatmul.f32.vlgmr.msra.gmra.mxu2 %v6183_v50 }
 0x888   :  { %v5822_v16 = vpop.f32.mrf.mxu2 }
 0x889   :  { %v5823_v3 = vadd.f32 %v5941_v36, %v5822_v16 }
 0x88b   :  { %5825 = vst [vmem:[#allocation27] sm:$0xff] %v5823_v3 }
 0x88c   :  { %5836 = dma.vmem_to_hbm [thread:$0]  %s5832_s16, 128, %s5834_s26, [#allocation6]  }
 0x88d   :  { %6569 = dma.done.wait [#allocation6], 128  }
 0x88e   :  { %6570 = vsyncadd [#allocation6], 4294967168 }
 0x88f   :  { %5841 = vsyncpa [#allocation5], 1 }
 0x890   :  { %5842 = vsyncpa [#allocation8], 1 }
 0x891   :  { %5843 = vsyncpa [#allocation11], 1 }
 0x892   :  { %5844 = vsyncpa [#allocation14], 1 }
 0x893   :  { %5845 = vsyncpa [#allocation17], 1 }
 0x894   :  { %5846 = vsyncpa [#allocation20], 1 }
 0x895   :  { %5847 = vsyncpa [#allocation23], 1 }
 0x896   :  { %5848 = vsyncpa [#allocation26], 1 }
 0x897   :  { %5849 = vsyncpa [#allocation6], 1 }

</bundles_post_ra>
